<compile_context>
chip_gen: v5e
topology: v5e:2x2
jax: 0.10.0
libtpu: 0.0.40
codegen_flags: <defaults>
</compile_context>

<pallas_src>
import functools

import jax
import jax.numpy as jnp
from jax.experimental import pallas as pl
from jax.experimental.pallas import tpu as pltpu


# --------------------------------------------------------------------------
# Kernels
# --------------------------------------------------------------------------
def _implicit_gemm(x_ref, w_ref, mp, owp):
    """4-tap implicit-GEMM conv on the space-to-depth input.

    x_ref: (1, R, 4C) bf16, R = (OH+2)*(OW+2) flattened s2d rows (one image)
    w_ref: (4, 4C, OC) bf16, tap index t = 2a + b
    Returns f32 accumulator of shape (Mp, OC), Mp = OH*(OW+2) ("padded-row" space;
    the 2 junk columns per row are sliced/zero-weighted downstream).
    """
    oc = w_ref.shape[2]
    acc = jnp.zeros((mp, oc), jnp.float32)
    for a in range(2):
        for b in range(2):
            off = a * owp + b
            xs = x_ref[0, off:off + mp, :]                  # contiguous window
            acc = acc + jnp.dot(xs, w_ref[2 * a + b],
                                preferred_element_type=jnp.float32)
    return acc


def _conv_lrelu_kernel(x_ref, w_ref, y_ref, *, mp, owp):
    """Conv (implicit GEMM) + LeakyReLU(0.2).  No BatchNorm (layer 1)."""
    acc = _implicit_gemm(x_ref, w_ref, mp, owp)
    acc = jnp.where(acc > 0, acc, 0.2 * acc)                # f32 epilogue
    y_ref[0] = acc.astype(y_ref.dtype)


def _conv_stats_kernel(x_ref, w_ref, m_ref, y_ref, s1_ref, s2_ref, *, mp, owp):
    """Conv (implicit GEMM) + per-image BN partial stats (sum, sum of squares)."""
    acc = _implicit_gemm(x_ref, w_ref, mp, owp)
    y_ref[0] = acc.astype(y_ref.dtype)
    yv = acc * m_ref[...]                                   # mask padded columns
    s1_ref[0] = jnp.sum(yv, axis=0, keepdims=True)
    s2_ref[0] = jnp.sum(yv * acc, axis=0, keepdims=True)


def _bn_lrelu_kernel(y_ref, sc_ref, sh_ref, z_ref):
    """Apply folded BatchNorm (y*scale + shift) + LeakyReLU(0.2) in f32."""
    z = y_ref[0].astype(jnp.float32) * sc_ref[...] + sh_ref[...]
    z_ref[0] = jnp.where(z > 0, z, 0.2 * z).astype(z_ref.dtype)


def _bn_lrelu_head_kernel(y_ref, sc_ref, sh_ref, w5_ref, o_ref):
    """Layer-4 epilogue fused with the final OC=1 conv + sigmoid."""
    z = y_ref[0].astype(jnp.float32) * sc_ref[...] + sh_ref[...]
    z = jnp.where(z > 0, z, 0.2 * z)
    logit = jnp.sum(z * w5_ref[...], keepdims=True)          # (1, 1); junk cols * 0
    o_ref[0] = 1.0 / (1.0 + jnp.exp(-logit))                 # sigmoid


# --------------------------------------------------------------------------
# pallas_call wrappers
# --------------------------------------------------------------------------
_CP = pltpu.CompilerParams(dimension_semantics=("parallel",))


def conv_layer(xs, w4, *, oh, ow, bn, mask=None):
    n, r, k4 = xs.shape
    oc = w4.shape[2]
    owp = ow + 2
    mp = oh * owp
    x_spec = pl.BlockSpec((1, r, k4), lambda i: (i, 0, 0))
    w_spec = pl.BlockSpec((4, k4, oc), lambda i: (0, 0, 0))          # resident
    y_spec = pl.BlockSpec((1, mp, oc), lambda i: (i, 0, 0))
    y_shape = jax.ShapeDtypeStruct((n, mp, oc), jnp.bfloat16)
    if not bn:
        return pl.pallas_call(
            functools.partial(_conv_lrelu_kernel, mp=mp, owp=owp),
            grid=(n,), in_specs=[x_spec, w_spec], out_specs=y_spec,
            out_shape=y_shape, compiler_params=_CP)(xs, w4)
    m_spec = pl.BlockSpec((mp, 1), lambda i: (0, 0))                 # resident
    s_spec = pl.BlockSpec((1, 1, oc), lambda i: (i, 0, 0))
    s_shape = jax.ShapeDtypeStruct((n, 1, oc), jnp.float32)
    return pl.pallas_call(
        functools.partial(_conv_stats_kernel, mp=mp, owp=owp),
        grid=(n,), in_specs=[x_spec, w_spec, m_spec],
        out_specs=(y_spec, s_spec, s_spec),
        out_shape=(y_shape, s_shape, s_shape),
        compiler_params=_CP)(xs, w4, mask)


def bn_lrelu_layer(y, scale, shift):
    n, mp, oc = y.shape
    y_spec = pl.BlockSpec((1, mp, oc), lambda i: (i, 0, 0))
    v_spec = pl.BlockSpec((1, oc), lambda i: (0, 0))
    return pl.pallas_call(
        _bn_lrelu_kernel, grid=(n,),
        in_specs=[y_spec, v_spec, v_spec], out_specs=y_spec,
        out_shape=jax.ShapeDtypeStruct((n, mp, oc), jnp.bfloat16),
        compiler_params=_CP)(y, scale, shift)


def bn_lrelu_head_layer(y, scale, shift, w5m):
    n, mp, oc = y.shape
    out = pl.pallas_call(
        _bn_lrelu_head_kernel, grid=(n,),
        in_specs=[pl.BlockSpec((1, mp, oc), lambda i: (i, 0, 0)),
                  pl.BlockSpec((1, oc), lambda i: (0, 0)),
                  pl.BlockSpec((1, oc), lambda i: (0, 0)),
                  pl.BlockSpec((mp, oc), lambda i: (0, 0))],
        out_specs=pl.BlockSpec((1, 1, 1), lambda i: (i, 0, 0)),
        out_shape=jax.ShapeDtypeStruct((n, 1, 1), jnp.float32),
        compiler_params=_CP)(y, scale, shift, w5m)
    return out.reshape(-1)


# --------------------------------------------------------------------------
# Plain-JAX glue (layout prep + tiny per-channel stat folding)
# --------------------------------------------------------------------------
def prep_s2d(x):
    """(N, H, W, C) -> zero-pad, space-to-depth by 2, flatten rows; bf16.

    Output: (N, (OH+2)*(OW+2), 4*C), channel order (row-parity, col-parity, c).
    Same byte count as the input (vs. 4x HBM expansion for explicit im2col)."""
    n, h, w, c = x.shape
    oh, ow = h // 2, w // 2
    owp = ow + 2
    xp = jnp.pad(x, ((0, 0), (1, 3), (1, 3), (0, 0)))        # (N, H+4, W+4, C)
    xs = xp.reshape(n, oh + 2, 2, owp, 2, c)
    xs = jnp.transpose(xs, (0, 1, 3, 2, 4, 5))               # (N, OH+2, OWp, 2, 2, C)
    xs = xs.reshape(n, (oh + 2) * owp, 4 * c)
    return xs.astype(jnp.bfloat16), oh, ow


def make_mask(oh, ow):
    """(Mp, 1) f32 mask: 1 on valid output columns, 0 on the 2 padded columns."""
    owp = ow + 2
    col = (jnp.arange(owp) < ow).astype(jnp.float32)
    return jnp.tile(col, oh).reshape(oh * owp, 1)


def bn_fold(s1, s2, count, gamma, beta, eps=1e-5):
    """Fold batch statistics into per-channel scale/shift (training-mode BN)."""
    mean = jnp.sum(s1, axis=0) / count                       # (1, OC)
    msq = jnp.sum(s2, axis=0) / count
    var = jnp.maximum(msq - mean * mean, 0.0)                # biased batch var
    scale = gamma * jax.lax.rsqrt(var + eps)
    shift = beta - mean * scale
    return scale, shift


def init_params(key, nc, ndf):
    """DCGAN-style init.  Conv weights are PyTorch OIHW, repacked into the
    (tap=2a+b, 4*IC, OC) implicit-GEMM layout matching the s2d channel order."""
    specs = [(ndf, nc), (ndf * 2, ndf), (ndf * 4, ndf * 2), (ndf * 8, ndf * 4)]
    params = []
    for i, (oc, ic) in enumerate(specs):
        key, wk, gk = jax.random.split(key, 3)
        w = 0.02 * jax.random.normal(wk, (oc, ic, 4, 4), jnp.float32)    # OIHW
        wt = jnp.transpose(w, (2, 3, 1, 0)).reshape(2, 2, 2, 2, ic, oc)  # (a,r,b,s,ic,oc)
        wt = jnp.transpose(wt, (0, 2, 1, 3, 4, 5)).reshape(4, 4 * ic, oc)
        if i > 0:  # layers 2..4 have BatchNorm
            gamma = 1.0 + 0.02 * jax.random.normal(gk, (1, oc), jnp.float32)
        else:      # layer 1 gamma/beta are never DMA'd into a kernel
            gamma = jnp.ones((1, oc), jnp.float32)
        beta = jnp.zeros((1, oc), jnp.float32)
        params.append((wt.astype(jnp.bfloat16), gamma, beta))
    # Final 4x4/s1/p0 conv (OC=1): stored as a (Mp4, 8*ndf) matrix in layer-4's
    # padded-row space (zeros on the 2 padded columns) for the fused epilogue.
    key, wk = jax.random.split(key)
    w5 = 0.02 * jax.random.normal(wk, (1, ndf * 8, 4, 4), jnp.float32)   # (1, IC, 4, 4)
    ow4, owp4 = 4, 6
    w5m = jnp.transpose(w5[0], (1, 2, 0))                    # (kh, kw, ic)
    w5m = jnp.pad(w5m, ((0, 0), (0, owp4 - ow4), (0, 0)))    # (4, 6, ic)
    params.append(w5m.reshape(4 * owp4, ndf * 8))            # (24, 8*ndf) f32
    return params


@jax.jit
def netD_forward(x_nchw, params):
    """Input NCHW (PyTorch convention); output (N,) like view(-1,1).squeeze(1)."""
    x = jnp.transpose(x_nchw, (0, 2, 3, 1))                  # -> NHWC
    n = x.shape[0]
    for li in range(4):
        w4, gamma, beta = params[li]
        oc = w4.shape[2]
        xs, oh, ow = prep_s2d(x)
        owp = ow + 2
        if li == 0:
            y = conv_layer(xs, w4, oh=oh, ow=ow, bn=False)
            x = y.reshape(n, oh, owp, oc)[:, :, :ow, :]      # drop padded cols
        else:
            mask = make_mask(oh, ow)
            y, s1, s2 = conv_layer(xs, w4, oh=oh, ow=ow, bn=True, mask=mask)
            scale, shift = bn_fold(s1, s2, n * oh * ow, gamma, beta)
            if li < 3:
                z = bn_lrelu_layer(y, scale, shift)
                x = z.reshape(n, oh, owp, oc)[:, :, :ow, :]
            else:
                # layer 4 epilogue fused with the final OC=1 conv + sigmoid
                return bn_lrelu_head_layer(y, scale, shift, params[4])


if __name__ == "__main__":
    # DCGAN discriminator needs 64x64 spatial input (final 4x4/s1/p0 conv).
    N, NC, NDF, S = 2, 3, 8, 64
    key = jax.random.PRNGKey(0)
    key, xk, pk = jax.random.split(key, 3)
    x = jax.random.normal(xk, (N, NC, S, S), jnp.float32)    # NCHW like PyTorch

    params = init_params(pk, NC, NDF)
    out = jax.block_until_ready(netD_forward(x, params))
    assert out.shape == (N,), out.shape
    assert bool(jnp.all(jnp.isfinite(out)))
    print("KERNEL_OK")
</pallas_src>

<mosaic_0001>
module attributes {stable_mosaic.version = 11 : i64} {
  func.func @_conv_lrelu_kernel(%arg0: i32, %arg1: memref<1x1156x12xbf16, #tpu.memory_space<vmem>>, %arg2: memref<4x12x8xbf16, #tpu.memory_space<vmem>>, %arg3: memref<1x1088x8xbf16, #tpu.memory_space<vmem>>) attributes {dimension_semantics = [#tpu.dimension_semantics<parallel>], iteration_bounds = array<i64: 2>, scalar_prefetch = 0 : i64, scratch_operands = 0 : i64, tpu.core_type = #tpu.core_type<tc>, window_params = [{transform_indices = @transform_0, window_bounds = array<i64: 1, 1156, 12>}, {pipeline_mode = #tpu.pipeline_mode<synchronous>, transform_indices = @transform_1, window_bounds = array<i64: 4, 12, 8>}, {transform_indices = @transform_2, window_bounds = array<i64: 1, 1088, 8>}]} {
    %cst = arith.constant 0.000000e+00 : f32
    %0 = vector.broadcast %cst : f32 to vector<1088x8xf32>
    %c0 = arith.constant 0 : index
    %c0_0 = arith.constant 0 : index
    %c0_1 = arith.constant 0 : index
    %1 = vector.load %arg1[%c0, %c0_0, %c0_1] : memref<1x1156x12xbf16, #tpu.memory_space<vmem>>, vector<1x1088x12xbf16>
    %2 = vector.shape_cast %1 : vector<1x1088x12xbf16> to vector<1088x12xbf16>
    %c0_2 = arith.constant 0 : index
    %c0_3 = arith.constant 0 : index
    %c0_4 = arith.constant 0 : index
    %3 = vector.load %arg2[%c0_2, %c0_3, %c0_4] : memref<4x12x8xbf16, #tpu.memory_space<vmem>>, vector<1x12x8xbf16>
    %4 = vector.shape_cast %3 : vector<1x12x8xbf16> to vector<12x8xbf16>
    %cst_5 = arith.constant dense<0.000000e+00> : vector<1088x8xf32>
    %5 = tpu.matmul %2, %4, %cst_5 {dimension_numbers = #tpu.dot_dimension_numbers<[1], [0], [0], [1], [0, 0, 1, 1], [], []>} : vector<1088x12xbf16>, vector<12x8xbf16>, vector<1088x8xf32> -> vector<1088x8xf32>
    %6 = arith.addf %0, %5 : vector<1088x8xf32>
    %c0_6 = arith.constant 0 : index
    %c1 = arith.constant 1 : index
    %c0_7 = arith.constant 0 : index
    %7 = vector.load %arg1[%c0_6, %c1, %c0_7] : memref<1x1156x12xbf16, #tpu.memory_space<vmem>>, vector<1x1088x12xbf16>
    %8 = vector.shape_cast %7 : vector<1x1088x12xbf16> to vector<1088x12xbf16>
    %c1_8 = arith.constant 1 : index
    %c0_9 = arith.constant 0 : index
    %c0_10 = arith.constant 0 : index
    %9 = vector.load %arg2[%c1_8, %c0_9, %c0_10] : memref<4x12x8xbf16, #tpu.memory_space<vmem>>, vector<1x12x8xbf16>
    %10 = vector.shape_cast %9 : vector<1x12x8xbf16> to vector<12x8xbf16>
    %cst_11 = arith.constant dense<0.000000e+00> : vector<1088x8xf32>
    %11 = tpu.matmul %8, %10, %cst_11 {dimension_numbers = #tpu.dot_dimension_numbers<[1], [0], [0], [1], [0, 0, 1, 1], [], []>} : vector<1088x12xbf16>, vector<12x8xbf16>, vector<1088x8xf32> -> vector<1088x8xf32>
    %12 = arith.addf %6, %11 : vector<1088x8xf32>
    %c0_12 = arith.constant 0 : index
    %c34 = arith.constant 34 : index
    %c0_13 = arith.constant 0 : index
    %13 = vector.load %arg1[%c0_12, %c34, %c0_13] : memref<1x1156x12xbf16, #tpu.memory_space<vmem>>, vector<1x1088x12xbf16>
    %14 = vector.shape_cast %13 : vector<1x1088x12xbf16> to vector<1088x12xbf16>
    %c2 = arith.constant 2 : index
    %c0_14 = arith.constant 0 : index
    %c0_15 = arith.constant 0 : index
    %15 = vector.load %arg2[%c2, %c0_14, %c0_15] : memref<4x12x8xbf16, #tpu.memory_space<vmem>>, vector<1x12x8xbf16>
    %16 = vector.shape_cast %15 : vector<1x12x8xbf16> to vector<12x8xbf16>
    %cst_16 = arith.constant dense<0.000000e+00> : vector<1088x8xf32>
    %17 = tpu.matmul %14, %16, %cst_16 {dimension_numbers = #tpu.dot_dimension_numbers<[1], [0], [0], [1], [0, 0, 1, 1], [], []>} : vector<1088x12xbf16>, vector<12x8xbf16>, vector<1088x8xf32> -> vector<1088x8xf32>
    %18 = arith.addf %12, %17 : vector<1088x8xf32>
    %c0_17 = arith.constant 0 : index
    %c35 = arith.constant 35 : index
    %c0_18 = arith.constant 0 : index
    %19 = vector.load %arg1[%c0_17, %c35, %c0_18] : memref<1x1156x12xbf16, #tpu.memory_space<vmem>>, vector<1x1088x12xbf16>
    %20 = vector.shape_cast %19 : vector<1x1088x12xbf16> to vector<1088x12xbf16>
    %c3 = arith.constant 3 : index
    %c0_19 = arith.constant 0 : index
    %c0_20 = arith.constant 0 : index
    %21 = vector.load %arg2[%c3, %c0_19, %c0_20] : memref<4x12x8xbf16, #tpu.memory_space<vmem>>, vector<1x12x8xbf16>
    %22 = vector.shape_cast %21 : vector<1x12x8xbf16> to vector<12x8xbf16>
    %cst_21 = arith.constant dense<0.000000e+00> : vector<1088x8xf32>
    %23 = tpu.matmul %20, %22, %cst_21 {dimension_numbers = #tpu.dot_dimension_numbers<[1], [0], [0], [1], [0, 0, 1, 1], [], []>} : vector<1088x12xbf16>, vector<12x8xbf16>, vector<1088x8xf32> -> vector<1088x8xf32>
    %24 = arith.addf %18, %23 : vector<1088x8xf32>
    %cst_22 = arith.constant 0.000000e+00 : f32
    %25 = vector.broadcast %cst_22 : f32 to vector<1088x8xf32>
    %26 = arith.cmpf ogt, %24, %25 : vector<1088x8xf32>
    %cst_23 = arith.constant 2.000000e-01 : f32
    %27 = vector.broadcast %cst_23 : f32 to vector<1088x8xf32>
    %28 = arith.mulf %27, %24 : vector<1088x8xf32>
    %29 = arith.select %26, %24, %28 : vector<1088x8xi1>, vector<1088x8xf32>
    %30 = arith.truncf %29 : vector<1088x8xf32> to vector<1088x8xbf16>
    %c0_24 = arith.constant 0 : index
    %c0_25 = arith.constant 0 : index
    %c0_26 = arith.constant 0 : index
    %31 = vector.load %arg3[%c0_24, %c0_25, %c0_26] : memref<1x1088x8xbf16, #tpu.memory_space<vmem>>, vector<1x1088x8xbf16>
    %32 = vector.shape_cast %31 : vector<1x1088x8xbf16> to vector<1088x8xbf16>
    %33 = vector.shape_cast %30 : vector<1088x8xbf16> to vector<1x1088x8xbf16>
    tpu.vector_store %arg3[%c0_24, %c0_25, %c0_26], %33 {strides = array<i32>} : memref<1x1088x8xbf16, #tpu.memory_space<vmem>>, vector<1x1088x8xbf16>,
    return
  }
  func.func @transform_0(%arg0: i32) -> (i32, i32, i32) {
    %c0_i32 = arith.constant 0 : i32
    %c0_i32_0 = arith.constant 0 : i32
    %c0_i32_1 = arith.constant 0 : i32
    return %arg0, %c0_i32, %c0_i32_0 : i32, i32, i32
  }
  func.func @transform_1(%arg0: i32) -> (i32, i32, i32) {
    %c0_i32 = arith.constant 0 : i32
    %c0_i32_0 = arith.constant 0 : i32
    %c0_i32_1 = arith.constant 0 : i32
    %c0_i32_2 = arith.constant 0 : i32
    return %c0_i32, %c0_i32_0, %c0_i32_1 : i32, i32, i32
  }
  func.func @transform_2(%arg0: i32) -> (i32, i32, i32) {
    %c0_i32 = arith.constant 0 : i32
    %c0_i32_0 = arith.constant 0 : i32
    %c0_i32_1 = arith.constant 0 : i32
    return %arg0, %c0_i32, %c0_i32_0 : i32, i32, i32
  }
}

module attributes {stable_mosaic.version = 11 : i64} {
  func.func @_conv_stats_kernel(%arg0: i32, %arg1: memref<1x324x32xbf16, #tpu.memory_space<vmem>>, %arg2: memref<4x32x16xbf16, #tpu.memory_space<vmem>>, %arg3: memref<288x1xf32, #tpu.memory_space<vmem>>, %arg4: memref<1x288x16xbf16, #tpu.memory_space<vmem>>, %arg5: memref<1x1x16xf32, #tpu.memory_space<vmem>>, %arg6: memref<1x1x16xf32, #tpu.memory_space<vmem>>) attributes {dimension_semantics = [#tpu.dimension_semantics<parallel>], iteration_bounds = array<i64: 2>, scalar_prefetch = 0 : i64, scratch_operands = 0 : i64, tpu.core_type = #tpu.core_type<tc>, window_params = [{transform_indices = @transform_0, window_bounds = array<i64: 1, 324, 32>}, {pipeline_mode = #tpu.pipeline_mode<synchronous>, transform_indices = @transform_1, window_bounds = array<i64: 4, 32, 16>}, {pipeline_mode = #tpu.pipeline_mode<synchronous>, transform_indices = @transform_2, window_bounds = array<i64: 288, 1>}, {transform_indices = @transform_3, window_bounds = array<i64: 1, 288, 16>}, {transform_indices = @transform_4, window_bounds = array<i64: 1, 1, 16>}, {transform_indices = @transform_5, window_bounds = array<i64: 1, 1, 16>}]} {
    %cst = arith.constant 0.000000e+00 : f32
    %0 = vector.broadcast %cst : f32 to vector<288x16xf32>
    %c0 = arith.constant 0 : index
    %c0_0 = arith.constant 0 : index
    %c0_1 = arith.constant 0 : index
    %1 = vector.load %arg1[%c0, %c0_0, %c0_1] : memref<1x324x32xbf16, #tpu.memory_space<vmem>>, vector<1x288x32xbf16>
    %2 = vector.shape_cast %1 : vector<1x288x32xbf16> to vector<288x32xbf16>
    %c0_2 = arith.constant 0 : index
    %c0_3 = arith.constant 0 : index
    %c0_4 = arith.constant 0 : index
    %3 = vector.load %arg2[%c0_2, %c0_3, %c0_4] : memref<4x32x16xbf16, #tpu.memory_space<vmem>>, vector<1x32x16xbf16>
    %4 = vector.shape_cast %3 : vector<1x32x16xbf16> to vector<32x16xbf16>
    %cst_5 = arith.constant dense<0.000000e+00> : vector<288x16xf32>
    %5 = tpu.matmul %2, %4, %cst_5 {dimension_numbers = #tpu.dot_dimension_numbers<[1], [0], [0], [1], [0, 0, 1, 1], [], []>} : vector<288x32xbf16>, vector<32x16xbf16>, vector<288x16xf32> -> vector<288x16xf32>
    %6 = arith.addf %0, %5 : vector<288x16xf32>
    %c0_6 = arith.constant 0 : index
    %c1 = arith.constant 1 : index
    %c0_7 = arith.constant 0 : index
    %7 = vector.load %arg1[%c0_6, %c1, %c0_7] : memref<1x324x32xbf16, #tpu.memory_space<vmem>>, vector<1x288x32xbf16>
    %8 = vector.shape_cast %7 : vector<1x288x32xbf16> to vector<288x32xbf16>
    %c1_8 = arith.constant 1 : index
    %c0_9 = arith.constant 0 : index
    %c0_10 = arith.constant 0 : index
    %9 = vector.load %arg2[%c1_8, %c0_9, %c0_10] : memref<4x32x16xbf16, #tpu.memory_space<vmem>>, vector<1x32x16xbf16>
    %10 = vector.shape_cast %9 : vector<1x32x16xbf16> to vector<32x16xbf16>
    %cst_11 = arith.constant dense<0.000000e+00> : vector<288x16xf32>
    %11 = tpu.matmul %8, %10, %cst_11 {dimension_numbers = #tpu.dot_dimension_numbers<[1], [0], [0], [1], [0, 0, 1, 1], [], []>} : vector<288x32xbf16>, vector<32x16xbf16>, vector<288x16xf32> -> vector<288x16xf32>
    %12 = arith.addf %6, %11 : vector<288x16xf32>
    %c0_12 = arith.constant 0 : index
    %c18 = arith.constant 18 : index
    %c0_13 = arith.constant 0 : index
    %13 = vector.load %arg1[%c0_12, %c18, %c0_13] : memref<1x324x32xbf16, #tpu.memory_space<vmem>>, vector<1x288x32xbf16>
    %14 = vector.shape_cast %13 : vector<1x288x32xbf16> to vector<288x32xbf16>
    %c2 = arith.constant 2 : index
    %c0_14 = arith.constant 0 : index
    %c0_15 = arith.constant 0 : index
    %15 = vector.load %arg2[%c2, %c0_14, %c0_15] : memref<4x32x16xbf16, #tpu.memory_space<vmem>>, vector<1x32x16xbf16>
    %16 = vector.shape_cast %15 : vector<1x32x16xbf16> to vector<32x16xbf16>
    %cst_16 = arith.constant dense<0.000000e+00> : vector<288x16xf32>
    %17 = tpu.matmul %14, %16, %cst_16 {dimension_numbers = #tpu.dot_dimension_numbers<[1], [0], [0], [1], [0, 0, 1, 1], [], []>} : vector<288x32xbf16>, vector<32x16xbf16>, vector<288x16xf32> -> vector<288x16xf32>
    %18 = arith.addf %12, %17 : vector<288x16xf32>
    %c0_17 = arith.constant 0 : index
    %c19 = arith.constant 19 : index
    %c0_18 = arith.constant 0 : index
    %19 = vector.load %arg1[%c0_17, %c19, %c0_18] : memref<1x324x32xbf16, #tpu.memory_space<vmem>>, vector<1x288x32xbf16>
    %20 = vector.shape_cast %19 : vector<1x288x32xbf16> to vector<288x32xbf16>
    %c3 = arith.constant 3 : index
    %c0_19 = arith.constant 0 : index
    %c0_20 = arith.constant 0 : index
    %21 = vector.load %arg2[%c3, %c0_19, %c0_20] : memref<4x32x16xbf16, #tpu.memory_space<vmem>>, vector<1x32x16xbf16>
    %22 = vector.shape_cast %21 : vector<1x32x16xbf16> to vector<32x16xbf16>
    %cst_21 = arith.constant dense<0.000000e+00> : vector<288x16xf32>
    %23 = tpu.matmul %20, %22, %cst_21 {dimension_numbers = #tpu.dot_dimension_numbers<[1], [0], [0], [1], [0, 0, 1, 1], [], []>} : vector<288x32xbf16>, vector<32x16xbf16>, vector<288x16xf32> -> vector<288x16xf32>
    %24 = arith.addf %18, %23 : vector<288x16xf32>
    %25 = arith.truncf %24 : vector<288x16xf32> to vector<288x16xbf16>
    %c0_22 = arith.constant 0 : index
    %c0_23 = arith.constant 0 : index
    %c0_24 = arith.constant 0 : index
    %26 = vector.load %arg4[%c0_22, %c0_23, %c0_24] : memref<1x288x16xbf16, #tpu.memory_space<vmem>>, vector<1x288x16xbf16>
    %27 = vector.shape_cast %26 : vector<1x288x16xbf16> to vector<288x16xbf16>
    %28 = vector.shape_cast %25 : vector<288x16xbf16> to vector<1x288x16xbf16>
    tpu.vector_store %arg4[%c0_22, %c0_23, %c0_24], %28 {strides = array<i32>} : memref<1x288x16xbf16, #tpu.memory_space<vmem>>, vector<1x288x16xbf16>,
    %c0_25 = arith.constant 0 : index
    %c0_26 = arith.constant 0 : index
    %29 = vector.load %arg3[%c0_25, %c0_26] : memref<288x1xf32, #tpu.memory_space<vmem>>, vector<288x1xf32>
    %30 = vector.broadcast %29 : vector<288x1xf32> to vector<288x16xf32>
    %31 = arith.mulf %24, %30 : vector<288x16xf32>
    %cst_27 = arith.constant dense<0.000000e+00> : vector<16xf32>
    %32 = vector.multi_reduction <add>, %31, %cst_27 [0] : vector<288x16xf32> to vector<16xf32>
    %33 = vector.shape_cast %32 : vector<16xf32> to vector<1x16xf32>
    %c0_28 = arith.constant 0 : index
    %c0_29 = arith.constant 0 : index
    %c0_30 = arith.constant 0 : index
    %34 = vector.load %arg5[%c0_28, %c0_29, %c0_30] : memref<1x1x16xf32, #tpu.memory_space<vmem>>, vector<1x1x16xf32>
    %35 = vector.shape_cast %34 : vector<1x1x16xf32> to vector<1x16xf32>
    %36 = vector.shape_cast %33 : vector<1x16xf32> to vector<1x1x16xf32>
    tpu.vector_store %arg5[%c0_28, %c0_29, %c0_30], %36 {strides = array<i32>} : memref<1x1x16xf32, #tpu.memory_space<vmem>>, vector<1x1x16xf32>,
    %37 = arith.mulf %31, %24 : vector<288x16xf32>
    %cst_31 = arith.constant dense<0.000000e+00> : vector<16xf32>
    %38 = vector.multi_reduction <add>, %37, %cst_31 [0] : vector<288x16xf32> to vector<16xf32>
    %39 = vector.shape_cast %38 : vector<16xf32> to vector<1x16xf32>
    %c0_32 = arith.constant 0 : index
    %c0_33 = arith.constant 0 : index
    %c0_34 = arith.constant 0 : index
    %40 = vector.load %arg6[%c0_32, %c0_33, %c0_34] : memref<1x1x16xf32, #tpu.memory_space<vmem>>, vector<1x1x16xf32>
    %41 = vector.shape_cast %40 : vector<1x1x16xf32> to vector<1x16xf32>
    %42 = vector.shape_cast %39 : vector<1x16xf32> to vector<1x1x16xf32>
    tpu.vector_store %arg6[%c0_32, %c0_33, %c0_34], %42 {strides = array<i32>} : memref<1x1x16xf32, #tpu.memory_space<vmem>>, vector<1x1x16xf32>,
    return
  }
  func.func @transform_0(%arg0: i32) -> (i32, i32, i32) {
    %c0_i32 = arith.constant 0 : i32
    %c0_i32_0 = arith.constant 0 : i32
    %c0_i32_1 = arith.constant 0 : i32
    return %arg0, %c0_i32, %c0_i32_0 : i32, i32, i32
  }
  func.func @transform_1(%arg0: i32) -> (i32, i32, i32) {
    %c0_i32 = arith.constant 0 : i32
    %c0_i32_0 = arith.constant 0 : i32
    %c0_i32_1 = arith.constant 0 : i32
    %c0_i32_2 = arith.constant 0 : i32
    return %c0_i32, %c0_i32_0, %c0_i32_1 : i32, i32, i32
  }
  func.func @transform_2(%arg0: i32) -> (i32, i32) {
    %c0_i32 = arith.constant 0 : i32
    %c0_i32_0 = arith.constant 0 : i32
    %c0_i32_1 = arith.constant 0 : i32
    return %c0_i32, %c0_i32_0 : i32, i32
  }
  func.func @transform_3(%arg0: i32) -> (i32, i32, i32) {
    %c0_i32 = arith.constant 0 : i32
    %c0_i32_0 = arith.constant 0 : i32
    %c0_i32_1 = arith.constant 0 : i32
    return %arg0, %c0_i32, %c0_i32_0 : i32, i32, i32
  }
  func.func @transform_4(%arg0: i32) -> (i32, i32, i32) {
    %c0_i32 = arith.constant 0 : i32
    %c0_i32_0 = arith.constant 0 : i32
    %c0_i32_1 = arith.constant 0 : i32
    return %arg0, %c0_i32, %c0_i32_0 : i32, i32, i32
  }
  func.func @transform_5(%arg0: i32) -> (i32, i32, i32) {
    %c0_i32 = arith.constant 0 : i32
    %c0_i32_0 = arith.constant 0 : i32
    %c0_i32_1 = arith.constant 0 : i32
    return %arg0, %c0_i32, %c0_i32_0 : i32, i32, i32
  }
}

module attributes {stable_mosaic.version = 11 : i64} {
  func.func @_bn_lrelu_kernel(%arg0: i32, %arg1: memref<1x288x16xbf16, #tpu.memory_space<vmem>>, %arg2: memref<1x16xf32, #tpu.memory_space<vmem>>, %arg3: memref<1x16xf32, #tpu.memory_space<vmem>>, %arg4: memref<1x288x16xbf16, #tpu.memory_space<vmem>>) attributes {dimension_semantics = [#tpu.dimension_semantics<parallel>], iteration_bounds = array<i64: 2>, scalar_prefetch = 0 : i64, scratch_operands = 0 : i64, tpu.core_type = #tpu.core_type<tc>, window_params = [{transform_indices = @transform_0, window_bounds = array<i64: 1, 288, 16>}, {pipeline_mode = #tpu.pipeline_mode<synchronous>, transform_indices = @transform_1, window_bounds = array<i64: 1, 16>}, {pipeline_mode = #tpu.pipeline_mode<synchronous>, transform_indices = @transform_2, window_bounds = array<i64: 1, 16>}, {transform_indices = @transform_3, window_bounds = array<i64: 1, 288, 16>}]} {
    %c0 = arith.constant 0 : index
    %c0_0 = arith.constant 0 : index
    %c0_1 = arith.constant 0 : index
    %0 = vector.load %arg1[%c0, %c0_0, %c0_1] : memref<1x288x16xbf16, #tpu.memory_space<vmem>>, vector<1x288x16xbf16>
    %1 = vector.shape_cast %0 : vector<1x288x16xbf16> to vector<288x16xbf16>
    %2 = arith.extf %1 : vector<288x16xbf16> to vector<288x16xf32>
    %c0_2 = arith.constant 0 : index
    %c0_3 = arith.constant 0 : index
    %3 = vector.load %arg2[%c0_2, %c0_3] : memref<1x16xf32, #tpu.memory_space<vmem>>, vector<1x16xf32>
    %4 = vector.broadcast %3 : vector<1x16xf32> to vector<288x16xf32>
    %5 = arith.mulf %2, %4 : vector<288x16xf32>
    %c0_4 = arith.constant 0 : index
    %c0_5 = arith.constant 0 : index
    %6 = vector.load %arg3[%c0_4, %c0_5] : memref<1x16xf32, #tpu.memory_space<vmem>>, vector<1x16xf32>
    %7 = vector.broadcast %6 : vector<1x16xf32> to vector<288x16xf32>
    %8 = arith.addf %5, %7 : vector<288x16xf32>
    %cst = arith.constant 0.000000e+00 : f32
    %9 = vector.broadcast %cst : f32 to vector<288x16xf32>
    %10 = arith.cmpf ogt, %8, %9 : vector<288x16xf32>
    %cst_6 = arith.constant 2.000000e-01 : f32
    %11 = vector.broadcast %cst_6 : f32 to vector<288x16xf32>
    %12 = arith.mulf %11, %8 : vector<288x16xf32>
    %13 = arith.select %10, %8, %12 : vector<288x16xi1>, vector<288x16xf32>
    %14 = arith.truncf %13 : vector<288x16xf32> to vector<288x16xbf16>
    %c0_7 = arith.constant 0 : index
    %c0_8 = arith.constant 0 : index
    %c0_9 = arith.constant 0 : index
    %15 = vector.load %arg4[%c0_7, %c0_8, %c0_9] : memref<1x288x16xbf16, #tpu.memory_space<vmem>>, vector<1x288x16xbf16>
    %16 = vector.shape_cast %15 : vector<1x288x16xbf16> to vector<288x16xbf16>
    %17 = vector.shape_cast %14 : vector<288x16xbf16> to vector<1x288x16xbf16>
    tpu.vector_store %arg4[%c0_7, %c0_8, %c0_9], %17 {strides = array<i32>} : memref<1x288x16xbf16, #tpu.memory_space<vmem>>, vector<1x288x16xbf16>,
    return
  }
  func.func @transform_0(%arg0: i32) -> (i32, i32, i32) {
    %c0_i32 = arith.constant 0 : i32
    %c0_i32_0 = arith.constant 0 : i32
    %c0_i32_1 = arith.constant 0 : i32
    return %arg0, %c0_i32, %c0_i32_0 : i32, i32, i32
  }
  func.func @transform_1(%arg0: i32) -> (i32, i32) {
    %c0_i32 = arith.constant 0 : i32
    %c0_i32_0 = arith.constant 0 : i32
    %c0_i32_1 = arith.constant 0 : i32
    return %c0_i32, %c0_i32_0 : i32, i32
  }
  func.func @transform_2(%arg0: i32) -> (i32, i32) {
    %c0_i32 = arith.constant 0 : i32
    %c0_i32_0 = arith.constant 0 : i32
    %c0_i32_1 = arith.constant 0 : i32
    return %c0_i32, %c0_i32_0 : i32, i32
  }
  func.func @transform_3(%arg0: i32) -> (i32, i32, i32) {
    %c0_i32 = arith.constant 0 : i32
    %c0_i32_0 = arith.constant 0 : i32
    %c0_i32_1 = arith.constant 0 : i32
    return %arg0, %c0_i32, %c0_i32_0 : i32, i32, i32
  }
}

module attributes {stable_mosaic.version = 11 : i64} {
  func.func @_conv_stats_kernel(%arg0: i32, %arg1: memref<1x100x64xbf16, #tpu.memory_space<vmem>>, %arg2: memref<4x64x32xbf16, #tpu.memory_space<vmem>>, %arg3: memref<80x1xf32, #tpu.memory_space<vmem>>, %arg4: memref<1x80x32xbf16, #tpu.memory_space<vmem>>, %arg5: memref<1x1x32xf32, #tpu.memory_space<vmem>>, %arg6: memref<1x1x32xf32, #tpu.memory_space<vmem>>) attributes {dimension_semantics = [#tpu.dimension_semantics<parallel>], iteration_bounds = array<i64: 2>, scalar_prefetch = 0 : i64, scratch_operands = 0 : i64, tpu.core_type = #tpu.core_type<tc>, window_params = [{transform_indices = @transform_0, window_bounds = array<i64: 1, 100, 64>}, {pipeline_mode = #tpu.pipeline_mode<synchronous>, transform_indices = @transform_1, window_bounds = array<i64: 4, 64, 32>}, {pipeline_mode = #tpu.pipeline_mode<synchronous>, transform_indices = @transform_2, window_bounds = array<i64: 80, 1>}, {transform_indices = @transform_3, window_bounds = array<i64: 1, 80, 32>}, {transform_indices = @transform_4, window_bounds = array<i64: 1, 1, 32>}, {transform_indices = @transform_5, window_bounds = array<i64: 1, 1, 32>}]} {
    %cst = arith.constant 0.000000e+00 : f32
    %0 = vector.broadcast %cst : f32 to vector<80x32xf32>
    %c0 = arith.constant 0 : index
    %c0_0 = arith.constant 0 : index
    %c0_1 = arith.constant 0 : index
    %1 = vector.load %arg1[%c0, %c0_0, %c0_1] : memref<1x100x64xbf16, #tpu.memory_space<vmem>>, vector<1x80x64xbf16>
    %2 = vector.shape_cast %1 : vector<1x80x64xbf16> to vector<80x64xbf16>
    %c0_2 = arith.constant 0 : index
    %c0_3 = arith.constant 0 : index
    %c0_4 = arith.constant 0 : index
    %3 = vector.load %arg2[%c0_2, %c0_3, %c0_4] : memref<4x64x32xbf16, #tpu.memory_space<vmem>>, vector<1x64x32xbf16>
    %4 = vector.shape_cast %3 : vector<1x64x32xbf16> to vector<64x32xbf16>
    %cst_5 = arith.constant dense<0.000000e+00> : vector<80x32xf32>
    %5 = tpu.matmul %2, %4, %cst_5 {dimension_numbers = #tpu.dot_dimension_numbers<[1], [0], [0], [1], [0, 0, 1, 1], [], []>} : vector<80x64xbf16>, vector<64x32xbf16>, vector<80x32xf32> -> vector<80x32xf32>
    %6 = arith.addf %0, %5 : vector<80x32xf32>
    %c0_6 = arith.constant 0 : index
    %c1 = arith.constant 1 : index
    %c0_7 = arith.constant 0 : index
    %7 = vector.load %arg1[%c0_6, %c1, %c0_7] : memref<1x100x64xbf16, #tpu.memory_space<vmem>>, vector<1x80x64xbf16>
    %8 = vector.shape_cast %7 : vector<1x80x64xbf16> to vector<80x64xbf16>
    %c1_8 = arith.constant 1 : index
    %c0_9 = arith.constant 0 : index
    %c0_10 = arith.constant 0 : index
    %9 = vector.load %arg2[%c1_8, %c0_9, %c0_10] : memref<4x64x32xbf16, #tpu.memory_space<vmem>>, vector<1x64x32xbf16>
    %10 = vector.shape_cast %9 : vector<1x64x32xbf16> to vector<64x32xbf16>
    %cst_11 = arith.constant dense<0.000000e+00> : vector<80x32xf32>
    %11 = tpu.matmul %8, %10, %cst_11 {dimension_numbers = #tpu.dot_dimension_numbers<[1], [0], [0], [1], [0, 0, 1, 1], [], []>} : vector<80x64xbf16>, vector<64x32xbf16>, vector<80x32xf32> -> vector<80x32xf32>
    %12 = arith.addf %6, %11 : vector<80x32xf32>
    %c0_12 = arith.constant 0 : index
    %c10 = arith.constant 10 : index
    %c0_13 = arith.constant 0 : index
    %13 = vector.load %arg1[%c0_12, %c10, %c0_13] : memref<1x100x64xbf16, #tpu.memory_space<vmem>>, vector<1x80x64xbf16>
    %14 = vector.shape_cast %13 : vector<1x80x64xbf16> to vector<80x64xbf16>
    %c2 = arith.constant 2 : index
    %c0_14 = arith.constant 0 : index
    %c0_15 = arith.constant 0 : index
    %15 = vector.load %arg2[%c2, %c0_14, %c0_15] : memref<4x64x32xbf16, #tpu.memory_space<vmem>>, vector<1x64x32xbf16>
    %16 = vector.shape_cast %15 : vector<1x64x32xbf16> to vector<64x32xbf16>
    %cst_16 = arith.constant dense<0.000000e+00> : vector<80x32xf32>
    %17 = tpu.matmul %14, %16, %cst_16 {dimension_numbers = #tpu.dot_dimension_numbers<[1], [0], [0], [1], [0, 0, 1, 1], [], []>} : vector<80x64xbf16>, vector<64x32xbf16>, vector<80x32xf32> -> vector<80x32xf32>
    %18 = arith.addf %12, %17 : vector<80x32xf32>
    %c0_17 = arith.constant 0 : index
    %c11 = arith.constant 11 : index
    %c0_18 = arith.constant 0 : index
    %19 = vector.load %arg1[%c0_17, %c11, %c0_18] : memref<1x100x64xbf16, #tpu.memory_space<vmem>>, vector<1x80x64xbf16>
    %20 = vector.shape_cast %19 : vector<1x80x64xbf16> to vector<80x64xbf16>
    %c3 = arith.constant 3 : index
    %c0_19 = arith.constant 0 : index
    %c0_20 = arith.constant 0 : index
    %21 = vector.load %arg2[%c3, %c0_19, %c0_20] : memref<4x64x32xbf16, #tpu.memory_space<vmem>>, vector<1x64x32xbf16>
    %22 = vector.shape_cast %21 : vector<1x64x32xbf16> to vector<64x32xbf16>
    %cst_21 = arith.constant dense<0.000000e+00> : vector<80x32xf32>
    %23 = tpu.matmul %20, %22, %cst_21 {dimension_numbers = #tpu.dot_dimension_numbers<[1], [0], [0], [1], [0, 0, 1, 1], [], []>} : vector<80x64xbf16>, vector<64x32xbf16>, vector<80x32xf32> -> vector<80x32xf32>
    %24 = arith.addf %18, %23 : vector<80x32xf32>
    %25 = arith.truncf %24 : vector<80x32xf32> to vector<80x32xbf16>
    %c0_22 = arith.constant 0 : index
    %c0_23 = arith.constant 0 : index
    %c0_24 = arith.constant 0 : index
    %26 = vector.load %arg4[%c0_22, %c0_23, %c0_24] : memref<1x80x32xbf16, #tpu.memory_space<vmem>>, vector<1x80x32xbf16>
    %27 = vector.shape_cast %26 : vector<1x80x32xbf16> to vector<80x32xbf16>
    %28 = vector.shape_cast %25 : vector<80x32xbf16> to vector<1x80x32xbf16>
    tpu.vector_store %arg4[%c0_22, %c0_23, %c0_24], %28 {strides = array<i32>} : memref<1x80x32xbf16, #tpu.memory_space<vmem>>, vector<1x80x32xbf16>,
    %c0_25 = arith.constant 0 : index
    %c0_26 = arith.constant 0 : index
    %29 = vector.load %arg3[%c0_25, %c0_26] : memref<80x1xf32, #tpu.memory_space<vmem>>, vector<80x1xf32>
    %30 = vector.broadcast %29 : vector<80x1xf32> to vector<80x32xf32>
    %31 = arith.mulf %24, %30 : vector<80x32xf32>
    %cst_27 = arith.constant dense<0.000000e+00> : vector<32xf32>
    %32 = vector.multi_reduction <add>, %31, %cst_27 [0] : vector<80x32xf32> to vector<32xf32>
    %33 = vector.shape_cast %32 : vector<32xf32> to vector<1x32xf32>
    %c0_28 = arith.constant 0 : index
    %c0_29 = arith.constant 0 : index
    %c0_30 = arith.constant 0 : index
    %34 = vector.load %arg5[%c0_28, %c0_29, %c0_30] : memref<1x1x32xf32, #tpu.memory_space<vmem>>, vector<1x1x32xf32>
    %35 = vector.shape_cast %34 : vector<1x1x32xf32> to vector<1x32xf32>
    %36 = vector.shape_cast %33 : vector<1x32xf32> to vector<1x1x32xf32>
    tpu.vector_store %arg5[%c0_28, %c0_29, %c0_30], %36 {strides = array<i32>} : memref<1x1x32xf32, #tpu.memory_space<vmem>>, vector<1x1x32xf32>,
    %37 = arith.mulf %31, %24 : vector<80x32xf32>
    %cst_31 = arith.constant dense<0.000000e+00> : vector<32xf32>
    %38 = vector.multi_reduction <add>, %37, %cst_31 [0] : vector<80x32xf32> to vector<32xf32>
    %39 = vector.shape_cast %38 : vector<32xf32> to vector<1x32xf32>
    %c0_32 = arith.constant 0 : index
    %c0_33 = arith.constant 0 : index
    %c0_34 = arith.constant 0 : index
    %40 = vector.load %arg6[%c0_32, %c0_33, %c0_34] : memref<1x1x32xf32, #tpu.memory_space<vmem>>, vector<1x1x32xf32>
    %41 = vector.shape_cast %40 : vector<1x1x32xf32> to vector<1x32xf32>
    %42 = vector.shape_cast %39 : vector<1x32xf32> to vector<1x1x32xf32>
    tpu.vector_store %arg6[%c0_32, %c0_33, %c0_34], %42 {strides = array<i32>} : memref<1x1x32xf32, #tpu.memory_space<vmem>>, vector<1x1x32xf32>,
    return
  }
  func.func @transform_0(%arg0: i32) -> (i32, i32, i32) {
    %c0_i32 = arith.constant 0 : i32
    %c0_i32_0 = arith.constant 0 : i32
    %c0_i32_1 = arith.constant 0 : i32
    return %arg0, %c0_i32, %c0_i32_0 : i32, i32, i32
  }
  func.func @transform_1(%arg0: i32) -> (i32, i32, i32) {
    %c0_i32 = arith.constant 0 : i32
    %c0_i32_0 = arith.constant 0 : i32
    %c0_i32_1 = arith.constant 0 : i32
    %c0_i32_2 = arith.constant 0 : i32
    return %c0_i32, %c0_i32_0, %c0_i32_1 : i32, i32, i32
  }
  func.func @transform_2(%arg0: i32) -> (i32, i32) {
    %c0_i32 = arith.constant 0 : i32
    %c0_i32_0 = arith.constant 0 : i32
    %c0_i32_1 = arith.constant 0 : i32
    return %c0_i32, %c0_i32_0 : i32, i32
  }
  func.func @transform_3(%arg0: i32) -> (i32, i32, i32) {
    %c0_i32 = arith.constant 0 : i32
    %c0_i32_0 = arith.constant 0 : i32
    %c0_i32_1 = arith.constant 0 : i32
    return %arg0, %c0_i32, %c0_i32_0 : i32, i32, i32
  }
  func.func @transform_4(%arg0: i32) -> (i32, i32, i32) {
    %c0_i32 = arith.constant 0 : i32
    %c0_i32_0 = arith.constant 0 : i32
    %c0_i32_1 = arith.constant 0 : i32
    return %arg0, %c0_i32, %c0_i32_0 : i32, i32, i32
  }
  func.func @transform_5(%arg0: i32) -> (i32, i32, i32) {
    %c0_i32 = arith.constant 0 : i32
    %c0_i32_0 = arith.constant 0 : i32
    %c0_i32_1 = arith.constant 0 : i32
    return %arg0, %c0_i32, %c0_i32_0 : i32, i32, i32
  }
}

module attributes {stable_mosaic.version = 11 : i64} {
  func.func @_bn_lrelu_kernel(%arg0: i32, %arg1: memref<1x80x32xbf16, #tpu.memory_space<vmem>>, %arg2: memref<1x32xf32, #tpu.memory_space<vmem>>, %arg3: memref<1x32xf32, #tpu.memory_space<vmem>>, %arg4: memref<1x80x32xbf16, #tpu.memory_space<vmem>>) attributes {dimension_semantics = [#tpu.dimension_semantics<parallel>], iteration_bounds = array<i64: 2>, scalar_prefetch = 0 : i64, scratch_operands = 0 : i64, tpu.core_type = #tpu.core_type<tc>, window_params = [{transform_indices = @transform_0, window_bounds = array<i64: 1, 80, 32>}, {pipeline_mode = #tpu.pipeline_mode<synchronous>, transform_indices = @transform_1, window_bounds = array<i64: 1, 32>}, {pipeline_mode = #tpu.pipeline_mode<synchronous>, transform_indices = @transform_2, window_bounds = array<i64: 1, 32>}, {transform_indices = @transform_3, window_bounds = array<i64: 1, 80, 32>}]} {
    %c0 = arith.constant 0 : index
    %c0_0 = arith.constant 0 : index
    %c0_1 = arith.constant 0 : index
    %0 = vector.load %arg1[%c0, %c0_0, %c0_1] : memref<1x80x32xbf16, #tpu.memory_space<vmem>>, vector<1x80x32xbf16>
    %1 = vector.shape_cast %0 : vector<1x80x32xbf16> to vector<80x32xbf16>
    %2 = arith.extf %1 : vector<80x32xbf16> to vector<80x32xf32>
    %c0_2 = arith.constant 0 : index
    %c0_3 = arith.constant 0 : index
    %3 = vector.load %arg2[%c0_2, %c0_3] : memref<1x32xf32, #tpu.memory_space<vmem>>, vector<1x32xf32>
    %4 = vector.broadcast %3 : vector<1x32xf32> to vector<80x32xf32>
    %5 = arith.mulf %2, %4 : vector<80x32xf32>
    %c0_4 = arith.constant 0 : index
    %c0_5 = arith.constant 0 : index
    %6 = vector.load %arg3[%c0_4, %c0_5] : memref<1x32xf32, #tpu.memory_space<vmem>>, vector<1x32xf32>
    %7 = vector.broadcast %6 : vector<1x32xf32> to vector<80x32xf32>
    %8 = arith.addf %5, %7 : vector<80x32xf32>
    %cst = arith.constant 0.000000e+00 : f32
    %9 = vector.broadcast %cst : f32 to vector<80x32xf32>
    %10 = arith.cmpf ogt, %8, %9 : vector<80x32xf32>
    %cst_6 = arith.constant 2.000000e-01 : f32
    %11 = vector.broadcast %cst_6 : f32 to vector<80x32xf32>
    %12 = arith.mulf %11, %8 : vector<80x32xf32>
    %13 = arith.select %10, %8, %12 : vector<80x32xi1>, vector<80x32xf32>
    %14 = arith.truncf %13 : vector<80x32xf32> to vector<80x32xbf16>
    %c0_7 = arith.constant 0 : index
    %c0_8 = arith.constant 0 : index
    %c0_9 = arith.constant 0 : index
    %15 = vector.load %arg4[%c0_7, %c0_8, %c0_9] : memref<1x80x32xbf16, #tpu.memory_space<vmem>>, vector<1x80x32xbf16>
    %16 = vector.shape_cast %15 : vector<1x80x32xbf16> to vector<80x32xbf16>
    %17 = vector.shape_cast %14 : vector<80x32xbf16> to vector<1x80x32xbf16>
    tpu.vector_store %arg4[%c0_7, %c0_8, %c0_9], %17 {strides = array<i32>} : memref<1x80x32xbf16, #tpu.memory_space<vmem>>, vector<1x80x32xbf16>,
    return
  }
  func.func @transform_0(%arg0: i32) -> (i32, i32, i32) {
    %c0_i32 = arith.constant 0 : i32
    %c0_i32_0 = arith.constant 0 : i32
    %c0_i32_1 = arith.constant 0 : i32
    return %arg0, %c0_i32, %c0_i32_0 : i32, i32, i32
  }
  func.func @transform_1(%arg0: i32) -> (i32, i32) {
    %c0_i32 = arith.constant 0 : i32
    %c0_i32_0 = arith.constant 0 : i32
    %c0_i32_1 = arith.constant 0 : i32
    return %c0_i32, %c0_i32_0 : i32, i32
  }
  func.func @transform_2(%arg0: i32) -> (i32, i32) {
    %c0_i32 = arith.constant 0 : i32
    %c0_i32_0 = arith.constant 0 : i32
    %c0_i32_1 = arith.constant 0 : i32
    return %c0_i32, %c0_i32_0 : i32, i32
  }
  func.func @transform_3(%arg0: i32) -> (i32, i32, i32) {
    %c0_i32 = arith.constant 0 : i32
    %c0_i32_0 = arith.constant 0 : i32
    %c0_i32_1 = arith.constant 0 : i32
    return %arg0, %c0_i32, %c0_i32_0 : i32, i32, i32
  }
}

module attributes {stable_mosaic.version = 11 : i64} {
  func.func @_conv_stats_kernel(%arg0: i32, %arg1: memref<1x36x128xbf16, #tpu.memory_space<vmem>>, %arg2: memref<4x128x64xbf16, #tpu.memory_space<vmem>>, %arg3: memref<24x1xf32, #tpu.memory_space<vmem>>, %arg4: memref<1x24x64xbf16, #tpu.memory_space<vmem>>, %arg5: memref<1x1x64xf32, #tpu.memory_space<vmem>>, %arg6: memref<1x1x64xf32, #tpu.memory_space<vmem>>) attributes {dimension_semantics = [#tpu.dimension_semantics<parallel>], iteration_bounds = array<i64: 2>, scalar_prefetch = 0 : i64, scratch_operands = 0 : i64, tpu.core_type = #tpu.core_type<tc>, window_params = [{transform_indices = @transform_0, window_bounds = array<i64: 1, 36, 128>}, {pipeline_mode = #tpu.pipeline_mode<synchronous>, transform_indices = @transform_1, window_bounds = array<i64: 4, 128, 64>}, {pipeline_mode = #tpu.pipeline_mode<synchronous>, transform_indices = @transform_2, window_bounds = array<i64: 24, 1>}, {transform_indices = @transform_3, window_bounds = array<i64: 1, 24, 64>}, {transform_indices = @transform_4, window_bounds = array<i64: 1, 1, 64>}, {transform_indices = @transform_5, window_bounds = array<i64: 1, 1, 64>}]} {
    %cst = arith.constant 0.000000e+00 : f32
    %0 = vector.broadcast %cst : f32 to vector<24x64xf32>
    %c0 = arith.constant 0 : index
    %c0_0 = arith.constant 0 : index
    %c0_1 = arith.constant 0 : index
    %1 = vector.load %arg1[%c0, %c0_0, %c0_1] : memref<1x36x128xbf16, #tpu.memory_space<vmem>>, vector<1x24x128xbf16>
    %2 = vector.shape_cast %1 : vector<1x24x128xbf16> to vector<24x128xbf16>
    %c0_2 = arith.constant 0 : index
    %c0_3 = arith.constant 0 : index
    %c0_4 = arith.constant 0 : index
    %3 = vector.load %arg2[%c0_2, %c0_3, %c0_4] : memref<4x128x64xbf16, #tpu.memory_space<vmem>>, vector<1x128x64xbf16>
    %4 = vector.shape_cast %3 : vector<1x128x64xbf16> to vector<128x64xbf16>
    %cst_5 = arith.constant dense<0.000000e+00> : vector<24x64xf32>
    %5 = tpu.matmul %2, %4, %cst_5 {dimension_numbers = #tpu.dot_dimension_numbers<[1], [0], [0], [1], [0, 0, 1, 1], [], []>} : vector<24x128xbf16>, vector<128x64xbf16>, vector<24x64xf32> -> vector<24x64xf32>
    %6 = arith.addf %0, %5 : vector<24x64xf32>
    %c0_6 = arith.constant 0 : index
    %c1 = arith.constant 1 : index
    %c0_7 = arith.constant 0 : index
    %7 = vector.load %arg1[%c0_6, %c1, %c0_7] : memref<1x36x128xbf16, #tpu.memory_space<vmem>>, vector<1x24x128xbf16>
    %8 = vector.shape_cast %7 : vector<1x24x128xbf16> to vector<24x128xbf16>
    %c1_8 = arith.constant 1 : index
    %c0_9 = arith.constant 0 : index
    %c0_10 = arith.constant 0 : index
    %9 = vector.load %arg2[%c1_8, %c0_9, %c0_10] : memref<4x128x64xbf16, #tpu.memory_space<vmem>>, vector<1x128x64xbf16>
    %10 = vector.shape_cast %9 : vector<1x128x64xbf16> to vector<128x64xbf16>
    %cst_11 = arith.constant dense<0.000000e+00> : vector<24x64xf32>
    %11 = tpu.matmul %8, %10, %cst_11 {dimension_numbers = #tpu.dot_dimension_numbers<[1], [0], [0], [1], [0, 0, 1, 1], [], []>} : vector<24x128xbf16>, vector<128x64xbf16>, vector<24x64xf32> -> vector<24x64xf32>
    %12 = arith.addf %6, %11 : vector<24x64xf32>
    %c0_12 = arith.constant 0 : index
    %c6 = arith.constant 6 : index
    %c0_13 = arith.constant 0 : index
    %13 = vector.load %arg1[%c0_12, %c6, %c0_13] : memref<1x36x128xbf16, #tpu.memory_space<vmem>>, vector<1x24x128xbf16>
    %14 = vector.shape_cast %13 : vector<1x24x128xbf16> to vector<24x128xbf16>
    %c2 = arith.constant 2 : index
    %c0_14 = arith.constant 0 : index
    %c0_15 = arith.constant 0 : index
    %15 = vector.load %arg2[%c2, %c0_14, %c0_15] : memref<4x128x64xbf16, #tpu.memory_space<vmem>>, vector<1x128x64xbf16>
    %16 = vector.shape_cast %15 : vector<1x128x64xbf16> to vector<128x64xbf16>
    %cst_16 = arith.constant dense<0.000000e+00> : vector<24x64xf32>
    %17 = tpu.matmul %14, %16, %cst_16 {dimension_numbers = #tpu.dot_dimension_numbers<[1], [0], [0], [1], [0, 0, 1, 1], [], []>} : vector<24x128xbf16>, vector<128x64xbf16>, vector<24x64xf32> -> vector<24x64xf32>
    %18 = arith.addf %12, %17 : vector<24x64xf32>
    %c0_17 = arith.constant 0 : index
    %c7 = arith.constant 7 : index
    %c0_18 = arith.constant 0 : index
    %19 = vector.load %arg1[%c0_17, %c7, %c0_18] : memref<1x36x128xbf16, #tpu.memory_space<vmem>>, vector<1x24x128xbf16>
    %20 = vector.shape_cast %19 : vector<1x24x128xbf16> to vector<24x128xbf16>
    %c3 = arith.constant 3 : index
    %c0_19 = arith.constant 0 : index
    %c0_20 = arith.constant 0 : index
    %21 = vector.load %arg2[%c3, %c0_19, %c0_20] : memref<4x128x64xbf16, #tpu.memory_space<vmem>>, vector<1x128x64xbf16>
    %22 = vector.shape_cast %21 : vector<1x128x64xbf16> to vector<128x64xbf16>
    %cst_21 = arith.constant dense<0.000000e+00> : vector<24x64xf32>
    %23 = tpu.matmul %20, %22, %cst_21 {dimension_numbers = #tpu.dot_dimension_numbers<[1], [0], [0], [1], [0, 0, 1, 1], [], []>} : vector<24x128xbf16>, vector<128x64xbf16>, vector<24x64xf32> -> vector<24x64xf32>
    %24 = arith.addf %18, %23 : vector<24x64xf32>
    %25 = arith.truncf %24 : vector<24x64xf32> to vector<24x64xbf16>
    %c0_22 = arith.constant 0 : index
    %c0_23 = arith.constant 0 : index
    %c0_24 = arith.constant 0 : index
    %26 = vector.load %arg4[%c0_22, %c0_23, %c0_24] : memref<1x24x64xbf16, #tpu.memory_space<vmem>>, vector<1x24x64xbf16>
    %27 = vector.shape_cast %26 : vector<1x24x64xbf16> to vector<24x64xbf16>
    %28 = vector.shape_cast %25 : vector<24x64xbf16> to vector<1x24x64xbf16>
    tpu.vector_store %arg4[%c0_22, %c0_23, %c0_24], %28 {strides = array<i32>} : memref<1x24x64xbf16, #tpu.memory_space<vmem>>, vector<1x24x64xbf16>,
    %c0_25 = arith.constant 0 : index
    %c0_26 = arith.constant 0 : index
    %29 = vector.load %arg3[%c0_25, %c0_26] : memref<24x1xf32, #tpu.memory_space<vmem>>, vector<24x1xf32>
    %30 = vector.broadcast %29 : vector<24x1xf32> to vector<24x64xf32>
    %31 = arith.mulf %24, %30 : vector<24x64xf32>
    %cst_27 = arith.constant dense<0.000000e+00> : vector<64xf32>
    %32 = vector.multi_reduction <add>, %31, %cst_27 [0] : vector<24x64xf32> to vector<64xf32>
    %33 = vector.shape_cast %32 : vector<64xf32> to vector<1x64xf32>
    %c0_28 = arith.constant 0 : index
    %c0_29 = arith.constant 0 : index
    %c0_30 = arith.constant 0 : index
    %34 = vector.load %arg5[%c0_28, %c0_29, %c0_30] : memref<1x1x64xf32, #tpu.memory_space<vmem>>, vector<1x1x64xf32>
    %35 = vector.shape_cast %34 : vector<1x1x64xf32> to vector<1x64xf32>
    %36 = vector.shape_cast %33 : vector<1x64xf32> to vector<1x1x64xf32>
    tpu.vector_store %arg5[%c0_28, %c0_29, %c0_30], %36 {strides = array<i32>} : memref<1x1x64xf32, #tpu.memory_space<vmem>>, vector<1x1x64xf32>,
    %37 = arith.mulf %31, %24 : vector<24x64xf32>
    %cst_31 = arith.constant dense<0.000000e+00> : vector<64xf32>
    %38 = vector.multi_reduction <add>, %37, %cst_31 [0] : vector<24x64xf32> to vector<64xf32>
    %39 = vector.shape_cast %38 : vector<64xf32> to vector<1x64xf32>
    %c0_32 = arith.constant 0 : index
    %c0_33 = arith.constant 0 : index
    %c0_34 = arith.constant 0 : index
    %40 = vector.load %arg6[%c0_32, %c0_33, %c0_34] : memref<1x1x64xf32, #tpu.memory_space<vmem>>, vector<1x1x64xf32>
    %41 = vector.shape_cast %40 : vector<1x1x64xf32> to vector<1x64xf32>
    %42 = vector.shape_cast %39 : vector<1x64xf32> to vector<1x1x64xf32>
    tpu.vector_store %arg6[%c0_32, %c0_33, %c0_34], %42 {strides = array<i32>} : memref<1x1x64xf32, #tpu.memory_space<vmem>>, vector<1x1x64xf32>,
    return
  }
  func.func @transform_0(%arg0: i32) -> (i32, i32, i32) {
    %c0_i32 = arith.constant 0 : i32
    %c0_i32_0 = arith.constant 0 : i32
    %c0_i32_1 = arith.constant 0 : i32
    return %arg0, %c0_i32, %c0_i32_0 : i32, i32, i32
  }
  func.func @transform_1(%arg0: i32) -> (i32, i32, i32) {
    %c0_i32 = arith.constant 0 : i32
    %c0_i32_0 = arith.constant 0 : i32
    %c0_i32_1 = arith.constant 0 : i32
    %c0_i32_2 = arith.constant 0 : i32
    return %c0_i32, %c0_i32_0, %c0_i32_1 : i32, i32, i32
  }
  func.func @transform_2(%arg0: i32) -> (i32, i32) {
    %c0_i32 = arith.constant 0 : i32
    %c0_i32_0 = arith.constant 0 : i32
    %c0_i32_1 = arith.constant 0 : i32
    return %c0_i32, %c0_i32_0 : i32, i32
  }
  func.func @transform_3(%arg0: i32) -> (i32, i32, i32) {
    %c0_i32 = arith.constant 0 : i32
    %c0_i32_0 = arith.constant 0 : i32
    %c0_i32_1 = arith.constant 0 : i32
    return %arg0, %c0_i32, %c0_i32_0 : i32, i32, i32
  }
  func.func @transform_4(%arg0: i32) -> (i32, i32, i32) {
    %c0_i32 = arith.constant 0 : i32
    %c0_i32_0 = arith.constant 0 : i32
    %c0_i32_1 = arith.constant 0 : i32
    return %arg0, %c0_i32, %c0_i32_0 : i32, i32, i32
  }
  func.func @transform_5(%arg0: i32) -> (i32, i32, i32) {
    %c0_i32 = arith.constant 0 : i32
    %c0_i32_0 = arith.constant 0 : i32
    %c0_i32_1 = arith.constant 0 : i32
    return %arg0, %c0_i32, %c0_i32_0 : i32, i32, i32
  }
}

module attributes {stable_mosaic.version = 11 : i64} {
  func.func @_bn_lrelu_head_kernel(%arg0: i32, %arg1: memref<1x24x64xbf16, #tpu.memory_space<vmem>>, %arg2: memref<1x64xf32, #tpu.memory_space<vmem>>, %arg3: memref<1x64xf32, #tpu.memory_space<vmem>>, %arg4: memref<24x64xf32, #tpu.memory_space<vmem>>, %arg5: memref<1x1x1xf32, #tpu.memory_space<vmem>>) attributes {dimension_semantics = [#tpu.dimension_semantics<parallel>], iteration_bounds = array<i64: 2>, scalar_prefetch = 0 : i64, scratch_operands = 0 : i64, tpu.core_type = #tpu.core_type<tc>, window_params = [{transform_indices = @transform_0, window_bounds = array<i64: 1, 24, 64>}, {pipeline_mode = #tpu.pipeline_mode<synchronous>, transform_indices = @transform_1, window_bounds = array<i64: 1, 64>}, {pipeline_mode = #tpu.pipeline_mode<synchronous>, transform_indices = @transform_2, window_bounds = array<i64: 1, 64>}, {pipeline_mode = #tpu.pipeline_mode<synchronous>, transform_indices = @transform_3, window_bounds = array<i64: 24, 64>}, {transform_indices = @transform_4, window_bounds = array<i64: 1, 1, 1>}]} {
    %c0 = arith.constant 0 : index
    %c0_0 = arith.constant 0 : index
    %c0_1 = arith.constant 0 : index
    %0 = vector.load %arg1[%c0, %c0_0, %c0_1] : memref<1x24x64xbf16, #tpu.memory_space<vmem>>, vector<1x24x64xbf16>
    %1 = vector.shape_cast %0 : vector<1x24x64xbf16> to vector<24x64xbf16>
    %2 = arith.extf %1 : vector<24x64xbf16> to vector<24x64xf32>
    %c0_2 = arith.constant 0 : index
    %c0_3 = arith.constant 0 : index
    %3 = vector.load %arg2[%c0_2, %c0_3] : memref<1x64xf32, #tpu.memory_space<vmem>>, vector<1x64xf32>
    %4 = vector.broadcast %3 : vector<1x64xf32> to vector<24x64xf32>
    %5 = arith.mulf %2, %4 : vector<24x64xf32>
    %c0_4 = arith.constant 0 : index
    %c0_5 = arith.constant 0 : index
    %6 = vector.load %arg3[%c0_4, %c0_5] : memref<1x64xf32, #tpu.memory_space<vmem>>, vector<1x64xf32>
    %7 = vector.broadcast %6 : vector<1x64xf32> to vector<24x64xf32>
    %8 = arith.addf %5, %7 : vector<24x64xf32>
    %cst = arith.constant 0.000000e+00 : f32
    %9 = vector.broadcast %cst : f32 to vector<24x64xf32>
    %10 = arith.cmpf ogt, %8, %9 : vector<24x64xf32>
    %cst_6 = arith.constant 2.000000e-01 : f32
    %11 = vector.broadcast %cst_6 : f32 to vector<24x64xf32>
    %12 = arith.mulf %11, %8 : vector<24x64xf32>
    %13 = arith.select %10, %8, %12 : vector<24x64xi1>, vector<24x64xf32>
    %c0_7 = arith.constant 0 : index
    %c0_8 = arith.constant 0 : index
    %14 = vector.load %arg4[%c0_7, %c0_8] : memref<24x64xf32, #tpu.memory_space<vmem>>, vector<24x64xf32>
    %15 = arith.mulf %13, %14 : vector<24x64xf32>
    %16 = vector.shape_cast %15 : vector<24x64xf32> to vector<1x24x64xf32>
    %cst_9 = arith.constant dense<0.000000e+00> : vector<1xf32>
    %17 = vector.multi_reduction <add>, %16, %cst_9 [1, 2] : vector<1x24x64xf32> to vector<1xf32>
    %18 = vector.shape_cast %17 : vector<1xf32> to vector<1x1x1xf32>
    %19 = vector.extract %18[0, 0, 0] : f32 from vector<1x1x1xf32>
    %20 = vector.broadcast %19 : f32 to vector<1x1xf32>
    %cst_10 = arith.constant 0.000000e+00 : f32
    %21 = vector.broadcast %cst_10 : f32 to vector<1x1xf32>
    %22 = arith.subf %21, %20 : vector<1x1xf32>
    %23 = math.exp %22 : vector<1x1xf32>
    %cst_11 = arith.constant 1.000000e+00 : f32
    %24 = vector.broadcast %cst_11 : f32 to vector<1x1xf32>
    %25 = arith.addf %24, %23 : vector<1x1xf32>
    %cst_12 = arith.constant 1.000000e+00 : f32
    %26 = vector.broadcast %cst_12 : f32 to vector<1x1xf32>
    %27 = arith.divf %26, %25 : vector<1x1xf32>
    %c0_13 = arith.constant 0 : index
    %c0_14 = arith.constant 0 : index
    %c0_15 = arith.constant 0 : index
    %28 = vector.load %arg5[%c0_13, %c0_14, %c0_15] : memref<1x1x1xf32, #tpu.memory_space<vmem>>, vector<1x1x1xf32>
    %29 = vector.shape_cast %28 : vector<1x1x1xf32> to vector<1x1xf32>
    %30 = vector.shape_cast %27 : vector<1x1xf32> to vector<1x1x1xf32>
    tpu.vector_store %arg5[%c0_13, %c0_14, %c0_15], %30 {strides = array<i32>} : memref<1x1x1xf32, #tpu.memory_space<vmem>>, vector<1x1x1xf32>,
    return
  }
  func.func @transform_0(%arg0: i32) -> (i32, i32, i32) {
    %c0_i32 = arith.constant 0 : i32
    %c0_i32_0 = arith.constant 0 : i32
    %c0_i32_1 = arith.constant 0 : i32
    return %arg0, %c0_i32, %c0_i32_0 : i32, i32, i32
  }
  func.func @transform_1(%arg0: i32) -> (i32, i32) {
    %c0_i32 = arith.constant 0 : i32
    %c0_i32_0 = arith.constant 0 : i32
    %c0_i32_1 = arith.constant 0 : i32
    return %c0_i32, %c0_i32_0 : i32, i32
  }
  func.func @transform_2(%arg0: i32) -> (i32, i32) {
    %c0_i32 = arith.constant 0 : i32
    %c0_i32_0 = arith.constant 0 : i32
    %c0_i32_1 = arith.constant 0 : i32
    return %c0_i32, %c0_i32_0 : i32, i32
  }
  func.func @transform_3(%arg0: i32) -> (i32, i32) {
    %c0_i32 = arith.constant 0 : i32
    %c0_i32_0 = arith.constant 0 : i32
    %c0_i32_1 = arith.constant 0 : i32
    return %c0_i32, %c0_i32_0 : i32, i32
  }
  func.func @transform_4(%arg0: i32) -> (i32, i32, i32) {
    %c0_i32 = arith.constant 0 : i32
    %c0_i32_0 = arith.constant 0 : i32
    %c0_i32_1 = arith.constant 0 : i32
    return %arg0, %c0_i32, %c0_i32_0 : i32, i32, i32
  }
}

</mosaic_0001>

<bundles_post_ra>
// kernel: netD_forward.7
= control target key start
LH: loop header
LB: loop body
LE: loop exit
PB: predicated region body
PF: predicated region fallthrough
CT: control target
= control target key end

     0   :  { %s6634_s9 = smov 0   ;;  %s8155_s0 = inlined_call_operand.vmem [shape: bf16[2,1156,12], index: 0, kind: input, shape index: {}]   ;;  %s8156_s1 = inlined_call_operand.vmem [shape: bf16[4,12,8], index: 1, kind: input, shape index: {}]   ;;  %s8157_s2 = inlined_call_operand.vmem [shape: bf16[2,1088,8], index: 2, kind: output, shape index: {}]  }
   0x1 LB: > { %s5614_s10 = sadd.s32 4294967295, %s6617_s9   ;;  %p5618_p0 = scmp.ge.s32.totalorder %s6617_s9, 1  ;;  %s6617_s9 = sphi %s6634_s9, %s12_s9  }
   0x2   : > { %p112_p1 = scmp.lt.s32.totalorder %s6617_s9, 3 }
   0x4   : > { %p113_p2 = pnand %p5618_p0, %p112_p1 }
   0x5   : > { %p134_p3 = scmp.lt.s32.totalorder (!%p113_p2), %s5614_s10, 1 }
   0x6   : > { %116 = sbr.rel (%p113_p2) target bundleno = 1247 (0x4df), region = 28 }
   0xb   : > { %v5969_v0 = vld [vmem:[%s8156_s1] sm:$0xf]  ;;  %v6529_v1 = vld [vmem:[%s8156_s1] sm:$0x30]  ;;  %vm1389_vm0 = vcmask 1045504   ;;  %s8159_s10 = smov (!%p134_p3, %s5614_s10), 1 }
   0xc   : > { %v5970_v2 = vor.u32 %v6529_v1, %v5969_v0  ;;  %v6315_v3 = vld [vmem:[%s8156_s1 + $0x10] sm:$0xf]  ;;  %v6599_v4 = vld [vmem:[%s8156_s1 + $0x10] sm:$0x30]  ;;  %v5897_v6 = vld [vmem:[%s8156_s1 + $0x8] sm:$0xf] }
   0xd   : > { %v6316_v5 = vor.u32 %v6599_v4, %v6315_v3  ;;  %v6530_v7 = vld [vmem:[%s8156_s1 + $0x8] sm:$0x30]  ;;  %v6389_v10 = vld [vmem:[%s8156_s1 + $0x18] sm:$0xf]  ;;  %v6600_v11 = vld [vmem:[%s8156_s1 + $0x18] sm:$0x30] }
   0xe   : > { %v1884_v8 = vsel %vm1389_vm0, %v5970_v2, 0  ;;  %v5898_v9 = vor.u32 %v6530_v7, %v5897_v6  ;;  %s6601_s27 = smul.u32 580, %s8159_s10  ;;  %v6390_v13 = vor.u32 %v6600_v11, %v6389_v10  ;;  %vm1184_vm1 = vcmask 97280  }
   0xf   : > { %1893 = vmatpush.bf16.msra.mxu1 %v1884_v8  ;;  %v3066_v12 = vsel %vm1389_vm0, %v6316_v5, 0  ;;  %vm2718_vm2 = vcmask 1046528   ;;  %vm630_vm3 = vsmask.f32 7424  ;;  %vm3560_vm4 = vsmask.f32 6400 }
  0x10   : > { %3075 = vmatpush.bf16.msra.mxu2 %v3066_v12  ;;  %v1391_v14 = vsel %vm1389_vm0, %v5898_v9, 0  ;;  %s6675_s30 = scalar_lea.vmem %s8155_s0, %s6601_s27  ;;  %v4391_v15 = vsel %vm1389_vm0, %v6390_v13, 0  ;;  %s6602_s3 = smul.u32 544, %s8159_s10  ;;  %vm5422_vm6 = vcmask 60416  }
  0x11   : > { %1400 = vmatpush.bf16.msra.mxu0 %v1391_v14  ;;  %v6461_v16 = vld [vmem:[%s6675_s30] sm:$0xff]  ;;  %v6043_v17 = vld [vmem:[%s6675_s30 + $0x10] sm:$0xe]  ;;  %v6531_v18 = vld [vmem:[%s6675_s30 + $0x10] sm:$0xf0]  ;;  %4400 = vmatpush.bf16.msra.mxu3 %v4391_v15 }
  0x12   : > { %v6532_v19 = vld [vmem:[%s6675_s30 + $0x18] sm:$0xff]  ;;  %v6044_v20 = vor.u32 %v6531_v18, %v6043_v17  ;;  %v6462_v21 = vld [vmem:[%s6675_s30 + $0x8] sm:$0xff]  ;;  %v634_v22 = vshll.u32 %v6461_v16, 16  ;;  %5971 = vmatmul.msk.bf16.vlgmr.msra.gmra.mxu1 %vm1184_vm1, %v6461_v16  ;;  %v632_v23 = vshrl.u32 %v6461_v16, 16  ;;  %v6533_v42 = vld [vmem:[%s6675_s30 + $0x20] sm:$0xff]  ;;  %s6777_s6 = scalar_lea.vmem %s8157_s2, %s6602_s3 }
  0x13   : > { %v2720_v25 = vrot.slane %v6532_v19, 1  ;;  %v639_v26 = vshll.u32 %v6462_v21, 16  ;;  %v3570_v30 = vshrl.u32 %v6532_v19, 16  ;;  %v3573_v31 = vshll.u32 %v6532_v19, 16  ;;  %v6463_v44 = vld [vmem:[%s6675_s30 + $0x10] sm:$0xff]  ;;  %v6534_v58 = vld [vmem:[%s6675_s30 + $0x28] sm:$0xff] }
  0x14   : > { %v2719_v24 = vrot.slane %v6044_v20, 1  ;;  %v3562_v27 = vshrl.u32 %v6044_v20, 16  ;;  %v636_v28 = vrot.slane %v634_v22, 1  ;;  %v3565_v29 = vshll.u32 %v6044_v20, 16  ;;  %v6464_v59 = vld [vmem:[%s6675_s30 + $0x18] sm:$0xff]  ;;  %v6535_v9 = vld [vmem:[%s6675_s30 + $0x30] sm:$0xff] }
  0x15   : > { %v641_v33 = vrot.slane %v639_v26, 1  ;;  %v3572_v37 = vrot.slane %v3570_v30, 1  ;;  %v3575_v38 = vrot.slane %v3573_v31, 2  ;;  %v3579_v45 = vshrl.u32 %v6533_v42, 16  ;;  %v6465_v10 = vld [vmem:[%s6675_s30 + $0x20] sm:$0xff] }
  0x16   : > { %v2721_v32 = vsel %vm2718_vm2, %v2719_v24, %v2720_v25  ;;  %v3564_v34 = vrot.slane %v3562_v27, 1  ;;  %v637_v35 = vor.u32 %v636_v28, %v632_v23  ;;  %v3567_v36 = vrot.slane %v3565_v29, 2  ;;  %v6536_v24 = vld [vmem:[%s6675_s30 + $0x38] sm:$0xff] }
  0x17   : > { %6317 = vmatmul.msk.bf16.vlgmr.msra.gmra.mxu2 %vm1184_vm1, %v2721_v32  ;;  %v3576_v41 = vor.u32 %v3575_v38, %v3572_v37  ;;  %v3582_v46 = vshll.u32 %v6533_v42, 16  ;;  %v643_v47 = vshrl.u32 %v6462_v21, 16  ;;  %v647_v48 = vshll.u32 %v6463_v44, 16 }
  0x18   : > { %v642_v39 = vsel %vm630_vm3, %v637_v35, %v641_v33  ;;  %v3568_v40 = vor.u32 %v3567_v36, %v3564_v34  ;;  %v2722_v49 = vrot.slane %v6533_v42, 1  ;;  %v3581_v50 = vrot.slane %v3579_v45, 1 }
  0x19   : > { %5899 = vmatmul.msk.bf16.vlgmr.msra.gmra.mxu0 %vm1184_vm1, %v642_v39  ;;  %v3584_v51 = vrot.slane %v3582_v46, 2  ;;  %v645_v52 = vor.u32 %v643_v47, %v641_v33  ;;  %v649_v53 = vrot.slane %v647_v48, 1  ;;  %v3588_v60 = vshrl.u32 %v6534_v58, 16  ;;  %v6537_v39 = vld [vmem:[%s6675_s30 + $0x40] sm:$0xff] }
  0x1a   : > { %v3577_v43 = vsel %vm3560_vm4, %v3568_v40, %v3576_v41  ;;  %v2723_v54 = vsel %vm2718_vm2, %v2720_v25, %v2722_v49  ;;  %v3591_v61 = vshll.u32 %v6534_v58, 16  ;;  %v651_v62 = vshrl.u32 %v6463_v44, 16  ;;  %v6466_v25 = vld [vmem:[%s6675_s30 + $0x28] sm:$0xff]  ;;  %v6467_v40 = vld [vmem:[%s6675_s30 + $0x30] sm:$0xff] }
  0x1b   : > { %6391 = vmatmul.msk.bf16.vlgmr.msra.gmra.mxu3 %vm1184_vm1, %v3577_v43  ;;  %v3585_v55 = vor.u32 %v3584_v51, %v3581_v50  ;;  %v650_v56 = vsel %vm630_vm3, %v645_v52, %v649_v53  ;;  %v655_v63 = vshll.u32 %v6464_v59, 16  ;;  %v2724_v0 = vrot.slane %v6534_v58, 1 }
  0x1c   : > { %v3590_v1 = vrot.slane %v3588_v60, 1  ;;  %v3593_v2 = vrot.slane %v3591_v61, 2  ;;  %v653_v3 = vor.u32 %v651_v62, %v649_v53  ;;  %v3597_v11 = vshrl.u32 %v6535_v9, 16 }
  0x1d   : > { %v3586_v57 = vsel %vm3560_vm4, %v3576_v41, %v3585_v55  ;;  %v657_v4 = vrot.slane %v655_v63, 1  ;;  %v2725_v5 = vsel %vm2718_vm2, %v2722_v49, %v2724_v0  ;;  %v3600_v12 = vshll.u32 %v6535_v9, 16 }
  0x1e   : > { %v3594_v6 = vor.u32 %v3593_v2, %v3590_v1  ;;  %v659_v13 = vshrl.u32 %v6464_v59, 16  ;;  %v663_v14 = vshll.u32 %v6465_v10, 16  ;;  %v2726_v15 = vrot.slane %v6535_v9, 1 }
  0x1f   : > { %v658_v7 = vsel %vm630_vm3, %v653_v3, %v657_v4  ;;  %v3599_v16 = vrot.slane %v3597_v11, 1  ;;  %v3602_v17 = vrot.slane %v3600_v12, 2  ;;  %v3606_v26 = vshrl.u32 %v6536_v24, 16 }
  0x20   : > { %v3595_v8 = vsel %vm3560_vm4, %v3585_v55, %v3594_v6  ;;  %v661_v18 = vor.u32 %v659_v13, %v657_v4  ;;  %v665_v19 = vrot.slane %v663_v14, 1  ;;  %v2727_v20 = vsel %vm2718_vm2, %v2724_v0, %v2726_v15  ;;  %v6468_v55 = vld [vmem:[%s6675_s30 + $0x38] sm:$0xff] }
  0x21   : > { %v3609_v27 = vshll.u32 %v6536_v24, 16  ;;  %v667_v28 = vshrl.u32 %v6465_v10, 16  ;;  %v671_v29 = vshll.u32 %v6466_v25, 16  ;;  %v2728_v30 = vrot.slane %v6536_v24, 1 }
  0x22   : > { %5972 = vmatmul.msk.bf16.gmra.mxu1 %vm1184_vm1, %v6462_v21  ;;  %v3603_v21 = vor.u32 %v3602_v17, %v3599_v16  ;;  %v666_v22 = vsel %vm630_vm3, %v661_v18, %v665_v19  ;;  %v3608_v31 = vrot.slane %v3606_v26, 1  ;;  %v3615_v41 = vshrl.u32 %v6537_v39, 16 }
  0x23   : > { %v3611_v32 = vrot.slane %v3609_v27, 2  ;;  %v669_v33 = vor.u32 %v667_v28, %v665_v19  ;;  %v673_v34 = vrot.slane %v671_v29, 1  ;;  %v2729_v35 = vsel %vm2718_vm2, %v2726_v15, %v2728_v30 }
  0x24   : > { %v3604_v23 = vsel %vm3560_vm4, %v3594_v6, %v3603_v21  ;;  %v3618_v42 = vshll.u32 %v6537_v39, 16  ;;  %v675_v43 = vshrl.u32 %v6466_v25, 16  ;;  %v2730_v45 = vrot.slane %v6537_v39, 1  ;;  %v6469_v6 = vld [vmem:[%s6675_s30 + $0x40] sm:$0xff] }
  0x25   : > { %v3612_v36 = vor.u32 %v3611_v32, %v3608_v31  ;;  %v674_v37 = vsel %vm630_vm3, %v669_v33, %v673_v34  ;;  %v3617_v46 = vrot.slane %v3615_v41, 1  ;;  %v683_v58 = vshrl.u32 %v6467_v40, 16  ;;  %v6761_v39 = vld [vmem:[%s6675_s30 + $0x60] sm:$0xff]  ;;  %v6765_v41 = vld [vmem:[%s6675_s30 + $0x50] sm:$0xff] }
  0x26   : > { %v3620_v47 = vrot.slane %v3618_v42, 2  ;;  %v677_v48 = vor.u32 %v675_v43, %v673_v34  ;;  %v2731_v50 = vsel %vm2718_vm2, %v2728_v30, %v2730_v45  ;;  %v691_v9 = vshrl.u32 %v6468_v55, 16 }
  0x27   : > { %6318 = vmatmul.msk.bf16.gmra.mxu2 %vm1184_vm1, %v2723_v54  ;;  %v3613_v38 = vsel %vm3560_vm4, %v3603_v21, %v3612_v36  ;;  %v6538_v54 = vld [vmem:[%s6675_s30 + $0x48] sm:$0xff]  ;;  %v699_v24 = vshrl.u32 %v6469_v6, 16  ;;  %v3651_v43 = vshrl.u32 %v6761_v39, 16 }
  0x28   : > { %v3621_v51 = vor.u32 %v3620_v47, %v3617_v46  ;;  %v2732_v60 = vrot.slane %v6538_v54, 1  ;;  %v6470_v21 = vld [vmem:[%s6675_s30 + $0x48] sm:$0xff] }
  0x29   : > { %5900 = vmatmul.msk.bf16.gmra.mxu0 %vm1184_vm1, %v650_v56  ;;  %v3624_v56 = vshrl.u32 %v6538_v54, 16  ;;  %v707_v47 = vshrl.u32 %v6470_v21, 16 }
  0x2a   : > { %v3622_v53 = vsel %vm3560_vm4, %v3612_v36, %v3621_v51  ;;  %v2733_v1 = vsel %vm2718_vm2, %v2730_v45, %v2732_v60 }
  0x2b   : > { %6392 = vmatmul.msk.bf16.gmra.mxu3 %vm1184_vm1, %v3586_v57  ;;  %v3627_v57 = vshll.u32 %v6538_v54, 16  ;;  %v3626_v61 = vrot.slane %v3624_v56, 1 }
  0x2d   : > { %v3629_v62 = vrot.slane %v3627_v57, 2 }
  0x2f   : > { %v3630_v2 = vor.u32 %v3629_v62, %v3626_v61 }
  0x31   : > { %v3631_v4 = vsel %vm3560_vm4, %v3621_v51, %v3630_v2  ;;  %v2738_v51 = vrot.slane %v6761_v39, 1 }
  0x32   : > { %5973 = vmatmul.msk.bf16.gmra.mxu1 %vm1184_vm1, %v6463_v44  ;;  %v679_v44 = vshll.u32 %v6467_v40, 16 }
  0x34   : > { %v681_v49 = vrot.slane %v679_v44, 1  ;;  %v3654_v44 = vshll.u32 %v6761_v39, 16 }
  0x36   : > { %v682_v52 = vsel %vm630_vm3, %v677_v48, %v681_v49  ;;  %v685_v63 = vor.u32 %v683_v58, %v681_v49  ;;  %v711_v48 = vshll.u32 %v6765_v41, 16 }
  0x37   : > { %6319 = vmatmul.msk.bf16.gmra.mxu2 %vm1184_vm1, %v2725_v5  ;;  %v6539_v5 = vld [vmem:[%s6675_s30 + $0x50] sm:$0xff] }
  0x38   : > { %v2734_v11 = vrot.slane %v6539_v5, 1  ;;  %v713_v58 = vrot.slane %v711_v48, 1 }
  0x39   : > { %5901 = vmatmul.msk.bf16.gmra.mxu0 %vm1184_vm1, %v658_v7  ;;  %v3633_v7 = vshrl.u32 %v6539_v5, 16 }
  0x3a   : > { %v2735_v16 = vsel %vm2718_vm2, %v2732_v60, %v2734_v11 }
  0x3b   : > { %6393 = vmatmul.msk.bf16.gmra.mxu3 %vm1184_vm1, %v3595_v8  ;;  %v3636_v8 = vshll.u32 %v6539_v5, 16  ;;  %v3635_v12 = vrot.slane %v3633_v7, 1  ;;  %v6786_v7 = vld [vmem:[%s6675_s30 + $0x68] sm:$0xff] }
  0x3d   : > { %v3638_v13 = vrot.slane %v3636_v8, 2 }
  0x3f   : > { %v3639_v17 = vor.u32 %v3638_v13, %v3635_v12 }
  0x41   : > { %v3640_v19 = vsel %vm3560_vm4, %v3630_v2, %v3639_v17 }
  0x42   : > { %5974 = vmatmul.msk.bf16.gmra.mxu1 %vm1184_vm1, %v6464_v59  ;;  %v687_v59 = vshll.u32 %v6468_v55, 16 }
  0x44   : > { %v689_v0 = vrot.slane %v687_v59, 1 }
  0x46   : > { %v690_v3 = vsel %vm630_vm3, %v685_v63, %v689_v0  ;;  %v693_v14 = vor.u32 %v691_v9, %v689_v0 }
  0x47   : > { %6320 = vmatmul.msk.bf16.gmra.mxu2 %vm1184_vm1, %v2727_v20  ;;  %v6540_v20 = vld [vmem:[%s6675_s30 + $0x58] sm:$0xff] }
  0x48   : > { %v2736_v27 = vrot.slane %v6540_v20, 1 }
  0x49   : > { %5902 = vmatmul.msk.bf16.gmra.mxu0 %vm1184_vm1, %v666_v22  ;;  %v3642_v22 = vshrl.u32 %v6540_v20, 16 }
  0x4a   : > { %v2737_v32 = vsel %vm2718_vm2, %v2734_v11, %v2736_v27  ;;  %v2739_v60 = vsel %vm2718_vm2, %v2736_v27, %v2738_v51 }
  0x4b   : > { %6394 = vmatmul.msk.bf16.gmra.mxu3 %vm1184_vm1, %v3604_v23  ;;  %v3645_v23 = vshll.u32 %v6540_v20, 16  ;;  %v3644_v28 = vrot.slane %v3642_v22, 1  ;;  %v2740_v22 = vrot.slane %v6786_v7, 1 }
  0x4d   : > { %v3647_v29 = vrot.slane %v3645_v23, 2 }
  0x4f   : > { %v3648_v33 = vor.u32 %v3647_v29, %v3644_v28 }
  0x52   : > { %5975 = vmatmul.msk.bf16.gmra.mxu1 %vm1184_vm1, %v6465_v10  ;;  %v695_v10 = vshll.u32 %v6469_v6, 16 }
  0x54   : > { %v697_v15 = vrot.slane %v695_v10, 1  ;;  %v6790_v10 = vld [vmem:[%s6675_s30 + $0x58] sm:$0xff] }
  0x56   : > { %v698_v18 = vsel %vm630_vm3, %v693_v14, %v697_v15  ;;  %v701_v30 = vor.u32 %v699_v24, %v697_v15  ;;  %v3660_v14 = vshrl.u32 %v6786_v7, 16  ;;  %v3663_v15 = vshll.u32 %v6786_v7, 16 }
  0x57   : > { %6321 = vmatmul.msk.bf16.gmra.mxu2 %vm1184_vm1, %v2729_v35 }
  0x58   : > { %v3662_v23 = vrot.slane %v3660_v14, 1  ;;  %v3665_v24 = vrot.slane %v3663_v15, 2 }
  0x59   : > { %5903 = vmatmul.msk.bf16.gmra.mxu0 %vm1184_vm1, %v674_v37 }
  0x5b   : > { %6395 = vmatmul.msk.bf16.gmra.mxu3 %vm1184_vm1, %v3613_v38  ;;  %v3649_v38 = vsel %vm3560_vm4, %v3639_v17, %v3648_v33 }
  0x62   : > { %5976 = vmatmul.msk.bf16.gmra.mxu1 %vm1184_vm1, %v6466_v25  ;;  %v703_v25 = vshll.u32 %v6470_v21, 16 }
  0x64   : > { %v705_v31 = vrot.slane %v703_v25, 1 }
  0x66   : > { %v706_v35 = vsel %vm630_vm3, %v701_v30, %v705_v31  ;;  %v709_v57 = vor.u32 %v707_v47, %v705_v31  ;;  %v2741_v31 = vsel %vm2718_vm2, %v2738_v51, %v2740_v22 }
  0x67   : > { %6322 = vmatmul.msk.bf16.gmra.mxu2 %vm1184_vm1, %v2731_v50 }
  0x68   : > { %v714_v2 = vsel %vm630_vm3, %v709_v57, %v713_v58 }
  0x69   : > { %5904 = vmatmul.msk.bf16.gmra.mxu0 %vm1184_vm1, %v682_v52  ;;  %v3653_v52 = vrot.slane %v3651_v43, 1 }
  0x6b   : > { %6396 = vmatmul.msk.bf16.gmra.mxu3 %vm1184_vm1, %v3622_v53  ;;  %v3656_v53 = vrot.slane %v3654_v44, 2 }
  0x6d   : > { %v3657_v62 = vor.u32 %v3656_v53, %v3653_v52  ;;  %v723_v53 = vshrl.u32 %v6790_v10, 16 }
  0x72   : > { %5977 = vmatmul.msk.bf16.gmra.mxu1 %vm1184_vm1, %v6467_v40 }
  0x77   : > { %6323 = vmatmul.msk.bf16.gmra.mxu2 %vm1184_vm1, %v2733_v1 }
  0x79   : > { %5905 = vmatmul.msk.bf16.gmra.mxu0 %vm1184_vm1, %v690_v3 }
  0x7b   : > { %6397 = vmatmul.msk.bf16.gmra.mxu3 %vm1184_vm1, %v3631_v4 }
  0x82   : > { %5978 = vmatmul.msk.bf16.gmra.mxu1 %vm1184_vm1, %v6468_v55 }
  0x87   : > { %6324 = vmatmul.msk.bf16.gmra.mxu2 %vm1184_vm1, %v2735_v16 }
  0x89   : > { %5906 = vmatmul.msk.bf16.gmra.mxu0 %vm1184_vm1, %v698_v18  ;;  %v715_v18 = vshrl.u32 %v6765_v41, 16 }
  0x8b   : > { %6398 = vmatmul.msk.bf16.gmra.mxu3 %vm1184_vm1, %v3640_v19  ;;  %v719_v19 = vshll.u32 %v6790_v10, 16  ;;  %v717_v28 = vor.u32 %v715_v18, %v713_v58 }
  0x8d   : > { %v721_v29 = vrot.slane %v719_v19, 1 }
  0x8f   : > { %v1895_v26 = vpop.f32.mrf.mxu1 }
  0x92   : > { %5979 = vmatmul.msk.bf16.gmra.mxu1 %vm1184_vm1, %v6469_v6  ;;  %v3658_v6 = vsel %vm3560_vm4, %v3648_v33, %v3657_v62  ;;  %v3666_v33 = vor.u32 %v3665_v24, %v3662_v23 }
  0x96   : > { %v1402_v34 = vpop.f32.mrf.mxu0 }
  0x97   : > { %6325 = vmatmul.msk.bf16.gmra.mxu2 %vm1184_vm1, %v2737_v32  ;;  %v1896_v36 = vadd.f32 %v1895_v26, %v1402_v34  ;;  %v1897_v37 = vpop.f32.mrf.mxu1 }
  0x99   : > { %5907 = vmatmul.msk.bf16.gmra.mxu0 %vm1184_vm1, %v706_v35 }
  0x9a   : > { %v3077_v40 = vpop.f32.mrf.mxu2 }
  0x9b   : > { %v3417_v42 = vadd.f32 %v3077_v40, %v1896_v36  ;;  %6399 = vmatmul.msk.bf16.gmra.mxu3 %vm1184_vm1, %v3649_v38 }
  0x9e   : > { %v4402_v45 = vpop.f32.mrf.mxu3  ;;  %v1404_v46 = vpop.f32.mrf.mxu0 }
  0x9f   : > { %v4742_v49 = vadd.f32 %v4402_v45, %v3417_v42  ;;  %v1900_v50 = vpop.f32.mrf.mxu1  ;;  %v1898_v55 = vadd.f32 %v1897_v37, %v1404_v46  ;;  %v722_v37 = vsel %vm630_vm3, %v717_v28, %v721_v29  ;;  %v6809_v42 = vld [vmem:[%s6675_s30 + $0x70] sm:$0xff]  ;;  %v6813_v45 = vld [vmem:[%s6675_s30 + $0x60] sm:$0xff] }
  0xa0   : > { %v2742_v57 = vrot.slane %v6809_v42, 1  ;;  %v731_v24 = vshrl.u32 %v6813_v45, 16 }
  0xa1   : > { %vm4878_vm5 = vcmp.gt.f32.partialorder %v4742_v49, 0.0  ;;  %v5014_v54 = vmul.f32 0.2, %v4742_v49 }
  0xa2   : > { %v3079_v56 = vpop.f32.mrf.mxu2  ;;  %5980 = vmatmul.msk.bf16.gmra.mxu1 %vm1184_vm1, %v6470_v21 }
  0xa3   : > { %v5150_v59 = vsel %vm4878_vm5, %v4742_v49, %v5014_v54  ;;  %v3418_v63 = vadd.f32 %v3079_v56, %v1898_v55  ;;  %v3669_v49 = vshrl.u32 %v6809_v42, 16  ;;  %v727_v54 = vshll.u32 %v6813_v45, 16 }
  0xa4   : > { %v5286_v61 = vpack.c.bf16 %v5150_v59, %v5150_v59 }
  0xa5   : > { %v3671_v58 = vrot.slane %v3669_v49, 1 }
  0xa6   : > { %5423 = vst.msk [vmem:[%s6777_s6] sm:$0xf] %vm5422_vm6, %v5286_v61  ;;  %v4404_v0 = vpop.f32.mrf.mxu3  ;;  %v1407_v1 = vpop.f32.mrf.mxu0 }
  0xa7   : > { %6326 = vmatmul.msk.bf16.gmra.mxu2 %vm1184_vm1, %v2739_v60  ;;  %v4743_v3 = vadd.f32 %v4404_v0, %v3418_v63  ;;  %v1901_v4 = vadd.f32 %v1900_v50, %v1407_v1  ;;  %v1902_v5 = vpop.f32.mrf.mxu1  ;;  %v3672_v50 = vshll.u32 %v6809_v42, 16  ;;  %v725_v63 = vor.u32 %v723_v53, %v721_v29 }
  0xa8   : > { %v729_v0 = vrot.slane %v727_v54, 1 }
  0xa9   : > { %vm4879_vm7 = vcmp.gt.f32.partialorder %v4743_v3, 0.0  ;;  %v5015_v8 = vmul.f32 0.2, %v4743_v3  ;;  %5908 = vmatmul.msk.bf16.gmra.mxu0 %vm1184_vm1, %v714_v2  ;;  %v3674_v59 = vrot.slane %v3672_v50, 2  ;;  %v2743_v2 = vsel %vm2718_vm2, %v2740_v22, %v2742_v57 }
  0xaa   : > { %v3082_v9 = vpop.f32.mrf.mxu2 }
  0xab   : > { %v5151_v11 = vsel %vm4879_vm7, %v4743_v3, %v5015_v8  ;;  %v3419_v12 = vadd.f32 %v3082_v9, %v1901_v4  ;;  %6400 = vmatmul.msk.bf16.gmra.mxu3 %vm1184_vm1, %v3658_v6  ;;  %v3675_v4 = vor.u32 %v3674_v59, %v3671_v58  ;;  %v730_v8 = vsel %vm630_vm3, %v725_v63, %v729_v0 }
  0xac   : > { %v5287_v13 = vpack.c.bf16 %v5151_v11, %v5151_v11 }
  0xae   : > { %5424 = vst.msk [vmem:[%s6777_s6 + $0x4] sm:$0xf] %vm5422_vm6, %v5287_v13  ;;  %v4407_v16 = vpop.f32.mrf.mxu3  ;;  %v1409_v17 = vpop.f32.mrf.mxu0  ;;  %v6832_v13 = vld [vmem:[%s6675_s30 + $0x78] sm:$0xff] }
  0xaf   : > { %v4744_v20 = vadd.f32 %v4407_v16, %v3419_v12  ;;  %v1905_v21 = vpop.f32.mrf.mxu1  ;;  %v1903_v26 = vadd.f32 %v1902_v5, %v1409_v17  ;;  %v3676_v12 = vsel %vm3560_vm4, %v3666_v33, %v3675_v4  ;;  %v6836_v16 = vld [vmem:[%s6675_s30 + $0x68] sm:$0xff]  ;;  %v2744_v28 = vrot.slane %v6832_v13, 1 }
  0xb0   : > { %v739_v59 = vshrl.u32 %v6836_v16, 16 }
  0xb1   : > { %vm4880_vm8 = vcmp.gt.f32.partialorder %v4744_v20, 0.0  ;;  %v5016_v25 = vmul.f32 0.2, %v4744_v20 }
  0xb2   : > { %v3084_v27 = vpop.f32.mrf.mxu2  ;;  %5981 = vmatmul.msk.bf16.gmra.mxu1 %vm1184_vm1, %v6765_v41  ;;  %v3667_v41 = vsel %vm3560_vm4, %v3657_v62, %v3666_v33 }
  0xb3   : > { %v5152_v30 = vsel %vm4880_vm8, %v4744_v20, %v5016_v25  ;;  %v3420_v34 = vadd.f32 %v3084_v27, %v1903_v26  ;;  %v3678_v20 = vshrl.u32 %v6832_v13, 16  ;;  %v735_v25 = vshll.u32 %v6836_v16, 16 }
  0xb4   : > { %v5288_v32 = vpack.c.bf16 %v5152_v30, %v5152_v30 }
  0xb5   : > { %v3680_v29 = vrot.slane %v3678_v20, 1 }
  0xb6   : > { %5425 = vst.msk [vmem:[%s6777_s6 + $0x8] sm:$0xf] %vm5422_vm6, %v5288_v32  ;;  %v4409_v35 = vpop.f32.mrf.mxu3  ;;  %v1412_v36 = vpop.f32.mrf.mxu0 }
  0xb7   : > { %6327 = vmatmul.msk.bf16.gmra.mxu2 %vm1184_vm1, %v2741_v31  ;;  %v4745_v38 = vadd.f32 %v4409_v35, %v3420_v34  ;;  %v1906_v39 = vadd.f32 %v1905_v21, %v1412_v36  ;;  %v1907_v40 = vpop.f32.mrf.mxu1  ;;  %v3681_v21 = vshll.u32 %v6832_v13, 16  ;;  %v733_v34 = vor.u32 %v731_v24, %v729_v0 }
  0xb8   : > { %v737_v35 = vrot.slane %v735_v25, 1 }
  0xb9   : > { %vm4881_vm9 = vcmp.gt.f32.partialorder %v4745_v38, 0.0  ;;  %v5017_v43 = vmul.f32 0.2, %v4745_v38  ;;  %5909 = vmatmul.msk.bf16.gmra.mxu0 %vm1184_vm1, %v722_v37  ;;  %v3683_v30 = vrot.slane %v3681_v21, 2  ;;  %v2745_v37 = vsel %vm2718_vm2, %v2742_v57, %v2744_v28 }
  0xba   : > { %v3087_v44 = vpop.f32.mrf.mxu2 }
  0xbb   : > { %v5153_v46 = vsel %vm4881_vm9, %v4745_v38, %v5017_v43  ;;  %v3421_v47 = vadd.f32 %v3087_v44, %v1906_v39  ;;  %6401 = vmatmul.msk.bf16.gmra.mxu3 %vm1184_vm1, %v3667_v41  ;;  %v3684_v39 = vor.u32 %v3683_v30, %v3680_v29  ;;  %v738_v43 = vsel %vm630_vm3, %v733_v34, %v737_v35 }
  0xbc   : > { %v5289_v48 = vpack.c.bf16 %v5153_v46, %v5153_v46 }
  0xbe   : > { %5426 = vst.msk [vmem:[%s6777_s6 + $0xc] sm:$0xf] %vm5422_vm6, %v5289_v48  ;;  %v4412_v51 = vpop.f32.mrf.mxu3  ;;  %v1414_v52 = vpop.f32.mrf.mxu0  ;;  %v6855_v48 = vld [vmem:[%s6675_s30 + $0x80] sm:$0xff] }
  0xbf   : > { %v4746_v55 = vadd.f32 %v4412_v51, %v3421_v47  ;;  %v1910_v56 = vpop.f32.mrf.mxu1  ;;  %v1908_v61 = vadd.f32 %v1907_v40, %v1414_v52  ;;  %v3685_v47 = vsel %vm3560_vm4, %v3675_v4, %v3684_v39  ;;  %v6859_v51 = vld [vmem:[%s6675_s30 + $0x70] sm:$0xff]  ;;  %v2746_v63 = vrot.slane %v6855_v48, 1 }
  0xc0   : > { %v747_v30 = vshrl.u32 %v6859_v51, 16 }
  0xc1   : > { %vm4882_vm10 = vcmp.gt.f32.partialorder %v4746_v55, 0.0  ;;  %v5018_v60 = vmul.f32 0.2, %v4746_v55 }
  0xc2   : > { %v3089_v62 = vpop.f32.mrf.mxu2  ;;  %5982 = vmatmul.msk.bf16.gmra.mxu1 %vm1184_vm1, %v6790_v10 }
  0xc3   : > { %v5154_v1 = vsel %vm4882_vm10, %v4746_v55, %v5018_v60  ;;  %v3422_v5 = vadd.f32 %v3089_v62, %v1908_v61  ;;  %v3687_v55 = vshrl.u32 %v6855_v48, 16  ;;  %v743_v60 = vshll.u32 %v6859_v51, 16 }
  0xc4   : > { %v5290_v3 = vpack.c.bf16 %v5154_v1, %v5154_v1 }
  0xc5   : > { %v3689_v0 = vrot.slane %v3687_v55, 1 }
  0xc6   : > { %5427 = vst.msk [vmem:[%s6777_s6 + $0x10] sm:$0xf] %vm5422_vm6, %v5290_v3  ;;  %v4414_v6 = vpop.f32.mrf.mxu3  ;;  %v1417_v7 = vpop.f32.mrf.mxu0 }
  0xc7   : > { %6328 = vmatmul.msk.bf16.gmra.mxu2 %vm1184_vm1, %v2743_v2  ;;  %v4747_v9 = vadd.f32 %v4414_v6, %v3422_v5  ;;  %v1911_v10 = vadd.f32 %v1910_v56, %v1417_v7  ;;  %v1912_v11 = vpop.f32.mrf.mxu1  ;;  %v3690_v56 = vshll.u32 %v6855_v48, 16  ;;  %v741_v5 = vor.u32 %v739_v59, %v737_v35 }
  0xc8   : > { %v745_v6 = vrot.slane %v743_v60, 1 }
  0xc9   : > { %vm4883_vm11 = vcmp.gt.f32.partialorder %v4747_v9, 0.0  ;;  %v5019_v14 = vmul.f32 0.2, %v4747_v9  ;;  %5910 = vmatmul.msk.bf16.gmra.mxu0 %vm1184_vm1, %v730_v8  ;;  %v3692_v1 = vrot.slane %v3690_v56, 2  ;;  %v2747_v8 = vsel %vm2718_vm2, %v2744_v28, %v2746_v63 }
  0xca   : > { %v3092_v15 = vpop.f32.mrf.mxu2 }
  0xcb   : > { %v5155_v17 = vsel %vm4883_vm11, %v4747_v9, %v5019_v14  ;;  %v3423_v18 = vadd.f32 %v3092_v15, %v1911_v10  ;;  %6402 = vmatmul.msk.bf16.gmra.mxu3 %vm1184_vm1, %v3676_v12  ;;  %v3693_v10 = vor.u32 %v3692_v1, %v3689_v0  ;;  %v746_v14 = vsel %vm630_vm3, %v741_v5, %v745_v6 }
  0xcc   : > { %v5291_v19 = vpack.c.bf16 %v5155_v17, %v5155_v17 }
  0xce   : > { %5428 = vst.msk [vmem:[%s6777_s6 + $0x14] sm:$0xf] %vm5422_vm6, %v5291_v19  ;;  %v4417_v22 = vpop.f32.mrf.mxu3  ;;  %v1419_v23 = vpop.f32.mrf.mxu0  ;;  %v6878_v19 = vld [vmem:[%s6675_s30 + $0x88] sm:$0xff] }
  0xcf   : > { %v4748_v26 = vadd.f32 %v4417_v22, %v3423_v18  ;;  %v1915_v27 = vpop.f32.mrf.mxu1  ;;  %v1913_v32 = vadd.f32 %v1912_v11, %v1419_v23  ;;  %v3694_v18 = vsel %vm3560_vm4, %v3684_v39, %v3693_v10  ;;  %v6882_v22 = vld [vmem:[%s6675_s30 + $0x78] sm:$0xff]  ;;  %v2748_v34 = vrot.slane %v6878_v19, 1 }
  0xd0   : > { %v755_v1 = vshrl.u32 %v6882_v22, 16 }
  0xd1   : > { %vm4884_vm12 = vcmp.gt.f32.partialorder %v4748_v26, 0.0  ;;  %v5020_v31 = vmul.f32 0.2, %v4748_v26 }
  0xd2   : > { %v3094_v33 = vpop.f32.mrf.mxu2  ;;  %5983 = vmatmul.msk.bf16.gmra.mxu1 %vm1184_vm1, %v6813_v45 }
  0xd3   : > { %v5156_v36 = vsel %vm4884_vm12, %v4748_v26, %v5020_v31  ;;  %v3424_v40 = vadd.f32 %v3094_v33, %v1913_v32  ;;  %v3696_v26 = vshrl.u32 %v6878_v19, 16  ;;  %v751_v31 = vshll.u32 %v6882_v22, 16 }
  0xd4   : > { %v5292_v38 = vpack.c.bf16 %v5156_v36, %v5156_v36 }
  0xd5   : > { %v3698_v35 = vrot.slane %v3696_v26, 1 }
  0xd6   : > { %5429 = vst.msk [vmem:[%s6777_s6 + $0x18] sm:$0xf] %vm5422_vm6, %v5292_v38  ;;  %v4419_v41 = vpop.f32.mrf.mxu3  ;;  %v1422_v42 = vpop.f32.mrf.mxu0 }
  0xd7   : > { %6329 = vmatmul.msk.bf16.gmra.mxu2 %vm1184_vm1, %v2745_v37  ;;  %v4749_v44 = vadd.f32 %v4419_v41, %v3424_v40  ;;  %v1916_v45 = vadd.f32 %v1915_v27, %v1422_v42  ;;  %v1917_v46 = vpop.f32.mrf.mxu1  ;;  %v3699_v27 = vshll.u32 %v6878_v19, 16  ;;  %v749_v40 = vor.u32 %v747_v30, %v745_v6 }
  0xd8   : > { %v753_v41 = vrot.slane %v751_v31, 1 }
  0xd9   : > { %vm4885_vm13 = vcmp.gt.f32.partialorder %v4749_v44, 0.0  ;;  %v5021_v49 = vmul.f32 0.2, %v4749_v44  ;;  %5911 = vmatmul.msk.bf16.gmra.mxu0 %vm1184_vm1, %v738_v43  ;;  %v3701_v36 = vrot.slane %v3699_v27, 2  ;;  %v2749_v43 = vsel %vm2718_vm2, %v2746_v63, %v2748_v34 }
  0xda   : > { %v3097_v50 = vpop.f32.mrf.mxu2 }
  0xdb   : > { %v5157_v52 = vsel %vm4885_vm13, %v4749_v44, %v5021_v49  ;;  %v3425_v53 = vadd.f32 %v3097_v50, %v1916_v45  ;;  %6403 = vmatmul.msk.bf16.gmra.mxu3 %vm1184_vm1, %v3685_v47  ;;  %v3702_v45 = vor.u32 %v3701_v36, %v3698_v35  ;;  %v754_v49 = vsel %vm630_vm3, %v749_v40, %v753_v41 }
  0xdc   : > { %v5293_v54 = vpack.c.bf16 %v5157_v52, %v5157_v52 }
  0xde   : > { %5430 = vst.msk [vmem:[%s6777_s6 + $0x1c] sm:$0xf] %vm5422_vm6, %v5293_v54  ;;  %v4422_v57 = vpop.f32.mrf.mxu3  ;;  %v1424_v58 = vpop.f32.mrf.mxu0  ;;  %v6901_v54 = vld [vmem:[%s6675_s30 + $0x90] sm:$0xff] }
  0xdf   : > { %v4750_v61 = vadd.f32 %v4422_v57, %v3425_v53  ;;  %v1920_v62 = vpop.f32.mrf.mxu1  ;;  %v1918_v3 = vadd.f32 %v1917_v46, %v1424_v58  ;;  %v3703_v53 = vsel %vm3560_vm4, %v3693_v10, %v3702_v45  ;;  %v6905_v57 = vld [vmem:[%s6675_s30 + $0x80] sm:$0xff]  ;;  %v2750_v5 = vrot.slane %v6901_v54, 1 }
  0xe0   : > { %v763_v36 = vshrl.u32 %v6905_v57, 16 }
  0xe1   : > { %vm4886_vm14 = vcmp.gt.f32.partialorder %v4750_v61, 0.0  ;;  %v5022_v2 = vmul.f32 0.2, %v4750_v61 }
  0xe2   : > { %v3099_v4 = vpop.f32.mrf.mxu2  ;;  %5984 = vmatmul.msk.bf16.gmra.mxu1 %vm1184_vm1, %v6836_v16 }
  0xe3   : > { %v5158_v7 = vsel %vm4886_vm14, %v4750_v61, %v5022_v2  ;;  %v3426_v11 = vadd.f32 %v3099_v4, %v1918_v3  ;;  %v3705_v61 = vshrl.u32 %v6901_v54, 16  ;;  %v759_v2 = vshll.u32 %v6905_v57, 16 }
  0xe4   : > { %v5294_v9 = vpack.c.bf16 %v5158_v7, %v5158_v7 }
  0xe5   : > { %v3707_v6 = vrot.slane %v3705_v61, 1 }
  0xe6   : > { %5431 = vst.msk [vmem:[%s6777_s6 + $0x20] sm:$0xf] %vm5422_vm6, %v5294_v9  ;;  %v4424_v12 = vpop.f32.mrf.mxu3  ;;  %v1427_v13 = vpop.f32.mrf.mxu0 }
  0xe7   : > { %6330 = vmatmul.msk.bf16.gmra.mxu2 %vm1184_vm1, %v2747_v8  ;;  %v4751_v15 = vadd.f32 %v4424_v12, %v3426_v11  ;;  %v1921_v16 = vadd.f32 %v1920_v62, %v1427_v13  ;;  %v1922_v17 = vpop.f32.mrf.mxu1  ;;  %v3708_v62 = vshll.u32 %v6901_v54, 16  ;;  %v757_v11 = vor.u32 %v755_v1, %v753_v41 }
  0xe8   : > { %v761_v12 = vrot.slane %v759_v2, 1 }
  0xe9   : > { %vm4887_vm15 = vcmp.gt.f32.partialorder %v4751_v15, 0.0  ;;  %v5023_v20 = vmul.f32 0.2, %v4751_v15  ;;  %5912 = vmatmul.msk.bf16.gmra.mxu0 %vm1184_vm1, %v746_v14  ;;  %v3710_v7 = vrot.slane %v3708_v62, 2  ;;  %v2751_v14 = vsel %vm2718_vm2, %v2748_v34, %v2750_v5 }
  0xea   : > { %v3102_v21 = vpop.f32.mrf.mxu2 }
  0xeb   : > { %v5159_v23 = vsel %vm4887_vm15, %v4751_v15, %v5023_v20  ;;  %v3427_v24 = vadd.f32 %v3102_v21, %v1921_v16  ;;  %6404 = vmatmul.msk.bf16.gmra.mxu3 %vm1184_vm1, %v3694_v18  ;;  %v3711_v16 = vor.u32 %v3710_v7, %v3707_v6  ;;  %v762_v20 = vsel %vm630_vm3, %v757_v11, %v761_v12 }
  0xec   : > { %v5295_v25 = vpack.c.bf16 %v5159_v23, %v5159_v23 }
  0xee   : > { %5432 = vst.msk [vmem:[%s6777_s6 + $0x24] sm:$0xf] %vm5422_vm6, %v5295_v25  ;;  %v4427_v28 = vpop.f32.mrf.mxu3  ;;  %v1429_v29 = vpop.f32.mrf.mxu0  ;;  %v6924_v25 = vld [vmem:[%s6675_s30 + $0x98] sm:$0xff] }
  0xef   : > { %v4752_v32 = vadd.f32 %v4427_v28, %v3427_v24  ;;  %v1925_v33 = vpop.f32.mrf.mxu1  ;;  %v1923_v38 = vadd.f32 %v1922_v17, %v1429_v29  ;;  %v3712_v24 = vsel %vm3560_vm4, %v3702_v45, %v3711_v16  ;;  %v6928_v28 = vld [vmem:[%s6675_s30 + $0x88] sm:$0xff]  ;;  %v2752_v40 = vrot.slane %v6924_v25, 1 }
  0xf0   : > { %v771_v7 = vshrl.u32 %v6928_v28, 16 }
  0xf1   : > { %vm4888_vm0 = vcmp.gt.f32.partialorder %v4752_v32, 0.0  ;;  %v5024_v37 = vmul.f32 0.2, %v4752_v32 }
  0xf2   : > { %v3104_v39 = vpop.f32.mrf.mxu2  ;;  %5985 = vmatmul.msk.bf16.gmra.mxu1 %vm1184_vm1, %v6859_v51 }
  0xf3   : > { %v5160_v42 = vsel %vm4888_vm0, %v4752_v32, %v5024_v37  ;;  %v3428_v46 = vadd.f32 %v3104_v39, %v1923_v38  ;;  %v3714_v32 = vshrl.u32 %v6924_v25, 16  ;;  %v767_v37 = vshll.u32 %v6928_v28, 16 }
  0xf4   : > { %v5296_v44 = vpack.c.bf16 %v5160_v42, %v5160_v42 }
  0xf5   : > { %v3716_v41 = vrot.slane %v3714_v32, 1 }
  0xf6   : > { %5433 = vst.msk [vmem:[%s6777_s6 + $0x28] sm:$0xf] %vm5422_vm6, %v5296_v44  ;;  %v4429_v47 = vpop.f32.mrf.mxu3  ;;  %v1432_v48 = vpop.f32.mrf.mxu0 }
  0xf7   : > { %6331 = vmatmul.msk.bf16.gmra.mxu2 %vm1184_vm1, %v2749_v43  ;;  %v4753_v50 = vadd.f32 %v4429_v47, %v3428_v46  ;;  %v1926_v51 = vadd.f32 %v1925_v33, %v1432_v48  ;;  %v1927_v52 = vpop.f32.mrf.mxu1  ;;  %v3717_v33 = vshll.u32 %v6924_v25, 16  ;;  %v765_v46 = vor.u32 %v763_v36, %v761_v12 }
  0xf8   : > { %v769_v47 = vrot.slane %v767_v37, 1 }
  0xf9   : > { %vm4889_vm5 = vcmp.gt.f32.partialorder %v4753_v50, 0.0  ;;  %v5025_v55 = vmul.f32 0.2, %v4753_v50  ;;  %5913 = vmatmul.msk.bf16.gmra.mxu0 %vm1184_vm1, %v754_v49  ;;  %v3719_v42 = vrot.slane %v3717_v33, 2  ;;  %v2753_v49 = vsel %vm2718_vm2, %v2750_v5, %v2752_v40 }
  0xfa   : > { %v3107_v56 = vpop.f32.mrf.mxu2 }
  0xfb   : > { %v5161_v58 = vsel %vm4889_vm5, %v4753_v50, %v5025_v55  ;;  %v3429_v59 = vadd.f32 %v3107_v56, %v1926_v51  ;;  %6405 = vmatmul.msk.bf16.gmra.mxu3 %vm1184_vm1, %v3703_v53  ;;  %v3720_v51 = vor.u32 %v3719_v42, %v3716_v41  ;;  %v770_v55 = vsel %vm630_vm3, %v765_v46, %v769_v47 }
  0xfc   : > { %v5297_v60 = vpack.c.bf16 %v5161_v58, %v5161_v58 }
  0xfe   : > { %5434 = vst.msk [vmem:[%s6777_s6 + $0x2c] sm:$0xf] %vm5422_vm6, %v5297_v60  ;;  %v4432_v63 = vpop.f32.mrf.mxu3  ;;  %v1434_v0 = vpop.f32.mrf.mxu0  ;;  %v6947_v60 = vld [vmem:[%s6675_s30 + $0xa0] sm:$0xff] }
  0xff   : > { %v4754_v3 = vadd.f32 %v4432_v63, %v3429_v59  ;;  %v1930_v4 = vpop.f32.mrf.mxu1  ;;  %v1928_v9 = vadd.f32 %v1927_v52, %v1434_v0  ;;  %v3721_v59 = vsel %vm3560_vm4, %v3711_v16, %v3720_v51  ;;  %v6951_v63 = vld [vmem:[%s6675_s30 + $0x90] sm:$0xff]  ;;  %v2754_v11 = vrot.slane %v6947_v60, 1 }
 0x100   : > { %v779_v42 = vshrl.u32 %v6951_v63, 16 }
 0x101   : > { %vm4890_vm7 = vcmp.gt.f32.partialorder %v4754_v3, 0.0  ;;  %v5026_v8 = vmul.f32 0.2, %v4754_v3 }
 0x102   : > { %v3109_v10 = vpop.f32.mrf.mxu2  ;;  %5986 = vmatmul.msk.bf16.gmra.mxu1 %vm1184_vm1, %v6882_v22 }
 0x103   : > { %v5162_v13 = vsel %vm4890_vm7, %v4754_v3, %v5026_v8  ;;  %v3430_v17 = vadd.f32 %v3109_v10, %v1928_v9  ;;  %v3723_v3 = vshrl.u32 %v6947_v60, 16  ;;  %v775_v8 = vshll.u32 %v6951_v63, 16 }
 0x104   : > { %v5298_v15 = vpack.c.bf16 %v5162_v13, %v5162_v13 }
 0x105   : > { %v3725_v12 = vrot.slane %v3723_v3, 1 }
 0x106   : > { %5435 = vst.msk [vmem:[%s6777_s6 + $0x30] sm:$0xf] %vm5422_vm6, %v5298_v15  ;;  %v4434_v18 = vpop.f32.mrf.mxu3  ;;  %v1437_v19 = vpop.f32.mrf.mxu0 }
 0x107   : > { %6332 = vmatmul.msk.bf16.gmra.mxu2 %vm1184_vm1, %v2751_v14  ;;  %v4755_v21 = vadd.f32 %v4434_v18, %v3430_v17  ;;  %v1931_v22 = vadd.f32 %v1930_v4, %v1437_v19  ;;  %v1932_v23 = vpop.f32.mrf.mxu1  ;;  %v3726_v4 = vshll.u32 %v6947_v60, 16  ;;  %v773_v17 = vor.u32 %v771_v7, %v769_v47 }
 0x108   : > { %v777_v18 = vrot.slane %v775_v8, 1 }
 0x109   : > { %vm4891_vm8 = vcmp.gt.f32.partialorder %v4755_v21, 0.0  ;;  %v5027_v26 = vmul.f32 0.2, %v4755_v21  ;;  %5914 = vmatmul.msk.bf16.gmra.mxu0 %vm1184_vm1, %v762_v20  ;;  %v3728_v13 = vrot.slane %v3726_v4, 2  ;;  %v2755_v20 = vsel %vm2718_vm2, %v2752_v40, %v2754_v11 }
 0x10a   : > { %v3112_v27 = vpop.f32.mrf.mxu2 }
 0x10b   : > { %v5163_v29 = vsel %vm4891_vm8, %v4755_v21, %v5027_v26  ;;  %v3431_v30 = vadd.f32 %v3112_v27, %v1931_v22  ;;  %6406 = vmatmul.msk.bf16.gmra.mxu3 %vm1184_vm1, %v3712_v24  ;;  %v3729_v22 = vor.u32 %v3728_v13, %v3725_v12  ;;  %v778_v26 = vsel %vm630_vm3, %v773_v17, %v777_v18 }
 0x10c   : > { %v5299_v31 = vpack.c.bf16 %v5163_v29, %v5163_v29 }
 0x10e   : > { %5436 = vst.msk [vmem:[%s6777_s6 + $0x34] sm:$0xf] %vm5422_vm6, %v5299_v31  ;;  %v4437_v34 = vpop.f32.mrf.mxu3  ;;  %v1439_v35 = vpop.f32.mrf.mxu0  ;;  %v6970_v31 = vld [vmem:[%s6675_s30 + $0xa8] sm:$0xff] }
 0x10f   : > { %v4756_v38 = vadd.f32 %v4437_v34, %v3431_v30  ;;  %v1935_v39 = vpop.f32.mrf.mxu1  ;;  %v1933_v44 = vadd.f32 %v1932_v23, %v1439_v35  ;;  %v3730_v30 = vsel %vm3560_vm4, %v3720_v51, %v3729_v22  ;;  %v6974_v34 = vld [vmem:[%s6675_s30 + $0x98] sm:$0xff]  ;;  %v2756_v46 = vrot.slane %v6970_v31, 1 }
 0x110   : > { %v787_v13 = vshrl.u32 %v6974_v34, 16 }
 0x111   : > { %vm4892_vm9 = vcmp.gt.f32.partialorder %v4756_v38, 0.0  ;;  %v5028_v43 = vmul.f32 0.2, %v4756_v38 }
 0x112   : > { %v3114_v45 = vpop.f32.mrf.mxu2  ;;  %5987 = vmatmul.msk.bf16.gmra.mxu1 %vm1184_vm1, %v6905_v57 }
 0x113   : > { %v5164_v48 = vsel %vm4892_vm9, %v4756_v38, %v5028_v43  ;;  %v3432_v52 = vadd.f32 %v3114_v45, %v1933_v44  ;;  %v3732_v38 = vshrl.u32 %v6970_v31, 16  ;;  %v783_v43 = vshll.u32 %v6974_v34, 16 }
 0x114   : > { %v5300_v50 = vpack.c.bf16 %v5164_v48, %v5164_v48 }
 0x115   : > { %v3734_v47 = vrot.slane %v3732_v38, 1 }
 0x116   : > { %5437 = vst.msk [vmem:[%s6777_s6 + $0x38] sm:$0xf] %vm5422_vm6, %v5300_v50  ;;  %v4439_v53 = vpop.f32.mrf.mxu3  ;;  %v1442_v54 = vpop.f32.mrf.mxu0 }
 0x117   : > { %6333 = vmatmul.msk.bf16.gmra.mxu2 %vm1184_vm1, %v2753_v49  ;;  %v4757_v56 = vadd.f32 %v4439_v53, %v3432_v52  ;;  %v1936_v57 = vadd.f32 %v1935_v39, %v1442_v54  ;;  %v1937_v58 = vpop.f32.mrf.mxu1  ;;  %v3735_v39 = vshll.u32 %v6970_v31, 16  ;;  %v781_v52 = vor.u32 %v779_v42, %v777_v18 }
 0x118   : > { %v785_v53 = vrot.slane %v783_v43, 1 }
 0x119   : > { %vm4893_vm10 = vcmp.gt.f32.partialorder %v4757_v56, 0.0  ;;  %v5029_v61 = vmul.f32 0.2, %v4757_v56  ;;  %5915 = vmatmul.msk.bf16.gmra.mxu0 %vm1184_vm1, %v770_v55  ;;  %v3737_v48 = vrot.slane %v3735_v39, 2  ;;  %v2757_v55 = vsel %vm2718_vm2, %v2754_v11, %v2756_v46 }
 0x11a   : > { %v3117_v62 = vpop.f32.mrf.mxu2 }
 0x11b   : > { %v5165_v0 = vsel %vm4893_vm10, %v4757_v56, %v5029_v61  ;;  %v3433_v1 = vadd.f32 %v3117_v62, %v1936_v57  ;;  %6407 = vmatmul.msk.bf16.gmra.mxu3 %vm1184_vm1, %v3721_v59  ;;  %v3738_v57 = vor.u32 %v3737_v48, %v3734_v47  ;;  %v786_v61 = vsel %vm630_vm3, %v781_v52, %v785_v53 }
 0x11c   : > { %v5301_v2 = vpack.c.bf16 %v5165_v0, %v5165_v0 }
 0x11e   : > { %5438 = vst.msk [vmem:[%s6777_s6 + $0x3c] sm:$0xf] %vm5422_vm6, %v5301_v2  ;;  %v4442_v5 = vpop.f32.mrf.mxu3  ;;  %v1444_v6 = vpop.f32.mrf.mxu0  ;;  %v6993_v2 = vld [vmem:[%s6675_s30 + $0xb0] sm:$0xff] }
 0x11f   : > { %v4758_v9 = vadd.f32 %v4442_v5, %v3433_v1  ;;  %v1940_v10 = vpop.f32.mrf.mxu1  ;;  %v1938_v15 = vadd.f32 %v1937_v58, %v1444_v6  ;;  %v3739_v1 = vsel %vm3560_vm4, %v3729_v22, %v3738_v57  ;;  %v6997_v5 = vld [vmem:[%s6675_s30 + $0xa0] sm:$0xff]  ;;  %v2758_v17 = vrot.slane %v6993_v2, 1 }
 0x120   : > { %v795_v48 = vshrl.u32 %v6997_v5, 16 }
 0x121   : > { %vm4894_vm11 = vcmp.gt.f32.partialorder %v4758_v9, 0.0  ;;  %v5030_v14 = vmul.f32 0.2, %v4758_v9 }
 0x122   : > { %v3119_v16 = vpop.f32.mrf.mxu2  ;;  %5988 = vmatmul.msk.bf16.gmra.mxu1 %vm1184_vm1, %v6928_v28 }
 0x123   : > { %v5166_v19 = vsel %vm4894_vm11, %v4758_v9, %v5030_v14  ;;  %v3434_v23 = vadd.f32 %v3119_v16, %v1938_v15  ;;  %v3741_v9 = vshrl.u32 %v6993_v2, 16  ;;  %v791_v14 = vshll.u32 %v6997_v5, 16 }
 0x124   : > { %v5302_v21 = vpack.c.bf16 %v5166_v19, %v5166_v19 }
 0x125   : > { %v3743_v18 = vrot.slane %v3741_v9, 1 }
 0x126   : > { %5439 = vst.msk [vmem:[%s6777_s6 + $0x40] sm:$0xf] %vm5422_vm6, %v5302_v21  ;;  %v4444_v24 = vpop.f32.mrf.mxu3  ;;  %v1447_v25 = vpop.f32.mrf.mxu0 }
 0x127   : > { %6334 = vmatmul.msk.bf16.gmra.mxu2 %vm1184_vm1, %v2755_v20  ;;  %v4759_v27 = vadd.f32 %v4444_v24, %v3434_v23  ;;  %v1941_v28 = vadd.f32 %v1940_v10, %v1447_v25  ;;  %v1942_v29 = vpop.f32.mrf.mxu1  ;;  %v3744_v10 = vshll.u32 %v6993_v2, 16  ;;  %v789_v23 = vor.u32 %v787_v13, %v785_v53 }
 0x128   : > { %v793_v24 = vrot.slane %v791_v14, 1 }
 0x129   : > { %vm4895_vm12 = vcmp.gt.f32.partialorder %v4759_v27, 0.0  ;;  %v5031_v32 = vmul.f32 0.2, %v4759_v27  ;;  %5916 = vmatmul.msk.bf16.gmra.mxu0 %vm1184_vm1, %v778_v26  ;;  %v3746_v19 = vrot.slane %v3744_v10, 2  ;;  %v2759_v26 = vsel %vm2718_vm2, %v2756_v46, %v2758_v17 }
 0x12a   : > { %v3122_v33 = vpop.f32.mrf.mxu2 }
 0x12b   : > { %v5167_v35 = vsel %vm4895_vm12, %v4759_v27, %v5031_v32  ;;  %v3435_v36 = vadd.f32 %v3122_v33, %v1941_v28  ;;  %6408 = vmatmul.msk.bf16.gmra.mxu3 %vm1184_vm1, %v3730_v30  ;;  %v3747_v28 = vor.u32 %v3746_v19, %v3743_v18  ;;  %v794_v32 = vsel %vm630_vm3, %v789_v23, %v793_v24 }
 0x12c   : > { %v5303_v37 = vpack.c.bf16 %v5167_v35, %v5167_v35 }
 0x12e   : > { %5440 = vst.msk [vmem:[%s6777_s6 + $0x44] sm:$0xf] %vm5422_vm6, %v5303_v37  ;;  %v4447_v40 = vpop.f32.mrf.mxu3  ;;  %v1449_v41 = vpop.f32.mrf.mxu0  ;;  %v7016_v37 = vld [vmem:[%s6675_s30 + $0xb8] sm:$0xff] }
 0x12f   : > { %v4760_v44 = vadd.f32 %v4447_v40, %v3435_v36  ;;  %v1945_v45 = vpop.f32.mrf.mxu1  ;;  %v1943_v50 = vadd.f32 %v1942_v29, %v1449_v41  ;;  %v3748_v36 = vsel %vm3560_vm4, %v3738_v57, %v3747_v28  ;;  %v7020_v40 = vld [vmem:[%s6675_s30 + $0xa8] sm:$0xff]  ;;  %v2760_v52 = vrot.slane %v7016_v37, 1 }
 0x130   : > { %v803_v19 = vshrl.u32 %v7020_v40, 16 }
 0x131   : > { %vm4896_vm13 = vcmp.gt.f32.partialorder %v4760_v44, 0.0  ;;  %v5032_v49 = vmul.f32 0.2, %v4760_v44 }
 0x132   : > { %v3124_v51 = vpop.f32.mrf.mxu2  ;;  %5989 = vmatmul.msk.bf16.gmra.mxu1 %vm1184_vm1, %v6951_v63 }
 0x133   : > { %v5168_v54 = vsel %vm4896_vm13, %v4760_v44, %v5032_v49  ;;  %v3436_v58 = vadd.f32 %v3124_v51, %v1943_v50  ;;  %v3750_v44 = vshrl.u32 %v7016_v37, 16  ;;  %v799_v49 = vshll.u32 %v7020_v40, 16 }
 0x134   : > { %v5304_v56 = vpack.c.bf16 %v5168_v54, %v5168_v54 }
 0x135   : > { %v3752_v53 = vrot.slane %v3750_v44, 1 }
 0x136   : > { %5441 = vst.msk [vmem:[%s6777_s6 + $0x48] sm:$0xf] %vm5422_vm6, %v5304_v56  ;;  %v4449_v59 = vpop.f32.mrf.mxu3  ;;  %v1452_v60 = vpop.f32.mrf.mxu0 }
 0x137   : > { %6335 = vmatmul.msk.bf16.gmra.mxu2 %vm1184_vm1, %v2757_v55  ;;  %v4761_v62 = vadd.f32 %v4449_v59, %v3436_v58  ;;  %v1946_v63 = vadd.f32 %v1945_v45, %v1452_v60  ;;  %v1947_v0 = vpop.f32.mrf.mxu1  ;;  %v3753_v45 = vshll.u32 %v7016_v37, 16  ;;  %v797_v58 = vor.u32 %v795_v48, %v793_v24 }
 0x138   : > { %v801_v59 = vrot.slane %v799_v49, 1 }
 0x139   : > { %vm4897_vm14 = vcmp.gt.f32.partialorder %v4761_v62, 0.0  ;;  %v5033_v3 = vmul.f32 0.2, %v4761_v62  ;;  %5917 = vmatmul.msk.bf16.gmra.mxu0 %vm1184_vm1, %v786_v61  ;;  %v3755_v54 = vrot.slane %v3753_v45, 2  ;;  %v2761_v61 = vsel %vm2718_vm2, %v2758_v17, %v2760_v52 }
 0x13a   : > { %v3127_v4 = vpop.f32.mrf.mxu2 }
 0x13b   : > { %v5169_v6 = vsel %vm4897_vm14, %v4761_v62, %v5033_v3  ;;  %v3437_v7 = vadd.f32 %v3127_v4, %v1946_v63  ;;  %6409 = vmatmul.msk.bf16.gmra.mxu3 %vm1184_vm1, %v3739_v1  ;;  %v3756_v63 = vor.u32 %v3755_v54, %v3752_v53  ;;  %v802_v3 = vsel %vm630_vm3, %v797_v58, %v801_v59 }
 0x13c   : > { %v5305_v8 = vpack.c.bf16 %v5169_v6, %v5169_v6 }
 0x13e   : > { %5442 = vst.msk [vmem:[%s6777_s6 + $0x4c] sm:$0xf] %vm5422_vm6, %v5305_v8  ;;  %v4452_v11 = vpop.f32.mrf.mxu3  ;;  %v1454_v12 = vpop.f32.mrf.mxu0  ;;  %v7039_v8 = vld [vmem:[%s6675_s30 + $0xc0] sm:$0xff] }
 0x13f   : > { %v4762_v15 = vadd.f32 %v4452_v11, %v3437_v7  ;;  %v1950_v16 = vpop.f32.mrf.mxu1  ;;  %v1948_v21 = vadd.f32 %v1947_v0, %v1454_v12  ;;  %v3757_v7 = vsel %vm3560_vm4, %v3747_v28, %v3756_v63  ;;  %v7043_v11 = vld [vmem:[%s6675_s30 + $0xb0] sm:$0xff]  ;;  %v2762_v23 = vrot.slane %v7039_v8, 1 }
 0x140   : > { %v811_v54 = vshrl.u32 %v7043_v11, 16 }
 0x141   : > { %vm4898_vm15 = vcmp.gt.f32.partialorder %v4762_v15, 0.0  ;;  %v5034_v20 = vmul.f32 0.2, %v4762_v15 }
 0x142   : > { %v3129_v22 = vpop.f32.mrf.mxu2  ;;  %5990 = vmatmul.msk.bf16.gmra.mxu1 %vm1184_vm1, %v6974_v34 }
 0x143   : > { %v5170_v25 = vsel %vm4898_vm15, %v4762_v15, %v5034_v20  ;;  %v3438_v29 = vadd.f32 %v3129_v22, %v1948_v21  ;;  %v3759_v15 = vshrl.u32 %v7039_v8, 16  ;;  %v807_v20 = vshll.u32 %v7043_v11, 16 }
 0x144   : > { %v5306_v27 = vpack.c.bf16 %v5170_v25, %v5170_v25 }
 0x145   : > { %v3761_v24 = vrot.slane %v3759_v15, 1 }
 0x146   : > { %5443 = vst.msk [vmem:[%s6777_s6 + $0x50] sm:$0xf] %vm5422_vm6, %v5306_v27  ;;  %v4454_v30 = vpop.f32.mrf.mxu3  ;;  %v1457_v31 = vpop.f32.mrf.mxu0 }
 0x147   : > { %6336 = vmatmul.msk.bf16.gmra.mxu2 %vm1184_vm1, %v2759_v26  ;;  %v4763_v33 = vadd.f32 %v4454_v30, %v3438_v29  ;;  %v1951_v34 = vadd.f32 %v1950_v16, %v1457_v31  ;;  %v1952_v35 = vpop.f32.mrf.mxu1  ;;  %v3762_v16 = vshll.u32 %v7039_v8, 16  ;;  %v805_v29 = vor.u32 %v803_v19, %v801_v59 }
 0x148   : > { %v809_v30 = vrot.slane %v807_v20, 1 }
 0x149   : > { %vm4899_vm0 = vcmp.gt.f32.partialorder %v4763_v33, 0.0  ;;  %v5035_v38 = vmul.f32 0.2, %v4763_v33  ;;  %5918 = vmatmul.msk.bf16.gmra.mxu0 %vm1184_vm1, %v794_v32  ;;  %v3764_v25 = vrot.slane %v3762_v16, 2  ;;  %v2763_v32 = vsel %vm2718_vm2, %v2760_v52, %v2762_v23 }
 0x14a   : > { %v3132_v39 = vpop.f32.mrf.mxu2 }
 0x14b   : > { %v5171_v41 = vsel %vm4899_vm0, %v4763_v33, %v5035_v38  ;;  %v3439_v42 = vadd.f32 %v3132_v39, %v1951_v34  ;;  %6410 = vmatmul.msk.bf16.gmra.mxu3 %vm1184_vm1, %v3748_v36  ;;  %v3765_v34 = vor.u32 %v3764_v25, %v3761_v24  ;;  %v810_v38 = vsel %vm630_vm3, %v805_v29, %v809_v30 }
 0x14c   : > { %v5307_v43 = vpack.c.bf16 %v5171_v41, %v5171_v41 }
 0x14e   : > { %5444 = vst.msk [vmem:[%s6777_s6 + $0x54] sm:$0xf] %vm5422_vm6, %v5307_v43  ;;  %v4457_v46 = vpop.f32.mrf.mxu3  ;;  %v1459_v47 = vpop.f32.mrf.mxu0  ;;  %v7062_v43 = vld [vmem:[%s6675_s30 + $0xc8] sm:$0xff] }
 0x14f   : > { %v4764_v50 = vadd.f32 %v4457_v46, %v3439_v42  ;;  %v1955_v51 = vpop.f32.mrf.mxu1  ;;  %v1953_v56 = vadd.f32 %v1952_v35, %v1459_v47  ;;  %v3766_v42 = vsel %vm3560_vm4, %v3756_v63, %v3765_v34  ;;  %v7066_v46 = vld [vmem:[%s6675_s30 + $0xb8] sm:$0xff]  ;;  %v2764_v58 = vrot.slane %v7062_v43, 1 }
 0x150   : > { %v819_v25 = vshrl.u32 %v7066_v46, 16 }
 0x151   : > { %vm4900_vm5 = vcmp.gt.f32.partialorder %v4764_v50, 0.0  ;;  %v5036_v55 = vmul.f32 0.2, %v4764_v50 }
 0x152   : > { %v3134_v57 = vpop.f32.mrf.mxu2  ;;  %5991 = vmatmul.msk.bf16.gmra.mxu1 %vm1184_vm1, %v6997_v5 }
 0x153   : > { %v5172_v60 = vsel %vm4900_vm5, %v4764_v50, %v5036_v55  ;;  %v3440_v0 = vadd.f32 %v3134_v57, %v1953_v56  ;;  %v3768_v50 = vshrl.u32 %v7062_v43, 16  ;;  %v815_v55 = vshll.u32 %v7066_v46, 16 }
 0x154   : > { %v5308_v62 = vpack.c.bf16 %v5172_v60, %v5172_v60 }
 0x155   : > { %v3770_v59 = vrot.slane %v3768_v50, 1 }
 0x156   : > { %5445 = vst.msk [vmem:[%s6777_s6 + $0x58] sm:$0xf] %vm5422_vm6, %v5308_v62  ;;  %v4459_v1 = vpop.f32.mrf.mxu3  ;;  %v1462_v2 = vpop.f32.mrf.mxu0 }
 0x157   : > { %6337 = vmatmul.msk.bf16.gmra.mxu2 %vm1184_vm1, %v2761_v61  ;;  %v4765_v4 = vadd.f32 %v4459_v1, %v3440_v0  ;;  %v1956_v5 = vadd.f32 %v1955_v51, %v1462_v2  ;;  %v1957_v6 = vpop.f32.mrf.mxu1  ;;  %v3771_v51 = vshll.u32 %v7062_v43, 16  ;;  %v813_v0 = vor.u32 %v811_v54, %v809_v30 }
 0x158   : > { %v817_v1 = vrot.slane %v815_v55, 1 }
 0x159   : > { %vm4901_vm7 = vcmp.gt.f32.partialorder %v4765_v4, 0.0  ;;  %v5037_v9 = vmul.f32 0.2, %v4765_v4  ;;  %5919 = vmatmul.msk.bf16.gmra.mxu0 %vm1184_vm1, %v802_v3  ;;  %v3773_v60 = vrot.slane %v3771_v51, 2  ;;  %v2765_v3 = vsel %vm2718_vm2, %v2762_v23, %v2764_v58 }
 0x15a   : > { %v3137_v10 = vpop.f32.mrf.mxu2 }
 0x15b   : > { %v5173_v12 = vsel %vm4901_vm7, %v4765_v4, %v5037_v9  ;;  %v3441_v13 = vadd.f32 %v3137_v10, %v1956_v5  ;;  %6411 = vmatmul.msk.bf16.gmra.mxu3 %vm1184_vm1, %v3757_v7  ;;  %v3774_v5 = vor.u32 %v3773_v60, %v3770_v59  ;;  %v818_v9 = vsel %vm630_vm3, %v813_v0, %v817_v1 }
 0x15c   : > { %v5309_v14 = vpack.c.bf16 %v5173_v12, %v5173_v12 }
 0x15e   : > { %5446 = vst.msk [vmem:[%s6777_s6 + $0x5c] sm:$0xf] %vm5422_vm6, %v5309_v14  ;;  %v4462_v17 = vpop.f32.mrf.mxu3  ;;  %v1464_v18 = vpop.f32.mrf.mxu0  ;;  %v7085_v14 = vld [vmem:[%s6675_s30 + $0xd0] sm:$0xff] }
 0x15f   : > { %v4766_v21 = vadd.f32 %v4462_v17, %v3441_v13  ;;  %v1960_v22 = vpop.f32.mrf.mxu1  ;;  %v1958_v27 = vadd.f32 %v1957_v6, %v1464_v18  ;;  %v3775_v13 = vsel %vm3560_vm4, %v3765_v34, %v3774_v5  ;;  %v7089_v17 = vld [vmem:[%s6675_s30 + $0xc0] sm:$0xff]  ;;  %v2766_v29 = vrot.slane %v7085_v14, 1 }
 0x160   : > { %v827_v60 = vshrl.u32 %v7089_v17, 16 }
 0x161   : > { %vm4902_vm8 = vcmp.gt.f32.partialorder %v4766_v21, 0.0  ;;  %v5038_v26 = vmul.f32 0.2, %v4766_v21 }
 0x162   : > { %v3139_v28 = vpop.f32.mrf.mxu2  ;;  %5992 = vmatmul.msk.bf16.gmra.mxu1 %vm1184_vm1, %v7020_v40 }
 0x163   : > { %v5174_v31 = vsel %vm4902_vm8, %v4766_v21, %v5038_v26  ;;  %v3442_v35 = vadd.f32 %v3139_v28, %v1958_v27  ;;  %v3777_v21 = vshrl.u32 %v7085_v14, 16  ;;  %v823_v26 = vshll.u32 %v7089_v17, 16 }
 0x164   : > { %v5310_v33 = vpack.c.bf16 %v5174_v31, %v5174_v31 }
 0x165   : > { %v3779_v30 = vrot.slane %v3777_v21, 1 }
 0x166   : > { %5447 = vst.msk [vmem:[%s6777_s6 + $0x60] sm:$0xf] %vm5422_vm6, %v5310_v33  ;;  %v4464_v36 = vpop.f32.mrf.mxu3  ;;  %v1467_v37 = vpop.f32.mrf.mxu0 }
 0x167   : > { %6338 = vmatmul.msk.bf16.gmra.mxu2 %vm1184_vm1, %v2763_v32  ;;  %v4767_v39 = vadd.f32 %v4464_v36, %v3442_v35  ;;  %v1961_v40 = vadd.f32 %v1960_v22, %v1467_v37  ;;  %v1962_v41 = vpop.f32.mrf.mxu1  ;;  %v3780_v22 = vshll.u32 %v7085_v14, 16  ;;  %v821_v35 = vor.u32 %v819_v25, %v817_v1 }
 0x168   : > { %v825_v36 = vrot.slane %v823_v26, 1 }
 0x169   : > { %vm4903_vm9 = vcmp.gt.f32.partialorder %v4767_v39, 0.0  ;;  %v5039_v44 = vmul.f32 0.2, %v4767_v39  ;;  %5920 = vmatmul.msk.bf16.gmra.mxu0 %vm1184_vm1, %v810_v38  ;;  %v3782_v31 = vrot.slane %v3780_v22, 2  ;;  %v2767_v38 = vsel %vm2718_vm2, %v2764_v58, %v2766_v29 }
 0x16a   : > { %v3142_v45 = vpop.f32.mrf.mxu2 }
 0x16b   : > { %v5175_v47 = vsel %vm4903_vm9, %v4767_v39, %v5039_v44  ;;  %v3443_v48 = vadd.f32 %v3142_v45, %v1961_v40  ;;  %6412 = vmatmul.msk.bf16.gmra.mxu3 %vm1184_vm1, %v3766_v42  ;;  %v3783_v40 = vor.u32 %v3782_v31, %v3779_v30  ;;  %v826_v44 = vsel %vm630_vm3, %v821_v35, %v825_v36 }
 0x16c   : > { %v5311_v49 = vpack.c.bf16 %v5175_v47, %v5175_v47 }
 0x16e   : > { %5448 = vst.msk [vmem:[%s6777_s6 + $0x64] sm:$0xf] %vm5422_vm6, %v5311_v49  ;;  %v4467_v52 = vpop.f32.mrf.mxu3  ;;  %v1469_v53 = vpop.f32.mrf.mxu0  ;;  %v7108_v49 = vld [vmem:[%s6675_s30 + $0xd8] sm:$0xff] }
 0x16f   : > { %v4768_v56 = vadd.f32 %v4467_v52, %v3443_v48  ;;  %v1965_v57 = vpop.f32.mrf.mxu1  ;;  %v1963_v62 = vadd.f32 %v1962_v41, %v1469_v53  ;;  %v3784_v48 = vsel %vm3560_vm4, %v3774_v5, %v3783_v40  ;;  %v7112_v52 = vld [vmem:[%s6675_s30 + $0xc8] sm:$0xff]  ;;  %v2768_v0 = vrot.slane %v7108_v49, 1 }
 0x170   : > { %v835_v31 = vshrl.u32 %v7112_v52, 16 }
 0x171   : > { %vm4904_vm10 = vcmp.gt.f32.partialorder %v4768_v56, 0.0  ;;  %v5040_v61 = vmul.f32 0.2, %v4768_v56 }
 0x172   : > { %v3144_v63 = vpop.f32.mrf.mxu2  ;;  %5993 = vmatmul.msk.bf16.gmra.mxu1 %vm1184_vm1, %v7043_v11 }
 0x173   : > { %v5176_v2 = vsel %vm4904_vm10, %v4768_v56, %v5040_v61  ;;  %v3444_v6 = vadd.f32 %v3144_v63, %v1963_v62  ;;  %v3786_v56 = vshrl.u32 %v7108_v49, 16  ;;  %v831_v61 = vshll.u32 %v7112_v52, 16 }
 0x174   : > { %v5312_v4 = vpack.c.bf16 %v5176_v2, %v5176_v2 }
 0x175   : > { %v3788_v1 = vrot.slane %v3786_v56, 1 }
 0x176   : > { %5449 = vst.msk [vmem:[%s6777_s6 + $0x68] sm:$0xf] %vm5422_vm6, %v5312_v4  ;;  %v4469_v7 = vpop.f32.mrf.mxu3  ;;  %v1472_v8 = vpop.f32.mrf.mxu0 }
 0x177   : > { %6339 = vmatmul.msk.bf16.gmra.mxu2 %vm1184_vm1, %v2765_v3  ;;  %v4769_v10 = vadd.f32 %v4469_v7, %v3444_v6  ;;  %v1966_v11 = vadd.f32 %v1965_v57, %v1472_v8  ;;  %v1967_v12 = vpop.f32.mrf.mxu1  ;;  %v3789_v57 = vshll.u32 %v7108_v49, 16  ;;  %v829_v6 = vor.u32 %v827_v60, %v825_v36 }
 0x178   : > { %v833_v7 = vrot.slane %v831_v61, 1 }
 0x179   : > { %vm4905_vm11 = vcmp.gt.f32.partialorder %v4769_v10, 0.0  ;;  %v5041_v15 = vmul.f32 0.2, %v4769_v10  ;;  %5921 = vmatmul.msk.bf16.gmra.mxu0 %vm1184_vm1, %v818_v9  ;;  %v3791_v2 = vrot.slane %v3789_v57, 2  ;;  %v2769_v9 = vsel %vm2718_vm2, %v2766_v29, %v2768_v0 }
 0x17a   : > { %v3147_v16 = vpop.f32.mrf.mxu2 }
 0x17b   : > { %v5177_v18 = vsel %vm4905_vm11, %v4769_v10, %v5041_v15  ;;  %v3445_v19 = vadd.f32 %v3147_v16, %v1966_v11  ;;  %6413 = vmatmul.msk.bf16.gmra.mxu3 %vm1184_vm1, %v3775_v13  ;;  %v3792_v11 = vor.u32 %v3791_v2, %v3788_v1  ;;  %v834_v15 = vsel %vm630_vm3, %v829_v6, %v833_v7 }
 0x17c   : > { %v5313_v20 = vpack.c.bf16 %v5177_v18, %v5177_v18 }
 0x17e   : > { %5450 = vst.msk [vmem:[%s6777_s6 + $0x6c] sm:$0xf] %vm5422_vm6, %v5313_v20  ;;  %v4472_v23 = vpop.f32.mrf.mxu3  ;;  %v1474_v24 = vpop.f32.mrf.mxu0  ;;  %v7131_v20 = vld [vmem:[%s6675_s30 + $0xe0] sm:$0xff] }
 0x17f   : > { %v4770_v27 = vadd.f32 %v4472_v23, %v3445_v19  ;;  %v1970_v28 = vpop.f32.mrf.mxu1  ;;  %v1968_v33 = vadd.f32 %v1967_v12, %v1474_v24  ;;  %v3793_v19 = vsel %vm3560_vm4, %v3783_v40, %v3792_v11  ;;  %v7135_v23 = vld [vmem:[%s6675_s30 + $0xd0] sm:$0xff]  ;;  %v2770_v35 = vrot.slane %v7131_v20, 1 }
 0x180   : > { %v843_v2 = vshrl.u32 %v7135_v23, 16 }
 0x181   : > { %vm4906_vm12 = vcmp.gt.f32.partialorder %v4770_v27, 0.0  ;;  %v5042_v32 = vmul.f32 0.2, %v4770_v27 }
 0x182   : > { %v3149_v34 = vpop.f32.mrf.mxu2  ;;  %5994 = vmatmul.msk.bf16.gmra.mxu1 %vm1184_vm1, %v7066_v46 }
 0x183   : > { %v5178_v37 = vsel %vm4906_vm12, %v4770_v27, %v5042_v32  ;;  %v3446_v41 = vadd.f32 %v3149_v34, %v1968_v33  ;;  %v3795_v27 = vshrl.u32 %v7131_v20, 16  ;;  %v839_v32 = vshll.u32 %v7135_v23, 16 }
 0x184   : > { %v5314_v39 = vpack.c.bf16 %v5178_v37, %v5178_v37 }
 0x185   : > { %v3797_v36 = vrot.slane %v3795_v27, 1 }
 0x186   : > { %5451 = vst.msk [vmem:[%s6777_s6 + $0x70] sm:$0xf] %vm5422_vm6, %v5314_v39  ;;  %v4474_v42 = vpop.f32.mrf.mxu3  ;;  %v1477_v43 = vpop.f32.mrf.mxu0 }
 0x187   : > { %6340 = vmatmul.msk.bf16.gmra.mxu2 %vm1184_vm1, %v2767_v38  ;;  %v4771_v45 = vadd.f32 %v4474_v42, %v3446_v41  ;;  %v1971_v46 = vadd.f32 %v1970_v28, %v1477_v43  ;;  %v1972_v47 = vpop.f32.mrf.mxu1  ;;  %v3798_v28 = vshll.u32 %v7131_v20, 16  ;;  %v837_v41 = vor.u32 %v835_v31, %v833_v7 }
 0x188   : > { %v841_v42 = vrot.slane %v839_v32, 1 }
 0x189   : > { %vm4907_vm13 = vcmp.gt.f32.partialorder %v4771_v45, 0.0  ;;  %v5043_v50 = vmul.f32 0.2, %v4771_v45  ;;  %5922 = vmatmul.msk.bf16.gmra.mxu0 %vm1184_vm1, %v826_v44  ;;  %v3800_v37 = vrot.slane %v3798_v28, 2  ;;  %v2771_v44 = vsel %vm2718_vm2, %v2768_v0, %v2770_v35 }
 0x18a   : > { %v3152_v51 = vpop.f32.mrf.mxu2 }
 0x18b   : > { %v5179_v53 = vsel %vm4907_vm13, %v4771_v45, %v5043_v50  ;;  %v3447_v54 = vadd.f32 %v3152_v51, %v1971_v46  ;;  %6414 = vmatmul.msk.bf16.gmra.mxu3 %vm1184_vm1, %v3784_v48  ;;  %v3801_v46 = vor.u32 %v3800_v37, %v3797_v36  ;;  %v842_v50 = vsel %vm630_vm3, %v837_v41, %v841_v42 }
 0x18c   : > { %v5315_v55 = vpack.c.bf16 %v5179_v53, %v5179_v53 }
 0x18e   : > { %5452 = vst.msk [vmem:[%s6777_s6 + $0x74] sm:$0xf] %vm5422_vm6, %v5315_v55  ;;  %v4477_v58 = vpop.f32.mrf.mxu3  ;;  %v1479_v59 = vpop.f32.mrf.mxu0  ;;  %v7154_v55 = vld [vmem:[%s6675_s30 + $0xe8] sm:$0xff] }
 0x18f   : > { %v4772_v62 = vadd.f32 %v4477_v58, %v3447_v54  ;;  %v1975_v63 = vpop.f32.mrf.mxu1  ;;  %v1973_v4 = vadd.f32 %v1972_v47, %v1479_v59  ;;  %v3802_v54 = vsel %vm3560_vm4, %v3792_v11, %v3801_v46  ;;  %v7158_v58 = vld [vmem:[%s6675_s30 + $0xd8] sm:$0xff]  ;;  %v2772_v6 = vrot.slane %v7154_v55, 1 }
 0x190   : > { %v851_v37 = vshrl.u32 %v7158_v58, 16 }
 0x191   : > { %vm4908_vm14 = vcmp.gt.f32.partialorder %v4772_v62, 0.0  ;;  %v5044_v3 = vmul.f32 0.2, %v4772_v62 }
 0x192   : > { %v3154_v5 = vpop.f32.mrf.mxu2  ;;  %5995 = vmatmul.msk.bf16.gmra.mxu1 %vm1184_vm1, %v7089_v17 }
 0x193   : > { %v5180_v8 = vsel %vm4908_vm14, %v4772_v62, %v5044_v3  ;;  %v3448_v12 = vadd.f32 %v3154_v5, %v1973_v4  ;;  %v3804_v62 = vshrl.u32 %v7154_v55, 16  ;;  %v847_v3 = vshll.u32 %v7158_v58, 16 }
 0x194   : > { %v5316_v10 = vpack.c.bf16 %v5180_v8, %v5180_v8 }
 0x195   : > { %v3806_v7 = vrot.slane %v3804_v62, 1 }
 0x196   : > { %5453 = vst.msk [vmem:[%s6777_s6 + $0x78] sm:$0xf] %vm5422_vm6, %v5316_v10  ;;  %v4479_v13 = vpop.f32.mrf.mxu3  ;;  %v1482_v14 = vpop.f32.mrf.mxu0 }
 0x197   : > { %6341 = vmatmul.msk.bf16.gmra.mxu2 %vm1184_vm1, %v2769_v9  ;;  %v4773_v16 = vadd.f32 %v4479_v13, %v3448_v12  ;;  %v1976_v17 = vadd.f32 %v1975_v63, %v1482_v14  ;;  %v1977_v18 = vpop.f32.mrf.mxu1  ;;  %v3807_v63 = vshll.u32 %v7154_v55, 16  ;;  %v845_v12 = vor.u32 %v843_v2, %v841_v42 }
 0x198   : > { %v849_v13 = vrot.slane %v847_v3, 1 }
 0x199   : > { %vm4909_vm15 = vcmp.gt.f32.partialorder %v4773_v16, 0.0  ;;  %v5045_v21 = vmul.f32 0.2, %v4773_v16  ;;  %5923 = vmatmul.msk.bf16.gmra.mxu0 %vm1184_vm1, %v834_v15  ;;  %v3809_v8 = vrot.slane %v3807_v63, 2  ;;  %v2773_v15 = vsel %vm2718_vm2, %v2770_v35, %v2772_v6 }
 0x19a   : > { %v3157_v22 = vpop.f32.mrf.mxu2 }
 0x19b   : > { %v5181_v24 = vsel %vm4909_vm15, %v4773_v16, %v5045_v21  ;;  %v3449_v25 = vadd.f32 %v3157_v22, %v1976_v17  ;;  %6415 = vmatmul.msk.bf16.gmra.mxu3 %vm1184_vm1, %v3793_v19  ;;  %v3810_v17 = vor.u32 %v3809_v8, %v3806_v7  ;;  %v850_v21 = vsel %vm630_vm3, %v845_v12, %v849_v13 }
 0x19c   : > { %v5317_v26 = vpack.c.bf16 %v5181_v24, %v5181_v24 }
 0x19e   : > { %5454 = vst.msk [vmem:[%s6777_s6 + $0x7c] sm:$0xf] %vm5422_vm6, %v5317_v26  ;;  %v4482_v29 = vpop.f32.mrf.mxu3  ;;  %v1484_v30 = vpop.f32.mrf.mxu0  ;;  %v7177_v26 = vld [vmem:[%s6675_s30 + $0xf0] sm:$0xff] }
 0x19f   : > { %v4774_v33 = vadd.f32 %v4482_v29, %v3449_v25  ;;  %v1980_v34 = vpop.f32.mrf.mxu1  ;;  %v1978_v39 = vadd.f32 %v1977_v18, %v1484_v30  ;;  %v3811_v25 = vsel %vm3560_vm4, %v3801_v46, %v3810_v17  ;;  %v7181_v29 = vld [vmem:[%s6675_s30 + $0xe0] sm:$0xff]  ;;  %v2774_v41 = vrot.slane %v7177_v26, 1 }
 0x1a0   : > { %v859_v8 = vshrl.u32 %v7181_v29, 16 }
 0x1a1   : > { %vm4910_vm0 = vcmp.gt.f32.partialorder %v4774_v33, 0.0  ;;  %v5046_v38 = vmul.f32 0.2, %v4774_v33 }
 0x1a2   : > { %v3159_v40 = vpop.f32.mrf.mxu2  ;;  %5996 = vmatmul.msk.bf16.gmra.mxu1 %vm1184_vm1, %v7112_v52 }
 0x1a3   : > { %v5182_v43 = vsel %vm4910_vm0, %v4774_v33, %v5046_v38  ;;  %v3450_v47 = vadd.f32 %v3159_v40, %v1978_v39  ;;  %v3813_v33 = vshrl.u32 %v7177_v26, 16  ;;  %v855_v38 = vshll.u32 %v7181_v29, 16 }
 0x1a4   : > { %v5318_v45 = vpack.c.bf16 %v5182_v43, %v5182_v43 }
 0x1a5   : > { %v3815_v42 = vrot.slane %v3813_v33, 1 }
 0x1a6   : > { %5455 = vst.msk [vmem:[%s6777_s6 + $0x80] sm:$0xf] %vm5422_vm6, %v5318_v45  ;;  %v4484_v48 = vpop.f32.mrf.mxu3  ;;  %v1487_v49 = vpop.f32.mrf.mxu0 }
 0x1a7   : > { %6342 = vmatmul.msk.bf16.gmra.mxu2 %vm1184_vm1, %v2771_v44  ;;  %v4775_v51 = vadd.f32 %v4484_v48, %v3450_v47  ;;  %v1981_v52 = vadd.f32 %v1980_v34, %v1487_v49  ;;  %v1982_v53 = vpop.f32.mrf.mxu1  ;;  %v3816_v34 = vshll.u32 %v7177_v26, 16  ;;  %v853_v47 = vor.u32 %v851_v37, %v849_v13 }
 0x1a8   : > { %v857_v48 = vrot.slane %v855_v38, 1 }
 0x1a9   : > { %vm4911_vm5 = vcmp.gt.f32.partialorder %v4775_v51, 0.0  ;;  %v5047_v56 = vmul.f32 0.2, %v4775_v51  ;;  %5924 = vmatmul.msk.bf16.gmra.mxu0 %vm1184_vm1, %v842_v50  ;;  %v3818_v43 = vrot.slane %v3816_v34, 2  ;;  %v2775_v50 = vsel %vm2718_vm2, %v2772_v6, %v2774_v41 }
 0x1aa   : > { %v3162_v57 = vpop.f32.mrf.mxu2 }
 0x1ab   : > { %v5183_v59 = vsel %vm4911_vm5, %v4775_v51, %v5047_v56  ;;  %v3451_v60 = vadd.f32 %v3162_v57, %v1981_v52  ;;  %6416 = vmatmul.msk.bf16.gmra.mxu3 %vm1184_vm1, %v3802_v54  ;;  %v3819_v52 = vor.u32 %v3818_v43, %v3815_v42  ;;  %v858_v56 = vsel %vm630_vm3, %v853_v47, %v857_v48 }
 0x1ac   : > { %v5319_v61 = vpack.c.bf16 %v5183_v59, %v5183_v59 }
 0x1ae   : > { %5456 = vst.msk [vmem:[%s6777_s6 + $0x84] sm:$0xf] %vm5422_vm6, %v5319_v61  ;;  %v4487_v0 = vpop.f32.mrf.mxu3  ;;  %v1489_v1 = vpop.f32.mrf.mxu0  ;;  %v7200_v61 = vld [vmem:[%s6675_s30 + $0xf8] sm:$0xff] }
 0x1af   : > { %v4776_v4 = vadd.f32 %v4487_v0, %v3451_v60  ;;  %v1985_v5 = vpop.f32.mrf.mxu1  ;;  %v1983_v10 = vadd.f32 %v1982_v53, %v1489_v1  ;;  %v3820_v60 = vsel %vm3560_vm4, %v3810_v17, %v3819_v52  ;;  %v7204_v0 = vld [vmem:[%s6675_s30 + $0xe8] sm:$0xff]  ;;  %v2776_v12 = vrot.slane %v7200_v61, 1 }
 0x1b0   : > { %v867_v43 = vshrl.u32 %v7204_v0, 16 }
 0x1b1   : > { %vm4912_vm7 = vcmp.gt.f32.partialorder %v4776_v4, 0.0  ;;  %v5048_v9 = vmul.f32 0.2, %v4776_v4 }
 0x1b2   : > { %v3164_v11 = vpop.f32.mrf.mxu2  ;;  %5997 = vmatmul.msk.bf16.gmra.mxu1 %vm1184_vm1, %v7135_v23 }
 0x1b3   : > { %v5184_v14 = vsel %vm4912_vm7, %v4776_v4, %v5048_v9  ;;  %v3452_v18 = vadd.f32 %v3164_v11, %v1983_v10  ;;  %v3822_v4 = vshrl.u32 %v7200_v61, 16  ;;  %v863_v9 = vshll.u32 %v7204_v0, 16 }
 0x1b4   : > { %v5320_v16 = vpack.c.bf16 %v5184_v14, %v5184_v14 }
 0x1b5   : > { %v3824_v13 = vrot.slane %v3822_v4, 1 }
 0x1b6   : > { %5457 = vst.msk [vmem:[%s6777_s6 + $0x88] sm:$0xf] %vm5422_vm6, %v5320_v16  ;;  %v4489_v19 = vpop.f32.mrf.mxu3  ;;  %v1492_v20 = vpop.f32.mrf.mxu0 }
 0x1b7   : > { %6343 = vmatmul.msk.bf16.gmra.mxu2 %vm1184_vm1, %v2773_v15  ;;  %v4777_v22 = vadd.f32 %v4489_v19, %v3452_v18  ;;  %v1986_v23 = vadd.f32 %v1985_v5, %v1492_v20  ;;  %v1987_v24 = vpop.f32.mrf.mxu1  ;;  %v3825_v5 = vshll.u32 %v7200_v61, 16  ;;  %v861_v18 = vor.u32 %v859_v8, %v857_v48 }
 0x1b8   : > { %v865_v19 = vrot.slane %v863_v9, 1 }
 0x1b9   : > { %vm4913_vm8 = vcmp.gt.f32.partialorder %v4777_v22, 0.0  ;;  %v5049_v27 = vmul.f32 0.2, %v4777_v22  ;;  %5925 = vmatmul.msk.bf16.gmra.mxu0 %vm1184_vm1, %v850_v21  ;;  %v3827_v14 = vrot.slane %v3825_v5, 2  ;;  %v2777_v21 = vsel %vm2718_vm2, %v2774_v41, %v2776_v12 }
 0x1ba   : > { %v3167_v28 = vpop.f32.mrf.mxu2 }
 0x1bb   : > { %v5185_v30 = vsel %vm4913_vm8, %v4777_v22, %v5049_v27  ;;  %v3453_v31 = vadd.f32 %v3167_v28, %v1986_v23  ;;  %6417 = vmatmul.msk.bf16.gmra.mxu3 %vm1184_vm1, %v3811_v25  ;;  %v3828_v23 = vor.u32 %v3827_v14, %v3824_v13  ;;  %v866_v27 = vsel %vm630_vm3, %v861_v18, %v865_v19 }
 0x1bc   : > { %v5321_v32 = vpack.c.bf16 %v5185_v30, %v5185_v30 }
 0x1be   : > { %5458 = vst.msk [vmem:[%s6777_s6 + $0x8c] sm:$0xf] %vm5422_vm6, %v5321_v32  ;;  %v4492_v35 = vpop.f32.mrf.mxu3  ;;  %v1494_v36 = vpop.f32.mrf.mxu0  ;;  %v7223_v32 = vld [vmem:[%s6675_s30 + $0x100] sm:$0xff] }
 0x1bf   : > { %v4778_v39 = vadd.f32 %v4492_v35, %v3453_v31  ;;  %v1990_v40 = vpop.f32.mrf.mxu1  ;;  %v1988_v45 = vadd.f32 %v1987_v24, %v1494_v36  ;;  %v3829_v31 = vsel %vm3560_vm4, %v3819_v52, %v3828_v23  ;;  %v7227_v35 = vld [vmem:[%s6675_s30 + $0xf0] sm:$0xff]  ;;  %v2778_v47 = vrot.slane %v7223_v32, 1 }
 0x1c0   : > { %v875_v14 = vshrl.u32 %v7227_v35, 16 }
 0x1c1   : > { %vm4914_vm9 = vcmp.gt.f32.partialorder %v4778_v39, 0.0  ;;  %v5050_v44 = vmul.f32 0.2, %v4778_v39 }
 0x1c2   : > { %v3169_v46 = vpop.f32.mrf.mxu2  ;;  %5998 = vmatmul.msk.bf16.gmra.mxu1 %vm1184_vm1, %v7158_v58 }
 0x1c3   : > { %v5186_v49 = vsel %vm4914_vm9, %v4778_v39, %v5050_v44  ;;  %v3454_v53 = vadd.f32 %v3169_v46, %v1988_v45  ;;  %v3831_v39 = vshrl.u32 %v7223_v32, 16  ;;  %v871_v44 = vshll.u32 %v7227_v35, 16 }
 0x1c4   : > { %v5322_v51 = vpack.c.bf16 %v5186_v49, %v5186_v49 }
 0x1c5   : > { %v3833_v48 = vrot.slane %v3831_v39, 1 }
 0x1c6   : > { %5459 = vst.msk [vmem:[%s6777_s6 + $0x90] sm:$0xf] %vm5422_vm6, %v5322_v51  ;;  %v4494_v54 = vpop.f32.mrf.mxu3  ;;  %v1497_v55 = vpop.f32.mrf.mxu0 }
 0x1c7   : > { %6344 = vmatmul.msk.bf16.gmra.mxu2 %vm1184_vm1, %v2775_v50  ;;  %v4779_v57 = vadd.f32 %v4494_v54, %v3454_v53  ;;  %v1991_v58 = vadd.f32 %v1990_v40, %v1497_v55  ;;  %v1992_v59 = vpop.f32.mrf.mxu1  ;;  %v3834_v40 = vshll.u32 %v7223_v32, 16  ;;  %v869_v53 = vor.u32 %v867_v43, %v865_v19 }
 0x1c8   : > { %v873_v54 = vrot.slane %v871_v44, 1 }
 0x1c9   : > { %vm4915_vm10 = vcmp.gt.f32.partialorder %v4779_v57, 0.0  ;;  %v5051_v62 = vmul.f32 0.2, %v4779_v57  ;;  %5926 = vmatmul.msk.bf16.gmra.mxu0 %vm1184_vm1, %v858_v56  ;;  %v3836_v49 = vrot.slane %v3834_v40, 2  ;;  %v2779_v56 = vsel %vm2718_vm2, %v2776_v12, %v2778_v47 }
 0x1ca   : > { %v3172_v63 = vpop.f32.mrf.mxu2 }
 0x1cb   : > { %v5187_v1 = vsel %vm4915_vm10, %v4779_v57, %v5051_v62  ;;  %v3455_v2 = vadd.f32 %v3172_v63, %v1991_v58  ;;  %6418 = vmatmul.msk.bf16.gmra.mxu3 %vm1184_vm1, %v3820_v60  ;;  %v3837_v58 = vor.u32 %v3836_v49, %v3833_v48  ;;  %v874_v62 = vsel %vm630_vm3, %v869_v53, %v873_v54 }
 0x1cc   : > { %v5323_v3 = vpack.c.bf16 %v5187_v1, %v5187_v1 }
 0x1ce   : > { %5460 = vst.msk [vmem:[%s6777_s6 + $0x94] sm:$0xf] %vm5422_vm6, %v5323_v3  ;;  %v4497_v6 = vpop.f32.mrf.mxu3  ;;  %v1499_v7 = vpop.f32.mrf.mxu0  ;;  %v7246_v3 = vld [vmem:[%s6675_s30 + $0x108] sm:$0xff] }
 0x1cf   : > { %v4780_v10 = vadd.f32 %v4497_v6, %v3455_v2  ;;  %v1995_v11 = vpop.f32.mrf.mxu1  ;;  %v1993_v16 = vadd.f32 %v1992_v59, %v1499_v7  ;;  %v3838_v2 = vsel %vm3560_vm4, %v3828_v23, %v3837_v58  ;;  %v7250_v6 = vld [vmem:[%s6675_s30 + $0xf8] sm:$0xff]  ;;  %v2780_v18 = vrot.slane %v7246_v3, 1 }
 0x1d0   : > { %v883_v49 = vshrl.u32 %v7250_v6, 16 }
 0x1d1   : > { %vm4916_vm11 = vcmp.gt.f32.partialorder %v4780_v10, 0.0  ;;  %v5052_v15 = vmul.f32 0.2, %v4780_v10 }
 0x1d2   : > { %v3174_v17 = vpop.f32.mrf.mxu2  ;;  %5999 = vmatmul.msk.bf16.gmra.mxu1 %vm1184_vm1, %v7181_v29 }
 0x1d3   : > { %v5188_v20 = vsel %vm4916_vm11, %v4780_v10, %v5052_v15  ;;  %v3456_v24 = vadd.f32 %v3174_v17, %v1993_v16  ;;  %v3840_v10 = vshrl.u32 %v7246_v3, 16  ;;  %v879_v15 = vshll.u32 %v7250_v6, 16 }
 0x1d4   : > { %v5324_v22 = vpack.c.bf16 %v5188_v20, %v5188_v20 }
 0x1d5   : > { %v3842_v19 = vrot.slane %v3840_v10, 1 }
 0x1d6   : > { %5461 = vst.msk [vmem:[%s6777_s6 + $0x98] sm:$0xf] %vm5422_vm6, %v5324_v22  ;;  %v4499_v25 = vpop.f32.mrf.mxu3  ;;  %v1502_v26 = vpop.f32.mrf.mxu0 }
 0x1d7   : > { %6345 = vmatmul.msk.bf16.gmra.mxu2 %vm1184_vm1, %v2777_v21  ;;  %v4781_v28 = vadd.f32 %v4499_v25, %v3456_v24  ;;  %v1996_v29 = vadd.f32 %v1995_v11, %v1502_v26  ;;  %v1997_v30 = vpop.f32.mrf.mxu1  ;;  %v3843_v11 = vshll.u32 %v7246_v3, 16  ;;  %v877_v24 = vor.u32 %v875_v14, %v873_v54 }
 0x1d8   : > { %v881_v25 = vrot.slane %v879_v15, 1 }
 0x1d9   : > { %vm4917_vm12 = vcmp.gt.f32.partialorder %v4781_v28, 0.0  ;;  %v5053_v33 = vmul.f32 0.2, %v4781_v28  ;;  %5927 = vmatmul.msk.bf16.gmra.mxu0 %vm1184_vm1, %v866_v27  ;;  %v3845_v20 = vrot.slane %v3843_v11, 2  ;;  %v2781_v27 = vsel %vm2718_vm2, %v2778_v47, %v2780_v18 }
 0x1da   : > { %v3177_v34 = vpop.f32.mrf.mxu2 }
 0x1db   : > { %v5189_v36 = vsel %vm4917_vm12, %v4781_v28, %v5053_v33  ;;  %v3457_v37 = vadd.f32 %v3177_v34, %v1996_v29  ;;  %6419 = vmatmul.msk.bf16.gmra.mxu3 %vm1184_vm1, %v3829_v31  ;;  %v3846_v29 = vor.u32 %v3845_v20, %v3842_v19  ;;  %v882_v33 = vsel %vm630_vm3, %v877_v24, %v881_v25 }
 0x1dc   : > { %v5325_v38 = vpack.c.bf16 %v5189_v36, %v5189_v36 }
 0x1de   : > { %5462 = vst.msk [vmem:[%s6777_s6 + $0x9c] sm:$0xf] %vm5422_vm6, %v5325_v38  ;;  %v4502_v41 = vpop.f32.mrf.mxu3  ;;  %v1504_v42 = vpop.f32.mrf.mxu0  ;;  %v7269_v38 = vld [vmem:[%s6675_s30 + $0x110] sm:$0xff] }
 0x1df   : > { %v4782_v45 = vadd.f32 %v4502_v41, %v3457_v37  ;;  %v2000_v46 = vpop.f32.mrf.mxu1  ;;  %v1998_v51 = vadd.f32 %v1997_v30, %v1504_v42  ;;  %v3847_v37 = vsel %vm3560_vm4, %v3837_v58, %v3846_v29  ;;  %v7273_v41 = vld [vmem:[%s6675_s30 + $0x100] sm:$0xff]  ;;  %v2782_v53 = vrot.slane %v7269_v38, 1 }
 0x1e0   : > { %v891_v20 = vshrl.u32 %v7273_v41, 16 }
 0x1e1   : > { %vm4918_vm13 = vcmp.gt.f32.partialorder %v4782_v45, 0.0  ;;  %v5054_v50 = vmul.f32 0.2, %v4782_v45 }
 0x1e2   : > { %v3179_v52 = vpop.f32.mrf.mxu2  ;;  %6000 = vmatmul.msk.bf16.gmra.mxu1 %vm1184_vm1, %v7204_v0 }
 0x1e3   : > { %v5190_v55 = vsel %vm4918_vm13, %v4782_v45, %v5054_v50  ;;  %v3458_v59 = vadd.f32 %v3179_v52, %v1998_v51  ;;  %v3849_v45 = vshrl.u32 %v7269_v38, 16  ;;  %v887_v50 = vshll.u32 %v7273_v41, 16 }
 0x1e4   : > { %v5326_v57 = vpack.c.bf16 %v5190_v55, %v5190_v55 }
 0x1e5   : > { %v3851_v54 = vrot.slane %v3849_v45, 1 }
 0x1e6   : > { %5463 = vst.msk [vmem:[%s6777_s6 + $0xa0] sm:$0xf] %vm5422_vm6, %v5326_v57  ;;  %v4504_v60 = vpop.f32.mrf.mxu3  ;;  %v1507_v61 = vpop.f32.mrf.mxu0 }
 0x1e7   : > { %6346 = vmatmul.msk.bf16.gmra.mxu2 %vm1184_vm1, %v2779_v56  ;;  %v4783_v63 = vadd.f32 %v4504_v60, %v3458_v59  ;;  %v2001_v0 = vadd.f32 %v2000_v46, %v1507_v61  ;;  %v2002_v1 = vpop.f32.mrf.mxu1  ;;  %v3852_v46 = vshll.u32 %v7269_v38, 16  ;;  %v885_v59 = vor.u32 %v883_v49, %v881_v25 }
 0x1e8   : > { %v889_v60 = vrot.slane %v887_v50, 1 }
 0x1e9   : > { %vm4919_vm14 = vcmp.gt.f32.partialorder %v4783_v63, 0.0  ;;  %v5055_v4 = vmul.f32 0.2, %v4783_v63  ;;  %5928 = vmatmul.msk.bf16.gmra.mxu0 %vm1184_vm1, %v874_v62  ;;  %v3854_v55 = vrot.slane %v3852_v46, 2  ;;  %v2783_v62 = vsel %vm2718_vm2, %v2780_v18, %v2782_v53 }
 0x1ea   : > { %v3182_v5 = vpop.f32.mrf.mxu2 }
 0x1eb   : > { %v5191_v7 = vsel %vm4919_vm14, %v4783_v63, %v5055_v4  ;;  %v3459_v8 = vadd.f32 %v3182_v5, %v2001_v0  ;;  %6420 = vmatmul.msk.bf16.gmra.mxu3 %vm1184_vm1, %v3838_v2  ;;  %v3855_v0 = vor.u32 %v3854_v55, %v3851_v54  ;;  %v890_v4 = vsel %vm630_vm3, %v885_v59, %v889_v60 }
 0x1ec   : > { %v5327_v9 = vpack.c.bf16 %v5191_v7, %v5191_v7 }
 0x1ee   : > { %5464 = vst.msk [vmem:[%s6777_s6 + $0xa4] sm:$0xf] %vm5422_vm6, %v5327_v9  ;;  %v4507_v12 = vpop.f32.mrf.mxu3  ;;  %v1509_v13 = vpop.f32.mrf.mxu0  ;;  %v7292_v9 = vld [vmem:[%s6675_s30 + $0x118] sm:$0xff] }
 0x1ef   : > { %v4784_v16 = vadd.f32 %v4507_v12, %v3459_v8  ;;  %v2005_v17 = vpop.f32.mrf.mxu1  ;;  %v2003_v22 = vadd.f32 %v2002_v1, %v1509_v13  ;;  %v3856_v8 = vsel %vm3560_vm4, %v3846_v29, %v3855_v0  ;;  %v7296_v12 = vld [vmem:[%s6675_s30 + $0x108] sm:$0xff]  ;;  %v2784_v24 = vrot.slane %v7292_v9, 1 }
 0x1f0   : > { %v899_v55 = vshrl.u32 %v7296_v12, 16 }
 0x1f1   : > { %vm4920_vm15 = vcmp.gt.f32.partialorder %v4784_v16, 0.0  ;;  %v5056_v21 = vmul.f32 0.2, %v4784_v16 }
 0x1f2   : > { %v3184_v23 = vpop.f32.mrf.mxu2  ;;  %6001 = vmatmul.msk.bf16.gmra.mxu1 %vm1184_vm1, %v7227_v35 }
 0x1f3   : > { %v5192_v26 = vsel %vm4920_vm15, %v4784_v16, %v5056_v21  ;;  %v3460_v30 = vadd.f32 %v3184_v23, %v2003_v22  ;;  %v3858_v16 = vshrl.u32 %v7292_v9, 16  ;;  %v895_v21 = vshll.u32 %v7296_v12, 16 }
 0x1f4   : > { %v5328_v28 = vpack.c.bf16 %v5192_v26, %v5192_v26 }
 0x1f5   : > { %v3860_v25 = vrot.slane %v3858_v16, 1 }
 0x1f6   : > { %5465 = vst.msk [vmem:[%s6777_s6 + $0xa8] sm:$0xf] %vm5422_vm6, %v5328_v28  ;;  %v4509_v31 = vpop.f32.mrf.mxu3  ;;  %v1512_v32 = vpop.f32.mrf.mxu0 }
 0x1f7   : > { %6347 = vmatmul.msk.bf16.gmra.mxu2 %vm1184_vm1, %v2781_v27  ;;  %v4785_v34 = vadd.f32 %v4509_v31, %v3460_v30  ;;  %v2006_v35 = vadd.f32 %v2005_v17, %v1512_v32  ;;  %v2007_v36 = vpop.f32.mrf.mxu1  ;;  %v3861_v17 = vshll.u32 %v7292_v9, 16  ;;  %v893_v30 = vor.u32 %v891_v20, %v889_v60 }
 0x1f8   : > { %v897_v31 = vrot.slane %v895_v21, 1 }
 0x1f9   : > { %vm4921_vm0 = vcmp.gt.f32.partialorder %v4785_v34, 0.0  ;;  %v5057_v39 = vmul.f32 0.2, %v4785_v34  ;;  %5929 = vmatmul.msk.bf16.gmra.mxu0 %vm1184_vm1, %v882_v33  ;;  %v3863_v26 = vrot.slane %v3861_v17, 2  ;;  %v2785_v33 = vsel %vm2718_vm2, %v2782_v53, %v2784_v24 }
 0x1fa   : > { %v3187_v40 = vpop.f32.mrf.mxu2 }
 0x1fb   : > { %v5193_v42 = vsel %vm4921_vm0, %v4785_v34, %v5057_v39  ;;  %v3461_v43 = vadd.f32 %v3187_v40, %v2006_v35  ;;  %6421 = vmatmul.msk.bf16.gmra.mxu3 %vm1184_vm1, %v3847_v37  ;;  %v3864_v35 = vor.u32 %v3863_v26, %v3860_v25  ;;  %v898_v39 = vsel %vm630_vm3, %v893_v30, %v897_v31 }
 0x1fc   : > { %v5329_v44 = vpack.c.bf16 %v5193_v42, %v5193_v42 }
 0x1fe   : > { %5466 = vst.msk [vmem:[%s6777_s6 + $0xac] sm:$0xf] %vm5422_vm6, %v5329_v44  ;;  %v4512_v47 = vpop.f32.mrf.mxu3  ;;  %v1514_v48 = vpop.f32.mrf.mxu0  ;;  %v7315_v44 = vld [vmem:[%s6675_s30 + $0x120] sm:$0xff] }
 0x1ff   : > { %v4786_v51 = vadd.f32 %v4512_v47, %v3461_v43  ;;  %v2010_v52 = vpop.f32.mrf.mxu1  ;;  %v2008_v57 = vadd.f32 %v2007_v36, %v1514_v48  ;;  %v3865_v43 = vsel %vm3560_vm4, %v3855_v0, %v3864_v35  ;;  %v7319_v47 = vld [vmem:[%s6675_s30 + $0x110] sm:$0xff]  ;;  %v2786_v59 = vrot.slane %v7315_v44, 1 }
 0x200   : > { %v907_v26 = vshrl.u32 %v7319_v47, 16 }
 0x201   : > { %vm4922_vm5 = vcmp.gt.f32.partialorder %v4786_v51, 0.0  ;;  %v5058_v56 = vmul.f32 0.2, %v4786_v51 }
 0x202   : > { %v3189_v58 = vpop.f32.mrf.mxu2  ;;  %6002 = vmatmul.msk.bf16.gmra.mxu1 %vm1184_vm1, %v7250_v6 }
 0x203   : > { %v5194_v61 = vsel %vm4922_vm5, %v4786_v51, %v5058_v56  ;;  %v3462_v1 = vadd.f32 %v3189_v58, %v2008_v57  ;;  %v3867_v51 = vshrl.u32 %v7315_v44, 16  ;;  %v903_v56 = vshll.u32 %v7319_v47, 16 }
 0x204   : > { %v5330_v63 = vpack.c.bf16 %v5194_v61, %v5194_v61 }
 0x205   : > { %v3869_v60 = vrot.slane %v3867_v51, 1 }
 0x206   : > { %5467 = vst.msk [vmem:[%s6777_s6 + $0xb0] sm:$0xf] %vm5422_vm6, %v5330_v63  ;;  %v4514_v2 = vpop.f32.mrf.mxu3  ;;  %v1517_v3 = vpop.f32.mrf.mxu0 }
 0x207   : > { %6348 = vmatmul.msk.bf16.gmra.mxu2 %vm1184_vm1, %v2783_v62  ;;  %v4787_v5 = vadd.f32 %v4514_v2, %v3462_v1  ;;  %v2011_v6 = vadd.f32 %v2010_v52, %v1517_v3  ;;  %v2012_v7 = vpop.f32.mrf.mxu1  ;;  %v3870_v52 = vshll.u32 %v7315_v44, 16  ;;  %v901_v1 = vor.u32 %v899_v55, %v897_v31 }
 0x208   : > { %v905_v2 = vrot.slane %v903_v56, 1 }
 0x209   : > { %vm4923_vm7 = vcmp.gt.f32.partialorder %v4787_v5, 0.0  ;;  %v5059_v10 = vmul.f32 0.2, %v4787_v5  ;;  %5930 = vmatmul.msk.bf16.gmra.mxu0 %vm1184_vm1, %v890_v4  ;;  %v3872_v61 = vrot.slane %v3870_v52, 2  ;;  %v2787_v4 = vsel %vm2718_vm2, %v2784_v24, %v2786_v59 }
 0x20a   : > { %v3192_v11 = vpop.f32.mrf.mxu2 }
 0x20b   : > { %v5195_v13 = vsel %vm4923_vm7, %v4787_v5, %v5059_v10  ;;  %v3463_v14 = vadd.f32 %v3192_v11, %v2011_v6  ;;  %6422 = vmatmul.msk.bf16.gmra.mxu3 %vm1184_vm1, %v3856_v8  ;;  %v3873_v6 = vor.u32 %v3872_v61, %v3869_v60  ;;  %v906_v10 = vsel %vm630_vm3, %v901_v1, %v905_v2 }
 0x20c   : > { %v5331_v15 = vpack.c.bf16 %v5195_v13, %v5195_v13 }
 0x20e   : > { %5468 = vst.msk [vmem:[%s6777_s6 + $0xb4] sm:$0xf] %vm5422_vm6, %v5331_v15  ;;  %v4517_v18 = vpop.f32.mrf.mxu3  ;;  %v1519_v19 = vpop.f32.mrf.mxu0  ;;  %v7338_v15 = vld [vmem:[%s6675_s30 + $0x128] sm:$0xff] }
 0x20f   : > { %v4788_v22 = vadd.f32 %v4517_v18, %v3463_v14  ;;  %v2015_v23 = vpop.f32.mrf.mxu1  ;;  %v2013_v28 = vadd.f32 %v2012_v7, %v1519_v19  ;;  %v3874_v14 = vsel %vm3560_vm4, %v3864_v35, %v3873_v6  ;;  %v7342_v18 = vld [vmem:[%s6675_s30 + $0x118] sm:$0xff]  ;;  %v2788_v30 = vrot.slane %v7338_v15, 1 }
 0x210   : > { %v915_v61 = vshrl.u32 %v7342_v18, 16 }
 0x211   : > { %vm4924_vm8 = vcmp.gt.f32.partialorder %v4788_v22, 0.0  ;;  %v5060_v27 = vmul.f32 0.2, %v4788_v22 }
 0x212   : > { %v3194_v29 = vpop.f32.mrf.mxu2  ;;  %6003 = vmatmul.msk.bf16.gmra.mxu1 %vm1184_vm1, %v7273_v41 }
 0x213   : > { %v5196_v32 = vsel %vm4924_vm8, %v4788_v22, %v5060_v27  ;;  %v3464_v36 = vadd.f32 %v3194_v29, %v2013_v28  ;;  %v3876_v22 = vshrl.u32 %v7338_v15, 16  ;;  %v911_v27 = vshll.u32 %v7342_v18, 16 }
 0x214   : > { %v5332_v34 = vpack.c.bf16 %v5196_v32, %v5196_v32 }
 0x215   : > { %v3878_v31 = vrot.slane %v3876_v22, 1 }
 0x216   : > { %5469 = vst.msk [vmem:[%s6777_s6 + $0xb8] sm:$0xf] %vm5422_vm6, %v5332_v34  ;;  %v4519_v37 = vpop.f32.mrf.mxu3  ;;  %v1522_v38 = vpop.f32.mrf.mxu0 }
 0x217   : > { %6349 = vmatmul.msk.bf16.gmra.mxu2 %vm1184_vm1, %v2785_v33  ;;  %v4789_v40 = vadd.f32 %v4519_v37, %v3464_v36  ;;  %v2016_v41 = vadd.f32 %v2015_v23, %v1522_v38  ;;  %v2017_v42 = vpop.f32.mrf.mxu1  ;;  %v3879_v23 = vshll.u32 %v7338_v15, 16  ;;  %v909_v36 = vor.u32 %v907_v26, %v905_v2 }
 0x218   : > { %v913_v37 = vrot.slane %v911_v27, 1 }
 0x219   : > { %vm4925_vm9 = vcmp.gt.f32.partialorder %v4789_v40, 0.0  ;;  %v5061_v45 = vmul.f32 0.2, %v4789_v40  ;;  %5931 = vmatmul.msk.bf16.gmra.mxu0 %vm1184_vm1, %v898_v39  ;;  %v3881_v32 = vrot.slane %v3879_v23, 2  ;;  %v2789_v39 = vsel %vm2718_vm2, %v2786_v59, %v2788_v30 }
 0x21a   : > { %v3197_v46 = vpop.f32.mrf.mxu2 }
 0x21b   : > { %v5197_v48 = vsel %vm4925_vm9, %v4789_v40, %v5061_v45  ;;  %v3465_v49 = vadd.f32 %v3197_v46, %v2016_v41  ;;  %6423 = vmatmul.msk.bf16.gmra.mxu3 %vm1184_vm1, %v3865_v43  ;;  %v3882_v41 = vor.u32 %v3881_v32, %v3878_v31  ;;  %v914_v45 = vsel %vm630_vm3, %v909_v36, %v913_v37 }
 0x21c   : > { %v5333_v50 = vpack.c.bf16 %v5197_v48, %v5197_v48 }
 0x21e   : > { %5470 = vst.msk [vmem:[%s6777_s6 + $0xbc] sm:$0xf] %vm5422_vm6, %v5333_v50  ;;  %v4522_v53 = vpop.f32.mrf.mxu3  ;;  %v1524_v54 = vpop.f32.mrf.mxu0  ;;  %v7361_v50 = vld [vmem:[%s6675_s30 + $0x130] sm:$0xff] }
 0x21f   : > { %v4790_v57 = vadd.f32 %v4522_v53, %v3465_v49  ;;  %v2020_v58 = vpop.f32.mrf.mxu1  ;;  %v2018_v63 = vadd.f32 %v2017_v42, %v1524_v54  ;;  %v3883_v49 = vsel %vm3560_vm4, %v3873_v6, %v3882_v41  ;;  %v7365_v53 = vld [vmem:[%s6675_s30 + $0x120] sm:$0xff]  ;;  %v2790_v1 = vrot.slane %v7361_v50, 1 }
 0x220   : > { %v923_v32 = vshrl.u32 %v7365_v53, 16 }
 0x221   : > { %vm4926_vm10 = vcmp.gt.f32.partialorder %v4790_v57, 0.0  ;;  %v5062_v62 = vmul.f32 0.2, %v4790_v57 }
 0x222   : > { %v3199_v0 = vpop.f32.mrf.mxu2  ;;  %6004 = vmatmul.msk.bf16.gmra.mxu1 %vm1184_vm1, %v7296_v12 }
 0x223   : > { %v5198_v3 = vsel %vm4926_vm10, %v4790_v57, %v5062_v62  ;;  %v3466_v7 = vadd.f32 %v3199_v0, %v2018_v63  ;;  %v3885_v57 = vshrl.u32 %v7361_v50, 16  ;;  %v919_v62 = vshll.u32 %v7365_v53, 16 }
 0x224   : > { %v5334_v5 = vpack.c.bf16 %v5198_v3, %v5198_v3 }
 0x225   : > { %v3887_v2 = vrot.slane %v3885_v57, 1 }
 0x226   : > { %5471 = vst.msk [vmem:[%s6777_s6 + $0xc0] sm:$0xf] %vm5422_vm6, %v5334_v5  ;;  %v4524_v8 = vpop.f32.mrf.mxu3  ;;  %v1527_v9 = vpop.f32.mrf.mxu0 }
 0x227   : > { %6350 = vmatmul.msk.bf16.gmra.mxu2 %vm1184_vm1, %v2787_v4  ;;  %v4791_v11 = vadd.f32 %v4524_v8, %v3466_v7  ;;  %v2021_v12 = vadd.f32 %v2020_v58, %v1527_v9  ;;  %v2022_v13 = vpop.f32.mrf.mxu1  ;;  %v3888_v58 = vshll.u32 %v7361_v50, 16  ;;  %v917_v7 = vor.u32 %v915_v61, %v913_v37 }
 0x228   : > { %v921_v8 = vrot.slane %v919_v62, 1 }
 0x229   : > { %vm4927_vm11 = vcmp.gt.f32.partialorder %v4791_v11, 0.0  ;;  %v5063_v16 = vmul.f32 0.2, %v4791_v11  ;;  %5932 = vmatmul.msk.bf16.gmra.mxu0 %vm1184_vm1, %v906_v10  ;;  %v3890_v3 = vrot.slane %v3888_v58, 2  ;;  %v2791_v10 = vsel %vm2718_vm2, %v2788_v30, %v2790_v1 }
 0x22a   : > { %v3202_v17 = vpop.f32.mrf.mxu2 }
 0x22b   : > { %v5199_v19 = vsel %vm4927_vm11, %v4791_v11, %v5063_v16  ;;  %v3467_v20 = vadd.f32 %v3202_v17, %v2021_v12  ;;  %6424 = vmatmul.msk.bf16.gmra.mxu3 %vm1184_vm1, %v3874_v14  ;;  %v3891_v12 = vor.u32 %v3890_v3, %v3887_v2  ;;  %v922_v16 = vsel %vm630_vm3, %v917_v7, %v921_v8 }
 0x22c   : > { %v5335_v21 = vpack.c.bf16 %v5199_v19, %v5199_v19 }
 0x22e   : > { %5472 = vst.msk [vmem:[%s6777_s6 + $0xc4] sm:$0xf] %vm5422_vm6, %v5335_v21  ;;  %v4527_v24 = vpop.f32.mrf.mxu3  ;;  %v1529_v25 = vpop.f32.mrf.mxu0  ;;  %v7384_v21 = vld [vmem:[%s6675_s30 + $0x138] sm:$0xff] }
 0x22f   : > { %v4792_v28 = vadd.f32 %v4527_v24, %v3467_v20  ;;  %v2025_v29 = vpop.f32.mrf.mxu1  ;;  %v2023_v34 = vadd.f32 %v2022_v13, %v1529_v25  ;;  %v3892_v20 = vsel %vm3560_vm4, %v3882_v41, %v3891_v12  ;;  %v7388_v24 = vld [vmem:[%s6675_s30 + $0x128] sm:$0xff]  ;;  %v2792_v36 = vrot.slane %v7384_v21, 1 }
 0x230   : > { %v931_v3 = vshrl.u32 %v7388_v24, 16 }
 0x231   : > { %vm4928_vm12 = vcmp.gt.f32.partialorder %v4792_v28, 0.0  ;;  %v5064_v33 = vmul.f32 0.2, %v4792_v28 }
 0x232   : > { %v3204_v35 = vpop.f32.mrf.mxu2  ;;  %6005 = vmatmul.msk.bf16.gmra.mxu1 %vm1184_vm1, %v7319_v47 }
 0x233   : > { %v5200_v38 = vsel %vm4928_vm12, %v4792_v28, %v5064_v33  ;;  %v3468_v42 = vadd.f32 %v3204_v35, %v2023_v34  ;;  %v3894_v28 = vshrl.u32 %v7384_v21, 16  ;;  %v927_v33 = vshll.u32 %v7388_v24, 16 }
 0x234   : > { %v5336_v40 = vpack.c.bf16 %v5200_v38, %v5200_v38 }
 0x235   : > { %v3896_v37 = vrot.slane %v3894_v28, 1 }
 0x236   : > { %5473 = vst.msk [vmem:[%s6777_s6 + $0xc8] sm:$0xf] %vm5422_vm6, %v5336_v40  ;;  %v4529_v43 = vpop.f32.mrf.mxu3  ;;  %v1532_v44 = vpop.f32.mrf.mxu0 }
 0x237   : > { %6351 = vmatmul.msk.bf16.gmra.mxu2 %vm1184_vm1, %v2789_v39  ;;  %v4793_v46 = vadd.f32 %v4529_v43, %v3468_v42  ;;  %v2026_v47 = vadd.f32 %v2025_v29, %v1532_v44  ;;  %v2027_v48 = vpop.f32.mrf.mxu1  ;;  %v3897_v29 = vshll.u32 %v7384_v21, 16  ;;  %v925_v42 = vor.u32 %v923_v32, %v921_v8 }
 0x238   : > { %v929_v43 = vrot.slane %v927_v33, 1 }
 0x239   : > { %vm4929_vm13 = vcmp.gt.f32.partialorder %v4793_v46, 0.0  ;;  %v5065_v51 = vmul.f32 0.2, %v4793_v46  ;;  %5933 = vmatmul.msk.bf16.gmra.mxu0 %vm1184_vm1, %v914_v45  ;;  %v3899_v38 = vrot.slane %v3897_v29, 2  ;;  %v2793_v45 = vsel %vm2718_vm2, %v2790_v1, %v2792_v36 }
 0x23a   : > { %v3207_v52 = vpop.f32.mrf.mxu2 }
 0x23b   : > { %v5201_v54 = vsel %vm4929_vm13, %v4793_v46, %v5065_v51  ;;  %v3469_v55 = vadd.f32 %v3207_v52, %v2026_v47  ;;  %6425 = vmatmul.msk.bf16.gmra.mxu3 %vm1184_vm1, %v3883_v49  ;;  %v3900_v47 = vor.u32 %v3899_v38, %v3896_v37  ;;  %v930_v51 = vsel %vm630_vm3, %v925_v42, %v929_v43 }
 0x23c   : > { %v5337_v56 = vpack.c.bf16 %v5201_v54, %v5201_v54 }
 0x23e   : > { %5474 = vst.msk [vmem:[%s6777_s6 + $0xcc] sm:$0xf] %vm5422_vm6, %v5337_v56  ;;  %v4532_v59 = vpop.f32.mrf.mxu3  ;;  %v1534_v60 = vpop.f32.mrf.mxu0  ;;  %v7407_v56 = vld [vmem:[%s6675_s30 + $0x140] sm:$0xff] }
 0x23f   : > { %v4794_v63 = vadd.f32 %v4532_v59, %v3469_v55  ;;  %v2030_v0 = vpop.f32.mrf.mxu1  ;;  %v2028_v5 = vadd.f32 %v2027_v48, %v1534_v60  ;;  %v3901_v55 = vsel %vm3560_vm4, %v3891_v12, %v3900_v47  ;;  %v7411_v59 = vld [vmem:[%s6675_s30 + $0x130] sm:$0xff]  ;;  %v2794_v7 = vrot.slane %v7407_v56, 1 }
 0x240   : > { %v939_v38 = vshrl.u32 %v7411_v59, 16 }
 0x241   : > { %vm4930_vm14 = vcmp.gt.f32.partialorder %v4794_v63, 0.0  ;;  %v5066_v4 = vmul.f32 0.2, %v4794_v63 }
 0x242   : > { %v3209_v6 = vpop.f32.mrf.mxu2  ;;  %6006 = vmatmul.msk.bf16.gmra.mxu1 %vm1184_vm1, %v7342_v18 }
 0x243   : > { %v5202_v9 = vsel %vm4930_vm14, %v4794_v63, %v5066_v4  ;;  %v3470_v13 = vadd.f32 %v3209_v6, %v2028_v5  ;;  %v3903_v63 = vshrl.u32 %v7407_v56, 16  ;;  %v935_v4 = vshll.u32 %v7411_v59, 16 }
 0x244   : > { %v5338_v11 = vpack.c.bf16 %v5202_v9, %v5202_v9 }
 0x245   : > { %v3905_v8 = vrot.slane %v3903_v63, 1 }
 0x246   : > { %5475 = vst.msk [vmem:[%s6777_s6 + $0xd0] sm:$0xf] %vm5422_vm6, %v5338_v11  ;;  %v4534_v14 = vpop.f32.mrf.mxu3  ;;  %v1537_v15 = vpop.f32.mrf.mxu0 }
 0x247   : > { %6352 = vmatmul.msk.bf16.gmra.mxu2 %vm1184_vm1, %v2791_v10  ;;  %v4795_v17 = vadd.f32 %v4534_v14, %v3470_v13  ;;  %v2031_v18 = vadd.f32 %v2030_v0, %v1537_v15  ;;  %v2032_v19 = vpop.f32.mrf.mxu1  ;;  %v3906_v0 = vshll.u32 %v7407_v56, 16  ;;  %v933_v13 = vor.u32 %v931_v3, %v929_v43 }
 0x248   : > { %v937_v14 = vrot.slane %v935_v4, 1 }
 0x249   : > { %vm4931_vm15 = vcmp.gt.f32.partialorder %v4795_v17, 0.0  ;;  %v5067_v22 = vmul.f32 0.2, %v4795_v17  ;;  %5934 = vmatmul.msk.bf16.gmra.mxu0 %vm1184_vm1, %v922_v16  ;;  %v3908_v9 = vrot.slane %v3906_v0, 2  ;;  %v2795_v16 = vsel %vm2718_vm2, %v2792_v36, %v2794_v7 }
 0x24a   : > { %v3212_v23 = vpop.f32.mrf.mxu2 }
 0x24b   : > { %v5203_v25 = vsel %vm4931_vm15, %v4795_v17, %v5067_v22  ;;  %v3471_v26 = vadd.f32 %v3212_v23, %v2031_v18  ;;  %6426 = vmatmul.msk.bf16.gmra.mxu3 %vm1184_vm1, %v3892_v20  ;;  %v3909_v18 = vor.u32 %v3908_v9, %v3905_v8  ;;  %v938_v22 = vsel %vm630_vm3, %v933_v13, %v937_v14 }
 0x24c   : > { %v5339_v27 = vpack.c.bf16 %v5203_v25, %v5203_v25 }
 0x24e   : > { %5476 = vst.msk [vmem:[%s6777_s6 + $0xd4] sm:$0xf] %vm5422_vm6, %v5339_v27  ;;  %v4537_v30 = vpop.f32.mrf.mxu3  ;;  %v1539_v31 = vpop.f32.mrf.mxu0  ;;  %v7430_v27 = vld [vmem:[%s6675_s30 + $0x148] sm:$0xff] }
 0x24f   : > { %v4796_v34 = vadd.f32 %v4537_v30, %v3471_v26  ;;  %v2035_v35 = vpop.f32.mrf.mxu1  ;;  %v2033_v40 = vadd.f32 %v2032_v19, %v1539_v31  ;;  %v3910_v26 = vsel %vm3560_vm4, %v3900_v47, %v3909_v18  ;;  %v7434_v30 = vld [vmem:[%s6675_s30 + $0x138] sm:$0xff]  ;;  %v2796_v42 = vrot.slane %v7430_v27, 1 }
 0x250   : > { %v947_v9 = vshrl.u32 %v7434_v30, 16 }
 0x251   : > { %vm4932_vm0 = vcmp.gt.f32.partialorder %v4796_v34, 0.0  ;;  %v5068_v39 = vmul.f32 0.2, %v4796_v34 }
 0x252   : > { %v3214_v41 = vpop.f32.mrf.mxu2  ;;  %6007 = vmatmul.msk.bf16.gmra.mxu1 %vm1184_vm1, %v7365_v53 }
 0x253   : > { %v5204_v44 = vsel %vm4932_vm0, %v4796_v34, %v5068_v39  ;;  %v3472_v48 = vadd.f32 %v3214_v41, %v2033_v40  ;;  %v3912_v34 = vshrl.u32 %v7430_v27, 16  ;;  %v943_v39 = vshll.u32 %v7434_v30, 16 }
 0x254   : > { %v5340_v46 = vpack.c.bf16 %v5204_v44, %v5204_v44 }
 0x255   : > { %v3914_v43 = vrot.slane %v3912_v34, 1 }
 0x256   : > { %5477 = vst.msk [vmem:[%s6777_s6 + $0xd8] sm:$0xf] %vm5422_vm6, %v5340_v46  ;;  %v4539_v49 = vpop.f32.mrf.mxu3  ;;  %v1542_v50 = vpop.f32.mrf.mxu0 }
 0x257   : > { %6353 = vmatmul.msk.bf16.gmra.mxu2 %vm1184_vm1, %v2793_v45  ;;  %v4797_v52 = vadd.f32 %v4539_v49, %v3472_v48  ;;  %v2036_v53 = vadd.f32 %v2035_v35, %v1542_v50  ;;  %v2037_v54 = vpop.f32.mrf.mxu1  ;;  %v3915_v35 = vshll.u32 %v7430_v27, 16  ;;  %v941_v48 = vor.u32 %v939_v38, %v937_v14 }
 0x258   : > { %v945_v49 = vrot.slane %v943_v39, 1 }
 0x259   : > { %vm4933_vm5 = vcmp.gt.f32.partialorder %v4797_v52, 0.0  ;;  %v5069_v57 = vmul.f32 0.2, %v4797_v52  ;;  %5935 = vmatmul.msk.bf16.gmra.mxu0 %vm1184_vm1, %v930_v51  ;;  %v3917_v44 = vrot.slane %v3915_v35, 2  ;;  %v2797_v51 = vsel %vm2718_vm2, %v2794_v7, %v2796_v42 }
 0x25a   : > { %v3217_v58 = vpop.f32.mrf.mxu2 }
 0x25b   : > { %v5205_v60 = vsel %vm4933_vm5, %v4797_v52, %v5069_v57  ;;  %v3473_v61 = vadd.f32 %v3217_v58, %v2036_v53  ;;  %6427 = vmatmul.msk.bf16.gmra.mxu3 %vm1184_vm1, %v3901_v55  ;;  %v3918_v53 = vor.u32 %v3917_v44, %v3914_v43  ;;  %v946_v57 = vsel %vm630_vm3, %v941_v48, %v945_v49 }
 0x25c   : > { %v5341_v62 = vpack.c.bf16 %v5205_v60, %v5205_v60 }
 0x25e   : > { %5478 = vst.msk [vmem:[%s6777_s6 + $0xdc] sm:$0xf] %vm5422_vm6, %v5341_v62  ;;  %v4542_v1 = vpop.f32.mrf.mxu3  ;;  %v1544_v2 = vpop.f32.mrf.mxu0  ;;  %v7453_v62 = vld [vmem:[%s6675_s30 + $0x150] sm:$0xff] }
 0x25f   : > { %v4798_v5 = vadd.f32 %v4542_v1, %v3473_v61  ;;  %v2040_v6 = vpop.f32.mrf.mxu1  ;;  %v2038_v11 = vadd.f32 %v2037_v54, %v1544_v2  ;;  %v3919_v61 = vsel %vm3560_vm4, %v3909_v18, %v3918_v53  ;;  %v7457_v1 = vld [vmem:[%s6675_s30 + $0x140] sm:$0xff]  ;;  %v2798_v13 = vrot.slane %v7453_v62, 1 }
 0x260   : > { %v955_v44 = vshrl.u32 %v7457_v1, 16 }
 0x261   : > { %vm4934_vm7 = vcmp.gt.f32.partialorder %v4798_v5, 0.0  ;;  %v5070_v10 = vmul.f32 0.2, %v4798_v5 }
 0x262   : > { %v3219_v12 = vpop.f32.mrf.mxu2  ;;  %6008 = vmatmul.msk.bf16.gmra.mxu1 %vm1184_vm1, %v7388_v24 }
 0x263   : > { %v5206_v15 = vsel %vm4934_vm7, %v4798_v5, %v5070_v10  ;;  %v3474_v19 = vadd.f32 %v3219_v12, %v2038_v11  ;;  %v3921_v5 = vshrl.u32 %v7453_v62, 16  ;;  %v951_v10 = vshll.u32 %v7457_v1, 16 }
 0x264   : > { %v5342_v17 = vpack.c.bf16 %v5206_v15, %v5206_v15 }
 0x265   : > { %v3923_v14 = vrot.slane %v3921_v5, 1 }
 0x266   : > { %5479 = vst.msk [vmem:[%s6777_s6 + $0xe0] sm:$0xf] %vm5422_vm6, %v5342_v17  ;;  %v4544_v20 = vpop.f32.mrf.mxu3  ;;  %v1547_v21 = vpop.f32.mrf.mxu0 }
 0x267   : > { %6354 = vmatmul.msk.bf16.gmra.mxu2 %vm1184_vm1, %v2795_v16  ;;  %v4799_v23 = vadd.f32 %v4544_v20, %v3474_v19  ;;  %v2041_v24 = vadd.f32 %v2040_v6, %v1547_v21  ;;  %v2042_v25 = vpop.f32.mrf.mxu1  ;;  %v3924_v6 = vshll.u32 %v7453_v62, 16  ;;  %v949_v19 = vor.u32 %v947_v9, %v945_v49 }
 0x268   : > { %v953_v20 = vrot.slane %v951_v10, 1 }
 0x269   : > { %vm4935_vm8 = vcmp.gt.f32.partialorder %v4799_v23, 0.0  ;;  %v5071_v28 = vmul.f32 0.2, %v4799_v23  ;;  %5936 = vmatmul.msk.bf16.gmra.mxu0 %vm1184_vm1, %v938_v22  ;;  %v3926_v15 = vrot.slane %v3924_v6, 2  ;;  %v2799_v22 = vsel %vm2718_vm2, %v2796_v42, %v2798_v13 }
 0x26a   : > { %v3222_v29 = vpop.f32.mrf.mxu2 }
 0x26b   : > { %v5207_v31 = vsel %vm4935_vm8, %v4799_v23, %v5071_v28  ;;  %v3475_v32 = vadd.f32 %v3222_v29, %v2041_v24  ;;  %6428 = vmatmul.msk.bf16.gmra.mxu3 %vm1184_vm1, %v3910_v26  ;;  %v3927_v24 = vor.u32 %v3926_v15, %v3923_v14  ;;  %v954_v28 = vsel %vm630_vm3, %v949_v19, %v953_v20 }
 0x26c   : > { %v5343_v33 = vpack.c.bf16 %v5207_v31, %v5207_v31 }
 0x26e   : > { %5480 = vst.msk [vmem:[%s6777_s6 + $0xe4] sm:$0xf] %vm5422_vm6, %v5343_v33  ;;  %v4547_v36 = vpop.f32.mrf.mxu3  ;;  %v1549_v37 = vpop.f32.mrf.mxu0  ;;  %v7476_v33 = vld [vmem:[%s6675_s30 + $0x158] sm:$0xff] }
 0x26f   : > { %v4800_v40 = vadd.f32 %v4547_v36, %v3475_v32  ;;  %v2045_v41 = vpop.f32.mrf.mxu1  ;;  %v2043_v46 = vadd.f32 %v2042_v25, %v1549_v37  ;;  %v3928_v32 = vsel %vm3560_vm4, %v3918_v53, %v3927_v24  ;;  %v7480_v36 = vld [vmem:[%s6675_s30 + $0x148] sm:$0xff]  ;;  %v2800_v48 = vrot.slane %v7476_v33, 1 }
 0x270   : > { %v963_v15 = vshrl.u32 %v7480_v36, 16 }
 0x271   : > { %vm4936_vm9 = vcmp.gt.f32.partialorder %v4800_v40, 0.0  ;;  %v5072_v45 = vmul.f32 0.2, %v4800_v40 }
 0x272   : > { %v3224_v47 = vpop.f32.mrf.mxu2  ;;  %6009 = vmatmul.msk.bf16.gmra.mxu1 %vm1184_vm1, %v7411_v59 }
 0x273   : > { %v5208_v50 = vsel %vm4936_vm9, %v4800_v40, %v5072_v45  ;;  %v3476_v54 = vadd.f32 %v3224_v47, %v2043_v46  ;;  %v3930_v40 = vshrl.u32 %v7476_v33, 16  ;;  %v959_v45 = vshll.u32 %v7480_v36, 16 }
 0x274   : > { %v5344_v52 = vpack.c.bf16 %v5208_v50, %v5208_v50 }
 0x275   : > { %v3932_v49 = vrot.slane %v3930_v40, 1 }
 0x276   : > { %5481 = vst.msk [vmem:[%s6777_s6 + $0xe8] sm:$0xf] %vm5422_vm6, %v5344_v52  ;;  %v4549_v55 = vpop.f32.mrf.mxu3  ;;  %v1552_v56 = vpop.f32.mrf.mxu0 }
 0x277   : > { %6355 = vmatmul.msk.bf16.gmra.mxu2 %vm1184_vm1, %v2797_v51  ;;  %v4801_v58 = vadd.f32 %v4549_v55, %v3476_v54  ;;  %v2046_v59 = vadd.f32 %v2045_v41, %v1552_v56  ;;  %v2047_v60 = vpop.f32.mrf.mxu1  ;;  %v3933_v41 = vshll.u32 %v7476_v33, 16  ;;  %v957_v54 = vor.u32 %v955_v44, %v953_v20 }
 0x278   : > { %v961_v55 = vrot.slane %v959_v45, 1 }
 0x279   : > { %vm4937_vm10 = vcmp.gt.f32.partialorder %v4801_v58, 0.0  ;;  %v5073_v63 = vmul.f32 0.2, %v4801_v58  ;;  %5937 = vmatmul.msk.bf16.gmra.mxu0 %vm1184_vm1, %v946_v57  ;;  %v3935_v50 = vrot.slane %v3933_v41, 2  ;;  %v2801_v57 = vsel %vm2718_vm2, %v2798_v13, %v2800_v48 }
 0x27a   : > { %v3227_v0 = vpop.f32.mrf.mxu2 }
 0x27b   : > { %v5209_v2 = vsel %vm4937_vm10, %v4801_v58, %v5073_v63  ;;  %v3477_v3 = vadd.f32 %v3227_v0, %v2046_v59  ;;  %6429 = vmatmul.msk.bf16.gmra.mxu3 %vm1184_vm1, %v3919_v61  ;;  %v3936_v59 = vor.u32 %v3935_v50, %v3932_v49  ;;  %v962_v63 = vsel %vm630_vm3, %v957_v54, %v961_v55 }
 0x27c   : > { %v5345_v4 = vpack.c.bf16 %v5209_v2, %v5209_v2 }
 0x27e   : > { %5482 = vst.msk [vmem:[%s6777_s6 + $0xec] sm:$0xf] %vm5422_vm6, %v5345_v4  ;;  %v4552_v7 = vpop.f32.mrf.mxu3  ;;  %v1554_v8 = vpop.f32.mrf.mxu0  ;;  %v7499_v4 = vld [vmem:[%s6675_s30 + $0x160] sm:$0xff] }
 0x27f   : > { %v4802_v11 = vadd.f32 %v4552_v7, %v3477_v3  ;;  %v2050_v12 = vpop.f32.mrf.mxu1  ;;  %v2048_v17 = vadd.f32 %v2047_v60, %v1554_v8  ;;  %v3937_v3 = vsel %vm3560_vm4, %v3927_v24, %v3936_v59  ;;  %v7503_v7 = vld [vmem:[%s6675_s30 + $0x150] sm:$0xff]  ;;  %v2802_v19 = vrot.slane %v7499_v4, 1 }
 0x280   : > { %v971_v50 = vshrl.u32 %v7503_v7, 16 }
 0x281   : > { %vm4938_vm11 = vcmp.gt.f32.partialorder %v4802_v11, 0.0  ;;  %v5074_v16 = vmul.f32 0.2, %v4802_v11 }
 0x282   : > { %v3229_v18 = vpop.f32.mrf.mxu2  ;;  %6010 = vmatmul.msk.bf16.gmra.mxu1 %vm1184_vm1, %v7434_v30 }
 0x283   : > { %v5210_v21 = vsel %vm4938_vm11, %v4802_v11, %v5074_v16  ;;  %v3478_v25 = vadd.f32 %v3229_v18, %v2048_v17  ;;  %v3939_v11 = vshrl.u32 %v7499_v4, 16  ;;  %v967_v16 = vshll.u32 %v7503_v7, 16 }
 0x284   : > { %v5346_v23 = vpack.c.bf16 %v5210_v21, %v5210_v21 }
 0x285   : > { %v3941_v20 = vrot.slane %v3939_v11, 1 }
 0x286   : > { %5483 = vst.msk [vmem:[%s6777_s6 + $0xf0] sm:$0xf] %vm5422_vm6, %v5346_v23  ;;  %v4554_v26 = vpop.f32.mrf.mxu3  ;;  %v1557_v27 = vpop.f32.mrf.mxu0 }
 0x287   : > { %6356 = vmatmul.msk.bf16.gmra.mxu2 %vm1184_vm1, %v2799_v22  ;;  %v4803_v29 = vadd.f32 %v4554_v26, %v3478_v25  ;;  %v2051_v30 = vadd.f32 %v2050_v12, %v1557_v27  ;;  %v2052_v31 = vpop.f32.mrf.mxu1  ;;  %v3942_v12 = vshll.u32 %v7499_v4, 16  ;;  %v965_v25 = vor.u32 %v963_v15, %v961_v55 }
 0x288   : > { %v969_v26 = vrot.slane %v967_v16, 1 }
 0x289   : > { %vm4939_vm12 = vcmp.gt.f32.partialorder %v4803_v29, 0.0  ;;  %v5075_v34 = vmul.f32 0.2, %v4803_v29  ;;  %5938 = vmatmul.msk.bf16.gmra.mxu0 %vm1184_vm1, %v954_v28  ;;  %v3944_v21 = vrot.slane %v3942_v12, 2  ;;  %v2803_v28 = vsel %vm2718_vm2, %v2800_v48, %v2802_v19 }
 0x28a   : > { %v3232_v35 = vpop.f32.mrf.mxu2 }
 0x28b   : > { %v5211_v37 = vsel %vm4939_vm12, %v4803_v29, %v5075_v34  ;;  %v3479_v38 = vadd.f32 %v3232_v35, %v2051_v30  ;;  %6430 = vmatmul.msk.bf16.gmra.mxu3 %vm1184_vm1, %v3928_v32  ;;  %v3945_v30 = vor.u32 %v3944_v21, %v3941_v20  ;;  %v970_v34 = vsel %vm630_vm3, %v965_v25, %v969_v26 }
 0x28c   : > { %v5347_v39 = vpack.c.bf16 %v5211_v37, %v5211_v37 }
 0x28e   : > { %5484 = vst.msk [vmem:[%s6777_s6 + $0xf4] sm:$0xf] %vm5422_vm6, %v5347_v39  ;;  %v4557_v42 = vpop.f32.mrf.mxu3  ;;  %v1559_v43 = vpop.f32.mrf.mxu0  ;;  %v7522_v39 = vld [vmem:[%s6675_s30 + $0x168] sm:$0xff] }
 0x28f   : > { %v4804_v46 = vadd.f32 %v4557_v42, %v3479_v38  ;;  %v2055_v47 = vpop.f32.mrf.mxu1  ;;  %v2053_v52 = vadd.f32 %v2052_v31, %v1559_v43  ;;  %v3946_v38 = vsel %vm3560_vm4, %v3936_v59, %v3945_v30  ;;  %v7526_v42 = vld [vmem:[%s6675_s30 + $0x158] sm:$0xff]  ;;  %v2804_v54 = vrot.slane %v7522_v39, 1 }
 0x290   : > { %v979_v21 = vshrl.u32 %v7526_v42, 16 }
 0x291   : > { %vm4940_vm13 = vcmp.gt.f32.partialorder %v4804_v46, 0.0  ;;  %v5076_v51 = vmul.f32 0.2, %v4804_v46 }
 0x292   : > { %v3234_v53 = vpop.f32.mrf.mxu2  ;;  %6011 = vmatmul.msk.bf16.gmra.mxu1 %vm1184_vm1, %v7457_v1 }
 0x293   : > { %v5212_v56 = vsel %vm4940_vm13, %v4804_v46, %v5076_v51  ;;  %v3480_v60 = vadd.f32 %v3234_v53, %v2053_v52  ;;  %v3948_v46 = vshrl.u32 %v7522_v39, 16  ;;  %v975_v51 = vshll.u32 %v7526_v42, 16 }
 0x294   : > { %v5348_v58 = vpack.c.bf16 %v5212_v56, %v5212_v56 }
 0x295   : > { %v3950_v55 = vrot.slane %v3948_v46, 1 }
 0x296   : > { %5485 = vst.msk [vmem:[%s6777_s6 + $0xf8] sm:$0xf] %vm5422_vm6, %v5348_v58  ;;  %v4559_v61 = vpop.f32.mrf.mxu3  ;;  %v1562_v62 = vpop.f32.mrf.mxu0 }
 0x297   : > { %6357 = vmatmul.msk.bf16.gmra.mxu2 %vm1184_vm1, %v2801_v57  ;;  %v4805_v0 = vadd.f32 %v4559_v61, %v3480_v60  ;;  %v2056_v1 = vadd.f32 %v2055_v47, %v1562_v62  ;;  %v2057_v2 = vpop.f32.mrf.mxu1  ;;  %v3951_v47 = vshll.u32 %v7522_v39, 16  ;;  %v973_v60 = vor.u32 %v971_v50, %v969_v26 }
 0x298   : > { %v977_v61 = vrot.slane %v975_v51, 1 }
 0x299   : > { %vm4941_vm14 = vcmp.gt.f32.partialorder %v4805_v0, 0.0  ;;  %v5077_v5 = vmul.f32 0.2, %v4805_v0  ;;  %5939 = vmatmul.msk.bf16.gmra.mxu0 %vm1184_vm1, %v962_v63  ;;  %v3953_v56 = vrot.slane %v3951_v47, 2  ;;  %v2805_v63 = vsel %vm2718_vm2, %v2802_v19, %v2804_v54 }
 0x29a   : > { %v3237_v6 = vpop.f32.mrf.mxu2 }
 0x29b   : > { %v5213_v8 = vsel %vm4941_vm14, %v4805_v0, %v5077_v5  ;;  %v3481_v9 = vadd.f32 %v3237_v6, %v2056_v1  ;;  %6431 = vmatmul.msk.bf16.gmra.mxu3 %vm1184_vm1, %v3937_v3  ;;  %v3954_v1 = vor.u32 %v3953_v56, %v3950_v55  ;;  %v978_v5 = vsel %vm630_vm3, %v973_v60, %v977_v61 }
 0x29c   : > { %v5349_v10 = vpack.c.bf16 %v5213_v8, %v5213_v8 }
 0x29e   : > { %5486 = vst.msk [vmem:[%s6777_s6 + $0xfc] sm:$0xf] %vm5422_vm6, %v5349_v10  ;;  %v4562_v13 = vpop.f32.mrf.mxu3  ;;  %v1564_v14 = vpop.f32.mrf.mxu0  ;;  %v7545_v10 = vld [vmem:[%s6675_s30 + $0x170] sm:$0xff] }
 0x29f   : > { %v4806_v17 = vadd.f32 %v4562_v13, %v3481_v9  ;;  %v2060_v18 = vpop.f32.mrf.mxu1  ;;  %v2058_v23 = vadd.f32 %v2057_v2, %v1564_v14  ;;  %v3955_v9 = vsel %vm3560_vm4, %v3945_v30, %v3954_v1  ;;  %v7549_v13 = vld [vmem:[%s6675_s30 + $0x160] sm:$0xff]  ;;  %v2806_v25 = vrot.slane %v7545_v10, 1 }
 0x2a0   : > { %v987_v56 = vshrl.u32 %v7549_v13, 16 }
 0x2a1   : > { %vm4942_vm15 = vcmp.gt.f32.partialorder %v4806_v17, 0.0  ;;  %v5078_v22 = vmul.f32 0.2, %v4806_v17 }
 0x2a2   : > { %v3239_v24 = vpop.f32.mrf.mxu2  ;;  %6012 = vmatmul.msk.bf16.gmra.mxu1 %vm1184_vm1, %v7480_v36 }
 0x2a3   : > { %v5214_v27 = vsel %vm4942_vm15, %v4806_v17, %v5078_v22  ;;  %v3482_v31 = vadd.f32 %v3239_v24, %v2058_v23  ;;  %v3957_v17 = vshrl.u32 %v7545_v10, 16  ;;  %v983_v22 = vshll.u32 %v7549_v13, 16 }
 0x2a4   : > { %v5350_v29 = vpack.c.bf16 %v5214_v27, %v5214_v27 }
 0x2a5   : > { %v3959_v26 = vrot.slane %v3957_v17, 1 }
 0x2a6   : > { %5487 = vst.msk [vmem:[%s6777_s6 + $0x100] sm:$0xf] %vm5422_vm6, %v5350_v29  ;;  %v4564_v32 = vpop.f32.mrf.mxu3  ;;  %v1567_v33 = vpop.f32.mrf.mxu0 }
 0x2a7   : > { %6358 = vmatmul.msk.bf16.gmra.mxu2 %vm1184_vm1, %v2803_v28  ;;  %v4807_v35 = vadd.f32 %v4564_v32, %v3482_v31  ;;  %v2061_v36 = vadd.f32 %v2060_v18, %v1567_v33  ;;  %v2062_v37 = vpop.f32.mrf.mxu1  ;;  %v3960_v18 = vshll.u32 %v7545_v10, 16  ;;  %v981_v31 = vor.u32 %v979_v21, %v977_v61 }
 0x2a8   : > { %v985_v32 = vrot.slane %v983_v22, 1 }
 0x2a9   : > { %vm4943_vm0 = vcmp.gt.f32.partialorder %v4807_v35, 0.0  ;;  %v5079_v40 = vmul.f32 0.2, %v4807_v35  ;;  %5940 = vmatmul.msk.bf16.gmra.mxu0 %vm1184_vm1, %v970_v34  ;;  %v3962_v27 = vrot.slane %v3960_v18, 2  ;;  %v2807_v34 = vsel %vm2718_vm2, %v2804_v54, %v2806_v25 }
 0x2aa   : > { %v3242_v41 = vpop.f32.mrf.mxu2 }
 0x2ab   : > { %v5215_v43 = vsel %vm4943_vm0, %v4807_v35, %v5079_v40  ;;  %v3483_v44 = vadd.f32 %v3242_v41, %v2061_v36  ;;  %6432 = vmatmul.msk.bf16.gmra.mxu3 %vm1184_vm1, %v3946_v38  ;;  %v3963_v36 = vor.u32 %v3962_v27, %v3959_v26  ;;  %v986_v40 = vsel %vm630_vm3, %v981_v31, %v985_v32 }
 0x2ac   : > { %v5351_v45 = vpack.c.bf16 %v5215_v43, %v5215_v43 }
 0x2ae   : > { %5488 = vst.msk [vmem:[%s6777_s6 + $0x104] sm:$0xf] %vm5422_vm6, %v5351_v45  ;;  %v4567_v48 = vpop.f32.mrf.mxu3  ;;  %v1569_v49 = vpop.f32.mrf.mxu0  ;;  %v7568_v45 = vld [vmem:[%s6675_s30 + $0x178] sm:$0xff] }
 0x2af   : > { %v4808_v52 = vadd.f32 %v4567_v48, %v3483_v44  ;;  %v2065_v53 = vpop.f32.mrf.mxu1  ;;  %v2063_v58 = vadd.f32 %v2062_v37, %v1569_v49  ;;  %v3964_v44 = vsel %vm3560_vm4, %v3954_v1, %v3963_v36  ;;  %v7572_v48 = vld [vmem:[%s6675_s30 + $0x168] sm:$0xff]  ;;  %v2808_v60 = vrot.slane %v7568_v45, 1 }
 0x2b0   : > { %v995_v27 = vshrl.u32 %v7572_v48, 16 }
 0x2b1   : > { %vm4944_vm5 = vcmp.gt.f32.partialorder %v4808_v52, 0.0  ;;  %v5080_v57 = vmul.f32 0.2, %v4808_v52 }
 0x2b2   : > { %v3244_v59 = vpop.f32.mrf.mxu2  ;;  %6013 = vmatmul.msk.bf16.gmra.mxu1 %vm1184_vm1, %v7503_v7 }
 0x2b3   : > { %v5216_v62 = vsel %vm4944_vm5, %v4808_v52, %v5080_v57  ;;  %v3484_v2 = vadd.f32 %v3244_v59, %v2063_v58  ;;  %v3966_v52 = vshrl.u32 %v7568_v45, 16  ;;  %v991_v57 = vshll.u32 %v7572_v48, 16 }
 0x2b4   : > { %v5352_v0 = vpack.c.bf16 %v5216_v62, %v5216_v62 }
 0x2b5   : > { %v3968_v61 = vrot.slane %v3966_v52, 1 }
 0x2b6   : > { %5489 = vst.msk [vmem:[%s6777_s6 + $0x108] sm:$0xf] %vm5422_vm6, %v5352_v0  ;;  %v4569_v3 = vpop.f32.mrf.mxu3  ;;  %v1572_v4 = vpop.f32.mrf.mxu0 }
 0x2b7   : > { %6359 = vmatmul.msk.bf16.gmra.mxu2 %vm1184_vm1, %v2805_v63  ;;  %v4809_v6 = vadd.f32 %v4569_v3, %v3484_v2  ;;  %v2066_v7 = vadd.f32 %v2065_v53, %v1572_v4  ;;  %v2067_v8 = vpop.f32.mrf.mxu1  ;;  %v3969_v53 = vshll.u32 %v7568_v45, 16  ;;  %v989_v2 = vor.u32 %v987_v56, %v985_v32 }
 0x2b8   : > { %v993_v3 = vrot.slane %v991_v57, 1 }
 0x2b9   : > { %vm4945_vm7 = vcmp.gt.f32.partialorder %v4809_v6, 0.0  ;;  %v5081_v11 = vmul.f32 0.2, %v4809_v6  ;;  %5941 = vmatmul.msk.bf16.gmra.mxu0 %vm1184_vm1, %v978_v5  ;;  %v3971_v62 = vrot.slane %v3969_v53, 2  ;;  %v2809_v5 = vsel %vm2718_vm2, %v2806_v25, %v2808_v60 }
 0x2ba   : > { %v3247_v12 = vpop.f32.mrf.mxu2 }
 0x2bb   : > { %v5217_v14 = vsel %vm4945_vm7, %v4809_v6, %v5081_v11  ;;  %v3485_v15 = vadd.f32 %v3247_v12, %v2066_v7  ;;  %6433 = vmatmul.msk.bf16.gmra.mxu3 %vm1184_vm1, %v3955_v9  ;;  %v3972_v7 = vor.u32 %v3971_v62, %v3968_v61  ;;  %v994_v11 = vsel %vm630_vm3, %v989_v2, %v993_v3 }
 0x2bc   : > { %v5353_v16 = vpack.c.bf16 %v5217_v14, %v5217_v14 }
 0x2be   : > { %5490 = vst.msk [vmem:[%s6777_s6 + $0x10c] sm:$0xf] %vm5422_vm6, %v5353_v16  ;;  %v4572_v19 = vpop.f32.mrf.mxu3  ;;  %v1574_v20 = vpop.f32.mrf.mxu0  ;;  %v7591_v16 = vld [vmem:[%s6675_s30 + $0x180] sm:$0xff] }
 0x2bf   : > { %v4810_v23 = vadd.f32 %v4572_v19, %v3485_v15  ;;  %v2070_v24 = vpop.f32.mrf.mxu1  ;;  %v2068_v29 = vadd.f32 %v2067_v8, %v1574_v20  ;;  %v3973_v15 = vsel %vm3560_vm4, %v3963_v36, %v3972_v7  ;;  %v7595_v19 = vld [vmem:[%s6675_s30 + $0x170] sm:$0xff]  ;;  %v2810_v31 = vrot.slane %v7591_v16, 1 }
 0x2c0   : > { %v1003_v62 = vshrl.u32 %v7595_v19, 16 }
 0x2c1   : > { %vm4946_vm8 = vcmp.gt.f32.partialorder %v4810_v23, 0.0  ;;  %v5082_v28 = vmul.f32 0.2, %v4810_v23 }
 0x2c2   : > { %v3249_v30 = vpop.f32.mrf.mxu2  ;;  %6014 = vmatmul.msk.bf16.gmra.mxu1 %vm1184_vm1, %v7526_v42 }
 0x2c3   : > { %v5218_v33 = vsel %vm4946_vm8, %v4810_v23, %v5082_v28  ;;  %v3486_v37 = vadd.f32 %v3249_v30, %v2068_v29  ;;  %v3975_v23 = vshrl.u32 %v7591_v16, 16  ;;  %v999_v28 = vshll.u32 %v7595_v19, 16 }
 0x2c4   : > { %v5354_v35 = vpack.c.bf16 %v5218_v33, %v5218_v33 }
 0x2c5   : > { %v3977_v32 = vrot.slane %v3975_v23, 1 }
 0x2c6   : > { %5491 = vst.msk [vmem:[%s6777_s6 + $0x110] sm:$0xf] %vm5422_vm6, %v5354_v35  ;;  %v4574_v38 = vpop.f32.mrf.mxu3  ;;  %v1577_v39 = vpop.f32.mrf.mxu0 }
 0x2c7   : > { %6360 = vmatmul.msk.bf16.gmra.mxu2 %vm1184_vm1, %v2807_v34  ;;  %v4811_v41 = vadd.f32 %v4574_v38, %v3486_v37  ;;  %v2071_v42 = vadd.f32 %v2070_v24, %v1577_v39  ;;  %v2072_v43 = vpop.f32.mrf.mxu1  ;;  %v3978_v24 = vshll.u32 %v7591_v16, 16  ;;  %v997_v37 = vor.u32 %v995_v27, %v993_v3 }
 0x2c8   : > { %v1001_v38 = vrot.slane %v999_v28, 1 }
 0x2c9   : > { %vm4947_vm9 = vcmp.gt.f32.partialorder %v4811_v41, 0.0  ;;  %v5083_v46 = vmul.f32 0.2, %v4811_v41  ;;  %5942 = vmatmul.msk.bf16.gmra.mxu0 %vm1184_vm1, %v986_v40  ;;  %v3980_v33 = vrot.slane %v3978_v24, 2  ;;  %v2811_v40 = vsel %vm2718_vm2, %v2808_v60, %v2810_v31 }
 0x2ca   : > { %v3252_v47 = vpop.f32.mrf.mxu2 }
 0x2cb   : > { %v5219_v49 = vsel %vm4947_vm9, %v4811_v41, %v5083_v46  ;;  %v3487_v50 = vadd.f32 %v3252_v47, %v2071_v42  ;;  %6434 = vmatmul.msk.bf16.gmra.mxu3 %vm1184_vm1, %v3964_v44  ;;  %v3981_v42 = vor.u32 %v3980_v33, %v3977_v32  ;;  %v1002_v46 = vsel %vm630_vm3, %v997_v37, %v1001_v38 }
 0x2cc   : > { %v5355_v51 = vpack.c.bf16 %v5219_v49, %v5219_v49 }
 0x2ce   : > { %5492 = vst.msk [vmem:[%s6777_s6 + $0x114] sm:$0xf] %vm5422_vm6, %v5355_v51  ;;  %v4577_v54 = vpop.f32.mrf.mxu3  ;;  %v1579_v55 = vpop.f32.mrf.mxu0  ;;  %v7614_v51 = vld [vmem:[%s6675_s30 + $0x188] sm:$0xff] }
 0x2cf   : > { %v4812_v58 = vadd.f32 %v4577_v54, %v3487_v50  ;;  %v2075_v59 = vpop.f32.mrf.mxu1  ;;  %v2073_v0 = vadd.f32 %v2072_v43, %v1579_v55  ;;  %v3982_v50 = vsel %vm3560_vm4, %v3972_v7, %v3981_v42  ;;  %v7618_v54 = vld [vmem:[%s6675_s30 + $0x178] sm:$0xff]  ;;  %v2812_v2 = vrot.slane %v7614_v51, 1 }
 0x2d0   : > { %v1011_v33 = vshrl.u32 %v7618_v54, 16 }
 0x2d1   : > { %vm4948_vm10 = vcmp.gt.f32.partialorder %v4812_v58, 0.0  ;;  %v5084_v63 = vmul.f32 0.2, %v4812_v58 }
 0x2d2   : > { %v3254_v1 = vpop.f32.mrf.mxu2  ;;  %6015 = vmatmul.msk.bf16.gmra.mxu1 %vm1184_vm1, %v7549_v13 }
 0x2d3   : > { %v5220_v4 = vsel %vm4948_vm10, %v4812_v58, %v5084_v63  ;;  %v3488_v8 = vadd.f32 %v3254_v1, %v2073_v0  ;;  %v3984_v58 = vshrl.u32 %v7614_v51, 16  ;;  %v1007_v63 = vshll.u32 %v7618_v54, 16 }
 0x2d4   : > { %v5356_v6 = vpack.c.bf16 %v5220_v4, %v5220_v4 }
 0x2d5   : > { %v3986_v3 = vrot.slane %v3984_v58, 1 }
 0x2d6   : > { %5493 = vst.msk [vmem:[%s6777_s6 + $0x118] sm:$0xf] %vm5422_vm6, %v5356_v6  ;;  %v4579_v9 = vpop.f32.mrf.mxu3  ;;  %v1582_v10 = vpop.f32.mrf.mxu0 }
 0x2d7   : > { %6361 = vmatmul.msk.bf16.gmra.mxu2 %vm1184_vm1, %v2809_v5  ;;  %v4813_v12 = vadd.f32 %v4579_v9, %v3488_v8  ;;  %v2076_v13 = vadd.f32 %v2075_v59, %v1582_v10  ;;  %v2077_v14 = vpop.f32.mrf.mxu1  ;;  %v3987_v59 = vshll.u32 %v7614_v51, 16  ;;  %v1005_v8 = vor.u32 %v1003_v62, %v1001_v38 }
 0x2d8   : > { %v1009_v9 = vrot.slane %v1007_v63, 1 }
 0x2d9   : > { %vm4949_vm11 = vcmp.gt.f32.partialorder %v4813_v12, 0.0  ;;  %v5085_v17 = vmul.f32 0.2, %v4813_v12  ;;  %5943 = vmatmul.msk.bf16.gmra.mxu0 %vm1184_vm1, %v994_v11  ;;  %v3989_v4 = vrot.slane %v3987_v59, 2  ;;  %v2813_v11 = vsel %vm2718_vm2, %v2810_v31, %v2812_v2 }
 0x2da   : > { %v3257_v18 = vpop.f32.mrf.mxu2 }
 0x2db   : > { %v5221_v20 = vsel %vm4949_vm11, %v4813_v12, %v5085_v17  ;;  %v3489_v21 = vadd.f32 %v3257_v18, %v2076_v13  ;;  %6435 = vmatmul.msk.bf16.gmra.mxu3 %vm1184_vm1, %v3973_v15  ;;  %v3990_v13 = vor.u32 %v3989_v4, %v3986_v3  ;;  %v1010_v17 = vsel %vm630_vm3, %v1005_v8, %v1009_v9 }
 0x2dc   : > { %v5357_v22 = vpack.c.bf16 %v5221_v20, %v5221_v20 }
 0x2de   : > { %5494 = vst.msk [vmem:[%s6777_s6 + $0x11c] sm:$0xf] %vm5422_vm6, %v5357_v22  ;;  %v4582_v25 = vpop.f32.mrf.mxu3  ;;  %v1584_v26 = vpop.f32.mrf.mxu0  ;;  %v7637_v22 = vld [vmem:[%s6675_s30 + $0x190] sm:$0xff] }
 0x2df   : > { %v4814_v29 = vadd.f32 %v4582_v25, %v3489_v21  ;;  %v2080_v30 = vpop.f32.mrf.mxu1  ;;  %v2078_v35 = vadd.f32 %v2077_v14, %v1584_v26  ;;  %v3991_v21 = vsel %vm3560_vm4, %v3981_v42, %v3990_v13  ;;  %v7641_v25 = vld [vmem:[%s6675_s30 + $0x180] sm:$0xff]  ;;  %v2814_v37 = vrot.slane %v7637_v22, 1 }
 0x2e0   : > { %v1019_v4 = vshrl.u32 %v7641_v25, 16 }
 0x2e1   : > { %vm4950_vm12 = vcmp.gt.f32.partialorder %v4814_v29, 0.0  ;;  %v5086_v34 = vmul.f32 0.2, %v4814_v29 }
 0x2e2   : > { %v3259_v36 = vpop.f32.mrf.mxu2  ;;  %6016 = vmatmul.msk.bf16.gmra.mxu1 %vm1184_vm1, %v7572_v48 }
 0x2e3   : > { %v5222_v39 = vsel %vm4950_vm12, %v4814_v29, %v5086_v34  ;;  %v3490_v43 = vadd.f32 %v3259_v36, %v2078_v35  ;;  %v3993_v29 = vshrl.u32 %v7637_v22, 16  ;;  %v1015_v34 = vshll.u32 %v7641_v25, 16 }
 0x2e4   : > { %v5358_v41 = vpack.c.bf16 %v5222_v39, %v5222_v39 }
 0x2e5   : > { %v3995_v38 = vrot.slane %v3993_v29, 1 }
 0x2e6   : > { %5495 = vst.msk [vmem:[%s6777_s6 + $0x120] sm:$0xf] %vm5422_vm6, %v5358_v41  ;;  %v4584_v44 = vpop.f32.mrf.mxu3  ;;  %v1587_v45 = vpop.f32.mrf.mxu0 }
 0x2e7   : > { %6362 = vmatmul.msk.bf16.gmra.mxu2 %vm1184_vm1, %v2811_v40  ;;  %v4815_v47 = vadd.f32 %v4584_v44, %v3490_v43  ;;  %v2081_v48 = vadd.f32 %v2080_v30, %v1587_v45  ;;  %v2082_v49 = vpop.f32.mrf.mxu1  ;;  %v3996_v30 = vshll.u32 %v7637_v22, 16  ;;  %v1013_v43 = vor.u32 %v1011_v33, %v1009_v9 }
 0x2e8   : > { %v1017_v44 = vrot.slane %v1015_v34, 1 }
 0x2e9   : > { %vm4951_vm13 = vcmp.gt.f32.partialorder %v4815_v47, 0.0  ;;  %v5087_v52 = vmul.f32 0.2, %v4815_v47  ;;  %5944 = vmatmul.msk.bf16.gmra.mxu0 %vm1184_vm1, %v1002_v46  ;;  %v3998_v39 = vrot.slane %v3996_v30, 2  ;;  %v2815_v46 = vsel %vm2718_vm2, %v2812_v2, %v2814_v37 }
 0x2ea   : > { %v3262_v53 = vpop.f32.mrf.mxu2 }
 0x2eb   : > { %v5223_v55 = vsel %vm4951_vm13, %v4815_v47, %v5087_v52  ;;  %v3491_v56 = vadd.f32 %v3262_v53, %v2081_v48  ;;  %6436 = vmatmul.msk.bf16.gmra.mxu3 %vm1184_vm1, %v3982_v50  ;;  %v3999_v48 = vor.u32 %v3998_v39, %v3995_v38  ;;  %v1018_v52 = vsel %vm630_vm3, %v1013_v43, %v1017_v44 }
 0x2ec   : > { %v5359_v57 = vpack.c.bf16 %v5223_v55, %v5223_v55 }
 0x2ee   : > { %5496 = vst.msk [vmem:[%s6777_s6 + $0x124] sm:$0xf] %vm5422_vm6, %v5359_v57  ;;  %v4587_v60 = vpop.f32.mrf.mxu3  ;;  %v1589_v61 = vpop.f32.mrf.mxu0  ;;  %v7660_v57 = vld [vmem:[%s6675_s30 + $0x198] sm:$0xff] }
 0x2ef   : > { %v4816_v0 = vadd.f32 %v4587_v60, %v3491_v56  ;;  %v2085_v1 = vpop.f32.mrf.mxu1  ;;  %v2083_v6 = vadd.f32 %v2082_v49, %v1589_v61  ;;  %v4000_v56 = vsel %vm3560_vm4, %v3990_v13, %v3999_v48  ;;  %v7664_v60 = vld [vmem:[%s6675_s30 + $0x188] sm:$0xff]  ;;  %v2816_v8 = vrot.slane %v7660_v57, 1 }
 0x2f0   : > { %v1027_v39 = vshrl.u32 %v7664_v60, 16 }
 0x2f1   : > { %vm4952_vm14 = vcmp.gt.f32.partialorder %v4816_v0, 0.0  ;;  %v5088_v5 = vmul.f32 0.2, %v4816_v0 }
 0x2f2   : > { %v3264_v7 = vpop.f32.mrf.mxu2  ;;  %6017 = vmatmul.msk.bf16.gmra.mxu1 %vm1184_vm1, %v7595_v19 }
 0x2f3   : > { %v5224_v10 = vsel %vm4952_vm14, %v4816_v0, %v5088_v5  ;;  %v3492_v14 = vadd.f32 %v3264_v7, %v2083_v6  ;;  %v4002_v0 = vshrl.u32 %v7660_v57, 16  ;;  %v1023_v5 = vshll.u32 %v7664_v60, 16 }
 0x2f4   : > { %v5360_v12 = vpack.c.bf16 %v5224_v10, %v5224_v10 }
 0x2f5   : > { %v4004_v9 = vrot.slane %v4002_v0, 1 }
 0x2f6   : > { %5497 = vst.msk [vmem:[%s6777_s6 + $0x128] sm:$0xf] %vm5422_vm6, %v5360_v12  ;;  %v4589_v15 = vpop.f32.mrf.mxu3  ;;  %v1592_v16 = vpop.f32.mrf.mxu0 }
 0x2f7   : > { %6363 = vmatmul.msk.bf16.gmra.mxu2 %vm1184_vm1, %v2813_v11  ;;  %v4817_v18 = vadd.f32 %v4589_v15, %v3492_v14  ;;  %v2086_v19 = vadd.f32 %v2085_v1, %v1592_v16  ;;  %v2087_v20 = vpop.f32.mrf.mxu1  ;;  %v4005_v1 = vshll.u32 %v7660_v57, 16  ;;  %v1021_v14 = vor.u32 %v1019_v4, %v1017_v44 }
 0x2f8   : > { %v1025_v15 = vrot.slane %v1023_v5, 1 }
 0x2f9   : > { %vm4953_vm15 = vcmp.gt.f32.partialorder %v4817_v18, 0.0  ;;  %v5089_v23 = vmul.f32 0.2, %v4817_v18  ;;  %5945 = vmatmul.msk.bf16.gmra.mxu0 %vm1184_vm1, %v1010_v17  ;;  %v4007_v10 = vrot.slane %v4005_v1, 2  ;;  %v2817_v17 = vsel %vm2718_vm2, %v2814_v37, %v2816_v8 }
 0x2fa   : > { %v3267_v24 = vpop.f32.mrf.mxu2 }
 0x2fb   : > { %v5225_v26 = vsel %vm4953_vm15, %v4817_v18, %v5089_v23  ;;  %v3493_v27 = vadd.f32 %v3267_v24, %v2086_v19  ;;  %6437 = vmatmul.msk.bf16.gmra.mxu3 %vm1184_vm1, %v3991_v21  ;;  %v4008_v19 = vor.u32 %v4007_v10, %v4004_v9  ;;  %v1026_v23 = vsel %vm630_vm3, %v1021_v14, %v1025_v15 }
 0x2fc   : > { %v5361_v28 = vpack.c.bf16 %v5225_v26, %v5225_v26 }
 0x2fe   : > { %5498 = vst.msk [vmem:[%s6777_s6 + $0x12c] sm:$0xf] %vm5422_vm6, %v5361_v28  ;;  %v4592_v31 = vpop.f32.mrf.mxu3  ;;  %v1594_v32 = vpop.f32.mrf.mxu0  ;;  %v7683_v28 = vld [vmem:[%s6675_s30 + $0x1a0] sm:$0xff] }
 0x2ff   : > { %v4818_v35 = vadd.f32 %v4592_v31, %v3493_v27  ;;  %v2090_v36 = vpop.f32.mrf.mxu1  ;;  %v2088_v41 = vadd.f32 %v2087_v20, %v1594_v32  ;;  %v4009_v27 = vsel %vm3560_vm4, %v3999_v48, %v4008_v19  ;;  %v7687_v31 = vld [vmem:[%s6675_s30 + $0x190] sm:$0xff]  ;;  %v2818_v43 = vrot.slane %v7683_v28, 1 }
 0x300   : > { %v1035_v10 = vshrl.u32 %v7687_v31, 16 }
 0x301   : > { %vm4954_vm0 = vcmp.gt.f32.partialorder %v4818_v35, 0.0  ;;  %v5090_v40 = vmul.f32 0.2, %v4818_v35 }
 0x302   : > { %v3269_v42 = vpop.f32.mrf.mxu2  ;;  %6018 = vmatmul.msk.bf16.gmra.mxu1 %vm1184_vm1, %v7618_v54 }
 0x303   : > { %v5226_v45 = vsel %vm4954_vm0, %v4818_v35, %v5090_v40  ;;  %v3494_v49 = vadd.f32 %v3269_v42, %v2088_v41  ;;  %v4011_v35 = vshrl.u32 %v7683_v28, 16  ;;  %v1031_v40 = vshll.u32 %v7687_v31, 16 }
 0x304   : > { %v5362_v47 = vpack.c.bf16 %v5226_v45, %v5226_v45 }
 0x305   : > { %v4013_v44 = vrot.slane %v4011_v35, 1 }
 0x306   : > { %5499 = vst.msk [vmem:[%s6777_s6 + $0x130] sm:$0xf] %vm5422_vm6, %v5362_v47  ;;  %v4594_v50 = vpop.f32.mrf.mxu3  ;;  %v1597_v51 = vpop.f32.mrf.mxu0 }
 0x307   : > { %6364 = vmatmul.msk.bf16.gmra.mxu2 %vm1184_vm1, %v2815_v46  ;;  %v4819_v53 = vadd.f32 %v4594_v50, %v3494_v49  ;;  %v2091_v54 = vadd.f32 %v2090_v36, %v1597_v51  ;;  %v2092_v55 = vpop.f32.mrf.mxu1  ;;  %v4014_v36 = vshll.u32 %v7683_v28, 16  ;;  %v1029_v49 = vor.u32 %v1027_v39, %v1025_v15 }
 0x308   : > { %v1033_v50 = vrot.slane %v1031_v40, 1 }
 0x309   : > { %vm4955_vm5 = vcmp.gt.f32.partialorder %v4819_v53, 0.0  ;;  %v5091_v58 = vmul.f32 0.2, %v4819_v53  ;;  %5946 = vmatmul.msk.bf16.gmra.mxu0 %vm1184_vm1, %v1018_v52  ;;  %v4016_v45 = vrot.slane %v4014_v36, 2  ;;  %v2819_v52 = vsel %vm2718_vm2, %v2816_v8, %v2818_v43 }
 0x30a   : > { %v3272_v59 = vpop.f32.mrf.mxu2 }
 0x30b   : > { %v5227_v61 = vsel %vm4955_vm5, %v4819_v53, %v5091_v58  ;;  %v3495_v62 = vadd.f32 %v3272_v59, %v2091_v54  ;;  %6438 = vmatmul.msk.bf16.gmra.mxu3 %vm1184_vm1, %v4000_v56  ;;  %v4017_v54 = vor.u32 %v4016_v45, %v4013_v44  ;;  %v1034_v58 = vsel %vm630_vm3, %v1029_v49, %v1033_v50 }
 0x30c   : > { %v5363_v63 = vpack.c.bf16 %v5227_v61, %v5227_v61 }
 0x30e   : > { %5500 = vst.msk [vmem:[%s6777_s6 + $0x134] sm:$0xf] %vm5422_vm6, %v5363_v63  ;;  %v4597_v2 = vpop.f32.mrf.mxu3  ;;  %v1599_v3 = vpop.f32.mrf.mxu0  ;;  %v7706_v63 = vld [vmem:[%s6675_s30 + $0x1a8] sm:$0xff] }
 0x30f   : > { %v4820_v6 = vadd.f32 %v4597_v2, %v3495_v62  ;;  %v2095_v7 = vpop.f32.mrf.mxu1  ;;  %v2093_v12 = vadd.f32 %v2092_v55, %v1599_v3  ;;  %v4018_v62 = vsel %vm3560_vm4, %v4008_v19, %v4017_v54  ;;  %v7710_v2 = vld [vmem:[%s6675_s30 + $0x198] sm:$0xff]  ;;  %v2820_v14 = vrot.slane %v7706_v63, 1 }
 0x310   : > { %v1043_v45 = vshrl.u32 %v7710_v2, 16 }
 0x311   : > { %vm4956_vm7 = vcmp.gt.f32.partialorder %v4820_v6, 0.0  ;;  %v5092_v11 = vmul.f32 0.2, %v4820_v6 }
 0x312   : > { %v3274_v13 = vpop.f32.mrf.mxu2  ;;  %6019 = vmatmul.msk.bf16.gmra.mxu1 %vm1184_vm1, %v7641_v25 }
 0x313   : > { %v5228_v16 = vsel %vm4956_vm7, %v4820_v6, %v5092_v11  ;;  %v3496_v20 = vadd.f32 %v3274_v13, %v2093_v12  ;;  %v4020_v6 = vshrl.u32 %v7706_v63, 16  ;;  %v1039_v11 = vshll.u32 %v7710_v2, 16 }
 0x314   : > { %v5364_v18 = vpack.c.bf16 %v5228_v16, %v5228_v16 }
 0x315   : > { %v4022_v15 = vrot.slane %v4020_v6, 1 }
 0x316   : > { %5501 = vst.msk [vmem:[%s6777_s6 + $0x138] sm:$0xf] %vm5422_vm6, %v5364_v18  ;;  %v4599_v21 = vpop.f32.mrf.mxu3  ;;  %v1602_v22 = vpop.f32.mrf.mxu0 }
 0x317   : > { %6365 = vmatmul.msk.bf16.gmra.mxu2 %vm1184_vm1, %v2817_v17  ;;  %v4821_v24 = vadd.f32 %v4599_v21, %v3496_v20  ;;  %v2096_v25 = vadd.f32 %v2095_v7, %v1602_v22  ;;  %v2097_v26 = vpop.f32.mrf.mxu1  ;;  %v4023_v7 = vshll.u32 %v7706_v63, 16  ;;  %v1037_v20 = vor.u32 %v1035_v10, %v1033_v50 }
 0x318   : > { %v1041_v21 = vrot.slane %v1039_v11, 1 }
 0x319   : > { %vm4957_vm8 = vcmp.gt.f32.partialorder %v4821_v24, 0.0  ;;  %v5093_v29 = vmul.f32 0.2, %v4821_v24  ;;  %5947 = vmatmul.msk.bf16.gmra.mxu0 %vm1184_vm1, %v1026_v23  ;;  %v4025_v16 = vrot.slane %v4023_v7, 2  ;;  %v2821_v23 = vsel %vm2718_vm2, %v2818_v43, %v2820_v14 }
 0x31a   : > { %v3277_v30 = vpop.f32.mrf.mxu2 }
 0x31b   : > { %v5229_v32 = vsel %vm4957_vm8, %v4821_v24, %v5093_v29  ;;  %v3497_v33 = vadd.f32 %v3277_v30, %v2096_v25  ;;  %6439 = vmatmul.msk.bf16.gmra.mxu3 %vm1184_vm1, %v4009_v27  ;;  %v4026_v25 = vor.u32 %v4025_v16, %v4022_v15  ;;  %v1042_v29 = vsel %vm630_vm3, %v1037_v20, %v1041_v21 }
 0x31c   : > { %v5365_v34 = vpack.c.bf16 %v5229_v32, %v5229_v32 }
 0x31e   : > { %5502 = vst.msk [vmem:[%s6777_s6 + $0x13c] sm:$0xf] %vm5422_vm6, %v5365_v34  ;;  %v4602_v37 = vpop.f32.mrf.mxu3  ;;  %v1604_v38 = vpop.f32.mrf.mxu0  ;;  %v7729_v34 = vld [vmem:[%s6675_s30 + $0x1b0] sm:$0xff] }
 0x31f   : > { %v4822_v41 = vadd.f32 %v4602_v37, %v3497_v33  ;;  %v2100_v42 = vpop.f32.mrf.mxu1  ;;  %v2098_v47 = vadd.f32 %v2097_v26, %v1604_v38  ;;  %v4027_v33 = vsel %vm3560_vm4, %v4017_v54, %v4026_v25  ;;  %v7733_v37 = vld [vmem:[%s6675_s30 + $0x1a0] sm:$0xff]  ;;  %v2822_v49 = vrot.slane %v7729_v34, 1 }
 0x320   : > { %v1051_v16 = vshrl.u32 %v7733_v37, 16 }
 0x321   : > { %vm4958_vm9 = vcmp.gt.f32.partialorder %v4822_v41, 0.0  ;;  %v5094_v46 = vmul.f32 0.2, %v4822_v41 }
 0x322   : > { %v3279_v48 = vpop.f32.mrf.mxu2  ;;  %6020 = vmatmul.msk.bf16.gmra.mxu1 %vm1184_vm1, %v7664_v60 }
 0x323   : > { %v5230_v51 = vsel %vm4958_vm9, %v4822_v41, %v5094_v46  ;;  %v3498_v55 = vadd.f32 %v3279_v48, %v2098_v47  ;;  %v4029_v41 = vshrl.u32 %v7729_v34, 16  ;;  %v1047_v46 = vshll.u32 %v7733_v37, 16 }
 0x324   : > { %v5366_v53 = vpack.c.bf16 %v5230_v51, %v5230_v51 }
 0x325   : > { %v4031_v50 = vrot.slane %v4029_v41, 1 }
 0x326   : > { %5503 = vst.msk [vmem:[%s6777_s6 + $0x140] sm:$0xf] %vm5422_vm6, %v5366_v53  ;;  %v4604_v56 = vpop.f32.mrf.mxu3  ;;  %v1607_v57 = vpop.f32.mrf.mxu0 }
 0x327   : > { %6366 = vmatmul.msk.bf16.gmra.mxu2 %vm1184_vm1, %v2819_v52  ;;  %v4823_v59 = vadd.f32 %v4604_v56, %v3498_v55  ;;  %v2101_v60 = vadd.f32 %v2100_v42, %v1607_v57  ;;  %v2102_v61 = vpop.f32.mrf.mxu1  ;;  %v4032_v42 = vshll.u32 %v7729_v34, 16  ;;  %v1045_v55 = vor.u32 %v1043_v45, %v1041_v21 }
 0x328   : > { %v1049_v56 = vrot.slane %v1047_v46, 1 }
 0x329   : > { %vm4959_vm10 = vcmp.gt.f32.partialorder %v4823_v59, 0.0  ;;  %v5095_v0 = vmul.f32 0.2, %v4823_v59  ;;  %5948 = vmatmul.msk.bf16.gmra.mxu0 %vm1184_vm1, %v1034_v58  ;;  %v4034_v51 = vrot.slane %v4032_v42, 2  ;;  %v2823_v58 = vsel %vm2718_vm2, %v2820_v14, %v2822_v49 }
 0x32a   : > { %v3282_v1 = vpop.f32.mrf.mxu2 }
 0x32b   : > { %v5231_v3 = vsel %vm4959_vm10, %v4823_v59, %v5095_v0  ;;  %v3499_v4 = vadd.f32 %v3282_v1, %v2101_v60  ;;  %6440 = vmatmul.msk.bf16.gmra.mxu3 %vm1184_vm1, %v4018_v62  ;;  %v4035_v60 = vor.u32 %v4034_v51, %v4031_v50  ;;  %v1050_v0 = vsel %vm630_vm3, %v1045_v55, %v1049_v56 }
 0x32c   : > { %v5367_v5 = vpack.c.bf16 %v5231_v3, %v5231_v3 }
 0x32e   : > { %5504 = vst.msk [vmem:[%s6777_s6 + $0x144] sm:$0xf] %vm5422_vm6, %v5367_v5  ;;  %v4607_v8 = vpop.f32.mrf.mxu3  ;;  %v1609_v9 = vpop.f32.mrf.mxu0  ;;  %v7752_v5 = vld [vmem:[%s6675_s30 + $0x1b8] sm:$0xff] }
 0x32f   : > { %v4824_v12 = vadd.f32 %v4607_v8, %v3499_v4  ;;  %v2105_v13 = vpop.f32.mrf.mxu1  ;;  %v2103_v18 = vadd.f32 %v2102_v61, %v1609_v9  ;;  %v4036_v4 = vsel %vm3560_vm4, %v4026_v25, %v4035_v60  ;;  %v7756_v8 = vld [vmem:[%s6675_s30 + $0x1a8] sm:$0xff]  ;;  %v2824_v20 = vrot.slane %v7752_v5, 1 }
 0x330   : > { %v1059_v51 = vshrl.u32 %v7756_v8, 16 }
 0x331   : > { %vm4960_vm11 = vcmp.gt.f32.partialorder %v4824_v12, 0.0  ;;  %v5096_v17 = vmul.f32 0.2, %v4824_v12 }
 0x332   : > { %v3284_v19 = vpop.f32.mrf.mxu2  ;;  %6021 = vmatmul.msk.bf16.gmra.mxu1 %vm1184_vm1, %v7687_v31 }
 0x333   : > { %v5232_v22 = vsel %vm4960_vm11, %v4824_v12, %v5096_v17  ;;  %v3500_v26 = vadd.f32 %v3284_v19, %v2103_v18  ;;  %v4038_v12 = vshrl.u32 %v7752_v5, 16  ;;  %v1055_v17 = vshll.u32 %v7756_v8, 16 }
 0x334   : > { %v5368_v24 = vpack.c.bf16 %v5232_v22, %v5232_v22 }
 0x335   : > { %v4040_v21 = vrot.slane %v4038_v12, 1 }
 0x336   : > { %5505 = vst.msk [vmem:[%s6777_s6 + $0x148] sm:$0xf] %vm5422_vm6, %v5368_v24  ;;  %v4609_v27 = vpop.f32.mrf.mxu3  ;;  %v1612_v28 = vpop.f32.mrf.mxu0 }
 0x337   : > { %6367 = vmatmul.msk.bf16.gmra.mxu2 %vm1184_vm1, %v2821_v23  ;;  %v4825_v30 = vadd.f32 %v4609_v27, %v3500_v26  ;;  %v2106_v31 = vadd.f32 %v2105_v13, %v1612_v28  ;;  %v2107_v32 = vpop.f32.mrf.mxu1  ;;  %v4041_v13 = vshll.u32 %v7752_v5, 16  ;;  %v1053_v26 = vor.u32 %v1051_v16, %v1049_v56 }
 0x338   : > { %v1057_v27 = vrot.slane %v1055_v17, 1 }
 0x339   : > { %vm4961_vm12 = vcmp.gt.f32.partialorder %v4825_v30, 0.0  ;;  %v5097_v35 = vmul.f32 0.2, %v4825_v30  ;;  %5949 = vmatmul.msk.bf16.gmra.mxu0 %vm1184_vm1, %v1042_v29  ;;  %v4043_v22 = vrot.slane %v4041_v13, 2  ;;  %v2825_v29 = vsel %vm2718_vm2, %v2822_v49, %v2824_v20 }
 0x33a   : > { %v3287_v36 = vpop.f32.mrf.mxu2 }
 0x33b   : > { %v5233_v38 = vsel %vm4961_vm12, %v4825_v30, %v5097_v35  ;;  %v3501_v39 = vadd.f32 %v3287_v36, %v2106_v31  ;;  %6441 = vmatmul.msk.bf16.gmra.mxu3 %vm1184_vm1, %v4027_v33  ;;  %v4044_v31 = vor.u32 %v4043_v22, %v4040_v21  ;;  %v1058_v35 = vsel %vm630_vm3, %v1053_v26, %v1057_v27 }
 0x33c   : > { %v5369_v40 = vpack.c.bf16 %v5233_v38, %v5233_v38 }
 0x33e   : > { %5506 = vst.msk [vmem:[%s6777_s6 + $0x14c] sm:$0xf] %vm5422_vm6, %v5369_v40  ;;  %v4612_v43 = vpop.f32.mrf.mxu3  ;;  %v1614_v44 = vpop.f32.mrf.mxu0  ;;  %v7775_v40 = vld [vmem:[%s6675_s30 + $0x1c0] sm:$0xff] }
 0x33f   : > { %v4826_v47 = vadd.f32 %v4612_v43, %v3501_v39  ;;  %v2110_v48 = vpop.f32.mrf.mxu1  ;;  %v2108_v53 = vadd.f32 %v2107_v32, %v1614_v44  ;;  %v4045_v39 = vsel %vm3560_vm4, %v4035_v60, %v4044_v31  ;;  %v7779_v43 = vld [vmem:[%s6675_s30 + $0x1b0] sm:$0xff]  ;;  %v2826_v55 = vrot.slane %v7775_v40, 1 }
 0x340   : > { %v1067_v22 = vshrl.u32 %v7779_v43, 16 }
 0x341   : > { %vm4962_vm13 = vcmp.gt.f32.partialorder %v4826_v47, 0.0  ;;  %v5098_v52 = vmul.f32 0.2, %v4826_v47 }
 0x342   : > { %v3289_v54 = vpop.f32.mrf.mxu2  ;;  %6022 = vmatmul.msk.bf16.gmra.mxu1 %vm1184_vm1, %v7710_v2 }
 0x343   : > { %v5234_v57 = vsel %vm4962_vm13, %v4826_v47, %v5098_v52  ;;  %v3502_v61 = vadd.f32 %v3289_v54, %v2108_v53  ;;  %v4047_v47 = vshrl.u32 %v7775_v40, 16  ;;  %v1063_v52 = vshll.u32 %v7779_v43, 16 }
 0x344   : > { %v5370_v59 = vpack.c.bf16 %v5234_v57, %v5234_v57 }
 0x345   : > { %v4049_v56 = vrot.slane %v4047_v47, 1 }
 0x346   : > { %5507 = vst.msk [vmem:[%s6777_s6 + $0x150] sm:$0xf] %vm5422_vm6, %v5370_v59  ;;  %v4614_v62 = vpop.f32.mrf.mxu3  ;;  %v1617_v63 = vpop.f32.mrf.mxu0 }
 0x347   : > { %6368 = vmatmul.msk.bf16.gmra.mxu2 %vm1184_vm1, %v2823_v58  ;;  %v4827_v1 = vadd.f32 %v4614_v62, %v3502_v61  ;;  %v2111_v2 = vadd.f32 %v2110_v48, %v1617_v63  ;;  %v2112_v3 = vpop.f32.mrf.mxu1  ;;  %v4050_v48 = vshll.u32 %v7775_v40, 16  ;;  %v1061_v61 = vor.u32 %v1059_v51, %v1057_v27 }
 0x348   : > { %v1065_v62 = vrot.slane %v1063_v52, 1 }
 0x349   : > { %vm4963_vm14 = vcmp.gt.f32.partialorder %v4827_v1, 0.0  ;;  %v5099_v6 = vmul.f32 0.2, %v4827_v1  ;;  %5950 = vmatmul.msk.bf16.gmra.mxu0 %vm1184_vm1, %v1050_v0  ;;  %v4052_v57 = vrot.slane %v4050_v48, 2  ;;  %v2827_v0 = vsel %vm2718_vm2, %v2824_v20, %v2826_v55 }
 0x34a   : > { %v3292_v7 = vpop.f32.mrf.mxu2 }
 0x34b   : > { %v5235_v9 = vsel %vm4963_vm14, %v4827_v1, %v5099_v6  ;;  %v3503_v10 = vadd.f32 %v3292_v7, %v2111_v2  ;;  %6442 = vmatmul.msk.bf16.gmra.mxu3 %vm1184_vm1, %v4036_v4  ;;  %v4053_v2 = vor.u32 %v4052_v57, %v4049_v56  ;;  %v1066_v6 = vsel %vm630_vm3, %v1061_v61, %v1065_v62 }
 0x34c   : > { %v5371_v11 = vpack.c.bf16 %v5235_v9, %v5235_v9 }
 0x34e   : > { %5508 = vst.msk [vmem:[%s6777_s6 + $0x154] sm:$0xf] %vm5422_vm6, %v5371_v11  ;;  %v4617_v14 = vpop.f32.mrf.mxu3  ;;  %v1619_v15 = vpop.f32.mrf.mxu0  ;;  %v7798_v11 = vld [vmem:[%s6675_s30 + $0x1c8] sm:$0xff] }
 0x34f   : > { %v4828_v18 = vadd.f32 %v4617_v14, %v3503_v10  ;;  %v2115_v19 = vpop.f32.mrf.mxu1  ;;  %v2113_v24 = vadd.f32 %v2112_v3, %v1619_v15  ;;  %v4054_v10 = vsel %vm3560_vm4, %v4044_v31, %v4053_v2  ;;  %v7802_v14 = vld [vmem:[%s6675_s30 + $0x1b8] sm:$0xff]  ;;  %v2828_v26 = vrot.slane %v7798_v11, 1 }
 0x350   : > { %v1075_v57 = vshrl.u32 %v7802_v14, 16 }
 0x351   : > { %vm4964_vm15 = vcmp.gt.f32.partialorder %v4828_v18, 0.0  ;;  %v5100_v23 = vmul.f32 0.2, %v4828_v18 }
 0x352   : > { %v3294_v25 = vpop.f32.mrf.mxu2  ;;  %6023 = vmatmul.msk.bf16.gmra.mxu1 %vm1184_vm1, %v7733_v37 }
 0x353   : > { %v5236_v28 = vsel %vm4964_vm15, %v4828_v18, %v5100_v23  ;;  %v3504_v32 = vadd.f32 %v3294_v25, %v2113_v24  ;;  %v4056_v18 = vshrl.u32 %v7798_v11, 16  ;;  %v1071_v23 = vshll.u32 %v7802_v14, 16 }
 0x354   : > { %v5372_v30 = vpack.c.bf16 %v5236_v28, %v5236_v28 }
 0x355   : > { %v4058_v27 = vrot.slane %v4056_v18, 1 }
 0x356   : > { %5509 = vst.msk [vmem:[%s6777_s6 + $0x158] sm:$0xf] %vm5422_vm6, %v5372_v30  ;;  %v4619_v33 = vpop.f32.mrf.mxu3  ;;  %v1622_v34 = vpop.f32.mrf.mxu0 }
 0x357   : > { %6369 = vmatmul.msk.bf16.gmra.mxu2 %vm1184_vm1, %v2825_v29  ;;  %v4829_v36 = vadd.f32 %v4619_v33, %v3504_v32  ;;  %v2116_v37 = vadd.f32 %v2115_v19, %v1622_v34  ;;  %v2117_v38 = vpop.f32.mrf.mxu1  ;;  %v4059_v19 = vshll.u32 %v7798_v11, 16  ;;  %v1069_v32 = vor.u32 %v1067_v22, %v1065_v62 }
 0x358   : > { %v1073_v33 = vrot.slane %v1071_v23, 1 }
 0x359   : > { %vm4965_vm0 = vcmp.gt.f32.partialorder %v4829_v36, 0.0  ;;  %v5101_v41 = vmul.f32 0.2, %v4829_v36  ;;  %5951 = vmatmul.msk.bf16.gmra.mxu0 %vm1184_vm1, %v1058_v35  ;;  %v4061_v28 = vrot.slane %v4059_v19, 2  ;;  %v2829_v35 = vsel %vm2718_vm2, %v2826_v55, %v2828_v26 }
 0x35a   : > { %v3297_v42 = vpop.f32.mrf.mxu2 }
 0x35b   : > { %v5237_v44 = vsel %vm4965_vm0, %v4829_v36, %v5101_v41  ;;  %v3505_v45 = vadd.f32 %v3297_v42, %v2116_v37  ;;  %6443 = vmatmul.msk.bf16.gmra.mxu3 %vm1184_vm1, %v4045_v39  ;;  %v4062_v37 = vor.u32 %v4061_v28, %v4058_v27  ;;  %v1074_v41 = vsel %vm630_vm3, %v1069_v32, %v1073_v33 }
 0x35c   : > { %v5373_v46 = vpack.c.bf16 %v5237_v44, %v5237_v44 }
 0x35e   : > { %5510 = vst.msk [vmem:[%s6777_s6 + $0x15c] sm:$0xf] %vm5422_vm6, %v5373_v46  ;;  %v4622_v49 = vpop.f32.mrf.mxu3  ;;  %v1624_v50 = vpop.f32.mrf.mxu0  ;;  %v7821_v46 = vld [vmem:[%s6675_s30 + $0x1d0] sm:$0xff] }
 0x35f   : > { %v4830_v53 = vadd.f32 %v4622_v49, %v3505_v45  ;;  %v2120_v54 = vpop.f32.mrf.mxu1  ;;  %v2118_v59 = vadd.f32 %v2117_v38, %v1624_v50  ;;  %v4063_v45 = vsel %vm3560_vm4, %v4053_v2, %v4062_v37  ;;  %v7825_v49 = vld [vmem:[%s6675_s30 + $0x1c0] sm:$0xff]  ;;  %v2830_v61 = vrot.slane %v7821_v46, 1 }
 0x360   : > { %v1083_v28 = vshrl.u32 %v7825_v49, 16 }
 0x361   : > { %vm4966_vm5 = vcmp.gt.f32.partialorder %v4830_v53, 0.0  ;;  %v5102_v58 = vmul.f32 0.2, %v4830_v53 }
 0x362   : > { %v3299_v60 = vpop.f32.mrf.mxu2  ;;  %6024 = vmatmul.msk.bf16.gmra.mxu1 %vm1184_vm1, %v7756_v8 }
 0x363   : > { %v5238_v63 = vsel %vm4966_vm5, %v4830_v53, %v5102_v58  ;;  %v3506_v3 = vadd.f32 %v3299_v60, %v2118_v59  ;;  %v4065_v53 = vshrl.u32 %v7821_v46, 16  ;;  %v1079_v58 = vshll.u32 %v7825_v49, 16 }
 0x364   : > { %v5374_v1 = vpack.c.bf16 %v5238_v63, %v5238_v63 }
 0x365   : > { %v4067_v62 = vrot.slane %v4065_v53, 1 }
 0x366   : > { %5511 = vst.msk [vmem:[%s6777_s6 + $0x160] sm:$0xf] %vm5422_vm6, %v5374_v1  ;;  %v4624_v4 = vpop.f32.mrf.mxu3  ;;  %v1627_v5 = vpop.f32.mrf.mxu0 }
 0x367   : > { %6370 = vmatmul.msk.bf16.gmra.mxu2 %vm1184_vm1, %v2827_v0  ;;  %v4831_v7 = vadd.f32 %v4624_v4, %v3506_v3  ;;  %v2121_v8 = vadd.f32 %v2120_v54, %v1627_v5  ;;  %v2122_v9 = vpop.f32.mrf.mxu1  ;;  %v4068_v54 = vshll.u32 %v7821_v46, 16  ;;  %v1077_v3 = vor.u32 %v1075_v57, %v1073_v33 }
 0x368   : > { %v1081_v4 = vrot.slane %v1079_v58, 1 }
 0x369   : > { %vm4967_vm7 = vcmp.gt.f32.partialorder %v4831_v7, 0.0  ;;  %v5103_v12 = vmul.f32 0.2, %v4831_v7  ;;  %5952 = vmatmul.msk.bf16.gmra.mxu0 %vm1184_vm1, %v1066_v6  ;;  %v4070_v63 = vrot.slane %v4068_v54, 2  ;;  %v2831_v6 = vsel %vm2718_vm2, %v2828_v26, %v2830_v61 }
 0x36a   : > { %v3302_v13 = vpop.f32.mrf.mxu2 }
 0x36b   : > { %v5239_v15 = vsel %vm4967_vm7, %v4831_v7, %v5103_v12  ;;  %v3507_v16 = vadd.f32 %v3302_v13, %v2121_v8  ;;  %6444 = vmatmul.msk.bf16.gmra.mxu3 %vm1184_vm1, %v4054_v10  ;;  %v4071_v8 = vor.u32 %v4070_v63, %v4067_v62  ;;  %v1082_v12 = vsel %vm630_vm3, %v1077_v3, %v1081_v4 }
 0x36c   : > { %v5375_v17 = vpack.c.bf16 %v5239_v15, %v5239_v15 }
 0x36e   : > { %5512 = vst.msk [vmem:[%s6777_s6 + $0x164] sm:$0xf] %vm5422_vm6, %v5375_v17  ;;  %v4627_v20 = vpop.f32.mrf.mxu3  ;;  %v1629_v21 = vpop.f32.mrf.mxu0  ;;  %v7844_v17 = vld [vmem:[%s6675_s30 + $0x1d8] sm:$0xff] }
 0x36f   : > { %v4832_v24 = vadd.f32 %v4627_v20, %v3507_v16  ;;  %v2125_v25 = vpop.f32.mrf.mxu1  ;;  %v2123_v30 = vadd.f32 %v2122_v9, %v1629_v21  ;;  %v4072_v16 = vsel %vm3560_vm4, %v4062_v37, %v4071_v8  ;;  %v7848_v20 = vld [vmem:[%s6675_s30 + $0x1c8] sm:$0xff]  ;;  %v2832_v32 = vrot.slane %v7844_v17, 1 }
 0x370   : > { %v1091_v63 = vshrl.u32 %v7848_v20, 16 }
 0x371   : > { %vm4968_vm8 = vcmp.gt.f32.partialorder %v4832_v24, 0.0  ;;  %v5104_v29 = vmul.f32 0.2, %v4832_v24 }
 0x372   : > { %v3304_v31 = vpop.f32.mrf.mxu2  ;;  %6025 = vmatmul.msk.bf16.gmra.mxu1 %vm1184_vm1, %v7779_v43 }
 0x373   : > { %v5240_v34 = vsel %vm4968_vm8, %v4832_v24, %v5104_v29  ;;  %v3508_v38 = vadd.f32 %v3304_v31, %v2123_v30  ;;  %v4074_v24 = vshrl.u32 %v7844_v17, 16  ;;  %v1087_v29 = vshll.u32 %v7848_v20, 16 }
 0x374   : > { %v5376_v36 = vpack.c.bf16 %v5240_v34, %v5240_v34 }
 0x375   : > { %v4076_v33 = vrot.slane %v4074_v24, 1 }
 0x376   : > { %5513 = vst.msk [vmem:[%s6777_s6 + $0x168] sm:$0xf] %vm5422_vm6, %v5376_v36  ;;  %v4629_v39 = vpop.f32.mrf.mxu3  ;;  %v1632_v40 = vpop.f32.mrf.mxu0 }
 0x377   : > { %6371 = vmatmul.msk.bf16.gmra.mxu2 %vm1184_vm1, %v2829_v35  ;;  %v4833_v42 = vadd.f32 %v4629_v39, %v3508_v38  ;;  %v2126_v43 = vadd.f32 %v2125_v25, %v1632_v40  ;;  %v2127_v44 = vpop.f32.mrf.mxu1  ;;  %v4077_v25 = vshll.u32 %v7844_v17, 16  ;;  %v1085_v38 = vor.u32 %v1083_v28, %v1081_v4 }
 0x378   : > { %v1089_v39 = vrot.slane %v1087_v29, 1 }
 0x379   : > { %vm4969_vm9 = vcmp.gt.f32.partialorder %v4833_v42, 0.0  ;;  %v5105_v47 = vmul.f32 0.2, %v4833_v42  ;;  %5953 = vmatmul.msk.bf16.gmra.mxu0 %vm1184_vm1, %v1074_v41  ;;  %v4079_v34 = vrot.slane %v4077_v25, 2  ;;  %v2833_v41 = vsel %vm2718_vm2, %v2830_v61, %v2832_v32 }
 0x37a   : > { %v3307_v48 = vpop.f32.mrf.mxu2 }
 0x37b   : > { %v5241_v50 = vsel %vm4969_vm9, %v4833_v42, %v5105_v47  ;;  %v3509_v51 = vadd.f32 %v3307_v48, %v2126_v43  ;;  %6445 = vmatmul.msk.bf16.gmra.mxu3 %vm1184_vm1, %v4063_v45  ;;  %v4080_v43 = vor.u32 %v4079_v34, %v4076_v33  ;;  %v1090_v47 = vsel %vm630_vm3, %v1085_v38, %v1089_v39 }
 0x37c   : > { %v5377_v52 = vpack.c.bf16 %v5241_v50, %v5241_v50 }
 0x37e   : > { %5514 = vst.msk [vmem:[%s6777_s6 + $0x16c] sm:$0xf] %vm5422_vm6, %v5377_v52  ;;  %v4632_v55 = vpop.f32.mrf.mxu3  ;;  %v1634_v56 = vpop.f32.mrf.mxu0  ;;  %v7867_v52 = vld [vmem:[%s6675_s30 + $0x1e0] sm:$0xff] }
 0x37f   : > { %v4834_v59 = vadd.f32 %v4632_v55, %v3509_v51  ;;  %v2130_v60 = vpop.f32.mrf.mxu1  ;;  %v2128_v1 = vadd.f32 %v2127_v44, %v1634_v56  ;;  %v4081_v51 = vsel %vm3560_vm4, %v4071_v8, %v4080_v43  ;;  %v7871_v55 = vld [vmem:[%s6675_s30 + $0x1d0] sm:$0xff]  ;;  %v2834_v3 = vrot.slane %v7867_v52, 1 }
 0x380   : > { %v1099_v34 = vshrl.u32 %v7871_v55, 16 }
 0x381   : > { %vm4970_vm10 = vcmp.gt.f32.partialorder %v4834_v59, 0.0  ;;  %v5106_v0 = vmul.f32 0.2, %v4834_v59 }
 0x382   : > { %v3309_v2 = vpop.f32.mrf.mxu2  ;;  %6026 = vmatmul.msk.bf16.gmra.mxu1 %vm1184_vm1, %v7802_v14 }
 0x383   : > { %v5242_v5 = vsel %vm4970_vm10, %v4834_v59, %v5106_v0  ;;  %v3510_v9 = vadd.f32 %v3309_v2, %v2128_v1  ;;  %v4083_v59 = vshrl.u32 %v7867_v52, 16  ;;  %v1095_v0 = vshll.u32 %v7871_v55, 16 }
 0x384   : > { %v5378_v7 = vpack.c.bf16 %v5242_v5, %v5242_v5 }
 0x385   : > { %v4085_v4 = vrot.slane %v4083_v59, 1 }
 0x386   : > { %5515 = vst.msk [vmem:[%s6777_s6 + $0x170] sm:$0xf] %vm5422_vm6, %v5378_v7  ;;  %v4634_v10 = vpop.f32.mrf.mxu3  ;;  %v1637_v11 = vpop.f32.mrf.mxu0 }
 0x387   : > { %6372 = vmatmul.msk.bf16.gmra.mxu2 %vm1184_vm1, %v2831_v6  ;;  %v4835_v13 = vadd.f32 %v4634_v10, %v3510_v9  ;;  %v2131_v14 = vadd.f32 %v2130_v60, %v1637_v11  ;;  %v2132_v15 = vpop.f32.mrf.mxu1  ;;  %v4086_v60 = vshll.u32 %v7867_v52, 16  ;;  %v1093_v9 = vor.u32 %v1091_v63, %v1089_v39 }
 0x388   : > { %v1097_v10 = vrot.slane %v1095_v0, 1 }
 0x389   : > { %vm4971_vm11 = vcmp.gt.f32.partialorder %v4835_v13, 0.0  ;;  %v5107_v18 = vmul.f32 0.2, %v4835_v13  ;;  %5954 = vmatmul.msk.bf16.gmra.mxu0 %vm1184_vm1, %v1082_v12  ;;  %v4088_v5 = vrot.slane %v4086_v60, 2  ;;  %v2835_v12 = vsel %vm2718_vm2, %v2832_v32, %v2834_v3 }
 0x38a   : > { %v3312_v19 = vpop.f32.mrf.mxu2 }
 0x38b   : > { %v5243_v21 = vsel %vm4971_vm11, %v4835_v13, %v5107_v18  ;;  %v3511_v22 = vadd.f32 %v3312_v19, %v2131_v14  ;;  %6446 = vmatmul.msk.bf16.gmra.mxu3 %vm1184_vm1, %v4072_v16  ;;  %v4089_v14 = vor.u32 %v4088_v5, %v4085_v4  ;;  %v1098_v18 = vsel %vm630_vm3, %v1093_v9, %v1097_v10 }
 0x38c   : > { %v5379_v23 = vpack.c.bf16 %v5243_v21, %v5243_v21 }
 0x38e   : > { %5516 = vst.msk [vmem:[%s6777_s6 + $0x174] sm:$0xf] %vm5422_vm6, %v5379_v23  ;;  %v4637_v26 = vpop.f32.mrf.mxu3  ;;  %v1639_v27 = vpop.f32.mrf.mxu0  ;;  %v7890_v23 = vld [vmem:[%s6675_s30 + $0x1e8] sm:$0xff] }
 0x38f   : > { %v4836_v30 = vadd.f32 %v4637_v26, %v3511_v22  ;;  %v2135_v31 = vpop.f32.mrf.mxu1  ;;  %v2133_v36 = vadd.f32 %v2132_v15, %v1639_v27  ;;  %v4090_v22 = vsel %vm3560_vm4, %v4080_v43, %v4089_v14  ;;  %v7894_v26 = vld [vmem:[%s6675_s30 + $0x1d8] sm:$0xff]  ;;  %v2836_v38 = vrot.slane %v7890_v23, 1 }
 0x390   : > { %v1107_v5 = vshrl.u32 %v7894_v26, 16 }
 0x391   : > { %vm4972_vm12 = vcmp.gt.f32.partialorder %v4836_v30, 0.0  ;;  %v5108_v35 = vmul.f32 0.2, %v4836_v30 }
 0x392   : > { %v3314_v37 = vpop.f32.mrf.mxu2  ;;  %6027 = vmatmul.msk.bf16.gmra.mxu1 %vm1184_vm1, %v7825_v49 }
 0x393   : > { %v5244_v40 = vsel %vm4972_vm12, %v4836_v30, %v5108_v35  ;;  %v3512_v44 = vadd.f32 %v3314_v37, %v2133_v36  ;;  %v4092_v30 = vshrl.u32 %v7890_v23, 16  ;;  %v1103_v35 = vshll.u32 %v7894_v26, 16 }
 0x394   : > { %v5380_v42 = vpack.c.bf16 %v5244_v40, %v5244_v40 }
 0x395   : > { %v4094_v39 = vrot.slane %v4092_v30, 1 }
 0x396   : > { %5517 = vst.msk [vmem:[%s6777_s6 + $0x178] sm:$0xf] %vm5422_vm6, %v5380_v42  ;;  %v4639_v45 = vpop.f32.mrf.mxu3  ;;  %v1642_v46 = vpop.f32.mrf.mxu0 }
 0x397   : > { %6373 = vmatmul.msk.bf16.gmra.mxu2 %vm1184_vm1, %v2833_v41  ;;  %v4837_v48 = vadd.f32 %v4639_v45, %v3512_v44  ;;  %v2136_v49 = vadd.f32 %v2135_v31, %v1642_v46  ;;  %v2137_v50 = vpop.f32.mrf.mxu1  ;;  %v4095_v31 = vshll.u32 %v7890_v23, 16  ;;  %v1101_v44 = vor.u32 %v1099_v34, %v1097_v10 }
 0x398   : > { %v1105_v45 = vrot.slane %v1103_v35, 1 }
 0x399   : > { %vm4973_vm13 = vcmp.gt.f32.partialorder %v4837_v48, 0.0  ;;  %v5109_v53 = vmul.f32 0.2, %v4837_v48  ;;  %5955 = vmatmul.msk.bf16.gmra.mxu0 %vm1184_vm1, %v1090_v47  ;;  %v4097_v40 = vrot.slane %v4095_v31, 2  ;;  %v2837_v47 = vsel %vm2718_vm2, %v2834_v3, %v2836_v38 }
 0x39a   : > { %v3317_v54 = vpop.f32.mrf.mxu2 }
 0x39b   : > { %v5245_v56 = vsel %vm4973_vm13, %v4837_v48, %v5109_v53  ;;  %v3513_v57 = vadd.f32 %v3317_v54, %v2136_v49  ;;  %6447 = vmatmul.msk.bf16.gmra.mxu3 %vm1184_vm1, %v4081_v51  ;;  %v4098_v49 = vor.u32 %v4097_v40, %v4094_v39  ;;  %v1106_v53 = vsel %vm630_vm3, %v1101_v44, %v1105_v45 }
 0x39c   : > { %v5381_v58 = vpack.c.bf16 %v5245_v56, %v5245_v56 }
 0x39e   : > { %5518 = vst.msk [vmem:[%s6777_s6 + $0x17c] sm:$0xf] %vm5422_vm6, %v5381_v58  ;;  %v4642_v61 = vpop.f32.mrf.mxu3  ;;  %v1644_v62 = vpop.f32.mrf.mxu0  ;;  %v7913_v58 = vld [vmem:[%s6675_s30 + $0x1f0] sm:$0xff] }
 0x39f   : > { %v4838_v1 = vadd.f32 %v4642_v61, %v3513_v57  ;;  %v2140_v2 = vpop.f32.mrf.mxu1  ;;  %v2138_v7 = vadd.f32 %v2137_v50, %v1644_v62  ;;  %v4099_v57 = vsel %vm3560_vm4, %v4089_v14, %v4098_v49  ;;  %v7917_v61 = vld [vmem:[%s6675_s30 + $0x1e0] sm:$0xff]  ;;  %v2838_v9 = vrot.slane %v7913_v58, 1 }
 0x3a0   : > { %v1115_v40 = vshrl.u32 %v7917_v61, 16 }
 0x3a1   : > { %vm4974_vm14 = vcmp.gt.f32.partialorder %v4838_v1, 0.0  ;;  %v5110_v6 = vmul.f32 0.2, %v4838_v1 }
 0x3a2   : > { %v3319_v8 = vpop.f32.mrf.mxu2  ;;  %6028 = vmatmul.msk.bf16.gmra.mxu1 %vm1184_vm1, %v7848_v20 }
 0x3a3   : > { %v5246_v11 = vsel %vm4974_vm14, %v4838_v1, %v5110_v6  ;;  %v3514_v15 = vadd.f32 %v3319_v8, %v2138_v7  ;;  %v4101_v1 = vshrl.u32 %v7913_v58, 16  ;;  %v1111_v6 = vshll.u32 %v7917_v61, 16 }
 0x3a4   : > { %v5382_v13 = vpack.c.bf16 %v5246_v11, %v5246_v11 }
 0x3a5   : > { %v4103_v10 = vrot.slane %v4101_v1, 1 }
 0x3a6   : > { %5519 = vst.msk [vmem:[%s6777_s6 + $0x180] sm:$0xf] %vm5422_vm6, %v5382_v13  ;;  %v4644_v16 = vpop.f32.mrf.mxu3  ;;  %v1647_v17 = vpop.f32.mrf.mxu0 }
 0x3a7   : > { %6374 = vmatmul.msk.bf16.gmra.mxu2 %vm1184_vm1, %v2835_v12  ;;  %v4839_v19 = vadd.f32 %v4644_v16, %v3514_v15  ;;  %v2141_v20 = vadd.f32 %v2140_v2, %v1647_v17  ;;  %v2142_v21 = vpop.f32.mrf.mxu1  ;;  %v4104_v2 = vshll.u32 %v7913_v58, 16  ;;  %v1109_v15 = vor.u32 %v1107_v5, %v1105_v45 }
 0x3a8   : > { %v1113_v16 = vrot.slane %v1111_v6, 1 }
 0x3a9   : > { %vm4975_vm15 = vcmp.gt.f32.partialorder %v4839_v19, 0.0  ;;  %v5111_v24 = vmul.f32 0.2, %v4839_v19  ;;  %5956 = vmatmul.msk.bf16.gmra.mxu0 %vm1184_vm1, %v1098_v18  ;;  %v4106_v11 = vrot.slane %v4104_v2, 2  ;;  %v2839_v18 = vsel %vm2718_vm2, %v2836_v38, %v2838_v9 }
 0x3aa   : > { %v3322_v25 = vpop.f32.mrf.mxu2 }
 0x3ab   : > { %v5247_v27 = vsel %vm4975_vm15, %v4839_v19, %v5111_v24  ;;  %v3515_v28 = vadd.f32 %v3322_v25, %v2141_v20  ;;  %6448 = vmatmul.msk.bf16.gmra.mxu3 %vm1184_vm1, %v4090_v22  ;;  %v4107_v20 = vor.u32 %v4106_v11, %v4103_v10  ;;  %v1114_v24 = vsel %vm630_vm3, %v1109_v15, %v1113_v16 }
 0x3ac   : > { %v5383_v29 = vpack.c.bf16 %v5247_v27, %v5247_v27 }
 0x3ae   : > { %5520 = vst.msk [vmem:[%s6777_s6 + $0x184] sm:$0xf] %vm5422_vm6, %v5383_v29  ;;  %v4647_v32 = vpop.f32.mrf.mxu3  ;;  %v1649_v33 = vpop.f32.mrf.mxu0  ;;  %v7936_v29 = vld [vmem:[%s6675_s30 + $0x1f8] sm:$0xff] }
 0x3af   : > { %v4840_v36 = vadd.f32 %v4647_v32, %v3515_v28  ;;  %v2145_v37 = vpop.f32.mrf.mxu1  ;;  %v2143_v42 = vadd.f32 %v2142_v21, %v1649_v33  ;;  %v4108_v28 = vsel %vm3560_vm4, %v4098_v49, %v4107_v20  ;;  %v7940_v32 = vld [vmem:[%s6675_s30 + $0x1e8] sm:$0xff]  ;;  %v2840_v44 = vrot.slane %v7936_v29, 1 }
 0x3b0   : > { %v1123_v11 = vshrl.u32 %v7940_v32, 16 }
 0x3b1   : > { %vm4976_vm0 = vcmp.gt.f32.partialorder %v4840_v36, 0.0  ;;  %v5112_v41 = vmul.f32 0.2, %v4840_v36 }
 0x3b2   : > { %v3324_v43 = vpop.f32.mrf.mxu2  ;;  %6029 = vmatmul.msk.bf16.gmra.mxu1 %vm1184_vm1, %v7871_v55 }
 0x3b3   : > { %v5248_v46 = vsel %vm4976_vm0, %v4840_v36, %v5112_v41  ;;  %v3516_v50 = vadd.f32 %v3324_v43, %v2143_v42  ;;  %v4110_v36 = vshrl.u32 %v7936_v29, 16  ;;  %v1119_v41 = vshll.u32 %v7940_v32, 16 }
 0x3b4   : > { %v5384_v48 = vpack.c.bf16 %v5248_v46, %v5248_v46 }
 0x3b5   : > { %v4112_v45 = vrot.slane %v4110_v36, 1 }
 0x3b6   : > { %5521 = vst.msk [vmem:[%s6777_s6 + $0x188] sm:$0xf] %vm5422_vm6, %v5384_v48  ;;  %v4649_v51 = vpop.f32.mrf.mxu3  ;;  %v1652_v52 = vpop.f32.mrf.mxu0 }
 0x3b7   : > { %6375 = vmatmul.msk.bf16.gmra.mxu2 %vm1184_vm1, %v2837_v47  ;;  %v4841_v54 = vadd.f32 %v4649_v51, %v3516_v50  ;;  %v2146_v55 = vadd.f32 %v2145_v37, %v1652_v52  ;;  %v2147_v56 = vpop.f32.mrf.mxu1  ;;  %v4113_v37 = vshll.u32 %v7936_v29, 16  ;;  %v1117_v50 = vor.u32 %v1115_v40, %v1113_v16 }
 0x3b8   : > { %v1121_v51 = vrot.slane %v1119_v41, 1 }
 0x3b9   : > { %vm4977_vm5 = vcmp.gt.f32.partialorder %v4841_v54, 0.0  ;;  %v5113_v59 = vmul.f32 0.2, %v4841_v54  ;;  %5957 = vmatmul.msk.bf16.gmra.mxu0 %vm1184_vm1, %v1106_v53  ;;  %v4115_v46 = vrot.slane %v4113_v37, 2  ;;  %v2841_v53 = vsel %vm2718_vm2, %v2838_v9, %v2840_v44 }
 0x3ba   : > { %v3327_v60 = vpop.f32.mrf.mxu2 }
 0x3bb   : > { %v5249_v62 = vsel %vm4977_vm5, %v4841_v54, %v5113_v59  ;;  %v3517_v63 = vadd.f32 %v3327_v60, %v2146_v55  ;;  %6449 = vmatmul.msk.bf16.gmra.mxu3 %vm1184_vm1, %v4099_v57  ;;  %v4116_v55 = vor.u32 %v4115_v46, %v4112_v45  ;;  %v1122_v59 = vsel %vm630_vm3, %v1117_v50, %v1121_v51 }
 0x3bc   : > { %v5385_v0 = vpack.c.bf16 %v5249_v62, %v5249_v62 }
 0x3be   : > { %5522 = vst.msk [vmem:[%s6777_s6 + $0x18c] sm:$0xf] %vm5422_vm6, %v5385_v0  ;;  %v4652_v3 = vpop.f32.mrf.mxu3  ;;  %v1654_v4 = vpop.f32.mrf.mxu0  ;;  %v7959_v0 = vld [vmem:[%s6675_s30 + $0x200] sm:$0xff] }
 0x3bf   : > { %v4842_v7 = vadd.f32 %v4652_v3, %v3517_v63  ;;  %v2150_v8 = vpop.f32.mrf.mxu1  ;;  %v2148_v13 = vadd.f32 %v2147_v56, %v1654_v4  ;;  %v4117_v63 = vsel %vm3560_vm4, %v4107_v20, %v4116_v55  ;;  %v7963_v3 = vld [vmem:[%s6675_s30 + $0x1f0] sm:$0xff]  ;;  %v2842_v15 = vrot.slane %v7959_v0, 1 }
 0x3c0   : > { %v1131_v46 = vshrl.u32 %v7963_v3, 16 }
 0x3c1   : > { %vm4978_vm7 = vcmp.gt.f32.partialorder %v4842_v7, 0.0  ;;  %v5114_v12 = vmul.f32 0.2, %v4842_v7 }
 0x3c2   : > { %v3329_v14 = vpop.f32.mrf.mxu2  ;;  %6030 = vmatmul.msk.bf16.gmra.mxu1 %vm1184_vm1, %v7894_v26 }
 0x3c3   : > { %v5250_v17 = vsel %vm4978_vm7, %v4842_v7, %v5114_v12  ;;  %v3518_v21 = vadd.f32 %v3329_v14, %v2148_v13  ;;  %v4119_v7 = vshrl.u32 %v7959_v0, 16  ;;  %v1127_v12 = vshll.u32 %v7963_v3, 16 }
 0x3c4   : > { %v5386_v19 = vpack.c.bf16 %v5250_v17, %v5250_v17 }
 0x3c5   : > { %v4121_v16 = vrot.slane %v4119_v7, 1 }
 0x3c6   : > { %5523 = vst.msk [vmem:[%s6777_s6 + $0x190] sm:$0xf] %vm5422_vm6, %v5386_v19  ;;  %v4654_v22 = vpop.f32.mrf.mxu3  ;;  %v1657_v23 = vpop.f32.mrf.mxu0 }
 0x3c7   : > { %6376 = vmatmul.msk.bf16.gmra.mxu2 %vm1184_vm1, %v2839_v18  ;;  %v4843_v25 = vadd.f32 %v4654_v22, %v3518_v21  ;;  %v2151_v26 = vadd.f32 %v2150_v8, %v1657_v23  ;;  %v2152_v27 = vpop.f32.mrf.mxu1  ;;  %v4122_v8 = vshll.u32 %v7959_v0, 16  ;;  %v1125_v21 = vor.u32 %v1123_v11, %v1121_v51 }
 0x3c8   : > { %v1129_v22 = vrot.slane %v1127_v12, 1 }
 0x3c9   : > { %vm4979_vm8 = vcmp.gt.f32.partialorder %v4843_v25, 0.0  ;;  %v5115_v30 = vmul.f32 0.2, %v4843_v25  ;;  %5958 = vmatmul.msk.bf16.gmra.mxu0 %vm1184_vm1, %v1114_v24  ;;  %v4124_v17 = vrot.slane %v4122_v8, 2  ;;  %v2843_v24 = vsel %vm2718_vm2, %v2840_v44, %v2842_v15 }
 0x3ca   : > { %v3332_v31 = vpop.f32.mrf.mxu2 }
 0x3cb   : > { %v5251_v33 = vsel %vm4979_vm8, %v4843_v25, %v5115_v30  ;;  %v3519_v34 = vadd.f32 %v3332_v31, %v2151_v26  ;;  %6450 = vmatmul.msk.bf16.gmra.mxu3 %vm1184_vm1, %v4108_v28  ;;  %v4125_v26 = vor.u32 %v4124_v17, %v4121_v16  ;;  %v1130_v30 = vsel %vm630_vm3, %v1125_v21, %v1129_v22 }
 0x3cc   : > { %v5387_v35 = vpack.c.bf16 %v5251_v33, %v5251_v33 }
 0x3ce   : > { %5524 = vst.msk [vmem:[%s6777_s6 + $0x194] sm:$0xf] %vm5422_vm6, %v5387_v35  ;;  %v4657_v38 = vpop.f32.mrf.mxu3  ;;  %v1659_v39 = vpop.f32.mrf.mxu0  ;;  %v7982_v35 = vld [vmem:[%s6675_s30 + $0x208] sm:$0xff] }
 0x3cf   : > { %v4844_v42 = vadd.f32 %v4657_v38, %v3519_v34  ;;  %v2155_v43 = vpop.f32.mrf.mxu1  ;;  %v2153_v48 = vadd.f32 %v2152_v27, %v1659_v39  ;;  %v4126_v34 = vsel %vm3560_vm4, %v4116_v55, %v4125_v26  ;;  %v7986_v38 = vld [vmem:[%s6675_s30 + $0x1f8] sm:$0xff]  ;;  %v2844_v50 = vrot.slane %v7982_v35, 1 }
 0x3d0   : > { %v1139_v17 = vshrl.u32 %v7986_v38, 16 }
 0x3d1   : > { %vm4980_vm9 = vcmp.gt.f32.partialorder %v4844_v42, 0.0  ;;  %v5116_v47 = vmul.f32 0.2, %v4844_v42 }
 0x3d2   : > { %v3334_v49 = vpop.f32.mrf.mxu2  ;;  %6031 = vmatmul.msk.bf16.gmra.mxu1 %vm1184_vm1, %v7917_v61 }
 0x3d3   : > { %v5252_v52 = vsel %vm4980_vm9, %v4844_v42, %v5116_v47  ;;  %v3520_v56 = vadd.f32 %v3334_v49, %v2153_v48  ;;  %v4128_v42 = vshrl.u32 %v7982_v35, 16  ;;  %v1135_v47 = vshll.u32 %v7986_v38, 16 }
 0x3d4   : > { %v5388_v54 = vpack.c.bf16 %v5252_v52, %v5252_v52 }
 0x3d5   : > { %v4130_v51 = vrot.slane %v4128_v42, 1 }
 0x3d6   : > { %5525 = vst.msk [vmem:[%s6777_s6 + $0x198] sm:$0xf] %vm5422_vm6, %v5388_v54  ;;  %v4659_v57 = vpop.f32.mrf.mxu3  ;;  %v1662_v58 = vpop.f32.mrf.mxu0 }
 0x3d7   : > { %6377 = vmatmul.msk.bf16.gmra.mxu2 %vm1184_vm1, %v2841_v53  ;;  %v4845_v60 = vadd.f32 %v4659_v57, %v3520_v56  ;;  %v2156_v61 = vadd.f32 %v2155_v43, %v1662_v58  ;;  %v2157_v62 = vpop.f32.mrf.mxu1  ;;  %v4131_v43 = vshll.u32 %v7982_v35, 16  ;;  %v1133_v56 = vor.u32 %v1131_v46, %v1129_v22 }
 0x3d8   : > { %v1137_v57 = vrot.slane %v1135_v47, 1 }
 0x3d9   : > { %vm4981_vm10 = vcmp.gt.f32.partialorder %v4845_v60, 0.0  ;;  %v5117_v1 = vmul.f32 0.2, %v4845_v60  ;;  %5959 = vmatmul.msk.bf16.gmra.mxu0 %vm1184_vm1, %v1122_v59  ;;  %v4133_v52 = vrot.slane %v4131_v43, 2  ;;  %v2845_v59 = vsel %vm2718_vm2, %v2842_v15, %v2844_v50 }
 0x3da   : > { %v3337_v2 = vpop.f32.mrf.mxu2 }
 0x3db   : > { %v5253_v4 = vsel %vm4981_vm10, %v4845_v60, %v5117_v1  ;;  %v3521_v5 = vadd.f32 %v3337_v2, %v2156_v61  ;;  %6451 = vmatmul.msk.bf16.gmra.mxu3 %vm1184_vm1, %v4117_v63  ;;  %v4134_v61 = vor.u32 %v4133_v52, %v4130_v51  ;;  %v1138_v1 = vsel %vm630_vm3, %v1133_v56, %v1137_v57 }
 0x3dc   : > { %v5389_v6 = vpack.c.bf16 %v5253_v4, %v5253_v4 }
 0x3de   : > { %5526 = vst.msk [vmem:[%s6777_s6 + $0x19c] sm:$0xf] %vm5422_vm6, %v5389_v6  ;;  %v4662_v9 = vpop.f32.mrf.mxu3  ;;  %v1664_v10 = vpop.f32.mrf.mxu0  ;;  %v8005_v6 = vld [vmem:[%s6675_s30 + $0x210] sm:$0xff] }
 0x3df   : > { %v4846_v13 = vadd.f32 %v4662_v9, %v3521_v5  ;;  %v2160_v14 = vpop.f32.mrf.mxu1  ;;  %v2158_v19 = vadd.f32 %v2157_v62, %v1664_v10  ;;  %v4135_v5 = vsel %vm3560_vm4, %v4125_v26, %v4134_v61  ;;  %v8009_v9 = vld [vmem:[%s6675_s30 + $0x200] sm:$0xff]  ;;  %v2846_v21 = vrot.slane %v8005_v6, 1 }
 0x3e0   : > { %v1147_v52 = vshrl.u32 %v8009_v9, 16 }
 0x3e1   : > { %vm4982_vm11 = vcmp.gt.f32.partialorder %v4846_v13, 0.0  ;;  %v5118_v18 = vmul.f32 0.2, %v4846_v13 }
 0x3e2   : > { %v3339_v20 = vpop.f32.mrf.mxu2  ;;  %6032 = vmatmul.msk.bf16.gmra.mxu1 %vm1184_vm1, %v7940_v32 }
 0x3e3   : > { %v5254_v23 = vsel %vm4982_vm11, %v4846_v13, %v5118_v18  ;;  %v3522_v27 = vadd.f32 %v3339_v20, %v2158_v19  ;;  %v4137_v13 = vshrl.u32 %v8005_v6, 16  ;;  %v1143_v18 = vshll.u32 %v8009_v9, 16 }
 0x3e4   : > { %v5390_v25 = vpack.c.bf16 %v5254_v23, %v5254_v23 }
 0x3e5   : > { %v4139_v22 = vrot.slane %v4137_v13, 1 }
 0x3e6   : > { %5527 = vst.msk [vmem:[%s6777_s6 + $0x1a0] sm:$0xf] %vm5422_vm6, %v5390_v25  ;;  %v4664_v28 = vpop.f32.mrf.mxu3  ;;  %v1667_v29 = vpop.f32.mrf.mxu0 }
 0x3e7   : > { %6378 = vmatmul.msk.bf16.gmra.mxu2 %vm1184_vm1, %v2843_v24  ;;  %v4847_v31 = vadd.f32 %v4664_v28, %v3522_v27  ;;  %v2161_v32 = vadd.f32 %v2160_v14, %v1667_v29  ;;  %v2162_v33 = vpop.f32.mrf.mxu1  ;;  %v4140_v14 = vshll.u32 %v8005_v6, 16  ;;  %v1141_v27 = vor.u32 %v1139_v17, %v1137_v57 }
 0x3e8   : > { %v1145_v28 = vrot.slane %v1143_v18, 1 }
 0x3e9   : > { %vm4983_vm12 = vcmp.gt.f32.partialorder %v4847_v31, 0.0  ;;  %v5119_v36 = vmul.f32 0.2, %v4847_v31  ;;  %5960 = vmatmul.msk.bf16.gmra.mxu0 %vm1184_vm1, %v1130_v30  ;;  %v4142_v23 = vrot.slane %v4140_v14, 2  ;;  %v2847_v30 = vsel %vm2718_vm2, %v2844_v50, %v2846_v21 }
 0x3ea   : > { %v3342_v37 = vpop.f32.mrf.mxu2 }
 0x3eb   : > { %v5255_v39 = vsel %vm4983_vm12, %v4847_v31, %v5119_v36  ;;  %v3523_v40 = vadd.f32 %v3342_v37, %v2161_v32  ;;  %6452 = vmatmul.msk.bf16.gmra.mxu3 %vm1184_vm1, %v4126_v34  ;;  %v4143_v32 = vor.u32 %v4142_v23, %v4139_v22  ;;  %v1146_v36 = vsel %vm630_vm3, %v1141_v27, %v1145_v28 }
 0x3ec   : > { %v5391_v41 = vpack.c.bf16 %v5255_v39, %v5255_v39 }
 0x3ee   : > { %5528 = vst.msk [vmem:[%s6777_s6 + $0x1a4] sm:$0xf] %vm5422_vm6, %v5391_v41  ;;  %v4667_v44 = vpop.f32.mrf.mxu3  ;;  %v1669_v45 = vpop.f32.mrf.mxu0  ;;  %v8028_v41 = vld [vmem:[%s6675_s30 + $0x218] sm:$0xff] }
 0x3ef   : > { %v4848_v48 = vadd.f32 %v4667_v44, %v3523_v40  ;;  %v2165_v49 = vpop.f32.mrf.mxu1  ;;  %v2163_v54 = vadd.f32 %v2162_v33, %v1669_v45  ;;  %v4144_v40 = vsel %vm3560_vm4, %v4134_v61, %v4143_v32  ;;  %v8032_v44 = vld [vmem:[%s6675_s30 + $0x208] sm:$0xff]  ;;  %v2848_v56 = vrot.slane %v8028_v41, 1 }
 0x3f0   : > { %v1155_v23 = vshrl.u32 %v8032_v44, 16 }
 0x3f1   : > { %vm4984_vm13 = vcmp.gt.f32.partialorder %v4848_v48, 0.0  ;;  %v5120_v53 = vmul.f32 0.2, %v4848_v48 }
 0x3f2   : > { %v3344_v55 = vpop.f32.mrf.mxu2  ;;  %6033 = vmatmul.msk.bf16.gmra.mxu1 %vm1184_vm1, %v7963_v3 }
 0x3f3   : > { %v5256_v58 = vsel %vm4984_vm13, %v4848_v48, %v5120_v53  ;;  %v3524_v62 = vadd.f32 %v3344_v55, %v2163_v54  ;;  %v4146_v48 = vshrl.u32 %v8028_v41, 16  ;;  %v1151_v53 = vshll.u32 %v8032_v44, 16 }
 0x3f4   : > { %v5392_v60 = vpack.c.bf16 %v5256_v58, %v5256_v58 }
 0x3f5   : > { %v4148_v57 = vrot.slane %v4146_v48, 1 }
 0x3f6   : > { %5529 = vst.msk [vmem:[%s6777_s6 + $0x1a8] sm:$0xf] %vm5422_vm6, %v5392_v60  ;;  %v4669_v63 = vpop.f32.mrf.mxu3  ;;  %v1672_v0 = vpop.f32.mrf.mxu0 }
 0x3f7   : > { %6379 = vmatmul.msk.bf16.gmra.mxu2 %vm1184_vm1, %v2845_v59  ;;  %v4849_v2 = vadd.f32 %v4669_v63, %v3524_v62  ;;  %v2166_v3 = vadd.f32 %v2165_v49, %v1672_v0  ;;  %v2167_v4 = vpop.f32.mrf.mxu1  ;;  %v4149_v49 = vshll.u32 %v8028_v41, 16  ;;  %v1149_v62 = vor.u32 %v1147_v52, %v1145_v28 }
 0x3f8   : > { %v1153_v63 = vrot.slane %v1151_v53, 1 }
 0x3f9   : > { %vm4985_vm14 = vcmp.gt.f32.partialorder %v4849_v2, 0.0  ;;  %v5121_v7 = vmul.f32 0.2, %v4849_v2  ;;  %5961 = vmatmul.msk.bf16.gmra.mxu0 %vm1184_vm1, %v1138_v1  ;;  %v4151_v58 = vrot.slane %v4149_v49, 2  ;;  %v2849_v1 = vsel %vm2718_vm2, %v2846_v21, %v2848_v56 }
 0x3fa   : > { %v3347_v8 = vpop.f32.mrf.mxu2 }
 0x3fb   : > { %v5257_v10 = vsel %vm4985_vm14, %v4849_v2, %v5121_v7  ;;  %v3525_v11 = vadd.f32 %v3347_v8, %v2166_v3  ;;  %6453 = vmatmul.msk.bf16.gmra.mxu3 %vm1184_vm1, %v4135_v5  ;;  %v4152_v3 = vor.u32 %v4151_v58, %v4148_v57  ;;  %v1154_v7 = vsel %vm630_vm3, %v1149_v62, %v1153_v63 }
 0x3fc   : > { %v5393_v12 = vpack.c.bf16 %v5257_v10, %v5257_v10 }
 0x3fe   : > { %5530 = vst.msk [vmem:[%s6777_s6 + $0x1ac] sm:$0xf] %vm5422_vm6, %v5393_v12  ;;  %v4672_v15 = vpop.f32.mrf.mxu3  ;;  %v1674_v16 = vpop.f32.mrf.mxu0  ;;  %v8051_v12 = vld [vmem:[%s6675_s30 + $0x220] sm:$0xff] }
 0x3ff   : > { %v4850_v19 = vadd.f32 %v4672_v15, %v3525_v11  ;;  %v2170_v20 = vpop.f32.mrf.mxu1  ;;  %v2168_v25 = vadd.f32 %v2167_v4, %v1674_v16  ;;  %v4153_v11 = vsel %vm3560_vm4, %v4143_v32, %v4152_v3  ;;  %v8055_v15 = vld [vmem:[%s6675_s30 + $0x210] sm:$0xff]  ;;  %v2850_v27 = vrot.slane %v8051_v12, 1 }
 0x400   : > { %v1163_v58 = vshrl.u32 %v8055_v15, 16 }
 0x401   : > { %vm4986_vm15 = vcmp.gt.f32.partialorder %v4850_v19, 0.0  ;;  %v5122_v24 = vmul.f32 0.2, %v4850_v19 }
 0x402   : > { %v3349_v26 = vpop.f32.mrf.mxu2  ;;  %6034 = vmatmul.msk.bf16.gmra.mxu1 %vm1184_vm1, %v7986_v38 }
 0x403   : > { %v5258_v29 = vsel %vm4986_vm15, %v4850_v19, %v5122_v24  ;;  %v3526_v33 = vadd.f32 %v3349_v26, %v2168_v25  ;;  %v4155_v19 = vshrl.u32 %v8051_v12, 16  ;;  %v1159_v24 = vshll.u32 %v8055_v15, 16 }
 0x404   : > { %v5394_v31 = vpack.c.bf16 %v5258_v29, %v5258_v29 }
 0x405   : > { %v4157_v28 = vrot.slane %v4155_v19, 1 }
 0x406   : > { %5531 = vst.msk [vmem:[%s6777_s6 + $0x1b0] sm:$0xf] %vm5422_vm6, %v5394_v31  ;;  %v4674_v34 = vpop.f32.mrf.mxu3  ;;  %v1677_v35 = vpop.f32.mrf.mxu0 }
 0x407   : > { %6380 = vmatmul.msk.bf16.gmra.mxu2 %vm1184_vm1, %v2847_v30  ;;  %v4851_v37 = vadd.f32 %v4674_v34, %v3526_v33  ;;  %v2171_v38 = vadd.f32 %v2170_v20, %v1677_v35  ;;  %v2172_v39 = vpop.f32.mrf.mxu1  ;;  %v4158_v20 = vshll.u32 %v8051_v12, 16  ;;  %v1157_v33 = vor.u32 %v1155_v23, %v1153_v63  ;;  %v2371_v12 = vld [vmem:[%s6675_s30 + $0x230] sm:$0x1] }
 0x408   : > { %v1161_v34 = vrot.slane %v1159_v24, 1 }
 0x409   : > { %vm4987_vm0 = vcmp.gt.f32.partialorder %v4851_v37, 0.0  ;;  %v5123_v42 = vmul.f32 0.2, %v4851_v37  ;;  %5962 = vmatmul.msk.bf16.gmra.mxu0 %vm1184_vm1, %v1146_v36  ;;  %v4160_v29 = vrot.slane %v4158_v20, 2  ;;  %v2851_v36 = vsel %vm2718_vm2, %v2848_v56, %v2850_v27 }
 0x40a   : > { %v3352_v43 = vpop.f32.mrf.mxu2 }
 0x40b   : > { %v5259_v45 = vsel %vm4987_vm0, %v4851_v37, %v5123_v42  ;;  %v3527_v46 = vadd.f32 %v3352_v43, %v2171_v38  ;;  %6454 = vmatmul.msk.bf16.gmra.mxu3 %vm1184_vm1, %v4144_v40  ;;  %v4161_v38 = vor.u32 %v4160_v29, %v4157_v28  ;;  %v1162_v42 = vsel %vm630_vm3, %v1157_v33, %v1161_v34 }
 0x40c   : > { %v5395_v47 = vpack.c.bf16 %v5259_v45, %v5259_v45 }
 0x40e   : > { %5532 = vst.msk [vmem:[%s6777_s6 + $0x1b4] sm:$0xf] %vm5422_vm6, %v5395_v47  ;;  %v4677_v50 = vpop.f32.mrf.mxu3  ;;  %v1679_v51 = vpop.f32.mrf.mxu0  ;;  %v8074_v47 = vld [vmem:[%s6675_s30 + $0x228] sm:$0xff] }
 0x40f   : > { %v4852_v54 = vadd.f32 %v4677_v50, %v3527_v46  ;;  %v2175_v55 = vpop.f32.mrf.mxu1  ;;  %v2173_v60 = vadd.f32 %v2172_v39, %v1679_v51  ;;  %v4162_v46 = vsel %vm3560_vm4, %v4152_v3, %v4161_v38  ;;  %v8078_v50 = vld [vmem:[%s6675_s30 + $0x218] sm:$0xff]  ;;  %v2852_v62 = vrot.slane %v8074_v47, 1 }
 0x411   : > { %vm4988_vm5 = vcmp.gt.f32.partialorder %v4852_v54, 0.0  ;;  %v5124_v59 = vmul.f32 0.2, %v4852_v54 }
 0x412   : > { %v3354_v61 = vpop.f32.mrf.mxu2  ;;  %6035 = vmatmul.msk.bf16.gmra.mxu1 %vm1184_vm1, %v8009_v9 }
 0x413   : > { %v5260_v0 = vsel %vm4988_vm5, %v4852_v54, %v5124_v59  ;;  %v3528_v4 = vadd.f32 %v3354_v61, %v2173_v60  ;;  %v4164_v54 = vshrl.u32 %v8074_v47, 16  ;;  %v1167_v59 = vshll.u32 %v8078_v50, 16 }
 0x414   : > { %v5396_v2 = vpack.c.bf16 %v5260_v0, %v5260_v0 }
 0x415   : > { %v4166_v63 = vrot.slane %v4164_v54, 1 }
 0x416   : > { %5533 = vst.msk [vmem:[%s6777_s6 + $0x1b8] sm:$0xf] %vm5422_vm6, %v5396_v2  ;;  %v4679_v5 = vpop.f32.mrf.mxu3  ;;  %v1682_v6 = vpop.f32.mrf.mxu0 }
 0x417   : > { %6381 = vmatmul.msk.bf16.gmra.mxu2 %vm1184_vm1, %v2849_v1  ;;  %v4853_v8 = vadd.f32 %v4679_v5, %v3528_v4  ;;  %v2176_v9 = vadd.f32 %v2175_v55, %v1682_v6  ;;  %v2177_v10 = vpop.f32.mrf.mxu1  ;;  %v4167_v55 = vshll.u32 %v8074_v47, 16  ;;  %v3553_v4 = vld [vmem:[%s6675_s30 + $0x230] sm:$0x3]  ;;  %v1165_v5 = vor.u32 %v1163_v58, %v1161_v34 }
 0x418   : > { %v1169_v6 = vrot.slane %v1167_v59, 1 }
 0x419   : > { %vm4989_vm7 = vcmp.gt.f32.partialorder %v4853_v8, 0.0  ;;  %v5125_v13 = vmul.f32 0.2, %v4853_v8  ;;  %5963 = vmatmul.msk.bf16.gmra.mxu0 %vm1184_vm1, %v1154_v7  ;;  %v4169_v0 = vrot.slane %v4167_v55, 2 }
 0x41a   : > { %v3357_v14 = vpop.f32.mrf.mxu2 }
 0x41b   : > { %v5261_v16 = vsel %vm4989_vm7, %v4853_v8, %v5125_v13  ;;  %v3529_v17 = vadd.f32 %v3357_v14, %v2176_v9  ;;  %6455 = vmatmul.msk.bf16.gmra.mxu3 %vm1184_vm1, %v4153_v11  ;;  %v2853_v8 = vsel %vm2718_vm2, %v2850_v27, %v2852_v62  ;;  %v283_v9 = vld [vmem:[%s6675_s30 + $0x220] sm:$0x1]  ;;  %v4170_v11 = vor.u32 %v4169_v0, %v4166_v63 }
 0x41c   : > { %v5397_v18 = vpack.c.bf16 %v5261_v16, %v5261_v16  ;;  %v3558_v13 = vunpack.c.l.b16 %v3553_v4 }
 0x41d   : > { %v4171_v23 = vsel %vm3560_vm4, %v4161_v38, %v4170_v11 }
 0x41e   : > { %5534 = vst.msk [vmem:[%s6777_s6 + $0x1bc] sm:$0xf] %vm5422_vm6, %v5397_v18  ;;  %v4682_v21 = vpop.f32.mrf.mxu3  ;;  %v1684_v22 = vpop.f32.mrf.mxu0  ;;  %v1170_v18 = vsel %vm630_vm3, %v1165_v5, %v1169_v6  ;;  %v3559_v24 = vpack.c.b16 %v3558_v13, %v3558_v13 }
 0x41f   : > { %v4854_v25 = vadd.f32 %v4682_v21, %v3529_v17  ;;  %v2180_v26 = vpop.f32.mrf.mxu1  ;;  %v2178_v31 = vadd.f32 %v2177_v10, %v1684_v22  ;;  %v2648_v22 = vunpack.c.l.b16 %v2371_v12 }
 0x420   : > { %v4176_v33 = vshll.u32 %v3559_v24, 16 }
 0x421   : > { %vm4990_vm8 = vcmp.gt.f32.partialorder %v4854_v25, 0.0  ;;  %v5126_v30 = vmul.f32 0.2, %v4854_v25 }
 0x422   : > { %v3359_v32 = vpop.f32.mrf.mxu2  ;;  %6036 = vmatmul.msk.bf16.gmra.mxu1 %vm1184_vm1, %v8032_v44 }
 0x423   : > { %v5262_v35 = vsel %vm4990_vm8, %v4854_v25, %v5126_v30  ;;  %v3530_v39 = vadd.f32 %v3359_v32, %v2178_v31  ;;  %v2717_v30 = vpack.c.b16 %v2648_v22, %v2648_v22  ;;  %v4173_v32 = vshrl.u32 %v3559_v24, 16 }
 0x424   : > { %v5398_v37 = vpack.c.bf16 %v5262_v35, %v5262_v35 }
 0x426   : > { %5535 = vst.msk [vmem:[%s6777_s6 + $0x1c0] sm:$0xf] %vm5422_vm6, %v5398_v37  ;;  %v4684_v40 = vpop.f32.mrf.mxu3  ;;  %v1687_v41 = vpop.f32.mrf.mxu0 }
 0x427   : > { %6382 = vmatmul.msk.bf16.gmra.mxu2 %vm1184_vm1, %v2851_v36  ;;  %v4855_v43 = vadd.f32 %v4684_v40, %v3530_v39  ;;  %v2181_v44 = vadd.f32 %v2180_v26, %v1687_v41  ;;  %v2182_v45 = vpop.f32.mrf.mxu1  ;;  %v1171_v36 = vshrl.u32 %v8078_v50, 16  ;;  %v2854_v40 = vrot.slane %v2717_v30, 1 }
 0x428   : > { %v4175_v41 = vrot.slane %v4173_v32, 1 }
 0x429   : > { %vm4991_vm9 = vcmp.gt.f32.partialorder %v4855_v43, 0.0  ;;  %v5127_v48 = vmul.f32 0.2, %v4855_v43  ;;  %5964 = vmatmul.msk.bf16.gmra.mxu0 %vm1184_vm1, %v1162_v42  ;;  %v4178_v42 = vrot.slane %v4176_v33, 2 }
 0x42a   : > { %v3362_v49 = vpop.f32.mrf.mxu2 }
 0x42b   : > { %v5263_v51 = vsel %vm4991_vm9, %v4855_v43, %v5127_v48  ;;  %v3531_v52 = vadd.f32 %v3362_v49, %v2181_v44  ;;  %6456 = vmatmul.msk.bf16.gmra.mxu3 %vm1184_vm1, %v4162_v46  ;;  %v1173_v46 = vor.u32 %v1171_v36, %v1169_v6  ;;  %v2855_v49 = vsel %vm2718_vm2, %v2852_v62, %v2854_v40 }
 0x42c   : > { %v5399_v53 = vpack.c.bf16 %v5263_v51, %v5263_v51 }
 0x42e   : > { %5536 = vst.msk [vmem:[%s6777_s6 + $0x1c4] sm:$0xf] %vm5422_vm6, %v5399_v53  ;;  %v4687_v56 = vpop.f32.mrf.mxu3  ;;  %v1689_v57 = vpop.f32.mrf.mxu0 }
 0x42f   : > { %v4856_v60 = vadd.f32 %v4687_v56, %v3531_v52  ;;  %v2185_v61 = vpop.f32.mrf.mxu1  ;;  %v2183_v2 = vadd.f32 %v2182_v45, %v1689_v57  ;;  %v4179_v52 = vor.u32 %v4178_v42, %v4175_v41 }
 0x431   : > { %vm4992_vm10 = vcmp.gt.f32.partialorder %v4856_v60, 0.0  ;;  %v5128_v1 = vmul.f32 0.2, %v4856_v60  ;;  %v4180_v59 = vsel %vm3560_vm4, %v4170_v11, %v4179_v52 }
 0x432   : > { %v3364_v3 = vpop.f32.mrf.mxu2  ;;  %6037 = vmatmul.msk.bf16.gmra.mxu1 %vm1184_vm1, %v8055_v15  ;;  %v560_v15 = vunpack.c.l.b16 %v283_v9 }
 0x433   : > { %v5264_v7 = vsel %vm4992_vm10, %v4856_v60, %v5128_v1  ;;  %v3532_v14 = vadd.f32 %v3364_v3, %v2183_v2 }
 0x434   : > { %v5400_v10 = vpack.c.bf16 %v5264_v7, %v5264_v7  ;;  %v629_v27 = vpack.c.b16 %v560_v15, %v560_v15 }
 0x436   : > { %5537 = vst.msk [vmem:[%s6777_s6 + $0x1c8] sm:$0xf] %vm5422_vm6, %v5400_v10  ;;  %v4689_v16 = vpop.f32.mrf.mxu3  ;;  %v1692_v17 = vpop.f32.mrf.mxu0  ;;  %v1175_v37 = vshll.u32 %v629_v27, 16 }
 0x437   : > { %6383 = vmatmul.msk.bf16.gmra.mxu2 %vm1184_vm1, %v2853_v8  ;;  %v4857_v19 = vadd.f32 %v4689_v16, %v3532_v14  ;;  %v2186_v20 = vadd.f32 %v2185_v61, %v1692_v17  ;;  %v2187_v21 = vpop.f32.mrf.mxu1 }
 0x438   : > { %v1177_v47 = vrot.slane %v1175_v37, 1 }
 0x439   : > { %vm4993_vm11 = vcmp.gt.f32.partialorder %v4857_v19, 0.0  ;;  %v5129_v25 = vmul.f32 0.2, %v4857_v19  ;;  %5965 = vmatmul.msk.bf16.gmra.mxu0 %vm1184_vm1, %v1170_v18 }
 0x43a   : > { %v3367_v26 = vpop.f32.mrf.mxu2  ;;  %v1178_v56 = vsel %vm630_vm3, %v1173_v46, %v1177_v47 }
 0x43b   : > { %v5265_v28 = vsel %vm4993_vm11, %v4857_v19, %v5129_v25  ;;  %v3533_v29 = vadd.f32 %v3367_v26, %v2186_v20  ;;  %6457 = vmatmul.msk.bf16.gmra.mxu3 %vm1184_vm1, %v4171_v23 }
 0x43c   : > { %v5401_v31 = vpack.c.bf16 %v5265_v28, %v5265_v28 }
 0x43e   : > { %5538 = vst.msk [vmem:[%s6777_s6 + $0x1cc] sm:$0xf] %vm5422_vm6, %v5401_v31  ;;  %v4692_v34 = vpop.f32.mrf.mxu3  ;;  %v1694_v35 = vpop.f32.mrf.mxu0 }
 0x43f   : > { %v4858_v38 = vadd.f32 %v4692_v34, %v3533_v29  ;;  %v2190_v39 = vpop.f32.mrf.mxu1  ;;  %v2188_v44 = vadd.f32 %v2187_v21, %v1694_v35 }
 0x441   : > { %vm4994_vm12 = vcmp.gt.f32.partialorder %v4858_v38, 0.0  ;;  %v5130_v43 = vmul.f32 0.2, %v4858_v38 }
 0x442   : > { %v3369_v45 = vpop.f32.mrf.mxu2  ;;  %6038 = vmatmul.msk.bf16.gmra.mxu1 %vm1184_vm1, %v8078_v50 }
 0x443   : > { %v5266_v48 = vsel %vm4994_vm12, %v4858_v38, %v5130_v43  ;;  %v3534_v53 = vadd.f32 %v3369_v45, %v2188_v44 }
 0x444   : > { %v5402_v51 = vpack.c.bf16 %v5266_v48, %v5266_v48 }
 0x446   : > { %5539 = vst.msk [vmem:[%s6777_s6 + $0x1d0] sm:$0xf] %vm5422_vm6, %v5402_v51  ;;  %v4694_v54 = vpop.f32.mrf.mxu3  ;;  %v1697_v55 = vpop.f32.mrf.mxu0 }
 0x447   : > { %6384 = vmatmul.msk.bf16.gmra.mxu2 %vm1184_vm1, %v2855_v49  ;;  %v4859_v57 = vadd.f32 %v4694_v54, %v3534_v53  ;;  %v2191_v58 = vadd.f32 %v2190_v39, %v1697_v55  ;;  %v2192_v50 = vpop.f32.mrf.mxu1 }
 0x449   : > { %vm4995_vm13 = vcmp.gt.f32.partialorder %v4859_v57, 0.0  ;;  %v5131_v60 = vmul.f32 0.2, %v4859_v57  ;;  %5966 = vmatmul.msk.bf16.gmra.mxu0 %vm1184_vm1, %v1178_v56 }
 0x44a   : > { %v3372_v61 = vpop.f32.mrf.mxu2 }
 0x44b   : > { %v5267_v62 = vsel %vm4995_vm13, %v4859_v57, %v5131_v60  ;;  %v3535_v63 = vadd.f32 %v3372_v61, %v2191_v58  ;;  %6458 = vmatmul.msk.bf16.gmra.mxu3 %vm1184_vm1, %v4180_v59 }
 0x44c   : > { %v5403_v0 = vpack.c.bf16 %v5267_v62, %v5267_v62 }
 0x44e   : > { %5540 = vst.msk [vmem:[%s6777_s6 + $0x1d4] sm:$0xf] %vm5422_vm6, %v5403_v0  ;;  %v4697_v1 = vpop.f32.mrf.mxu3  ;;  %v1699_v2 = vpop.f32.mrf.mxu0 }
 0x44f   : > { %v4860_v3 = vadd.f32 %v4697_v1, %v3535_v63  ;;  %v2195_v4 = vpop.f32.mrf.mxu1  ;;  %v2193_v6 = vadd.f32 %v2192_v50, %v1699_v2 }
 0x451   : > { %vm4996_vm2 = vcmp.gt.f32.partialorder %v4860_v3, 0.0  ;;  %v5132_v5 = vmul.f32 0.2, %v4860_v3 }
 0x452   : > { %v3374_v7 = vpop.f32.mrf.mxu2 }
 0x453   : > { %v5268_v8 = vsel %vm4996_vm2, %v4860_v3, %v5132_v5  ;;  %v3536_v10 = vadd.f32 %v3374_v7, %v2193_v6 }
 0x454   : > { %v5404_v9 = vpack.c.bf16 %v5268_v8, %v5268_v8 }
 0x456   : > { %5541 = vst.msk [vmem:[%s6777_s6 + $0x1d8] sm:$0xf] %vm5422_vm6, %v5404_v9  ;;  %v4699_v11 = vpop.f32.mrf.mxu3  ;;  %v1702_v12 = vpop.f32.mrf.mxu0 }
 0x457   : > { %v4861_v13 = vadd.f32 %v4699_v11, %v3536_v10  ;;  %v2196_v14 = vadd.f32 %v2195_v4, %v1702_v12  ;;  %v2197_v16 = vpop.f32.mrf.mxu1 }
 0x459   : > { %vm4997_vm1 = vcmp.gt.f32.partialorder %v4861_v13, 0.0  ;;  %v5133_v17 = vmul.f32 0.2, %v4861_v13 }
 0x45a   : > { %v3377_v18 = vpop.f32.mrf.mxu2 }
 0x45b   : > { %v5269_v15 = vsel %vm4997_vm1, %v4861_v13, %v5133_v17  ;;  %v3537_v19 = vadd.f32 %v3377_v18, %v2196_v14 }
 0x45c   : > { %v5405_v20 = vpack.c.bf16 %v5269_v15, %v5269_v15 }
 0x45e   : > { %5542 = vst.msk [vmem:[%s6777_s6 + $0x1dc] sm:$0xf] %vm5422_vm6, %v5405_v20  ;;  %v4702_v21 = vpop.f32.mrf.mxu3  ;;  %v1704_v22 = vpop.f32.mrf.mxu0 }
 0x45f   : > { %v4862_v23 = vadd.f32 %v4702_v21, %v3537_v19  ;;  %v2200_v24 = vpop.f32.mrf.mxu1  ;;  %v2198_v26 = vadd.f32 %v2197_v16, %v1704_v22 }
 0x461   : > { %vm4998_vm3 = vcmp.gt.f32.partialorder %v4862_v23, 0.0  ;;  %v5134_v25 = vmul.f32 0.2, %v4862_v23 }
 0x462   : > { %v3379_v27 = vpop.f32.mrf.mxu2 }
 0x463   : > { %v5270_v28 = vsel %vm4998_vm3, %v4862_v23, %v5134_v25  ;;  %v3538_v30 = vadd.f32 %v3379_v27, %v2198_v26 }
 0x464   : > { %v5406_v29 = vpack.c.bf16 %v5270_v28, %v5270_v28 }
 0x466   : > { %5543 = vst.msk [vmem:[%s6777_s6 + $0x1e0] sm:$0xf] %vm5422_vm6, %v5406_v29  ;;  %v4704_v31 = vpop.f32.mrf.mxu3  ;;  %v1707_v32 = vpop.f32.mrf.mxu0 }
 0x467   : > { %v4863_v33 = vadd.f32 %v4704_v31, %v3538_v30  ;;  %v2201_v34 = vadd.f32 %v2200_v24, %v1707_v32  ;;  %v2202_v35 = vpop.f32.mrf.mxu1 }
 0x469   : > { %vm4999_vm4 = vcmp.gt.f32.partialorder %v4863_v33, 0.0  ;;  %v5135_v36 = vmul.f32 0.2, %v4863_v33 }
 0x46a   : > { %v3382_v37 = vpop.f32.mrf.mxu2 }
 0x46b   : > { %v5271_v38 = vsel %vm4999_vm4, %v4863_v33, %v5135_v36  ;;  %v3539_v39 = vadd.f32 %v3382_v37, %v2201_v34 }
 0x46c   : > { %v5407_v40 = vpack.c.bf16 %v5271_v38, %v5271_v38 }
 0x46e   : > { %5544 = vst.msk [vmem:[%s6777_s6 + $0x1e4] sm:$0xf] %vm5422_vm6, %v5407_v40  ;;  %v4707_v41 = vpop.f32.mrf.mxu3  ;;  %v1709_v42 = vpop.f32.mrf.mxu0 }
 0x46f   : > { %v4864_v43 = vadd.f32 %v4707_v41, %v3539_v39  ;;  %v2205_v44 = vpop.f32.mrf.mxu1  ;;  %v2203_v46 = vadd.f32 %v2202_v35, %v1709_v42 }
 0x471   : > { %vm5000_vm14 = vcmp.gt.f32.partialorder %v4864_v43, 0.0  ;;  %v5136_v45 = vmul.f32 0.2, %v4864_v43 }
 0x472   : > { %v3384_v47 = vpop.f32.mrf.mxu2 }
 0x473   : > { %v5272_v48 = vsel %vm5000_vm14, %v4864_v43, %v5136_v45  ;;  %v3540_v51 = vadd.f32 %v3384_v47, %v2203_v46 }
 0x474   : > { %v5408_v49 = vpack.c.bf16 %v5272_v48, %v5272_v48 }
 0x476   : > { %5545 = vst.msk [vmem:[%s6777_s6 + $0x1e8] sm:$0xf] %vm5422_vm6, %v5408_v49  ;;  %v4709_v52 = vpop.f32.mrf.mxu3  ;;  %v1712_v53 = vpop.f32.mrf.mxu0 }
 0x477   : > { %v4865_v54 = vadd.f32 %v4709_v52, %v3540_v51  ;;  %v2206_v55 = vadd.f32 %v2205_v44, %v1712_v53  ;;  %v2207_v56 = vpop.f32.mrf.mxu1 }
 0x479   : > { %vm5001_vm15 = vcmp.gt.f32.partialorder %v4865_v54, 0.0  ;;  %v5137_v57 = vmul.f32 0.2, %v4865_v54 }
 0x47a   : > { %v3387_v58 = vpop.f32.mrf.mxu2 }
 0x47b   : > { %v5273_v50 = vsel %vm5001_vm15, %v4865_v54, %v5137_v57  ;;  %v3541_v59 = vadd.f32 %v3387_v58, %v2206_v55 }
 0x47c   : > { %v5409_v60 = vpack.c.bf16 %v5273_v50, %v5273_v50 }
 0x47e   : > { %5546 = vst.msk [vmem:[%s6777_s6 + $0x1ec] sm:$0xf] %vm5422_vm6, %v5409_v60  ;;  %v4712_v61 = vpop.f32.mrf.mxu3  ;;  %v1714_v62 = vpop.f32.mrf.mxu0 }
 0x47f   : > { %v4866_v63 = vadd.f32 %v4712_v61, %v3541_v59  ;;  %v2210_v0 = vpop.f32.mrf.mxu1  ;;  %v2208_v2 = vadd.f32 %v2207_v56, %v1714_v62 }
 0x481   : > { %vm5002_vm0 = vcmp.gt.f32.partialorder %v4866_v63, 0.0  ;;  %v5138_v1 = vmul.f32 0.2, %v4866_v63 }
 0x482   : > { %v3389_v3 = vpop.f32.mrf.mxu2 }
 0x483   : > { %v5274_v4 = vsel %vm5002_vm0, %v4866_v63, %v5138_v1  ;;  %v3542_v6 = vadd.f32 %v3389_v3, %v2208_v2 }
 0x484   : > { %v5410_v5 = vpack.c.bf16 %v5274_v4, %v5274_v4 }
 0x486   : > { %5547 = vst.msk [vmem:[%s6777_s6 + $0x1f0] sm:$0xf] %vm5422_vm6, %v5410_v5  ;;  %v4714_v7 = vpop.f32.mrf.mxu3  ;;  %v1717_v8 = vpop.f32.mrf.mxu0 }
 0x487   : > { %v4867_v9 = vadd.f32 %v4714_v7, %v3542_v6  ;;  %v2211_v10 = vadd.f32 %v2210_v0, %v1717_v8  ;;  %v2212_v11 = vpop.f32.mrf.mxu1 }
 0x489   : > { %vm5003_vm5 = vcmp.gt.f32.partialorder %v4867_v9, 0.0  ;;  %v5139_v12 = vmul.f32 0.2, %v4867_v9 }
 0x48a   : > { %v3392_v13 = vpop.f32.mrf.mxu2 }
 0x48b   : > { %v5275_v14 = vsel %vm5003_vm5, %v4867_v9, %v5139_v12  ;;  %v3543_v16 = vadd.f32 %v3392_v13, %v2211_v10 }
 0x48c   : > { %v5411_v17 = vpack.c.bf16 %v5275_v14, %v5275_v14 }
 0x48e   : > { %5548 = vst.msk [vmem:[%s6777_s6 + $0x1f4] sm:$0xf] %vm5422_vm6, %v5411_v17  ;;  %v4717_v18 = vpop.f32.mrf.mxu3  ;;  %v1719_v15 = vpop.f32.mrf.mxu0 }
 0x48f   : > { %v4868_v19 = vadd.f32 %v4717_v18, %v3543_v16  ;;  %v2215_v20 = vpop.f32.mrf.mxu1  ;;  %v2213_v22 = vadd.f32 %v2212_v11, %v1719_v15 }
 0x491   : > { %vm5004_vm7 = vcmp.gt.f32.partialorder %v4868_v19, 0.0  ;;  %v5140_v21 = vmul.f32 0.2, %v4868_v19 }
 0x492   : > { %v3394_v23 = vpop.f32.mrf.mxu2 }
 0x493   : > { %v5276_v24 = vsel %vm5004_vm7, %v4868_v19, %v5140_v21  ;;  %v3544_v26 = vadd.f32 %v3394_v23, %v2213_v22 }
 0x494   : > { %v5412_v25 = vpack.c.bf16 %v5276_v24, %v5276_v24 }
 0x496   : > { %5549 = vst.msk [vmem:[%s6777_s6 + $0x1f8] sm:$0xf] %vm5422_vm6, %v5412_v25  ;;  %v4719_v27 = vpop.f32.mrf.mxu3  ;;  %v1722_v28 = vpop.f32.mrf.mxu0 }
 0x497   : > { %v4869_v29 = vadd.f32 %v4719_v27, %v3544_v26  ;;  %v2216_v30 = vadd.f32 %v2215_v20, %v1722_v28  ;;  %v2217_v31 = vpop.f32.mrf.mxu1 }
 0x499   : > { %vm5005_vm8 = vcmp.gt.f32.partialorder %v4869_v29, 0.0  ;;  %v5141_v32 = vmul.f32 0.2, %v4869_v29 }
 0x49a   : > { %v3397_v33 = vpop.f32.mrf.mxu2 }
 0x49b   : > { %v5277_v34 = vsel %vm5005_vm8, %v4869_v29, %v5141_v32  ;;  %v3545_v35 = vadd.f32 %v3397_v33, %v2216_v30 }
 0x49c   : > { %v5413_v36 = vpack.c.bf16 %v5277_v34, %v5277_v34 }
 0x49e   : > { %5550 = vst.msk [vmem:[%s6777_s6 + $0x1fc] sm:$0xf] %vm5422_vm6, %v5413_v36  ;;  %v4722_v37 = vpop.f32.mrf.mxu3  ;;  %v1724_v38 = vpop.f32.mrf.mxu0 }
 0x49f   : > { %v4870_v39 = vadd.f32 %v4722_v37, %v3545_v35  ;;  %v2220_v40 = vpop.f32.mrf.mxu1  ;;  %v2218_v42 = vadd.f32 %v2217_v31, %v1724_v38 }
 0x4a1   : > { %vm5006_vm9 = vcmp.gt.f32.partialorder %v4870_v39, 0.0  ;;  %v5142_v41 = vmul.f32 0.2, %v4870_v39 }
 0x4a2   : > { %v3399_v43 = vpop.f32.mrf.mxu2 }
 0x4a3   : > { %v5278_v44 = vsel %vm5006_vm9, %v4870_v39, %v5142_v41  ;;  %v3546_v46 = vadd.f32 %v3399_v43, %v2218_v42 }
 0x4a4   : > { %v5414_v45 = vpack.c.bf16 %v5278_v44, %v5278_v44 }
 0x4a6   : > { %5551 = vst.msk [vmem:[%s6777_s6 + $0x200] sm:$0xf] %vm5422_vm6, %v5414_v45  ;;  %v4724_v47 = vpop.f32.mrf.mxu3  ;;  %v1727_v48 = vpop.f32.mrf.mxu0 }
 0x4a7   : > { %v4871_v49 = vadd.f32 %v4724_v47, %v3546_v46  ;;  %v2221_v51 = vadd.f32 %v2220_v40, %v1727_v48  ;;  %v2222_v52 = vpop.f32.mrf.mxu1 }
 0x4a9   : > { %vm5007_vm10 = vcmp.gt.f32.partialorder %v4871_v49, 0.0  ;;  %v5143_v53 = vmul.f32 0.2, %v4871_v49 }
 0x4aa   : > { %v3402_v54 = vpop.f32.mrf.mxu2 }
 0x4ab   : > { %v5279_v55 = vsel %vm5007_vm10, %v4871_v49, %v5143_v53  ;;  %v3547_v56 = vadd.f32 %v3402_v54, %v2221_v51 }
 0x4ac   : > { %v5415_v57 = vpack.c.bf16 %v5279_v55, %v5279_v55 }
 0x4ae   : > { %5552 = vst.msk [vmem:[%s6777_s6 + $0x204] sm:$0xf] %vm5422_vm6, %v5415_v57  ;;  %v4727_v58 = vpop.f32.mrf.mxu3  ;;  %v1729_v50 = vpop.f32.mrf.mxu0 }
 0x4af   : > { %v4872_v59 = vadd.f32 %v4727_v58, %v3547_v56  ;;  %v2223_v61 = vadd.f32 %v2222_v52, %v1729_v50  ;;  %v2225_v62 = vpop.f32.mrf.mxu1 }
 0x4b1   : > { %vm5008_vm11 = vcmp.gt.f32.partialorder %v4872_v59, 0.0  ;;  %v5144_v60 = vmul.f32 0.2, %v4872_v59 }
 0x4b2   : > { %v3404_v63 = vpop.f32.mrf.mxu2 }
 0x4b3   : > { %v5280_v0 = vsel %vm5008_vm11, %v4872_v59, %v5144_v60  ;;  %v3548_v2 = vadd.f32 %v3404_v63, %v2223_v61 }
 0x4b4   : > { %v5416_v1 = vpack.c.bf16 %v5280_v0, %v5280_v0 }
 0x4b6   : > { %5553 = vst.msk [vmem:[%s6777_s6 + $0x208] sm:$0xf] %vm5422_vm6, %v5416_v1  ;;  %v4729_v3 = vpop.f32.mrf.mxu3  ;;  %v1732_v4 = vpop.f32.mrf.mxu0 }
 0x4b7   : > { %v4873_v5 = vadd.f32 %v4729_v3, %v3548_v2  ;;  %v2226_v6 = vadd.f32 %v2225_v62, %v1732_v4  ;;  %v2227_v10 = vpop.f32.mrf.mxu1 }
 0x4b9   : > { %vm5009_vm12 = vcmp.gt.f32.partialorder %v4873_v5, 0.0  ;;  %v5145_v7 = vmul.f32 0.2, %v4873_v5 }
 0x4ba   : > { %v3407_v8 = vpop.f32.mrf.mxu2 }
 0x4bb   : > { %v5281_v9 = vsel %vm5009_vm12, %v4873_v5, %v5145_v7  ;;  %v3549_v11 = vadd.f32 %v3407_v8, %v2226_v6 }
 0x4bc   : > { %v5417_v12 = vpack.c.bf16 %v5281_v9, %v5281_v9 }
 0x4be   : > { %5554 = vst.msk [vmem:[%s6777_s6 + $0x20c] sm:$0xf] %vm5422_vm6, %v5417_v12  ;;  %v4732_v13 = vpop.f32.mrf.mxu3  ;;  %v1734_v14 = vpop.f32.mrf.mxu0 }
 0x4bf   : > { %v4874_v16 = vadd.f32 %v4732_v13, %v3549_v11  ;;  %v2228_v18 = vadd.f32 %v2227_v10, %v1734_v14  ;;  %v2230_v21 = vpop.f32.mrf.mxu1 }
 0x4c1   : > { %vm5010_vm13 = vcmp.gt.f32.partialorder %v4874_v16, 0.0  ;;  %v5146_v17 = vmul.f32 0.2, %v4874_v16 }
 0x4c2   : > { %v3409_v15 = vpop.f32.mrf.mxu2 }
 0x4c3   : > { %v5282_v19 = vsel %vm5010_vm13, %v4874_v16, %v5146_v17  ;;  %v3550_v22 = vadd.f32 %v3409_v15, %v2228_v18 }
 0x4c4   : > { %v5418_v20 = vpack.c.bf16 %v5282_v19, %v5282_v19 }
 0x4c6   : > { %5555 = vst.msk [vmem:[%s6777_s6 + $0x210] sm:$0xf] %vm5422_vm6, %v5418_v20  ;;  %v4734_v23 = vpop.f32.mrf.mxu3  ;;  %v1737_v24 = vpop.f32.mrf.mxu0 }
 0x4c7   : > { %v4875_v25 = vadd.f32 %v4734_v23, %v3550_v22  ;;  %v2231_v26 = vadd.f32 %v2230_v21, %v1737_v24  ;;  %v2232_v35 = vpop.f32.mrf.mxu1 }
 0x4c9   : > { %vm5011_vm2 = vcmp.gt.f32.partialorder %v4875_v25, 0.0  ;;  %v5147_v27 = vmul.f32 0.2, %v4875_v25 }
 0x4ca   : > { %v3412_v28 = vpop.f32.mrf.mxu2 }
 0x4cb   : > { %v5283_v29 = vsel %vm5011_vm2, %v4875_v25, %v5147_v27  ;;  %v3551_v30 = vadd.f32 %v3412_v28, %v2231_v26 }
 0x4cc   : > { %v5419_v31 = vpack.c.bf16 %v5283_v29, %v5283_v29 }
 0x4ce   : > { %5556 = vst.msk [vmem:[%s6777_s6 + $0x214] sm:$0xf] %vm5422_vm6, %v5419_v31  ;;  %v4737_v32 = vpop.f32.mrf.mxu3  ;;  %v1739_v33 = vpop.f32.mrf.mxu0 }
 0x4cf   : > { %v4876_v34 = vadd.f32 %v4737_v32, %v3551_v30  ;;  %v2233_v37 = vadd.f32 %v2232_v35, %v1739_v33 }
 0x4d1   : > { %vm5012_vm1 = vcmp.gt.f32.partialorder %v4876_v34, 0.0  ;;  %v5148_v36 = vmul.f32 0.2, %v4876_v34 }
 0x4d2   : > { %v3414_v38 = vpop.f32.mrf.mxu2 }
 0x4d3   : > { %v5284_v39 = vsel %vm5012_vm1, %v4876_v34, %v5148_v36  ;;  %v3552_v41 = vadd.f32 %v3414_v38, %v2233_v37 }
 0x4d4   : > { %v5420_v40 = vpack.c.bf16 %v5284_v39, %v5284_v39 }
 0x4d6   : > { %5557 = vst.msk [vmem:[%s6777_s6 + $0x218] sm:$0xf] %vm5422_vm6, %v5420_v40  ;;  %v4739_v42 = vpop.f32.mrf.mxu3 }
 0x4d7   : > { %v4877_v43 = vadd.f32 %v4739_v42, %v3552_v41 }
 0x4d9   : > { %vm5013_vm3 = vcmp.gt.f32.partialorder %v4877_v43, 0.0  ;;  %v5149_v44 = vmul.f32 0.2, %v4877_v43 }
 0x4db   : > { %v5285_v45 = vsel %vm5013_vm3, %v4877_v43, %v5149_v44 }
 0x4dc   : > { %v5421_v46 = vpack.c.bf16 %v5285_v45, %v5285_v45 }
 0x4de   : > { %5558 = vst.msk [vmem:[%s6777_s6 + $0x21c] sm:$0xf] %vm5422_vm6, %v5421_v46 }
 0x4df PF: > { %s12_s9 = sadd.s32 1, %s6617_s9  }
 0x4e0   : > { %p9_p4 = scmp.ge.s32.totalorder %s12_s9, 4  }
 0x4e2   :  { %11 = sbr.rel (!%p9_p4) target bundleno = 1 (0x1), region = 61 }

// kernel: tile.18
= control target key start
LH: loop header
LB: loop body
LE: loop exit
PB: predicated region body
PF: predicated region fallthrough
CT: control target
= control target key end

     0   :  { %s28_s0 = inlined_call_operand.vmem [shape: f32[18], index: 0, kind: input, shape index: {}]   ;;  %s29_s1 = inlined_call_operand.vmem [shape: f32[16,18], index: 1, kind: output, shape index: {}]  }
   0x1   :  { %v4_v0 = vld [vmem:[%s28_s0] ss:$0 sm:$0xff] }
   0x2   :  { %5 = vst [vmem:[%s29_s1] sm:$0xff] %v4_v0 }
   0x3   :  { %8 = vst [vmem:[%s29_s1 + $0x8] sm:$0xff] %v4_v0 }

// kernel: tile.0
= control target key start
LH: loop header
LB: loop body
LE: loop exit
PB: predicated region body
PF: predicated region fallthrough
CT: control target
= control target key end

     0   :  { %s607_s10 = smov 127   ;;  %s608_s11 = smov 126   ;;  %vm3_vm0 = vcmask 7168   ;;  %s1245_s0 = inlined_call_operand.vmem [shape: f32[16,18], index: 0, kind: input, shape index: {}]   ;;  %s1246_s1 = inlined_call_operand.vmem [shape: f32[288,1], index: 1, kind: output, shape index: {}]  }
   0x1   :  { %v637_v0 = vld.sshfl [vmem:[%s1245_s0] sm:$0xff pattern:$0xf6d4b290]   ;;  %s609_s12 = smov 125   ;;  %s610_s21 = smov 124  }
   0x2   :  { %v35_v1 = vld.sshfl [vmem:[%s1245_s0] sm:$0xff pattern:$0x6d4b2907]   ;;  %11 = vrot.lane.b32.xlu0 %v637_v0, %s607_s10  ;;  %v450_v3 = vld.sshfl [vmem:[%s1245_s0 + $0x1] sm:$0xff pattern:$0xd4b2907e]  }
   0x3   :  { %36 = vrot.lane.b32.xlu1 %v35_v1, %s608_s11  ;;  %61 = vrot.lane.b32.xlu2 %v35_v1, %s609_s12  ;;  %v441_v2 = vld.sshfl [vmem:[%s1245_s0 + $0x1] sm:$0xff pattern:$0x6d4b2907]   ;;  %s611_s22 = smov 123   ;;  %s612_s25 = smov 122  }
   0x4   :  { %v85_v4 = vld.sshfl [vmem:[%s1245_s0] sm:$0xff pattern:$0xd4b2907e]   ;;  %v468_v5 = vld.sshfl [vmem:[%s1245_s0 + $0x1] sm:$0xff pattern:$0x4b2907e5]  }
   0x5   :  { %v135_v6 = vld.sshfl [vmem:[%s1245_s0] sm:$0xff pattern:$0x4b2907e5]   ;;  %v495_v7 = vld.sshfl [vmem:[%s1245_s0 + $0x1] sm:$0xff pattern:$0xb2907e5c]  }
   0x6   :  { %s613_s28 = smov 121   ;;  %v210_v8 = vld.sshfl [vmem:[%s1245_s0] sm:$0xff pattern:$0xb2907e5c]   ;;  %s614_s2 = smov 120  }
   0x7   :  { %v504_v9 = vld.sshfl [vmem:[%s1245_s0 + $0x1] sm:$0xff pattern:$0x2907e5c3]   ;;  %s615_s5 = smov 119   ;;  %s618_s14 = smov 116  }
   0x8   :  { %v235_v10 = vld.sshfl [vmem:[%s1245_s0] sm:$0xff pattern:$0x2907e5c3]   ;;  %v522_v11 = vld.sshfl [vmem:[%s1245_s0 + $0x1] sm:$0xff pattern:$0x907e5c3a]  }
   0x9   :  { %v285_v12 = vld.sshfl [vmem:[%s1245_s0] sm:$0xff pattern:$0x907e5c3a]   ;;  %v549_v13 = vld.sshfl [vmem:[%s1245_s0 + $0x1] sm:$0xff pattern:$0x7e5c3a1]  }
   0xa   :  { %24 = vrot.lane.b32.xlu0 %v441_v2, %s607_s10  ;;  %s616_s10 = smov 118   ;;  %s619_s17 = smov 115   ;;  %v360_v14 = vld.sshfl [vmem:[%s1245_s0] sm:$0xff pattern:$0x7e5c3a1]  }
   0xb   :  { %49 = vrot.lane.b32.xlu1 %v450_v3, %s608_s11  ;;  %74 = vrot.lane.b32.xlu2 %v450_v3, %s609_s12  ;;  %s617_s11 = smov 117   ;;  %s620_s20 = smov 114   ;;  %v558_v15 = vld.sshfl [vmem:[%s1245_s0 + $0x2] sm:$0xff pattern:$0x6d4b2907]  }
   0xc   :  { %s621_s23 = smov 113   ;;  %s622_s24 = smov 112   ;;  %v2_v50 = vld [vmem:[%s1245_s0] sm:$0xff]   ;;  %v435_v51 = vld [vmem:[%s1245_s0 + $0x8] sm:$0xff]  }
   0xd   :  { %4 = vst.msk [vmem:[%s1246_s1] ss:$18 sm:$0xff] %vm3_vm0, %v2_v50  }
   0xe   :  { %436 = vst.msk [vmem:[%s1246_s1 + $0x90] ss:$18 sm:$0xff] %vm3_vm0, %v435_v51  }
  0x12   :  { %86 = vrot.lane.b32.xlu0 %v85_v4, %s610_s21 }
  0x13   :  { %99 = vrot.lane.b32.xlu1 %v468_v5, %s610_s21  ;;  %111 = vrot.lane.b32.xlu2 %v85_v4, %s611_s22 }
  0x1a   :  { %124 = vrot.lane.b32.xlu0 %v468_v5, %s611_s22 }
  0x1b   :  { %136 = vrot.lane.b32.xlu1 %v135_v6, %s612_s25  ;;  %149 = vrot.lane.b32.xlu2 %v495_v7, %s612_s25  ;;  %s623_s25 = smov 111  }
  0x22   :  { %161 = vrot.lane.b32.xlu0 %v135_v6, %s613_s28 }
  0x23   :  { %174 = vrot.lane.b32.xlu1 %v495_v7, %s613_s28  ;;  %186 = vrot.lane.b32.xlu2 %v210_v8, %s614_s2 }
  0x2a   :  { %199 = vrot.lane.b32.xlu0 %v504_v9, %s614_s2 }
  0x2b   :  { %211 = vrot.lane.b32.xlu1 %v210_v8, %s615_s5  ;;  %224 = vrot.lane.b32.xlu2 %v504_v9, %s615_s5 }
  0x32   :  { %236 = vrot.lane.b32.xlu0 %v235_v10, %s616_s10 }
  0x33   :  { %249 = vrot.lane.b32.xlu1 %v522_v11, %s616_s10  ;;  %261 = vrot.lane.b32.xlu2 %v235_v10, %s617_s11 }
  0x3a   :  { %274 = vrot.lane.b32.xlu0 %v522_v11, %s617_s11 }
  0x3b   :  { %286 = vrot.lane.b32.xlu1 %v285_v12, %s618_s14  ;;  %299 = vrot.lane.b32.xlu2 %v549_v13, %s618_s14 }
  0x42   :  { %311 = vrot.lane.b32.xlu0 %v285_v12, %s619_s17 }
  0x43   :  { %324 = vrot.lane.b32.xlu1 %v549_v13, %s619_s17  ;;  %336 = vrot.lane.b32.xlu2 %v360_v14, %s620_s20 }
  0x4a   :  { %349 = vrot.lane.b32.xlu0 %v558_v15, %s620_s20 }
  0x4b   :  { %361 = vrot.lane.b32.xlu1 %v360_v14, %s621_s23  ;;  %374 = vrot.lane.b32.xlu2 %v558_v15, %s621_s23 }
  0x52   :  { %387 = vrot.lane.b32.xlu0 %v441_v2, %s622_s24 }
  0x53   :  { %399 = vrot.lane.b32.xlu1 %v637_v0, %s622_s24  ;;  %412 = vrot.lane.b32.xlu2 %v441_v2, %s623_s25 }
  0x5a   :  { %424 = vrot.lane.b32.xlu0 %v637_v0, %s623_s25 }
  0x5d   :  { %v62_v16 = vpop.permute.xlu2 %61  }
  0x5e   :  { %455 = vst.msk [vmem:[%s1246_s1 + $0x81] ss:$-126 sm:$0x3] %vm3_vm0, %v62_v16  }
  0x5f   :  { %456 = vst.msk [vmem:[%s1246_s1 + $0x1a1] ss:$-126 sm:$0xc] %vm3_vm0, %v62_v16  }
  0x60   :  { %457 = vst.msk [vmem:[%s1246_s1 + $0x2c1] ss:$-126 sm:$0x30] %vm3_vm0, %v62_v16  }
  0x61   :  { %458 = vst.msk [vmem:[%s1246_s1 + $0x3e1] ss:$-126 sm:$0xc0] %vm3_vm0, %v62_v16  }
  0x65   :  { %v75_v17 = vpop.permute.xlu2 %74  }
  0x66   :  { %460 = vst.msk [vmem:[%s1246_s1 + $0x111] ss:$-126 sm:$0x7] %vm3_vm0, %v75_v17  }
  0x67   :  { %461 = vst.msk [vmem:[%s1246_s1 + $0x231] ss:$-126 sm:$0x18] %vm3_vm0, %v75_v17  }
  0x68   :  { %462 = vst.msk [vmem:[%s1246_s1 + $0x351] ss:$-126 sm:$0x60] %vm3_vm0, %v75_v17  }
  0x69   :  { %463 = vst.msk [vmem:[%s1246_s1 + $0xf8] sm:$0x80] %vm3_vm0, %v75_v17  }
  0x6d   :  { %v112_v18 = vpop.permute.xlu2 %111  }
  0x6e   :  { %473 = vst.msk [vmem:[%s1246_s1 + $0x101] ss:$-126 sm:$0x7] %vm3_vm0, %v112_v18  }
  0x6f   :  { %474 = vst.msk [vmem:[%s1246_s1 + $0x221] ss:$-126 sm:$0x18] %vm3_vm0, %v112_v18  }
  0x70   :  { %475 = vst.msk [vmem:[%s1246_s1 + $0x341] ss:$-126 sm:$0x60] %vm3_vm0, %v112_v18  }
  0x71   :  { %476 = vst.msk [vmem:[%s1246_s1 + $0xe8] sm:$0x80] %vm3_vm0, %v112_v18  }
  0x74   :  { %v12_v19 = vpop.permute.xlu0 %11  }
  0x75   :  { %v37_v20 = vpop.permute.xlu1 %36   ;;  %437 = vst.msk [vmem:[%s1246_s1 + $0x1] ss:$162 sm:$0x3] %vm3_vm0, %v12_v19   ;;  %v150_v21 = vpop.permute.xlu2 %149  }
  0x76   :  { %438 = vst.msk [vmem:[%s1246_s1 - $0x11f] ss:$162 sm:$0xc] %vm3_vm0, %v12_v19  }
  0x77   :  { %439 = vst.msk [vmem:[%s1246_s1 - $0x23f] ss:$162 sm:$0x30] %vm3_vm0, %v12_v19  }
  0x78   :  { %440 = vst.msk [vmem:[%s1246_s1 - $0x35f] ss:$162 sm:$0xc0] %vm3_vm0, %v12_v19  }
  0x79   :  { %446 = vst.msk [vmem:[%s1246_s1 + $0x80] ss:$-126 sm:$0x3] %vm3_vm0, %v37_v20  }
  0x7a   :  { %447 = vst.msk [vmem:[%s1246_s1 + $0x1a0] ss:$-126 sm:$0xc] %vm3_vm0, %v37_v20  }
  0x7b   :  { %448 = vst.msk [vmem:[%s1246_s1 + $0x2c0] ss:$-126 sm:$0x30] %vm3_vm0, %v37_v20  }
  0x7c   :  { %449 = vst.msk [vmem:[%s1246_s1 + $0x3e0] ss:$-126 sm:$0xc0] %vm3_vm0, %v37_v20   ;;  %v25_v22 = vpop.permute.xlu0 %24  }
  0x7d   :  { %v50_v23 = vpop.permute.xlu1 %49   ;;  %442 = vst.msk [vmem:[%s1246_s1 + $0x91] ss:$-126 sm:$0x3] %vm3_vm0, %v25_v22   ;;  %v187_v24 = vpop.permute.xlu2 %186  }
  0x7e   :  { %443 = vst.msk [vmem:[%s1246_s1 + $0x1b1] ss:$-126 sm:$0xc] %vm3_vm0, %v25_v22  }
  0x7f   :  { %444 = vst.msk [vmem:[%s1246_s1 + $0x2d1] ss:$-126 sm:$0x30] %vm3_vm0, %v25_v22  }
  0x80   :  { %445 = vst.msk [vmem:[%s1246_s1 + $0x3f1] ss:$-126 sm:$0xc0] %vm3_vm0, %v25_v22  }
  0x81   :  { %451 = vst.msk [vmem:[%s1246_s1 + $0x110] ss:$-126 sm:$0x7] %vm3_vm0, %v50_v23  }
  0x82   :  { %452 = vst.msk [vmem:[%s1246_s1 + $0x230] ss:$-126 sm:$0x18] %vm3_vm0, %v50_v23  }
  0x83   :  { %453 = vst.msk [vmem:[%s1246_s1 + $0x350] ss:$-126 sm:$0x60] %vm3_vm0, %v50_v23  }
  0x84   :  { %454 = vst.msk [vmem:[%s1246_s1 + $0xf7] sm:$0x80] %vm3_vm0, %v50_v23   ;;  %v87_v25 = vpop.permute.xlu0 %86  }
  0x85   :  { %v100_v26 = vpop.permute.xlu1 %99   ;;  %464 = vst.msk [vmem:[%s1246_s1 + $0x100] ss:$-126 sm:$0x7] %vm3_vm0, %v87_v25   ;;  %v225_v27 = vpop.permute.xlu2 %224  }
  0x86   :  { %465 = vst.msk [vmem:[%s1246_s1 + $0x220] ss:$-126 sm:$0x18] %vm3_vm0, %v87_v25  }
  0x87   :  { %466 = vst.msk [vmem:[%s1246_s1 + $0x340] ss:$-126 sm:$0x60] %vm3_vm0, %v87_v25  }
  0x88   :  { %467 = vst.msk [vmem:[%s1246_s1 + $0xe7] sm:$0x80] %vm3_vm0, %v87_v25  }
  0x89   :  { %469 = vst.msk [vmem:[%s1246_s1 + $0x70] ss:$162 sm:$0x3] %vm3_vm0, %v100_v26  }
  0x8a   :  { %470 = vst.msk [vmem:[%s1246_s1 + $0x190] ss:$-126 sm:$0xc] %vm3_vm0, %v100_v26  }
  0x8b   :  { %471 = vst.msk [vmem:[%s1246_s1 + $0x2b0] ss:$-126 sm:$0x30] %vm3_vm0, %v100_v26  }
  0x8c   :  { %472 = vst.msk [vmem:[%s1246_s1 + $0x3d0] ss:$-126 sm:$0xc0] %vm3_vm0, %v100_v26   ;;  %v125_v28 = vpop.permute.xlu0 %124  }
  0x8d   :  { %v137_v29 = vpop.permute.xlu1 %136   ;;  %478 = vst.msk [vmem:[%s1246_s1 + $0x71] ss:$162 sm:$0x3] %vm3_vm0, %v125_v28   ;;  %v262_v32 = vpop.permute.xlu2 %261  }
  0x8e   :  { %479 = vst.msk [vmem:[%s1246_s1 + $0x191] ss:$-126 sm:$0xc] %vm3_vm0, %v125_v28  }
  0x8f   :  { %480 = vst.msk [vmem:[%s1246_s1 + $0x2b1] ss:$-126 sm:$0x30] %vm3_vm0, %v125_v28  }
  0x90   :  { %481 = vst.msk [vmem:[%s1246_s1 + $0x3d1] ss:$-126 sm:$0xc0] %vm3_vm0, %v125_v28  }
  0x91   :  { %487 = vst.msk [vmem:[%s1246_s1 + $0xf0] ss:$-126 sm:$0x3] %vm3_vm0, %v150_v21  }
  0x92   :  { %488 = vst.msk [vmem:[%s1246_s1 + $0x210] ss:$-126 sm:$0x1c] %vm3_vm0, %v150_v21  }
  0x93   :  { %489 = vst.msk [vmem:[%s1246_s1 + $0x330] ss:$-126 sm:$0x60] %vm3_vm0, %v150_v21  }
  0x94   :  { %490 = vst.msk [vmem:[%s1246_s1 + $0xd7] sm:$0x80] %vm3_vm0, %v150_v21   ;;  %v162_v30 = vpop.permute.xlu0 %161  }
  0x95   :  { %v175_v31 = vpop.permute.xlu1 %174   ;;  %482 = vst.msk [vmem:[%s1246_s1 + $0x60] ss:$162 sm:$0x3] %vm3_vm0, %v137_v29   ;;  %v300_v35 = vpop.permute.xlu2 %299  }
  0x96   :  { %483 = vst.msk [vmem:[%s1246_s1 + $0x180] ss:$-126 sm:$0xc] %vm3_vm0, %v137_v29  }
  0x97   :  { %484 = vst.msk [vmem:[%s1246_s1 + $0x2a0] ss:$-126 sm:$0x30] %vm3_vm0, %v137_v29  }
  0x98   :  { %485 = vst.msk [vmem:[%s1246_s1 + $0x3c0] ss:$-126 sm:$0xc0] %vm3_vm0, %v137_v29  }
  0x99   :  { %491 = vst.msk [vmem:[%s1246_s1 + $0x61] ss:$162 sm:$0x3] %vm3_vm0, %v162_v30  }
  0x9a   :  { %492 = vst.msk [vmem:[%s1246_s1 + $0x181] ss:$-126 sm:$0xc] %vm3_vm0, %v162_v30  }
  0x9b   :  { %493 = vst.msk [vmem:[%s1246_s1 + $0x2a1] ss:$-126 sm:$0x30] %vm3_vm0, %v162_v30  }
  0x9c   :  { %494 = vst.msk [vmem:[%s1246_s1 + $0x3c1] ss:$-126 sm:$0xc0] %vm3_vm0, %v162_v30   ;;  %v200_v33 = vpop.permute.xlu0 %199  }
  0x9d   :  { %v212_v34 = vpop.permute.xlu1 %211   ;;  %500 = vst.msk [vmem:[%s1246_s1 + $0xe0] ss:$-126 sm:$0x3] %vm3_vm0, %v187_v24   ;;  %v337_v40 = vpop.permute.xlu2 %336  }
  0x9e   :  { %501 = vst.msk [vmem:[%s1246_s1 + $0x200] ss:$-126 sm:$0x1c] %vm3_vm0, %v187_v24  }
  0x9f   :  { %502 = vst.msk [vmem:[%s1246_s1 + $0x320] ss:$-126 sm:$0x60] %vm3_vm0, %v187_v24  }
  0xa0   :  { %503 = vst.msk [vmem:[%s1246_s1 + $0xc7] sm:$0x80] %vm3_vm0, %v187_v24  }
  0xa1   :  { %496 = vst.msk [vmem:[%s1246_s1 + $0xf1] ss:$-126 sm:$0x3] %vm3_vm0, %v175_v31  }
  0xa2   :  { %497 = vst.msk [vmem:[%s1246_s1 + $0x211] ss:$-126 sm:$0x1c] %vm3_vm0, %v175_v31  }
  0xa3   :  { %498 = vst.msk [vmem:[%s1246_s1 + $0x331] ss:$-126 sm:$0x60] %vm3_vm0, %v175_v31  }
  0xa4   :  { %499 = vst.msk [vmem:[%s1246_s1 + $0xd8] sm:$0x80] %vm3_vm0, %v175_v31   ;;  %v237_v36 = vpop.permute.xlu0 %236  }
  0xa5   :  { %v250_v37 = vpop.permute.xlu1 %249   ;;  %505 = vst.msk [vmem:[%s1246_s1 + $0x50] ss:$162 sm:$0x3] %vm3_vm0, %v200_v33   ;;  %v375_v43 = vpop.permute.xlu2 %374  }
  0xa6   :  { %506 = vst.msk [vmem:[%s1246_s1 - $0xd0] ss:$162 sm:$0xc] %vm3_vm0, %v200_v33  }
  0xa7   :  { %507 = vst.msk [vmem:[%s1246_s1 + $0x290] ss:$-126 sm:$0x30] %vm3_vm0, %v200_v33  }
  0xa8   :  { %508 = vst.msk [vmem:[%s1246_s1 + $0x3b0] ss:$-126 sm:$0xc0] %vm3_vm0, %v200_v33  }
  0xa9   :  { %514 = vst.msk [vmem:[%s1246_s1 + $0x51] ss:$162 sm:$0x3] %vm3_vm0, %v225_v27  }
  0xaa   :  { %515 = vst.msk [vmem:[%s1246_s1 - $0xcf] ss:$162 sm:$0xc] %vm3_vm0, %v225_v27  }
  0xab   :  { %516 = vst.msk [vmem:[%s1246_s1 + $0x291] ss:$-126 sm:$0x30] %vm3_vm0, %v225_v27  }
  0xac   :  { %517 = vst.msk [vmem:[%s1246_s1 + $0x3b1] ss:$-126 sm:$0xc0] %vm3_vm0, %v225_v27   ;;  %v275_v38 = vpop.permute.xlu0 %274  }
  0xad   :  { %v287_v39 = vpop.permute.xlu1 %286   ;;  %509 = vst.msk [vmem:[%s1246_s1 + $0xe1] ss:$-126 sm:$0x3] %vm3_vm0, %v212_v34   ;;  %v413_v47 = vpop.permute.xlu2 %412  }
  0xae   :  { %510 = vst.msk [vmem:[%s1246_s1 + $0x201] ss:$-126 sm:$0x1c] %vm3_vm0, %v212_v34  }
  0xaf   :  { %511 = vst.msk [vmem:[%s1246_s1 + $0x321] ss:$-126 sm:$0x60] %vm3_vm0, %v212_v34  }
  0xb0   :  { %512 = vst.msk [vmem:[%s1246_s1 + $0xc8] sm:$0x80] %vm3_vm0, %v212_v34  }
  0xb1   :  { %518 = vst.msk [vmem:[%s1246_s1 + $0x40] ss:$162 sm:$0x3] %vm3_vm0, %v237_v36  }
  0xb2   :  { %519 = vst.msk [vmem:[%s1246_s1 - $0xe0] ss:$162 sm:$0xc] %vm3_vm0, %v237_v36  }
  0xb3   :  { %520 = vst.msk [vmem:[%s1246_s1 + $0x280] ss:$-126 sm:$0x30] %vm3_vm0, %v237_v36  }
  0xb4   :  { %521 = vst.msk [vmem:[%s1246_s1 + $0x3a0] ss:$-126 sm:$0xc0] %vm3_vm0, %v237_v36   ;;  %v312_v41 = vpop.permute.xlu0 %311  }
  0xb5   :  { %v325_v42 = vpop.permute.xlu1 %324   ;;  %527 = vst.msk [vmem:[%s1246_s1 + $0x41] ss:$162 sm:$0x3] %vm3_vm0, %v262_v32  }
  0xb6   :  { %528 = vst.msk [vmem:[%s1246_s1 - $0xdf] ss:$162 sm:$0xc] %vm3_vm0, %v262_v32  }
  0xb7   :  { %529 = vst.msk [vmem:[%s1246_s1 + $0x281] ss:$-126 sm:$0x30] %vm3_vm0, %v262_v32  }
  0xb8   :  { %530 = vst.msk [vmem:[%s1246_s1 + $0x3a1] ss:$-126 sm:$0xc0] %vm3_vm0, %v262_v32  }
  0xb9   :  { %523 = vst.msk [vmem:[%s1246_s1 + $0xd0] ss:$-126 sm:$0x3] %vm3_vm0, %v250_v37  }
  0xba   :  { %524 = vst.msk [vmem:[%s1246_s1 + $0x1f0] ss:$-126 sm:$0xc] %vm3_vm0, %v250_v37  }
  0xbb   :  { %525 = vst.msk [vmem:[%s1246_s1 + $0x310] ss:$-126 sm:$0x70] %vm3_vm0, %v250_v37  }
  0xbc   :  { %526 = vst.msk [vmem:[%s1246_s1 + $0xb7] sm:$0x80] %vm3_vm0, %v250_v37   ;;  %v350_v44 = vpop.permute.xlu0 %349  }
  0xbd   :  { %v362_v45 = vpop.permute.xlu1 %361   ;;  %532 = vst.msk [vmem:[%s1246_s1 + $0xd1] ss:$-126 sm:$0x3] %vm3_vm0, %v275_v38  }
  0xbe   :  { %533 = vst.msk [vmem:[%s1246_s1 + $0x1f1] ss:$-126 sm:$0xc] %vm3_vm0, %v275_v38  }
  0xbf   :  { %534 = vst.msk [vmem:[%s1246_s1 + $0x311] ss:$-126 sm:$0x70] %vm3_vm0, %v275_v38  }
  0xc0   :  { %535 = vst.msk [vmem:[%s1246_s1 + $0xb8] sm:$0x80] %vm3_vm0, %v275_v38  }
  0xc1   :  { %541 = vst.msk [vmem:[%s1246_s1 + $0x30] ss:$162 sm:$0x3] %vm3_vm0, %v300_v35  }
  0xc2   :  { %542 = vst.msk [vmem:[%s1246_s1 - $0xf0] ss:$162 sm:$0xc] %vm3_vm0, %v300_v35  }
  0xc3   :  { %543 = vst.msk [vmem:[%s1246_s1 - $0x210] ss:$162 sm:$0x30] %vm3_vm0, %v300_v35  }
  0xc4   :  { %544 = vst.msk [vmem:[%s1246_s1 + $0x390] ss:$-126 sm:$0xc0] %vm3_vm0, %v300_v35   ;;  %v388_v46 = vpop.permute.xlu0 %387  }
  0xc5   :  { %536 = vst.msk [vmem:[%s1246_s1 + $0xc0] ss:$-126 sm:$0x3] %vm3_vm0, %v287_v39   ;;  %v400_v48 = vpop.permute.xlu1 %399  }
  0xc6   :  { %537 = vst.msk [vmem:[%s1246_s1 + $0x1e0] ss:$-126 sm:$0xc] %vm3_vm0, %v287_v39  }
  0xc7   :  { %538 = vst.msk [vmem:[%s1246_s1 + $0x300] ss:$-126 sm:$0x70] %vm3_vm0, %v287_v39  }
  0xc8   :  { %539 = vst.msk [vmem:[%s1246_s1 + $0xa7] sm:$0x80] %vm3_vm0, %v287_v39  }
  0xc9   :  { %545 = vst.msk [vmem:[%s1246_s1 + $0xc1] ss:$-126 sm:$0x3] %vm3_vm0, %v312_v41  }
  0xca   :  { %546 = vst.msk [vmem:[%s1246_s1 + $0x1e1] ss:$-126 sm:$0xc] %vm3_vm0, %v312_v41  }
  0xcb   :  { %547 = vst.msk [vmem:[%s1246_s1 + $0x301] ss:$-126 sm:$0x70] %vm3_vm0, %v312_v41  }
  0xcc   :  { %548 = vst.msk [vmem:[%s1246_s1 + $0xa8] sm:$0x80] %vm3_vm0, %v312_v41   ;;  %v425_v49 = vpop.permute.xlu0 %424  }
  0xcd   :  { %554 = vst.msk [vmem:[%s1246_s1 + $0x20] ss:$162 sm:$0x3] %vm3_vm0, %v337_v40  }
  0xce   :  { %555 = vst.msk [vmem:[%s1246_s1 - $0x100] ss:$162 sm:$0xc] %vm3_vm0, %v337_v40  }
  0xcf   :  { %556 = vst.msk [vmem:[%s1246_s1 - $0x220] ss:$162 sm:$0x30] %vm3_vm0, %v337_v40  }
  0xd0   :  { %557 = vst.msk [vmem:[%s1246_s1 + $0x380] ss:$-126 sm:$0xc0] %vm3_vm0, %v337_v40  }
  0xd1   :  { %550 = vst.msk [vmem:[%s1246_s1 + $0x31] ss:$162 sm:$0x3] %vm3_vm0, %v325_v42  }
  0xd2   :  { %551 = vst.msk [vmem:[%s1246_s1 - $0xef] ss:$162 sm:$0xc] %vm3_vm0, %v325_v42  }
  0xd3   :  { %552 = vst.msk [vmem:[%s1246_s1 - $0x20f] ss:$162 sm:$0x30] %vm3_vm0, %v325_v42  }
  0xd4   :  { %553 = vst.msk [vmem:[%s1246_s1 + $0x391] ss:$-126 sm:$0xc0] %vm3_vm0, %v325_v42  }
  0xd5   :  { %559 = vst.msk [vmem:[%s1246_s1 + $0xb0] ss:$-126 sm:$0x3] %vm3_vm0, %v350_v44  }
  0xd6   :  { %560 = vst.msk [vmem:[%s1246_s1 + $0x1d0] ss:$-126 sm:$0xc] %vm3_vm0, %v350_v44  }
  0xd7   :  { %561 = vst.msk [vmem:[%s1246_s1 + $0x2f0] ss:$-126 sm:$0x30] %vm3_vm0, %v350_v44  }
  0xd8   :  { %562 = vst.msk [vmem:[%s1246_s1 + $0x410] ss:$-126 sm:$0xc0] %vm3_vm0, %v350_v44  }
  0xd9   :  { %568 = vst.msk [vmem:[%s1246_s1 + $0xb1] ss:$-126 sm:$0x3] %vm3_vm0, %v375_v43  }
  0xda   :  { %569 = vst.msk [vmem:[%s1246_s1 + $0x1d1] ss:$-126 sm:$0xc] %vm3_vm0, %v375_v43  }
  0xdb   :  { %570 = vst.msk [vmem:[%s1246_s1 + $0x2f1] ss:$-126 sm:$0x30] %vm3_vm0, %v375_v43  }
  0xdc   :  { %571 = vst.msk [vmem:[%s1246_s1 + $0x411] ss:$-126 sm:$0xc0] %vm3_vm0, %v375_v43  }
  0xdd   :  { %563 = vst.msk [vmem:[%s1246_s1 + $0x21] ss:$162 sm:$0x3] %vm3_vm0, %v362_v45  }
  0xde   :  { %564 = vst.msk [vmem:[%s1246_s1 - $0xff] ss:$162 sm:$0xc] %vm3_vm0, %v362_v45  }
  0xdf   :  { %565 = vst.msk [vmem:[%s1246_s1 - $0x21f] ss:$162 sm:$0x30] %vm3_vm0, %v362_v45  }
  0xe0   :  { %566 = vst.msk [vmem:[%s1246_s1 + $0x381] ss:$-126 sm:$0xc0] %vm3_vm0, %v362_v45  }
  0xe1   :  { %573 = vst.msk [vmem:[%s1246_s1 + $0xa0] ss:$-126 sm:$0x3] %vm3_vm0, %v388_v46  }
  0xe2   :  { %574 = vst.msk [vmem:[%s1246_s1 + $0x1c0] ss:$-126 sm:$0xc] %vm3_vm0, %v388_v46  }
  0xe3   :  { %575 = vst.msk [vmem:[%s1246_s1 + $0x2e0] ss:$-126 sm:$0x30] %vm3_vm0, %v388_v46  }
  0xe4   :  { %576 = vst.msk [vmem:[%s1246_s1 + $0x400] ss:$-126 sm:$0xc0] %vm3_vm0, %v388_v46  }
  0xe5   :  { %582 = vst.msk [vmem:[%s1246_s1 + $0xa1] ss:$-126 sm:$0x3] %vm3_vm0, %v413_v47  }
  0xe6   :  { %583 = vst.msk [vmem:[%s1246_s1 + $0x1c1] ss:$-126 sm:$0xc] %vm3_vm0, %v413_v47  }
  0xe7   :  { %584 = vst.msk [vmem:[%s1246_s1 + $0x2e1] ss:$-126 sm:$0x30] %vm3_vm0, %v413_v47  }
  0xe8   :  { %585 = vst.msk [vmem:[%s1246_s1 + $0x401] ss:$-126 sm:$0xc0] %vm3_vm0, %v413_v47  }
  0xe9   :  { %577 = vst.msk [vmem:[%s1246_s1 + $0x10] ss:$162 sm:$0x3] %vm3_vm0, %v400_v48  }
  0xea   :  { %578 = vst.msk [vmem:[%s1246_s1 - $0x110] ss:$162 sm:$0xc] %vm3_vm0, %v400_v48  }
  0xeb   :  { %579 = vst.msk [vmem:[%s1246_s1 - $0x230] ss:$162 sm:$0x30] %vm3_vm0, %v400_v48  }
  0xec   :  { %580 = vst.msk [vmem:[%s1246_s1 - $0x350] ss:$162 sm:$0xc0] %vm3_vm0, %v400_v48  }
  0xed   :  { %586 = vst.msk [vmem:[%s1246_s1 + $0x11] ss:$162 sm:$0x3] %vm3_vm0, %v425_v49  }
  0xee   :  { %587 = vst.msk [vmem:[%s1246_s1 - $0x10f] ss:$162 sm:$0xc] %vm3_vm0, %v425_v49  }
  0xef   :  { %588 = vst.msk [vmem:[%s1246_s1 - $0x22f] ss:$162 sm:$0x30] %vm3_vm0, %v425_v49  }
  0xf0   :  { %589 = vst.msk [vmem:[%s1246_s1 - $0x34f] ss:$162 sm:$0xc0] %vm3_vm0, %v425_v49  }

// kernel: netD_forward.9
= control target key start
LH: loop header
LB: loop body
LE: loop exit
PB: predicated region body
PF: predicated region fallthrough
CT: control target
= control target key end

     0   :  { %s696_s12 = smov 0   ;;  %s896_s0 = inlined_call_operand.vmem [shape: bf16[2,288,16], index: 0, kind: input, shape index: {}]   ;;  %s897_s1 = inlined_call_operand.vmem [shape: f32[1,16], index: 1, kind: input, shape index: {}]   ;;  %s898_s2 = inlined_call_operand.vmem [shape: f32[1,16], index: 2, kind: input, shape index: {}]   ;;  %s899_s3 = inlined_call_operand.vmem [shape: bf16[2,288,16], index: 3, kind: output, shape index: {}]  }
   0x1 LB: > { %s559_s13 = sadd.s32 4294967295, %s674_s12   ;;  %p563_p0 = scmp.ge.s32.totalorder %s674_s12, 1  ;;  %s674_s12 = sphi %s696_s12, %s13_s12  }
   0x2   : > { %p137_p1 = scmp.lt.s32.totalorder %s674_s12, 3 }
   0x4   : > { %p138_p2 = pnand %p563_p0, %p137_p1 }
   0x5   : > { %p161_p3 = scmp.lt.s32.totalorder (!%p138_p2), %s559_s13, 1 }
   0x6   : > { %141 = sbr.rel (%p138_p2) target bundleno = 85 (0x55), region = 32 }
   0xb   : > { %s901_s13 = smov (!%p161_p3, %s559_s13), 1  ;;  %v717_v0 = vld [vmem:[%s897_s1] ss:$0 sm:$0xff]  ;;  %vm467_vm0 = vcmask 125952  }
   0xc   : > { %s657_s14 = smul.u32 144, %s901_s13  ;;  %v725_v5 = vld [vmem:[%s898_s2] ss:$0 sm:$0xff] }
   0xe   : > { %s712_s17 = scalar_lea.vmem %s896_s0, %s657_s14  ;;  %s749_s24 = scalar_lea.vmem %s899_s3, %s657_s14 }
   0xf   : > { %v569_v1 = vld [vmem:[%s712_s17] sm:$0xff]   ;;  %v640_v2 = vld [vmem:[%s712_s17 + $0x8] sm:$0xff]   ;;  %v641_v3 = vld [vmem:[%s712_s17 + $0x10] sm:$0xff]  }
  0x10   : > { %v570_v4 = vunpack.c.l.bf16 %v569_v1  ;;  %v571_v6 = vunpack.c.h.bf16 %v569_v1  ;;  %v574_v7 = vunpack.c.l.bf16 %v640_v2  ;;  %v575_v8 = vunpack.c.h.bf16 %v640_v2  ;;  %v642_v9 = vld [vmem:[%s712_s17 + $0x18] sm:$0xff]   ;;  %v643_v41 = vld [vmem:[%s712_s17 + $0x20] sm:$0xff]   ;;  %v644_v45 = vld [vmem:[%s712_s17 + $0x28] sm:$0xff]  }
  0x11   : > { %v578_v10 = vunpack.c.l.bf16 %v641_v3  ;;  %v579_v11 = vunpack.c.h.bf16 %v641_v3  ;;  %v582_v12 = vunpack.c.l.bf16 %v642_v9  ;;  %v583_v13 = vunpack.c.h.bf16 %v642_v9  ;;  %v645_v46 = vld [vmem:[%s712_s17 + $0x30] sm:$0xff]   ;;  %v646_v61 = vld [vmem:[%s712_s17 + $0x38] sm:$0xff]  }
  0x12   : > { %v247_v14 = vmul.f32 %v717_v0, %v570_v4  ;;  %v248_v15 = vmul.f32 %v717_v0, %v571_v6  ;;  %v249_v16 = vmul.f32 %v717_v0, %v574_v7  ;;  %v250_v17 = vmul.f32 %v717_v0, %v575_v8 }
  0x13   : > { %v251_v18 = vmul.f32 %v717_v0, %v578_v10  ;;  %v252_v19 = vmul.f32 %v717_v0, %v579_v11  ;;  %v253_v20 = vmul.f32 %v717_v0, %v582_v12  ;;  %v254_v21 = vmul.f32 %v717_v0, %v583_v13 }
  0x14   : > { %v287_v22 = vadd.f32 %v725_v5, %v247_v14  ;;  %v288_v23 = vadd.f32 %v725_v5, %v248_v15  ;;  %v289_v24 = vadd.f32 %v725_v5, %v249_v16  ;;  %v290_v25 = vadd.f32 %v725_v5, %v250_v17 }
  0x15   : > { %v291_v26 = vadd.f32 %v725_v5, %v251_v18  ;;  %v292_v27 = vadd.f32 %v725_v5, %v252_v19  ;;  %v293_v28 = vadd.f32 %v725_v5, %v253_v20  ;;  %v294_v29 = vadd.f32 %v725_v5, %v254_v21 }
  0x16   : > { %vm323_vm1 = vcmp.gt.f32.partialorder %v287_v22, 0.0  ;;  %v359_v30 = vmul.f32 0.2, %v287_v22  ;;  %vm324_vm2 = vcmp.gt.f32.partialorder %v288_v23, 0.0  ;;  %v360_v31 = vmul.f32 0.2, %v288_v23 }
  0x17   : > { %vm325_vm3 = vcmp.gt.f32.partialorder %v289_v24, 0.0  ;;  %v361_v32 = vmul.f32 0.2, %v289_v24  ;;  %vm326_vm4 = vcmp.gt.f32.partialorder %v290_v25, 0.0  ;;  %v362_v33 = vmul.f32 0.2, %v290_v25 }
  0x18   : > { %v395_v34 = vsel %vm323_vm1, %v287_v22, %v359_v30  ;;  %v396_v35 = vsel %vm324_vm2, %v288_v23, %v360_v31  ;;  %vm327_vm5 = vcmp.gt.f32.partialorder %v291_v26, 0.0  ;;  %v363_v36 = vmul.f32 0.2, %v291_v26  ;;  %v647_v23 = vld [vmem:[%s712_s17 + $0x40] sm:$0xff]  }
  0x19   : > { %v431_v37 = vpack.c.bf16 %v395_v34, %v395_v34  ;;  %v432_v38 = vpack.c.bf16 %v396_v35, %v396_v35  ;;  %v397_v39 = vsel %vm325_vm3, %v289_v24, %v361_v32  ;;  %v398_v40 = vsel %vm326_vm4, %v290_v25, %v362_v33 }
  0x1a   : > { %v433_v42 = vpack.c.bf16 %v397_v39, %v397_v39  ;;  %v434_v43 = vpack.c.bf16 %v398_v40, %v398_v40  ;;  %v399_v44 = vsel %vm327_vm5, %v291_v26, %v363_v36  ;;  %vm328_vm6 = vcmp.gt.f32.partialorder %v292_v27, 0.0 }
  0x1b   : > { %468 = vst.msk [vmem:[%s749_s24] sm:$0xf] %vm467_vm0, %v431_v37  ;;  %v435_v47 = vpack.c.bf16 %v399_v44, %v399_v44  ;;  %v364_v48 = vmul.f32 0.2, %v292_v27  ;;  %vm329_vm7 = vcmp.gt.f32.partialorder %v293_v28, 0.0  ;;  %vm330_vm8 = vcmp.gt.f32.partialorder %v294_v29, 0.0 }
  0x1c   : > { %469 = vst.msk [vmem:[%s749_s24 + $0x4] sm:$0xf] %vm467_vm0, %v432_v38  ;;  %v365_v49 = vmul.f32 0.2, %v293_v28  ;;  %v366_v50 = vmul.f32 0.2, %v294_v29  ;;  %v586_v51 = vunpack.c.l.bf16 %v643_v41  ;;  %v587_v52 = vunpack.c.h.bf16 %v643_v41 }
  0x1d   : > { %470 = vst.msk [vmem:[%s749_s24 + $0x8] sm:$0xf] %vm467_vm0, %v433_v42  ;;  %v400_v53 = vsel %vm328_vm6, %v292_v27, %v364_v48  ;;  %v590_v54 = vunpack.c.l.bf16 %v644_v45  ;;  %v591_v55 = vunpack.c.h.bf16 %v644_v45  ;;  %v594_v56 = vunpack.c.l.bf16 %v645_v46 }
  0x1e   : > { %471 = vst.msk [vmem:[%s749_s24 + $0xc] sm:$0xf] %vm467_vm0, %v434_v43  ;;  %v436_v57 = vpack.c.bf16 %v400_v53, %v400_v53  ;;  %v401_v58 = vsel %vm329_vm7, %v293_v28, %v365_v49  ;;  %v402_v59 = vsel %vm330_vm8, %v294_v29, %v366_v50  ;;  %v255_v60 = vmul.f32 %v717_v0, %v586_v51  ;;  %v648_v28 = vld [vmem:[%s712_s17 + $0x48] sm:$0xff]  }
  0x1f   : > { %472 = vst.msk [vmem:[%s749_s24 + $0x10] sm:$0xf] %vm467_vm0, %v435_v47  ;;  %v437_v62 = vpack.c.bf16 %v401_v58, %v401_v58  ;;  %v438_v63 = vpack.c.bf16 %v402_v59, %v402_v59  ;;  %v256_v1 = vmul.f32 %v717_v0, %v587_v52  ;;  %v257_v2 = vmul.f32 %v717_v0, %v590_v54  ;;  %v649_v54 = vld [vmem:[%s712_s17 + $0x50] sm:$0xff]   ;;  %v650_v58 = vld [vmem:[%s712_s17 + $0x58] sm:$0xff]  }
  0x20   : > { %473 = vst.msk [vmem:[%s749_s24 + $0x14] sm:$0xf] %vm467_vm0, %v436_v57  ;;  %v295_v3 = vadd.f32 %v725_v5, %v255_v60  ;;  %v258_v4 = vmul.f32 %v717_v0, %v591_v55  ;;  %v259_v6 = vmul.f32 %v717_v0, %v594_v56  ;;  %v595_v7 = vunpack.c.h.bf16 %v645_v46 }
  0x21   : > { %474 = vst.msk [vmem:[%s749_s24 + $0x18] sm:$0xf] %vm467_vm0, %v437_v62  ;;  %v296_v8 = vadd.f32 %v725_v5, %v256_v1  ;;  %v297_v9 = vadd.f32 %v725_v5, %v257_v2  ;;  %v598_v10 = vunpack.c.l.bf16 %v646_v61  ;;  %v599_v11 = vunpack.c.h.bf16 %v646_v61 }
  0x22   : > { %475 = vst.msk [vmem:[%s749_s24 + $0x1c] sm:$0xf] %vm467_vm0, %v438_v63  ;;  %vm331_vm9 = vcmp.gt.f32.partialorder %v295_v3, 0.0  ;;  %v367_v12 = vmul.f32 0.2, %v295_v3  ;;  %v298_v13 = vadd.f32 %v725_v5, %v258_v4  ;;  %v299_v14 = vadd.f32 %v725_v5, %v259_v6 }
  0x23   : > { %vm332_vm10 = vcmp.gt.f32.partialorder %v296_v8, 0.0  ;;  %v368_v15 = vmul.f32 0.2, %v296_v8  ;;  %vm333_vm11 = vcmp.gt.f32.partialorder %v297_v9, 0.0  ;;  %v369_v16 = vmul.f32 0.2, %v297_v9 }
  0x24   : > { %v403_v17 = vsel %vm331_vm9, %v295_v3, %v367_v12  ;;  %vm334_vm12 = vcmp.gt.f32.partialorder %v298_v13, 0.0  ;;  %v370_v18 = vmul.f32 0.2, %v298_v13  ;;  %vm335_vm13 = vcmp.gt.f32.partialorder %v299_v14, 0.0 }
  0x25   : > { %v439_v19 = vpack.c.bf16 %v403_v17, %v403_v17  ;;  %v404_v20 = vsel %vm332_vm10, %v296_v8, %v368_v15  ;;  %v405_v21 = vsel %vm333_vm11, %v297_v9, %v369_v16  ;;  %v371_v22 = vmul.f32 0.2, %v299_v14  ;;  %v652_v15 = vld [vmem:[%s712_s17 + $0x68] sm:$0xff]  }
  0x26   : > { %v440_v24 = vpack.c.bf16 %v404_v20, %v404_v20  ;;  %v441_v25 = vpack.c.bf16 %v405_v21, %v405_v21  ;;  %v406_v26 = vsel %vm334_vm12, %v298_v13, %v370_v18  ;;  %v260_v27 = vmul.f32 %v717_v0, %v595_v7  ;;  %v651_v7 = vld [vmem:[%s712_s17 + $0x60] sm:$0xff]  }
  0x27   : > { %476 = vst.msk [vmem:[%s749_s24 + $0x20] sm:$0xf] %vm467_vm0, %v439_v19  ;;  %v442_v29 = vpack.c.bf16 %v406_v26, %v406_v26  ;;  %v407_v30 = vsel %vm335_vm13, %v299_v14, %v371_v22  ;;  %v261_v31 = vmul.f32 %v717_v0, %v598_v10  ;;  %v262_v32 = vmul.f32 %v717_v0, %v599_v11 }
  0x28   : > { %477 = vst.msk [vmem:[%s749_s24 + $0x24] sm:$0xf] %vm467_vm0, %v440_v24  ;;  %v443_v33 = vpack.c.bf16 %v407_v30, %v407_v30  ;;  %v300_v34 = vadd.f32 %v725_v5, %v260_v27  ;;  %v602_v35 = vunpack.c.l.bf16 %v647_v23  ;;  %v603_v36 = vunpack.c.h.bf16 %v647_v23 }
  0x29   : > { %478 = vst.msk [vmem:[%s749_s24 + $0x28] sm:$0xf] %vm467_vm0, %v441_v25  ;;  %v301_v37 = vadd.f32 %v725_v5, %v261_v31  ;;  %v302_v38 = vadd.f32 %v725_v5, %v262_v32  ;;  %v606_v39 = vunpack.c.l.bf16 %v648_v28  ;;  %v607_v40 = vunpack.c.h.bf16 %v648_v28 }
  0x2a   : > { %479 = vst.msk [vmem:[%s749_s24 + $0x2c] sm:$0xf] %vm467_vm0, %v442_v29  ;;  %vm336_vm14 = vcmp.gt.f32.partialorder %v300_v34, 0.0  ;;  %v372_v41 = vmul.f32 0.2, %v300_v34  ;;  %v263_v42 = vmul.f32 %v717_v0, %v602_v35  ;;  %v264_v43 = vmul.f32 %v717_v0, %v603_v36 }
  0x2b   : > { %480 = vst.msk [vmem:[%s749_s24 + $0x30] sm:$0xf] %vm467_vm0, %v443_v33  ;;  %vm337_vm15 = vcmp.gt.f32.partialorder %v301_v37, 0.0  ;;  %v373_v44 = vmul.f32 0.2, %v301_v37  ;;  %vm338_vm1 = vcmp.gt.f32.partialorder %v302_v38, 0.0  ;;  %v265_v45 = vmul.f32 %v717_v0, %v606_v39 }
  0x2c   : > { %v408_v46 = vsel %vm336_vm14, %v300_v34, %v372_v41  ;;  %v374_v47 = vmul.f32 0.2, %v302_v38  ;;  %v303_v48 = vadd.f32 %v725_v5, %v263_v42  ;;  %v304_v49 = vadd.f32 %v725_v5, %v264_v43 }
  0x2d   : > { %v444_v50 = vpack.c.bf16 %v408_v46, %v408_v46  ;;  %v409_v51 = vsel %vm337_vm15, %v301_v37, %v373_v44  ;;  %v305_v52 = vadd.f32 %v725_v5, %v265_v45  ;;  %v266_v53 = vmul.f32 %v717_v0, %v607_v40  ;;  %v653_v40 = vld [vmem:[%s712_s17 + $0x70] sm:$0xff]  }
  0x2e   : > { %v445_v55 = vpack.c.bf16 %v409_v51, %v409_v51  ;;  %v410_v56 = vsel %vm338_vm1, %v302_v38, %v374_v47  ;;  %vm339_vm2 = vcmp.gt.f32.partialorder %v303_v48, 0.0  ;;  %v375_v57 = vmul.f32 0.2, %v303_v48  ;;  %v654_v51 = vld [vmem:[%s712_s17 + $0x78] sm:$0xff]  }
  0x2f   : > { %481 = vst.msk [vmem:[%s749_s24 + $0x34] sm:$0xf] %vm467_vm0, %v444_v50  ;;  %v446_v59 = vpack.c.bf16 %v410_v56, %v410_v56  ;;  %vm340_vm3 = vcmp.gt.f32.partialorder %v304_v49, 0.0  ;;  %v376_v60 = vmul.f32 0.2, %v304_v49  ;;  %vm341_vm4 = vcmp.gt.f32.partialorder %v305_v52, 0.0 }
  0x30   : > { %482 = vst.msk [vmem:[%s749_s24 + $0x38] sm:$0xf] %vm467_vm0, %v445_v55  ;;  %v411_v61 = vsel %vm339_vm2, %v303_v48, %v375_v57  ;;  %v377_v62 = vmul.f32 0.2, %v305_v52  ;;  %v306_v63 = vadd.f32 %v725_v5, %v266_v53  ;;  %v610_v1 = vunpack.c.l.bf16 %v649_v54 }
  0x31   : > { %483 = vst.msk [vmem:[%s749_s24 + $0x3c] sm:$0xf] %vm467_vm0, %v446_v59  ;;  %v447_v2 = vpack.c.bf16 %v411_v61, %v411_v61  ;;  %v412_v3 = vsel %vm340_vm3, %v304_v49, %v376_v60  ;;  %v611_v4 = vunpack.c.h.bf16 %v649_v54  ;;  %v614_v6 = vunpack.c.l.bf16 %v650_v58  ;;  %v655_v59 = vld [vmem:[%s712_s17 + $0x80] sm:$0xff]  }
  0x32   : > { %v448_v8 = vpack.c.bf16 %v412_v3, %v412_v3  ;;  %v413_v9 = vsel %vm341_vm4, %v305_v52, %v377_v62  ;;  %vm342_vm5 = vcmp.gt.f32.partialorder %v306_v63, 0.0  ;;  %v378_v10 = vmul.f32 0.2, %v306_v63 }
  0x33   : > { %484 = vst.msk [vmem:[%s749_s24 + $0x40] sm:$0xf] %vm467_vm0, %v447_v2  ;;  %v449_v11 = vpack.c.bf16 %v413_v9, %v413_v9  ;;  %v267_v12 = vmul.f32 %v717_v0, %v610_v1  ;;  %v268_v13 = vmul.f32 %v717_v0, %v611_v4  ;;  %v269_v14 = vmul.f32 %v717_v0, %v614_v6 }
  0x34   : > { %485 = vst.msk [vmem:[%s749_s24 + $0x44] sm:$0xf] %vm467_vm0, %v448_v8  ;;  %v414_v16 = vsel %vm342_vm5, %v306_v63, %v378_v10  ;;  %v615_v17 = vunpack.c.h.bf16 %v650_v58  ;;  %v618_v18 = vunpack.c.l.bf16 %v651_v7  ;;  %v619_v19 = vunpack.c.h.bf16 %v651_v7 }
  0x35   : > { %486 = vst.msk [vmem:[%s749_s24 + $0x48] sm:$0xf] %vm467_vm0, %v449_v11  ;;  %v450_v20 = vpack.c.bf16 %v414_v16, %v414_v16  ;;  %v307_v21 = vadd.f32 %v725_v5, %v267_v12  ;;  %v308_v22 = vadd.f32 %v725_v5, %v268_v13  ;;  %v309_v23 = vadd.f32 %v725_v5, %v269_v14 }
  0x36   : > { %v270_v24 = vmul.f32 %v717_v0, %v615_v17  ;;  %v271_v25 = vmul.f32 %v717_v0, %v618_v18  ;;  %v272_v26 = vmul.f32 %v717_v0, %v619_v19  ;;  %v622_v27 = vunpack.c.l.bf16 %v652_v15  ;;  %v656_v19 = vld [vmem:[%s712_s17 + $0x88] sm:$0xff]  }
  0x37   : > { %487 = vst.msk [vmem:[%s749_s24 + $0x4c] sm:$0xf] %vm467_vm0, %v450_v20  ;;  %vm343_vm6 = vcmp.gt.f32.partialorder %v307_v21, 0.0  ;;  %v379_v28 = vmul.f32 0.2, %v307_v21  ;;  %vm344_vm7 = vcmp.gt.f32.partialorder %v308_v22, 0.0  ;;  %v623_v29 = vunpack.c.h.bf16 %v652_v15 }
  0x38   : > { %v380_v30 = vmul.f32 0.2, %v308_v22  ;;  %vm345_vm8 = vcmp.gt.f32.partialorder %v309_v23, 0.0  ;;  %v381_v31 = vmul.f32 0.2, %v309_v23  ;;  %v310_v32 = vadd.f32 %v725_v5, %v270_v24 }
  0x39   : > { %v415_v33 = vsel %vm343_vm6, %v307_v21, %v379_v28  ;;  %v311_v34 = vadd.f32 %v725_v5, %v271_v25  ;;  %v312_v35 = vadd.f32 %v725_v5, %v272_v26  ;;  %v273_v36 = vmul.f32 %v717_v0, %v622_v27 }
  0x3a   : > { %v451_v37 = vpack.c.bf16 %v415_v33, %v415_v33  ;;  %v416_v38 = vsel %vm344_vm7, %v308_v22, %v380_v30  ;;  %v417_v39 = vsel %vm345_vm8, %v309_v23, %v381_v31  ;;  %vm346_vm9 = vcmp.gt.f32.partialorder %v310_v32, 0.0 }
  0x3b   : > { %v452_v41 = vpack.c.bf16 %v416_v38, %v416_v38  ;;  %v453_v42 = vpack.c.bf16 %v417_v39, %v417_v39  ;;  %v382_v43 = vmul.f32 0.2, %v310_v32  ;;  %vm347_vm10 = vcmp.gt.f32.partialorder %v311_v34, 0.0 }
  0x3c   : > { %488 = vst.msk [vmem:[%s749_s24 + $0x50] sm:$0xf] %vm467_vm0, %v451_v37  ;;  %v383_v44 = vmul.f32 0.2, %v311_v34  ;;  %vm348_vm11 = vcmp.gt.f32.partialorder %v312_v35, 0.0  ;;  %v313_v45 = vadd.f32 %v725_v5, %v273_v36  ;;  %v274_v46 = vmul.f32 %v717_v0, %v623_v29 }
  0x3d   : > { %489 = vst.msk [vmem:[%s749_s24 + $0x54] sm:$0xf] %vm467_vm0, %v452_v41  ;;  %v418_v47 = vsel %vm346_vm9, %v310_v32, %v382_v43  ;;  %v384_v48 = vmul.f32 0.2, %v312_v35  ;;  %v626_v49 = vunpack.c.l.bf16 %v653_v40  ;;  %v627_v50 = vunpack.c.h.bf16 %v653_v40 }
  0x3e   : > { %490 = vst.msk [vmem:[%s749_s24 + $0x58] sm:$0xf] %vm467_vm0, %v453_v42  ;;  %v454_v52 = vpack.c.bf16 %v418_v47, %v418_v47  ;;  %v419_v53 = vsel %vm347_vm10, %v311_v34, %v383_v44  ;;  %vm349_vm12 = vcmp.gt.f32.partialorder %v313_v45, 0.0  ;;  %v385_v54 = vmul.f32 0.2, %v313_v45 }
  0x3f   : > { %v455_v55 = vpack.c.bf16 %v419_v53, %v419_v53  ;;  %v420_v56 = vsel %vm348_vm11, %v312_v35, %v384_v48  ;;  %v314_v57 = vadd.f32 %v725_v5, %v274_v46  ;;  %v275_v58 = vmul.f32 %v717_v0, %v626_v49 }
  0x40   : > { %491 = vst.msk [vmem:[%s749_s24 + $0x5c] sm:$0xf] %vm467_vm0, %v454_v52  ;;  %v456_v60 = vpack.c.bf16 %v420_v56, %v420_v56  ;;  %v421_v61 = vsel %vm349_vm12, %v313_v45, %v385_v54  ;;  %v276_v62 = vmul.f32 %v717_v0, %v627_v50  ;;  %v630_v63 = vunpack.c.l.bf16 %v654_v51 }
  0x41   : > { %492 = vst.msk [vmem:[%s749_s24 + $0x60] sm:$0xf] %vm467_vm0, %v455_v55  ;;  %v457_v1 = vpack.c.bf16 %v421_v61, %v421_v61  ;;  %vm350_vm13 = vcmp.gt.f32.partialorder %v314_v57, 0.0  ;;  %v386_v2 = vmul.f32 0.2, %v314_v57  ;;  %v315_v3 = vadd.f32 %v725_v5, %v275_v58 }
  0x42   : > { %493 = vst.msk [vmem:[%s749_s24 + $0x64] sm:$0xf] %vm467_vm0, %v456_v60  ;;  %v316_v4 = vadd.f32 %v725_v5, %v276_v62  ;;  %v277_v6 = vmul.f32 %v717_v0, %v630_v63  ;;  %v631_v7 = vunpack.c.h.bf16 %v654_v51  ;;  %v634_v8 = vunpack.c.l.bf16 %v655_v59 }
  0x43   : > { %494 = vst.msk [vmem:[%s749_s24 + $0x68] sm:$0xf] %vm467_vm0, %v457_v1  ;;  %v422_v9 = vsel %vm350_vm13, %v314_v57, %v386_v2  ;;  %vm351_vm14 = vcmp.gt.f32.partialorder %v315_v3, 0.0  ;;  %v387_v10 = vmul.f32 0.2, %v315_v3  ;;  %v635_v11 = vunpack.c.h.bf16 %v655_v59 }
  0x44   : > { %v458_v12 = vpack.c.bf16 %v422_v9, %v422_v9  ;;  %vm352_vm15 = vcmp.gt.f32.partialorder %v316_v4, 0.0  ;;  %v388_v13 = vmul.f32 0.2, %v316_v4  ;;  %v317_v14 = vadd.f32 %v725_v5, %v277_v6 }
  0x45   : > { %v423_v15 = vsel %vm351_vm14, %v315_v3, %v387_v10  ;;  %v278_v16 = vmul.f32 %v717_v0, %v631_v7  ;;  %v279_v17 = vmul.f32 %v717_v0, %v634_v8  ;;  %v280_v18 = vmul.f32 %v717_v0, %v635_v11 }
  0x46   : > { %495 = vst.msk [vmem:[%s749_s24 + $0x6c] sm:$0xf] %vm467_vm0, %v458_v12  ;;  %v459_v20 = vpack.c.bf16 %v423_v15, %v423_v15  ;;  %v424_v21 = vsel %vm352_vm15, %v316_v4, %v388_v13  ;;  %vm353_vm1 = vcmp.gt.f32.partialorder %v317_v14, 0.0  ;;  %v389_v22 = vmul.f32 0.2, %v317_v14 }
  0x47   : > { %v460_v23 = vpack.c.bf16 %v424_v21, %v424_v21  ;;  %v318_v24 = vadd.f32 %v725_v5, %v278_v16  ;;  %v319_v25 = vadd.f32 %v725_v5, %v279_v17  ;;  %v320_v26 = vadd.f32 %v725_v5, %v280_v18 }
  0x48   : > { %496 = vst.msk [vmem:[%s749_s24 + $0x70] sm:$0xf] %vm467_vm0, %v459_v20  ;;  %v425_v27 = vsel %vm353_vm1, %v317_v14, %v389_v22  ;;  %v638_v28 = vunpack.c.l.bf16 %v656_v19  ;;  %v639_v29 = vunpack.c.h.bf16 %v656_v19 }
  0x49   : > { %497 = vst.msk [vmem:[%s749_s24 + $0x74] sm:$0xf] %vm467_vm0, %v460_v23  ;;  %v461_v30 = vpack.c.bf16 %v425_v27, %v425_v27  ;;  %vm354_vm2 = vcmp.gt.f32.partialorder %v318_v24, 0.0  ;;  %v390_v31 = vmul.f32 0.2, %v318_v24  ;;  %vm355_vm3 = vcmp.gt.f32.partialorder %v319_v25, 0.0 }
  0x4a   : > { %v391_v32 = vmul.f32 0.2, %v319_v25  ;;  %vm356_vm4 = vcmp.gt.f32.partialorder %v320_v26, 0.0  ;;  %v392_v33 = vmul.f32 0.2, %v320_v26  ;;  %v281_v34 = vmul.f32 %v717_v0, %v638_v28 }
  0x4b   : > { %498 = vst.msk [vmem:[%s749_s24 + $0x78] sm:$0xf] %vm467_vm0, %v461_v30  ;;  %v426_v35 = vsel %vm354_vm2, %v318_v24, %v390_v31  ;;  %v282_v36 = vmul.f32 %v717_v0, %v639_v29 }
  0x4c   : > { %v462_v37 = vpack.c.bf16 %v426_v35, %v426_v35  ;;  %v427_v38 = vsel %vm355_vm3, %v319_v25, %v391_v32  ;;  %v428_v39 = vsel %vm356_vm4, %v320_v26, %v392_v33  ;;  %v321_v40 = vadd.f32 %v725_v5, %v281_v34 }
  0x4d   : > { %v463_v41 = vpack.c.bf16 %v427_v38, %v427_v38  ;;  %v464_v42 = vpack.c.bf16 %v428_v39, %v428_v39  ;;  %v322_v43 = vadd.f32 %v725_v5, %v282_v36 }
  0x4e   : > { %499 = vst.msk [vmem:[%s749_s24 + $0x7c] sm:$0xf] %vm467_vm0, %v462_v37  ;;  %vm357_vm5 = vcmp.gt.f32.partialorder %v321_v40, 0.0  ;;  %v393_v44 = vmul.f32 0.2, %v321_v40 }
  0x4f   : > { %500 = vst.msk [vmem:[%s749_s24 + $0x80] sm:$0xf] %vm467_vm0, %v463_v41  ;;  %vm358_vm6 = vcmp.gt.f32.partialorder %v322_v43, 0.0  ;;  %v394_v45 = vmul.f32 0.2, %v322_v43 }
  0x50   : > { %501 = vst.msk [vmem:[%s749_s24 + $0x84] sm:$0xf] %vm467_vm0, %v464_v42  ;;  %v429_v0 = vsel %vm357_vm5, %v321_v40, %v393_v44 }
  0x51   : > { %v465_v46 = vpack.c.bf16 %v429_v0, %v429_v0  ;;  %v430_v47 = vsel %vm358_vm6, %v322_v43, %v394_v45 }
  0x52   : > { %v466_v48 = vpack.c.bf16 %v430_v47, %v430_v47 }
  0x53   : > { %502 = vst.msk [vmem:[%s749_s24 + $0x88] sm:$0xf] %vm467_vm0, %v465_v46 }
  0x54   : > { %503 = vst.msk [vmem:[%s749_s24 + $0x8c] sm:$0xf] %vm467_vm0, %v466_v48 }
  0x55 PF: > { %s13_s12 = sadd.s32 1, %s674_s12  }
  0x56   : > { %p10_p4 = scmp.ge.s32.totalorder %s13_s12, 4  }
  0x58   :  { %12 = sbr.rel (!%p10_p4) target bundleno = 1 (0x1), region = 62 }

// kernel: netD_forward.8
= control target key start
LH: loop header
LB: loop body
LE: loop exit
PB: predicated region body
PF: predicated region fallthrough
CT: control target
= control target key end

     0   :  { %s2589_s18 = smov 0   ;;  %s3256_s0 = inlined_call_operand.vmem [shape: bf16[2,324,32], index: 0, kind: input, shape index: {}]   ;;  %s3257_s1 = inlined_call_operand.vmem [shape: bf16[4,32,16], index: 1, kind: input, shape index: {}]   ;;  %s3258_s2 = inlined_call_operand.vmem [shape: f32[288,1], index: 2, kind: input, shape index: {}]   ;;  %s3259_s3 = inlined_call_operand.vmem [shape: bf16[2,288,16], index: 3, kind: output, shape index: {0}]   ;;  %s3260_s4 = inlined_call_operand.vmem [shape: f32[2,1,16], index: 4, kind: output, shape index: {1}]   ;;  %s3261_s5 = inlined_call_operand.vmem [shape: f32[2,1,16], index: 5, kind: output, shape index: {2}]  }
   0x1 LB: > { %s2223_s19 = sadd.s32 4294967295, %s2556_s18   ;;  %p2227_p0 = scmp.ge.s32.totalorder %s2556_s18, 1  ;;  %s2556_s18 = sphi %s2589_s18, %s16_s18  }
   0x2   : > { %p192_p1 = scmp.lt.s32.totalorder %s2556_s18, 3 }
   0x4   : > { %p193_p2 = pnand %p2227_p0, %p192_p1 }
   0x5   : > { %p226_p3 = scmp.lt.s32.totalorder (!%p193_p2), %s2223_s19, 1 }
   0x6   : > { %196 = sbr.rel (%p193_p2) target bundleno = 459 (0x1cb), region = 32 }
   0xb   : > { %v2511_v0 = vld [vmem:[%s3257_s1 + $0x8] sm:$0xff]  ;;  %v2513_v2 = vld [vmem:[%s3257_s1 + $0x18] sm:$0xff]  ;;  %v2510_v4 = vld [vmem:[%s3257_s1] sm:$0xff]  ;;  %s3263_s19 = smov (!%p226_p3, %s2223_s19), 1  ;;  %v2558_v9 = vmov 0   ;;  %vm543_vm0 = vcmask 261120  }
   0xc   : > { %v2533_v1 = vld [vmem:[%s3257_s1 + $0x28] sm:$0xff]  ;;  %v2535_v3 = vld [vmem:[%s3257_s1 + $0x38] sm:$0xff]  ;;  %751 = vmatpush.bf16.msra.mxu1 %v2511_v0  ;;  %v2532_v5 = vld [vmem:[%s3257_s1 + $0x20] sm:$0xff]  ;;  %604 = vmatpush.bf16.msra.mxu0 %v2513_v2  ;;  %s2536_s13 = smul.u32 164, %s3263_s19  ;;  %vm979_vm1 = vcmask 1046528   ;;  %vm1635_vm4 = vcmask 125952   ;;  %s238_s28 = scalar_lea.vmem %s3260_s4, %s3263_s19 }
   0xd   : > { %1089 = vmatpush.bf16.msra.mxu2 %v2533_v1  ;;  %1470 = vmatpush.bf16.msra.mxu3 %v2535_v3  ;;  %v2512_v6 = vld [vmem:[%s3257_s1 + $0x10] sm:$0xff]  ;;  %v1672_v8 = vld [vmem:[%s3258_s2] sm:$0xff]  ;;  %v1673_v22 = vld [vmem:[%s3258_s2 + $0x8] sm:$0xff]  ;;  %vm382_vm2 = vsmask.f32 7424  ;;  %s2537_s29 = smul.u32 144, %s3263_s19  ;;  %s241_s6 = scalar_lea.vmem %s3261_s5, %s3263_s19 }
   0xe   : > { %v2534_v7 = vld [vmem:[%s3257_s1 + $0x30] sm:$0xff]  ;;  %2547 = vset.pattern.permute.xlu0 %v2558_v9  ;;  %2548 = vset.pattern.permute.xlu1 %v2558_v9  ;;  %s2630_s16 = scalar_lea.vmem %s3256_s0, %s2536_s13  ;;  %vm1227_vm3 = vsmask.f32 6400  ;;  %v1675_v50 = vld [vmem:[%s3258_s2 + $0x18] sm:$0xff]  ;;  %vm1924_vm5 = vcmask 130048   ;;  %vm2002_vm6 = vcmask 122880  }
   0xf   : > { %1710 = vperm.xlu0 %2547, %v1672_v8   ;;  %2549 = vset.pattern.permute.xlu2 %v2558_v9  ;;  %v2492_v10 = vld [vmem:[%s2630_s16] sm:$0xff]  ;;  %v2364_v11 = vld [vmem:[%s2630_s16 + $0x8] sm:$0xe]  ;;  %v2514_v12 = vld [vmem:[%s2630_s16 + $0x8] sm:$0xf0]  ;;  %s2781_s9 = scalar_lea.vmem %s3259_s3, %s2537_s29 }
  0x10   : > { %752 = vmatpush.bf16.msra.mxu1 %v2510_v4  ;;  %605 = vmatpush.bf16.msra.mxu0 %v2512_v6  ;;  %v2515_v13 = vld [vmem:[%s2630_s16 + $0x10] sm:$0xff]  ;;  %v2365_v14 = vor.u32 %v2514_v12, %v2364_v11  ;;  %v2493_v15 = vld [vmem:[%s2630_s16 + $0x8] sm:$0xff]  ;;  %v386_v16 = vshll.u32 %v2492_v10, 16  ;;  %v384_v17 = vshrl.u32 %v2492_v10, 16  ;;  %v2516_v37 = vld [vmem:[%s2630_s16 + $0x18] sm:$0xff] }
  0x11   : > { %1090 = vmatpush.bf16.msra.mxu2 %v2532_v5  ;;  %1471 = vmatpush.bf16.msra.mxu3 %v2534_v7  ;;  %v981_v19 = vrot.slane %v2515_v13, 1  ;;  %v391_v20 = vshll.u32 %v2493_v15, 16  ;;  %v1237_v25 = vshrl.u32 %v2515_v13, 16  ;;  %v1240_v26 = vshll.u32 %v2515_v13, 16  ;;  %v2494_v39 = vld [vmem:[%s2630_s16 + $0x10] sm:$0xff]  ;;  %v2517_v55 = vld [vmem:[%s2630_s16 + $0x20] sm:$0xff] }
  0x12   : > { %v980_v18 = vrot.slane %v2365_v14, 1  ;;  %v1229_v21 = vshrl.u32 %v2365_v14, 16  ;;  %v388_v23 = vrot.slane %v386_v16, 1  ;;  %v1232_v24 = vshll.u32 %v2365_v14, 16  ;;  %v1674_v40 = vld [vmem:[%s3258_s2 + $0x10] sm:$0xff]  ;;  %v2495_v56 = vld [vmem:[%s2630_s16 + $0x18] sm:$0xff] }
  0x13   : > { %2340 = vmatmul.msk.bf16.vlgmr.msra.gmra.mxu1 %vm543_vm0, %v2492_v10  ;;  %v393_v28 = vrot.slane %v391_v20, 1  ;;  %v1239_v32 = vrot.slane %v1237_v25, 1  ;;  %v1242_v33 = vrot.slane %v1240_v26, 2  ;;  %v1246_v41 = vshrl.u32 %v2516_v37, 16  ;;  %1720 = vperm.xlu1 %2548, %v1674_v40   ;;  %v2518_v6 = vld [vmem:[%s2630_s16 + $0x28] sm:$0xff]  ;;  %v2496_v7 = vld [vmem:[%s2630_s16 + $0x20] sm:$0xff] }
  0x14   : > { %v982_v27 = vsel %vm979_vm1, %v980_v18, %v981_v19  ;;  %v1231_v29 = vrot.slane %v1229_v21, 1  ;;  %v389_v30 = vor.u32 %v388_v23, %v384_v17  ;;  %v1234_v31 = vrot.slane %v1232_v24, 2  ;;  %v1678_v8 = vld [vmem:[%s3258_s2 + $0x30] sm:$0xff]  ;;  %v1676_v18 = vld [vmem:[%s3258_s2 + $0x20] sm:$0xff]  ;;  %v2497_v25 = vld [vmem:[%s2630_s16 + $0x28] sm:$0xff] }
  0x15   : > { %2442 = vmatmul.msk.bf16.vlgmr.msra.gmra.mxu2 %vm543_vm0, %v982_v27  ;;  %v1243_v36 = vor.u32 %v1242_v33, %v1239_v32  ;;  %v1249_v42 = vshll.u32 %v2516_v37, 16  ;;  %v395_v43 = vshrl.u32 %v2493_v15, 16  ;;  %v399_v44 = vshll.u32 %v2494_v39, 16  ;;  %1730 = vperm.xlu2 %2549, %v1676_v18   ;;  %v2519_v24 = vld [vmem:[%s2630_s16 + $0x30] sm:$0xff]  ;;  %v1677_v26 = vld [vmem:[%s3258_s2 + $0x28] sm:$0xff] }
  0x16   : > { %v394_v34 = vsel %vm382_vm2, %v389_v30, %v393_v28  ;;  %v1235_v35 = vor.u32 %v1234_v31, %v1231_v29  ;;  %v983_v45 = vrot.slane %v2516_v37, 1  ;;  %v1248_v46 = vrot.slane %v1246_v41, 1  ;;  %v2520_v41 = vld [vmem:[%s2630_s16 + $0x38] sm:$0xff] }
  0x17   : > { %1715 = vperm.xlu0 %2547, %v1673_v22   ;;  %2314 = vmatmul.msk.bf16.vlgmr.msra.gmra.mxu0 %vm543_vm0, %v394_v34  ;;  %v1251_v47 = vrot.slane %v1249_v42, 2  ;;  %v397_v48 = vor.u32 %v395_v43, %v393_v28  ;;  %v401_v49 = vrot.slane %v399_v44, 1  ;;  %v1255_v57 = vshrl.u32 %v2517_v55, 16  ;;  %v2498_v42 = vld [vmem:[%s2630_s16 + $0x30] sm:$0xff] }
  0x18   : > { %v1244_v38 = vsel %vm1227_vm3, %v1235_v35, %v1243_v36  ;;  %v984_v51 = vsel %vm979_vm1, %v981_v19, %v983_v45  ;;  %v1258_v58 = vshll.u32 %v2517_v55, 16  ;;  %v403_v59 = vshrl.u32 %v2494_v39, 16  ;;  %v1679_v19 = vld [vmem:[%s3258_s2 + $0x38] sm:$0xff]  ;;  %v1682_v43 = vld [vmem:[%s3258_s2 + $0x50] sm:$0xff] }
  0x19   : > { %2472 = vmatmul.msk.bf16.vlgmr.msra.gmra.mxu3 %vm543_vm0, %v1244_v38  ;;  %v1252_v52 = vor.u32 %v1251_v47, %v1248_v46  ;;  %v402_v53 = vsel %vm382_vm2, %v397_v48, %v401_v49  ;;  %v407_v60 = vshll.u32 %v2495_v56, 16  ;;  %v985_v61 = vrot.slane %v2517_v55, 1 }
  0x1a   : > { %v1257_v62 = vrot.slane %v1255_v57, 1  ;;  %v1260_v63 = vrot.slane %v1258_v58, 2  ;;  %v405_v0 = vor.u32 %v403_v59, %v401_v49  ;;  %v1264_v9 = vshrl.u32 %v2518_v6, 16  ;;  %v2521_v58 = vld [vmem:[%s2630_s16 + $0x40] sm:$0xff]  ;;  %v2499_v59 = vld [vmem:[%s2630_s16 + $0x38] sm:$0xff] }
  0x1b   : > { %1725 = vperm.xlu1 %2548, %v1675_v50   ;;  %v1253_v54 = vsel %vm1227_vm3, %v1243_v36, %v1252_v52  ;;  %v409_v1 = vrot.slane %v407_v60, 1  ;;  %v986_v2 = vsel %vm979_vm1, %v983_v45, %v985_v61  ;;  %v1267_v10 = vshll.u32 %v2518_v6, 16  ;;  %v1681_v36 = vld [vmem:[%s3258_s2 + $0x48] sm:$0xff]  ;;  %v1684_v60 = vld [vmem:[%s3258_s2 + $0x60] sm:$0xff] }
  0x1c   : > { %v1261_v3 = vor.u32 %v1260_v63, %v1257_v62  ;;  %v411_v11 = vshrl.u32 %v2495_v56, 16  ;;  %v415_v12 = vshll.u32 %v2496_v7, 16  ;;  %v987_v13 = vrot.slane %v2518_v6, 1  ;;  %v1685_v6 = vld [vmem:[%s3258_s2 + $0x68] sm:$0xff] }
  0x1d   : > { %v410_v4 = vsel %vm382_vm2, %v405_v0, %v409_v1  ;;  %v1266_v14 = vrot.slane %v1264_v9, 1  ;;  %v1273_v27 = vshrl.u32 %v2519_v24, 16  ;;  %v1276_v28 = vshll.u32 %v2519_v24, 16  ;;  %1735 = vperm.xlu2 %2549, %v1677_v26  }
  0x1e   : > { %v1262_v5 = vsel %vm1227_vm3, %v1252_v52, %v1261_v3  ;;  %v413_v16 = vor.u32 %v411_v11, %v409_v1  ;;  %v417_v17 = vrot.slane %v415_v12, 1  ;;  %v988_v20 = vsel %vm979_vm1, %v985_v61, %v987_v13  ;;  %v2522_v11 = vld [vmem:[%s2630_s16 + $0x48] sm:$0xff]  ;;  %v2500_v12 = vld [vmem:[%s2630_s16 + $0x40] sm:$0xff] }
  0x1f   : > { %1740 = vperm.xlu0 %2547, %v1678_v8   ;;  %v419_v29 = vshrl.u32 %v2496_v7, 16  ;;  %v423_v30 = vshll.u32 %v2497_v25, 16  ;;  %v989_v31 = vrot.slane %v2519_v24, 1  ;;  %v1275_v32 = vrot.slane %v1273_v27, 1 }
  0x20   : > { %v418_v22 = vsel %vm382_vm2, %v413_v16, %v417_v17  ;;  %v1278_v33 = vrot.slane %v1276_v28, 2  ;;  %v1282_v44 = vshrl.u32 %v2520_v41, 16  ;;  %v1285_v45 = vshll.u32 %v2520_v41, 16  ;;  %v2523_v28 = vld [vmem:[%s2630_s16 + $0x50] sm:$0xff] }
  0x21   : > { %v421_v34 = vor.u32 %v419_v29, %v417_v17  ;;  %v425_v35 = vrot.slane %v423_v30, 1  ;;  %v990_v37 = vsel %vm979_vm1, %v987_v13, %v989_v31  ;;  %v427_v46 = vshrl.u32 %v2497_v25, 16  ;;  %v1683_v13 = vld [vmem:[%s3258_s2 + $0x58] sm:$0xff]  ;;  %v2501_v29 = vld [vmem:[%s2630_s16 + $0x48] sm:$0xff] }
  0x22   : > { %v1279_v38 = vor.u32 %v1278_v33, %v1275_v32  ;;  %v431_v47 = vshll.u32 %v2498_v42, 16  ;;  %v991_v48 = vrot.slane %v2520_v41, 1  ;;  %v1284_v49 = vrot.slane %v1282_v44, 1  ;;  %v1688_v32 = vld [vmem:[%s3258_s2 + $0x80] sm:$0xff] }
  0x23   : > { %2341 = vmatmul.msk.bf16.gmra.mxu1 %vm543_vm0, %v2493_v15  ;;  %v1269_v15 = vrot.slane %v1267_v10, 2  ;;  %1745 = vperm.xlu1 %2548, %v1679_v19   ;;  %v1287_v50 = vrot.slane %v1285_v45, 2  ;;  %v1291_v61 = vshrl.u32 %v2521_v58, 16  ;;  %v1294_v62 = vshll.u32 %v2521_v58, 16 }
  0x24   : > { %v433_v52 = vrot.slane %v431_v47, 1  ;;  %v435_v63 = vshrl.u32 %v2498_v42, 16  ;;  %v439_v0 = vshll.u32 %v2499_v59, 16  ;;  %v993_v1 = vrot.slane %v2521_v58, 1 }
  0x25   : > { %2443 = vmatmul.msk.bf16.gmra.mxu2 %vm543_vm0, %v984_v51  ;;  %v1270_v21 = vor.u32 %v1269_v15, %v1266_v14  ;;  %v429_v51 = vor.u32 %v427_v46, %v425_v35  ;;  %v1288_v55 = vor.u32 %v1287_v50, %v1284_v49  ;;  %v1300_v14 = vshrl.u32 %v2522_v11, 16  ;;  %v2763_v49 = vld [vmem:[%s2630_s16 + $0x58] sm:$0xff] }
  0x26   : > { %v1303_v15 = vshll.u32 %v2522_v11, 16  ;;  %v443_v16 = vshrl.u32 %v2499_v59, 16  ;;  %v447_v17 = vshll.u32 %v2500_v12, 16  ;;  %v995_v18 = vrot.slane %v2522_v11, 1 }
  0x27   : > { %2315 = vmatmul.msk.bf16.gmra.mxu0 %vm543_vm0, %v402_v53  ;;  %v1271_v23 = vsel %vm1227_vm3, %v1261_v3, %v1270_v21  ;;  %1755 = vperm.xlu0 %2547, %v1681_v36   ;;  %v1280_v40 = vsel %vm1227_vm3, %v1270_v21, %v1279_v38  ;;  %v1680_v53 = vld [vmem:[%s3258_s2 + $0x40] sm:$0xff]  ;;  %v1289_v57 = vsel %vm1227_vm3, %v1279_v38, %v1288_v55  ;;  %v1296_v3 = vrot.slane %v1294_v62, 2 }
  0x28   : > { %1750 = vperm.xlu2 %2549, %v1680_v53   ;;  %v1302_v19 = vrot.slane %v1300_v14, 1  ;;  %v1309_v30 = vshrl.u32 %v2523_v28, 16  ;;  %v451_v33 = vshrl.u32 %v2500_v12, 16  ;;  %v997_v36 = vrot.slane %v2523_v28, 1 }
  0x29   : > { %2473 = vmatmul.msk.bf16.gmra.mxu3 %vm543_vm0, %v1253_v54  ;;  %v992_v54 = vsel %vm979_vm1, %v989_v31, %v991_v48  ;;  %v1312_v31 = vshll.u32 %v2523_v28, 16 }
  0x2a   : > { %v998_v41 = vsel %vm979_vm1, %v995_v18, %v997_v36 }
  0x2b   : > { %1760 = vperm.xlu1 %2548, %v1682_v43   ;;  %v1314_v38 = vrot.slane %v1312_v31, 2  ;;  %v1686_v43 = vld [vmem:[%s3258_s2 + $0x70] sm:$0xff] }
  0x2f   : > { %1770 = vperm.xlu0 %2547, %v1684_v60  }
  0x30   : > { %1765 = vperm.xlu2 %2549, %v1683_v13  }
  0x33   : > { %2342 = vmatmul.msk.bf16.gmra.mxu1 %vm543_vm0, %v2494_v39  ;;  %v426_v39 = vsel %vm382_vm2, %v421_v34, %v425_v35  ;;  %1775 = vperm.xlu1 %2548, %v1685_v6   ;;  %v455_v34 = vshll.u32 %v2501_v29, 16 }
  0x35   : > { %2444 = vmatmul.msk.bf16.gmra.mxu2 %vm543_vm0, %v986_v2  ;;  %v1293_v2 = vrot.slane %v1291_v61, 1 }
  0x37   : > { %2316 = vmatmul.msk.bf16.gmra.mxu0 %vm543_vm0, %v410_v4  ;;  %v437_v4 = vor.u32 %v435_v63, %v433_v52  ;;  %v1297_v8 = vor.u32 %v1296_v3, %v1293_v2  ;;  %v999_v63 = vrot.slane %v2763_v49, 1 }
  0x38   : > { %1780 = vperm.xlu2 %2549, %v1686_v43  }
  0x39   : > { %2474 = vmatmul.msk.bf16.gmra.mxu3 %vm543_vm0, %v1262_v5  ;;  %v441_v5 = vrot.slane %v439_v0, 1  ;;  %v1298_v10 = vsel %vm1227_vm3, %v1288_v55, %v1297_v8  ;;  %v1321_v55 = vshll.u32 %v2763_v49, 16 }
  0x3b   : > { %v442_v9 = vsel %vm382_vm2, %v437_v4, %v441_v5  ;;  %v445_v21 = vor.u32 %v443_v16, %v441_v5  ;;  %1790 = vperm.xlu1 %2548, %v1688_v32   ;;  %v1694_v32 = vld [vmem:[%s3258_s2 + $0xb0] sm:$0xff] }
  0x43   : > { %2343 = vmatmul.msk.bf16.gmra.mxu1 %vm543_vm0, %v2495_v56  ;;  %v434_v56 = vsel %vm382_vm2, %v429_v51, %v433_v52  ;;  %v2767_v51 = vld [vmem:[%s2630_s16 + $0x50] sm:$0xff] }
  0x44   : > { %v463_v60 = vshll.u32 %v2767_v51, 16 }
  0x45   : > { %2445 = vmatmul.msk.bf16.gmra.mxu2 %vm543_vm0, %v988_v20  ;;  %v1305_v20 = vrot.slane %v1303_v15, 2 }
  0x46   : > { %v465_v6 = vrot.slane %v463_v60, 1 }
  0x47   : > { %2317 = vmatmul.msk.bf16.gmra.mxu0 %vm543_vm0, %v418_v22  ;;  %v449_v22 = vrot.slane %v447_v17, 1  ;;  %v1306_v24 = vor.u32 %v1305_v20, %v1302_v19  ;;  %v2799_v20 = vld [vmem:[%s2630_s16 + $0x60] sm:$0xff] }
  0x49   : > { %2475 = vmatmul.msk.bf16.gmra.mxu3 %vm543_vm0, %v1271_v23  ;;  %v996_v23 = vsel %vm979_vm1, %v993_v1, %v995_v18  ;;  %v450_v26 = vsel %vm382_vm2, %v445_v21, %v449_v22  ;;  %v1307_v27 = vsel %vm1227_vm3, %v1297_v8, %v1306_v24  ;;  %v1691_v8 = vld [vmem:[%s3258_s2 + $0x98] sm:$0xff] }
  0x4a   : > { %1805 = vperm.xlu1 %2548, %v1691_v8  }
  0x52   : > { %1820 = vperm.xlu1 %2548, %v1694_v32  }
  0x53   : > { %2344 = vmatmul.msk.bf16.gmra.mxu1 %vm543_vm0, %v2496_v7  ;;  %v994_v7 = vsel %vm979_vm1, %v991_v48, %v993_v1  ;;  %v1323_v1 = vrot.slane %v1321_v55, 2  ;;  %v1696_v55 = vld [vmem:[%s3258_s2 + $0xc0] sm:$0xff] }
  0x55   : > { %2446 = vmatmul.msk.bf16.gmra.mxu2 %vm543_vm0, %v990_v37  ;;  %v1311_v37 = vrot.slane %v1309_v30, 1 }
  0x57   : > { %2318 = vmatmul.msk.bf16.gmra.mxu0 %vm543_vm0, %v426_v39  ;;  %v453_v39 = vor.u32 %v451_v33, %v449_v22 }
  0x59   : > { %2476 = vmatmul.msk.bf16.gmra.mxu3 %vm543_vm0, %v1280_v40  ;;  %v457_v40 = vrot.slane %v455_v34, 1  ;;  %v1327_v34 = vshrl.u32 %v2799_v20, 16 }
  0x5b   : > { %v458_v45 = vsel %vm382_vm2, %v453_v39, %v457_v40 }
  0x63   : > { %2345 = vmatmul.msk.bf16.gmra.mxu1 %vm543_vm0, %v2497_v25  ;;  %v1687_v25 = vld [vmem:[%s3258_s2 + $0x78] sm:$0xff] }
  0x64   : > { %1785 = vperm.xlu0 %2547, %v1687_v25   ;;  %v1693_v25 = vld [vmem:[%s3258_s2 + $0xa8] sm:$0xff] }
  0x65   : > { %2447 = vmatmul.msk.bf16.gmra.mxu2 %vm543_vm0, %v992_v54  ;;  %v1318_v54 = vshrl.u32 %v2763_v49, 16 }
  0x67   : > { %2319 = vmatmul.msk.bf16.gmra.mxu0 %vm543_vm0, %v434_v56  ;;  %v1690_v56 = vld [vmem:[%s3258_s2 + $0x90] sm:$0xff]  ;;  %v1320_v0 = vrot.slane %v1318_v54, 1 }
  0x69   : > { %2477 = vmatmul.msk.bf16.gmra.mxu3 %vm543_vm0, %v1289_v57 }
  0x6c   : > { %1800 = vperm.xlu0 %2547, %v1690_v56  }
  0x73   : > { %2346 = vmatmul.msk.bf16.gmra.mxu1 %vm543_vm0, %v2498_v42  ;;  %v1315_v42 = vor.u32 %v1314_v38, %v1311_v37  ;;  %v1689_v38 = vld [vmem:[%s3258_s2 + $0x88] sm:$0xff] }
  0x74   : > { %1815 = vperm.xlu0 %2547, %v1693_v25   ;;  %1795 = vperm.xlu2 %2549, %v1689_v38   ;;  %v1692_v25 = vld [vmem:[%s3258_s2 + $0xa0] sm:$0xff] }
  0x75   : > { %2448 = vmatmul.msk.bf16.gmra.mxu2 %vm543_vm0, %v994_v7  ;;  %v1316_v48 = vsel %vm1227_vm3, %v1306_v24, %v1315_v42  ;;  %v1000_v7 = vsel %vm979_vm1, %v997_v36, %v999_v63 }
  0x77   : > { %2320 = vmatmul.msk.bf16.gmra.mxu0 %vm543_vm0, %v442_v9  ;;  %v2792_v9 = vor.u32 %v1323_v1, %v1320_v0 }
  0x79   : > { %2478 = vmatmul.msk.bf16.gmra.mxu3 %vm543_vm0, %v1298_v10  ;;  %v1325_v19 = vsel %vm1227_vm3, %v1315_v42, %v2792_v9  ;;  %v467_v42 = vshrl.u32 %v2767_v51, 16 }
  0x7b   : > { %v469_v56 = vor.u32 %v467_v42, %v465_v6 }
  0x7c   : > { %1830 = vperm.xlu0 %2547, %v1696_v55   ;;  %1810 = vperm.xlu2 %2549, %v1692_v25   ;;  %v1695_v55 = vld [vmem:[%s3258_s2 + $0xb8] sm:$0xff] }
  0x81   : > { %v1711_v53 = vpop.permute.xlu0 %1710 }
  0x83   : > { %2347 = vmatmul.msk.bf16.gmra.mxu1 %vm543_vm0, %v2499_v59  ;;  %v459_v59 = vshrl.u32 %v2501_v29, 16 }
  0x84   : > { %1825 = vperm.xlu2 %2549, %v1695_v55  }
  0x85   : > { %2449 = vmatmul.msk.bf16.gmra.mxu2 %vm543_vm0, %v996_v23  ;;  %v461_v5 = vor.u32 %v459_v59, %v457_v40  ;;  %v1721_v31 = vpop.permute.xlu1 %1720 }
  0x87   : > { %2321 = vmatmul.msk.bf16.gmra.mxu0 %vm543_vm0, %v450_v26  ;;  %v466_v15 = vsel %vm382_vm2, %v461_v5, %v465_v6  ;;  %v2806_v26 = vld [vmem:[%s2630_s16 + $0x58] sm:$0xff] }
  0x88   : > { %v471_v43 = vshll.u32 %v2806_v26, 16 }
  0x89   : > { %2479 = vmatmul.msk.bf16.gmra.mxu3 %vm543_vm0, %v1307_v27 }
  0x90   : > { %v754_v35 = vpop.f32.mrf.mxu1 }
  0x93   : > { %2348 = vmatmul.msk.bf16.gmra.mxu1 %vm543_vm0, %v2500_v12  ;;  %v1716_v12 = vpop.permute.xlu0 %1715 }
  0x94   : > { %v607_v44 = vpop.f32.mrf.mxu0 }
  0x95   : > { %2450 = vmatmul.msk.bf16.gmra.mxu2 %vm543_vm0, %v998_v41  ;;  %v755_v46 = vadd.f32 %v754_v35, %v607_v44  ;;  %v1330_v35 = vshll.u32 %v2799_v20, 16 }
  0x97   : > { %2322 = vmatmul.msk.bf16.gmra.mxu0 %vm543_vm0, %v458_v45 }
  0x98   : > { %v756_v47 = vpop.f32.mrf.mxu1  ;;  %v1092_v50 = vpop.f32.mrf.mxu2 }
  0x99   : > { %v1182_v52 = vadd.f32 %v1092_v50, %v755_v46  ;;  %2480 = vmatmul.msk.bf16.gmra.mxu3 %vm543_vm0, %v1316_v48  ;;  %v1001_v46 = vrot.slane %v2799_v20, 1  ;;  %v1332_v48 = vrot.slane %v1330_v35, 2 }
  0x9b   : > { %v1002_v60 = vsel %vm979_vm1, %v999_v63, %v1001_v46 }
  0x9c   : > { %v1473_v57 = vpop.f32.mrf.mxu3  ;;  %v609_v58 = vpop.f32.mrf.mxu0 }
  0x9d   : > { %v1563_v61 = vadd.f32 %v1473_v57, %v1182_v52  ;;  %v757_v3 = vadd.f32 %v756_v47, %v609_v58  ;;  %v1329_v47 = vrot.slane %v1327_v34, 1  ;;  %v473_v57 = vrot.slane %v471_v43, 1 }
  0x9f   : > { %v1599_v2 = vpack.c.bf16 %v1563_v61, %v1563_v61  ;;  %v1888_v10 = vmul.f32 %v1711_v53, %v1563_v61  ;;  %v474_v63 = vsel %vm382_vm2, %v469_v56, %v473_v57 }
  0xa0   : > { %v759_v62 = vpop.f32.mrf.mxu1  ;;  %v1094_v4 = vpop.f32.mrf.mxu2 }
  0xa1   : > { %1636 = vst.msk [vmem:[%s2781_s9] sm:$0xf] %vm1635_vm4, %v1599_v2  ;;  %v1183_v11 = vadd.f32 %v1094_v4, %v757_v3  ;;  %v2004_v21 = vmul.f32 %v1888_v10, %v1563_v61  ;;  %v1925_v27 = vsel %vm1924_vm5, %v1888_v10, 0.0  ;;  %v1697_v61 = vld [vmem:[%s3258_s2 + $0xc8] sm:$0xff]  ;;  %v1726_v2 = vpop.permute.xlu1 %1725 }
  0xa2   : > { %1835 = vperm.xlu1 %2548, %v1697_v61   ;;  %v2851_v10 = vld [vmem:[%s2630_s16 + $0x68] sm:$0xff] }
  0xa3   : > { %2349 = vmatmul.msk.bf16.gmra.mxu1 %vm543_vm0, %v2501_v29  ;;  %v2040_v36 = vsel %vm1924_vm5, %v2004_v21, 0.0  ;;  %v1003_v34 = vrot.slane %v2851_v10, 1 }
  0xa4   : > { %v1475_v13 = vpop.f32.mrf.mxu3  ;;  %v612_v14 = vpop.f32.mrf.mxu0 }
  0xa5   : > { %2451 = vmatmul.msk.bf16.gmra.mxu2 %vm543_vm0, %v1000_v7  ;;  %v1564_v16 = vadd.f32 %v1475_v13, %v1183_v11  ;;  %v760_v17 = vadd.f32 %v759_v62, %v612_v14  ;;  %v2842_v62 = vor.u32 %v1332_v48, %v1329_v47  ;;  %v1699_v14 = vld [vmem:[%s3258_s2 + $0xd8] sm:$0xff]  ;;  %v1004_v47 = vsel %vm979_vm1, %v1001_v46, %v1003_v34 }
  0xa6   : > { %1845 = vperm.xlu0 %2547, %v1699_v14   ;;  %v1703_v48 = vld [vmem:[%s3258_s2 + $0xf8] sm:$0xff] }
  0xa7   : > { %v1600_v22 = vpack.c.bf16 %v1564_v16, %v1564_v16  ;;  %v1889_v23 = vmul.f32 %v1716_v12, %v1564_v16  ;;  %2323 = vmatmul.msk.bf16.gmra.mxu0 %vm543_vm0, %v466_v15  ;;  %v1334_v8 = vsel %vm1227_vm3, %v2792_v9, %v2842_v62  ;;  %v2858_v15 = vld [vmem:[%s2630_s16 + $0x60] sm:$0xff] }
  0xa8   : > { %v761_v18 = vpop.f32.mrf.mxu1  ;;  %v1097_v24 = vpop.f32.mrf.mxu2 }
  0xa9   : > { %1637 = vst.msk [vmem:[%s2781_s9 + $0x4] sm:$0xf] %vm1635_vm4, %v1600_v22  ;;  %v1926_v28 = vsel %vm1924_vm5, %v1889_v23, 0.0  ;;  %v2005_v29 = vmul.f32 %v1889_v23, %v1564_v16  ;;  %v1184_v30 = vadd.f32 %v1097_v24, %v760_v17  ;;  %2481 = vmatmul.msk.bf16.gmra.mxu3 %vm543_vm0, %v1325_v19  ;;  %v1700_v19 = vld [vmem:[%s3258_s2 + $0xe0] sm:$0xff]  ;;  %v1336_v22 = vshrl.u32 %v2851_v10, 16 }
  0xaa   : > { %v1927_v33 = vadd.f32 %v1926_v28, %v1925_v27  ;;  %v1339_v23 = vshll.u32 %v2851_v10, 16  ;;  %1850 = vperm.xlu1 %2548, %v1700_v19  }
  0xab   : > { %v2041_v37 = vsel %vm1924_vm5, %v2005_v29, 0.0  ;;  %v1338_v35 = vrot.slane %v1336_v22, 1 }
  0xac   : > { %v2042_v39 = vadd.f32 %v2041_v37, %v2040_v36  ;;  %v1478_v40 = vpop.f32.mrf.mxu3  ;;  %v614_v41 = vpop.f32.mrf.mxu0  ;;  %v1341_v36 = vrot.slane %v1339_v23, 2 }
  0xad   : > { %v1565_v44 = vadd.f32 %v1478_v40, %v1184_v30  ;;  %v762_v53 = vadd.f32 %v761_v18, %v614_v41  ;;  %v1731_v18 = vpop.permute.xlu2 %1730  ;;  %v475_v30 = vshrl.u32 %v2806_v26, 16  ;;  %v1702_v41 = vld [vmem:[%s3258_s2 + $0xf0] sm:$0xff] }
  0xae   : > { %1860 = vperm.xlu0 %2547, %v1702_v41  }
  0xaf   : > { %v1601_v50 = vpack.c.bf16 %v1565_v44, %v1565_v44  ;;  %v1890_v52 = vmul.f32 %v1721_v31, %v1565_v44  ;;  %v479_v31 = vshll.u32 %v2858_v15, 16  ;;  %v477_v42 = vor.u32 %v475_v30, %v473_v57 }
  0xb0   : > { %v764_v45 = vpop.f32.mrf.mxu1  ;;  %v1099_v54 = vpop.f32.mrf.mxu2 }
  0xb1   : > { %1638 = vst.msk [vmem:[%s2781_s9 + $0x8] sm:$0xf] %vm1635_vm4, %v1601_v50  ;;  %v1928_v58 = vsel %vm1924_vm5, %v1890_v52, 0.0  ;;  %v2006_v59 = vmul.f32 %v1890_v52, %v1565_v44  ;;  %v1185_v1 = vadd.f32 %v1099_v54, %v762_v53  ;;  %v481_v43 = vrot.slane %v479_v31, 1 }
  0xb2   : > { %1865 = vperm.xlu1 %2548, %v1703_v48   ;;  %v2951_v48 = vld [vmem:[%s2630_s16 + $0x78] sm:$0xff] }
  0xb3   : > { %2350 = vmatmul.msk.bf16.gmra.mxu1 %vm543_vm0, %v2767_v51  ;;  %v1929_v51 = vadd.f32 %v1928_v58, %v1927_v33  ;;  %v2043_v0 = vsel %vm1924_vm5, %v2006_v59, 0.0  ;;  %v482_v57 = vsel %vm382_vm2, %v477_v42, %v481_v43 }
  0xb4   : > { %v2044_v3 = vadd.f32 %v2043_v0, %v2042_v39  ;;  %v1480_v4 = vpop.f32.mrf.mxu3  ;;  %v617_v49 = vpop.f32.mrf.mxu0 }
  0xb5   : > { %2452 = vmatmul.msk.bf16.gmra.mxu2 %vm543_vm0, %v1002_v60  ;;  %v1566_v5 = vadd.f32 %v1480_v4, %v1185_v1  ;;  %v765_v6 = vadd.f32 %v764_v45, %v617_v49  ;;  %v1736_v54 = vpop.permute.xlu2 %1735  ;;  %v2911_v4 = vld [vmem:[%s2630_s16 + $0x68] sm:$0xff] }
  0xb7   : > { %v1602_v11 = vpack.c.bf16 %v1566_v5, %v1566_v5  ;;  %v1891_v12 = vmul.f32 %v1726_v2, %v1566_v5  ;;  %2324 = vmatmul.msk.bf16.gmra.mxu0 %vm543_vm0, %v474_v63 }
  0xb8   : > { %v766_v7 = vpop.f32.mrf.mxu1  ;;  %v1102_v13 = vpop.f32.mrf.mxu2 }
  0xb9   : > { %1639 = vst.msk [vmem:[%s2781_s9 + $0xc] sm:$0xf] %vm1635_vm4, %v1602_v11  ;;  %v1930_v16 = vsel %vm1924_vm5, %v1891_v12, 0.0  ;;  %v2007_v17 = vmul.f32 %v1891_v12, %v1566_v5  ;;  %v1186_v9 = vadd.f32 %v1102_v13, %v765_v6  ;;  %2482 = vmatmul.msk.bf16.gmra.mxu3 %vm543_vm0, %v1334_v8  ;;  %v1706_v5 = vld [vmem:[%s3258_s2 + $0x110] sm:$0xff]  ;;  %v1741_v12 = vpop.permute.xlu0 %1740 }
  0xba   : > { %v1931_v21 = vadd.f32 %v1930_v16, %v1929_v51  ;;  %v2904_v51 = vld [vmem:[%s2630_s16 + $0x70] sm:$0xff]  ;;  %1880 = vperm.xlu1 %2548, %v1706_v5  }
  0xbb   : > { %v2045_v24 = vsel %vm1924_vm5, %v2007_v17, 0.0  ;;  %v1348_v8 = vshll.u32 %v2904_v51, 16  ;;  %v1698_v13 = vld [vmem:[%s3258_s2 + $0xd0] sm:$0xff]  ;;  %v1005_v22 = vrot.slane %v2904_v51, 1 }
  0xbc   : > { %v2046_v27 = vadd.f32 %v2045_v24, %v2044_v3  ;;  %v1483_v28 = vpop.f32.mrf.mxu3  ;;  %v619_v29 = vpop.f32.mrf.mxu0  ;;  %v1705_v3 = vld [vmem:[%s3258_s2 + $0x108] sm:$0xff]  ;;  %1840 = vperm.xlu2 %2549, %v1698_v13  }
  0xbd   : > { %v1567_v32 = vadd.f32 %v1483_v28, %v1186_v9  ;;  %v767_v39 = vadd.f32 %v766_v7, %v619_v29  ;;  %1875 = vperm.xlu0 %2547, %v1705_v3   ;;  %v1345_v7 = vshrl.u32 %v2904_v51, 16  ;;  %v483_v9 = vshrl.u32 %v2858_v15, 16 }
  0xbe   : > { %v1350_v24 = vrot.slane %v1348_v8, 2 }
  0xbf   : > { %v1603_v37 = vpack.c.bf16 %v1567_v32, %v1567_v32  ;;  %v1892_v38 = vmul.f32 %v1731_v18, %v1567_v32  ;;  %v487_v18 = vshll.u32 %v2911_v4, 16  ;;  %v1347_v23 = vrot.slane %v1345_v7, 1 }
  0xc0   : > { %v769_v33 = vpop.f32.mrf.mxu1  ;;  %v1104_v40 = vpop.f32.mrf.mxu2  ;;  %v485_v30 = vor.u32 %v483_v9, %v481_v43 }
  0xc1   : > { %1640 = vst.msk [vmem:[%s2781_s9 + $0x10] sm:$0xf] %vm1635_vm4, %v1603_v37  ;;  %v1932_v44 = vsel %vm1924_vm5, %v1892_v38, 0.0  ;;  %v2008_v45 = vmul.f32 %v1892_v38, %v1567_v32  ;;  %v1187_v53 = vadd.f32 %v1104_v40, %v767_v39  ;;  %v489_v31 = vrot.slane %v487_v18, 1  ;;  %v1746_v39 = vpop.permute.xlu1 %1745  ;;  %v1701_v40 = vld [vmem:[%s3258_s2 + $0xe8] sm:$0xff] }
  0xc2   : > { %v1933_v50 = vadd.f32 %v1932_v44, %v1931_v21  ;;  %v2939_v37 = vor.u32 %v1350_v24, %v1347_v23  ;;  %v1756_v23 = vpop.permute.xlu0 %1755  ;;  %v1707_v24 = vld [vmem:[%s3258_s2 + $0x118] sm:$0xff] }
  0xc3   : > { %2351 = vmatmul.msk.bf16.gmra.mxu1 %vm543_vm0, %v2806_v26  ;;  %v2892_v26 = vor.u32 %v1341_v36, %v1338_v35  ;;  %v2047_v52 = vsel %vm1924_vm5, %v2008_v45, 0.0  ;;  %v1006_v35 = vsel %vm979_vm1, %v1003_v34, %v1005_v22  ;;  %v490_v34 = vsel %vm382_vm2, %v485_v30, %v489_v31 }
  0xc4   : > { %v2048_v20 = vadd.f32 %v2047_v52, %v2046_v27  ;;  %v1485_v46 = vpop.f32.mrf.mxu3  ;;  %v622_v56 = vpop.f32.mrf.mxu0  ;;  %1855 = vperm.xlu2 %2549, %v1701_v40  }
  0xc5   : > { %2453 = vmatmul.msk.bf16.gmra.mxu2 %vm543_vm0, %v1004_v47  ;;  %v1568_v58 = vadd.f32 %v1485_v46, %v1187_v53  ;;  %v770_v59 = vadd.f32 %v769_v33, %v622_v56  ;;  %v1343_v61 = vsel %vm1227_vm3, %v2842_v62, %v2892_v26  ;;  %v1352_v47 = vsel %vm1227_vm3, %v2892_v26, %v2939_v37 }
  0xc6   : > { %v1354_v26 = vshrl.u32 %v2951_v48, 16 }
  0xc7   : > { %v1604_v0 = vpack.c.bf16 %v1568_v58, %v1568_v58  ;;  %v1893_v1 = vmul.f32 %v1736_v54, %v1568_v58  ;;  %2325 = vmatmul.msk.bf16.gmra.mxu0 %vm543_vm0, %v482_v57  ;;  %v2955_v54 = vld [vmem:[%s2630_s16 + $0x70] sm:$0xff]  ;;  %v1357_v57 = vshll.u32 %v2951_v48, 16 }
  0xc8   : > { %v771_v60 = vpop.f32.mrf.mxu1  ;;  %v1107_v2 = vpop.f32.mrf.mxu2  ;;  %v495_v3 = vshll.u32 %v2955_v54, 16  ;;  %v1356_v5 = vrot.slane %v1354_v26, 1 }
  0xc9   : > { %1641 = vst.msk [vmem:[%s2781_s9 + $0x14] sm:$0xf] %vm1635_vm4, %v1604_v0  ;;  %v1934_v49 = vsel %vm1924_vm5, %v1893_v1, 0.0  ;;  %v2009_v63 = vmul.f32 %v1893_v1, %v1568_v58  ;;  %v1188_v62 = vadd.f32 %v1107_v2, %v770_v59  ;;  %2483 = vmatmul.msk.bf16.gmra.mxu3 %vm543_vm0, %v1343_v61  ;;  %v1751_v59 = vpop.permute.xlu2 %1750  ;;  %v491_v2 = vshrl.u32 %v2911_v4, 16 }
  0xca   : > { %v1935_v6 = vadd.f32 %v1934_v49, %v1933_v50 }
  0xcb   : > { %v2049_v11 = vsel %vm1924_vm5, %v2009_v63, 0.0  ;;  %v493_v13 = vor.u32 %v491_v2, %v489_v31 }
  0xcc   : > { %v2050_v14 = vadd.f32 %v2049_v11, %v2048_v20  ;;  %v1488_v16 = vpop.f32.mrf.mxu3  ;;  %v624_v17 = vpop.f32.mrf.mxu0 }
  0xcd   : > { %v1569_v19 = vadd.f32 %v1488_v16, %v1188_v62  ;;  %v772_v28 = vadd.f32 %v771_v60, %v624_v17  ;;  %v1704_v60 = vld [vmem:[%s3258_s2 + $0x100] sm:$0xff]  ;;  %v1007_v62 = vrot.slane %v2951_v48, 1 }
  0xce   : > { %1870 = vperm.xlu2 %2549, %v1704_v60  }
  0xcf   : > { %v1605_v25 = vpack.c.bf16 %v1569_v19, %v1569_v19  ;;  %v1894_v27 = vmul.f32 %v1741_v12, %v1569_v19  ;;  %v1008_v9 = vsel %vm979_vm1, %v1005_v22, %v1007_v62 }
  0xd0   : > { %v774_v21 = vpop.f32.mrf.mxu1  ;;  %v1109_v29 = vpop.f32.mrf.mxu2 }
  0xd1   : > { %1642 = vst.msk [vmem:[%s2781_s9 + $0x18] sm:$0xf] %vm1635_vm4, %v1605_v25  ;;  %v1936_v32 = vsel %vm1924_vm5, %v1894_v27, 0.0  ;;  %v2010_v33 = vmul.f32 %v1894_v27, %v1569_v19 }
  0xd2   : > { %v1937_v36 = vadd.f32 %v1936_v32, %v1935_v6  ;;  %v1359_v6 = vrot.slane %v1357_v57, 2  ;;  %v2992_v32 = vld [vmem:[%s2630_s16 + $0x80] sm:$0xff] }
  0xd3   : > { %2352 = vmatmul.msk.bf16.gmra.mxu1 %vm543_vm0, %v2858_v15  ;;  %v2051_v38 = vsel %vm1924_vm5, %v2010_v33, 0.0  ;;  %v1189_v15 = vadd.f32 %v1109_v29, %v772_v28 }
  0xd4   : > { %v2052_v41 = vadd.f32 %v2051_v38, %v2050_v14  ;;  %v1490_v42 = vpop.f32.mrf.mxu3  ;;  %v627_v10 = vpop.f32.mrf.mxu0  ;;  %v497_v14 = vrot.slane %v495_v3, 1  ;;  %v2980_v19 = vor.u32 %v1359_v6, %v1356_v5  ;;  %v2996_v38 = vld [vmem:[%s2630_s16 + $0x78] sm:$0xff] }
  0xd5   : > { %2454 = vmatmul.msk.bf16.gmra.mxu2 %vm543_vm0, %v1006_v35  ;;  %v1570_v43 = vadd.f32 %v1490_v42, %v1189_v15  ;;  %v775_v44 = vadd.f32 %v774_v21, %v627_v10  ;;  %v1366_v42 = vshll.u32 %v2992_v32, 16 }
  0xd6   : > { %v498_v22 = vsel %vm382_vm2, %v493_v13, %v497_v14  ;;  %1885 = vperm.xlu2 %2549, %v1707_v24   ;;  %v1361_v31 = vsel %vm1227_vm3, %v2939_v37, %v2980_v19  ;;  %v1363_v37 = vshrl.u32 %v2992_v32, 16  ;;  %v3027_v13 = vld [vmem:[%s2630_s16 + $0x88] sm:$0xff] }
  0xd7   : > { %v1606_v50 = vpack.c.bf16 %v1570_v43, %v1570_v43  ;;  %v1895_v52 = vmul.f32 %v1746_v39, %v1570_v43  ;;  %2326 = vmatmul.msk.bf16.gmra.mxu0 %vm543_vm0, %v490_v34  ;;  %v1761_v34 = vpop.permute.xlu1 %1760  ;;  %v1375_v24 = vshll.u32 %v3027_v13, 16 }
  0xd8   : > { %v776_v45 = vpop.f32.mrf.mxu1  ;;  %v1112_v53 = vpop.f32.mrf.mxu2 }
  0xd9   : > { %1643 = vst.msk [vmem:[%s2781_s9 + $0x1c] sm:$0xf] %vm1635_vm4, %v1606_v50  ;;  %v1938_v55 = vsel %vm1924_vm5, %v1895_v52, 0.0  ;;  %v2011_v20 = vmul.f32 %v1895_v52, %v1570_v43  ;;  %v1190_v46 = vadd.f32 %v1112_v53, %v775_v44  ;;  %2484 = vmatmul.msk.bf16.gmra.mxu3 %vm543_vm0, %v1352_v47  ;;  %v499_v47 = vshrl.u32 %v2955_v54, 16 }
  0xda   : > { %v1939_v56 = vadd.f32 %v1938_v55, %v1937_v36  ;;  %v503_v50 = vshll.u32 %v2996_v38, 16  ;;  %v1009_v55 = vrot.slane %v2992_v32, 1 }
  0xdb   : > { %v2053_v58 = vsel %vm1924_vm5, %v2011_v20, 0.0  ;;  %v1365_v20 = vrot.slane %v1363_v37, 1 }
  0xdc   : > { %v2054_v61 = vadd.f32 %v2053_v58, %v2052_v41  ;;  %v1493_v0 = vpop.f32.mrf.mxu3  ;;  %v629_v1 = vpop.f32.mrf.mxu0  ;;  %v505_v60 = vrot.slane %v503_v50, 1 }
  0xdd   : > { %v1571_v49 = vadd.f32 %v1493_v0, %v1190_v46  ;;  %v777_v11 = vadd.f32 %v776_v45, %v629_v1  ;;  %v1368_v46 = vrot.slane %v1366_v42, 2  ;;  %v1010_v1 = vsel %vm979_vm1, %v1007_v62, %v1009_v55 }
  0xdf   : > { %v1607_v7 = vpack.c.bf16 %v1571_v49, %v1571_v49  ;;  %v1896_v8 = vmul.f32 %v1751_v59, %v1571_v49  ;;  %v501_v59 = vor.u32 %v499_v47, %v497_v14  ;;  %v3018_v3 = vor.u32 %v1368_v46, %v1365_v20 }
  0xe0   : > { %v779_v63 = vpop.f32.mrf.mxu1  ;;  %v1114_v12 = vpop.f32.mrf.mxu2 }
  0xe1   : > { %1644 = vst.msk [vmem:[%s2781_s9 + $0x20] sm:$0xf] %vm1635_vm4, %v1607_v7  ;;  %v1940_v16 = vsel %vm1924_vm5, %v1896_v8, 0.0  ;;  %v2012_v17 = vmul.f32 %v1896_v8, %v1571_v49  ;;  %v506_v8 = vsel %vm382_vm2, %v501_v59, %v505_v60  ;;  %v1370_v62 = vsel %vm1227_vm3, %v2980_v19, %v3018_v3 }
  0xe2   : > { %v1941_v18 = vadd.f32 %v1940_v16, %v1939_v56  ;;  %v1372_v19 = vshrl.u32 %v3027_v13, 16 }
  0xe3   : > { %2353 = vmatmul.msk.bf16.gmra.mxu1 %vm543_vm0, %v2911_v4  ;;  %v2055_v21 = vsel %vm1924_vm5, %v2012_v17, 0.0  ;;  %v1191_v4 = vadd.f32 %v1114_v12, %v777_v11 }
  0xe4   : > { %v2056_v25 = vadd.f32 %v2055_v21, %v2054_v61  ;;  %v1495_v27 = vpop.f32.mrf.mxu3  ;;  %v632_v51 = vpop.f32.mrf.mxu0 }
  0xe5   : > { %2455 = vmatmul.msk.bf16.gmra.mxu2 %vm543_vm0, %v1008_v9  ;;  %v1572_v28 = vadd.f32 %v1495_v27, %v1191_v4  ;;  %v780_v29 = vadd.f32 %v779_v63, %v632_v51  ;;  %v1766_v63 = vpop.permute.xlu2 %1765  ;;  %v3031_v9 = vld [vmem:[%s2630_s16 + $0x80] sm:$0xff]  ;;  %v1771_v27 = vpop.permute.xlu0 %1770 }
  0xe7   : > { %v1608_v33 = vpack.c.bf16 %v1572_v28, %v1572_v28  ;;  %v1897_v35 = vmul.f32 %v1756_v23, %v1572_v28  ;;  %2327 = vmatmul.msk.bf16.gmra.mxu0 %vm543_vm0, %v498_v22 }
  0xe8   : > { %v781_v30 = vpop.f32.mrf.mxu1  ;;  %v1117_v36 = vpop.f32.mrf.mxu2 }
  0xe9   : > { %1645 = vst.msk [vmem:[%s2781_s9 + $0x24] sm:$0xf] %vm1635_vm4, %v1608_v33  ;;  %v1942_v15 = vsel %vm1924_vm5, %v1897_v35, 0.0  ;;  %v2013_v39 = vmul.f32 %v1897_v35, %v1572_v28  ;;  %v1192_v40 = vadd.f32 %v1117_v36, %v780_v29  ;;  %2485 = vmatmul.msk.bf16.gmra.mxu3 %vm543_vm0, %v1361_v31  ;;  %v507_v29 = vshrl.u32 %v2996_v38, 16 }
  0xea   : > { %v1943_v41 = vadd.f32 %v1942_v15, %v1941_v18  ;;  %v1011_v35 = vrot.slane %v3027_v13, 1  ;;  %v1374_v36 = vrot.slane %v1372_v19, 1  ;;  %v1377_v15 = vrot.slane %v1375_v24, 2  ;;  %v1218_v24 = vld [vmem:[%s2630_s16 + $0x98] sm:$0x3] }
  0xeb   : > { %v2057_v10 = vsel %vm1924_vm5, %v2013_v39, 0.0  ;;  %v509_v42 = vor.u32 %v507_v29, %v505_v60  ;;  %v283_v29 = vld [vmem:[%s2630_s16 + $0x90] sm:$0x1] }
  0xec   : > { %v2058_v43 = vadd.f32 %v2057_v10, %v2056_v25  ;;  %v1498_v44 = vpop.f32.mrf.mxu3  ;;  %v634_v45 = vpop.f32.mrf.mxu0  ;;  %v3053_v47 = vor.u32 %v1377_v15, %v1374_v36  ;;  %v1225_v36 = vunpack.c.l.b16 %v1218_v24 }
  0xed   : > { %v1573_v52 = vadd.f32 %v1498_v44, %v1192_v40  ;;  %v782_v57 = vadd.f32 %v781_v30, %v634_v45  ;;  %v511_v30 = vshll.u32 %v3031_v9, 16  ;;  %v1012_v44 = vsel %vm979_vm1, %v1009_v55, %v1011_v35 }
  0xee   : > { %v1379_v55 = vsel %vm1227_vm3, %v3018_v3, %v3053_v47 }
  0xef   : > { %v1609_v56 = vpack.c.bf16 %v1573_v52, %v1573_v52  ;;  %v1898_v26 = vmul.f32 %v1761_v34, %v1573_v52  ;;  %v513_v10 = vrot.slane %v511_v30, 1 }
  0xf0   : > { %v784_v53 = vpop.f32.mrf.mxu1  ;;  %v1119_v58 = vpop.f32.mrf.mxu2 }
  0xf1   : > { %1646 = vst.msk [vmem:[%s2781_s9 + $0x28] sm:$0xf] %vm1635_vm4, %v1609_v56  ;;  %v1944_v61 = vsel %vm1924_vm5, %v1898_v26, 0.0  ;;  %v2014_v0 = vmul.f32 %v1898_v26, %v1573_v52  ;;  %v1776_v52 = vpop.permute.xlu1 %1775  ;;  %v514_v56 = vsel %vm382_vm2, %v509_v42, %v513_v10  ;;  %v362_v42 = vunpack.c.l.b16 %v283_v29 }
  0xf2   : > { %v1945_v2 = vadd.f32 %v1944_v61, %v1943_v41 }
  0xf3   : > { %2354 = vmatmul.msk.bf16.gmra.mxu1 %vm543_vm0, %v2955_v54  ;;  %v2059_v49 = vsel %vm1924_vm5, %v2014_v0, 0.0  ;;  %v1193_v54 = vadd.f32 %v1119_v58, %v782_v57  ;;  %v3062_v58 = vld [vmem:[%s2630_s16 + $0x90] sm:$0xff]  ;;  %v3066_v0 = vld [vmem:[%s2630_s16 + $0x88] sm:$0xff] }
  0xf4   : > { %v2060_v5 = vadd.f32 %v2059_v49, %v2058_v43  ;;  %v1500_v6 = vpop.f32.mrf.mxu3  ;;  %v637_v7 = vpop.f32.mrf.mxu0  ;;  %v1381_v3 = vshrl.u32 %v3062_v58, 16 }
  0xf5   : > { %2456 = vmatmul.msk.bf16.gmra.mxu2 %vm543_vm0, %v1010_v1  ;;  %v1574_v48 = vadd.f32 %v1500_v6, %v1193_v54  ;;  %v785_v11 = vadd.f32 %v784_v53, %v637_v7  ;;  %v1781_v6 = vpop.permute.xlu2 %1780 }
  0xf7   : > { %v1610_v14 = vpack.c.bf16 %v1574_v48, %v1574_v48  ;;  %v1899_v16 = vmul.f32 %v1766_v63, %v1574_v48  ;;  %2328 = vmatmul.msk.bf16.gmra.mxu0 %vm543_vm0, %v506_v8  ;;  %v1384_v63 = vshll.u32 %v3062_v58, 16 }
  0xf8   : > { %v786_v12 = vpop.f32.mrf.mxu1  ;;  %v1122_v17 = vpop.f32.mrf.mxu2 }
  0xf9   : > { %1647 = vst.msk [vmem:[%s2781_s9 + $0x2c] sm:$0xf] %vm1635_vm4, %v1610_v14  ;;  %v1946_v18 = vsel %vm1924_vm5, %v1899_v16, 0.0  ;;  %v2015_v21 = vmul.f32 %v1899_v16, %v1574_v48  ;;  %v1194_v4 = vadd.f32 %v1122_v17, %v785_v11  ;;  %2486 = vmatmul.msk.bf16.gmra.mxu3 %vm543_vm0, %v1370_v62  ;;  %v515_v11 = vshrl.u32 %v3031_v9, 16 }
  0xfa   : > { %v1947_v23 = vadd.f32 %v1946_v18, %v1945_v2  ;;  %v1013_v16 = vrot.slane %v3062_v58, 1  ;;  %v1383_v17 = vrot.slane %v1381_v3, 1  ;;  %v1386_v18 = vrot.slane %v1384_v63, 2 }
  0xfb   : > { %v2061_v25 = vsel %vm1924_vm5, %v2015_v21, 0.0 }
  0xfc   : > { %v2062_v51 = vadd.f32 %v2061_v25, %v2060_v5  ;;  %v1503_v22 = vpop.f32.mrf.mxu3  ;;  %v639_v28 = vpop.f32.mrf.mxu0  ;;  %v517_v25 = vor.u32 %v515_v11, %v513_v10 }
  0xfd   : > { %v1575_v31 = vadd.f32 %v1503_v22, %v1194_v4  ;;  %v787_v41 = vadd.f32 %v786_v12, %v639_v28  ;;  %v519_v12 = vshll.u32 %v3066_v0, 16  ;;  %v1014_v28 = vsel %vm979_vm1, %v1011_v35, %v1013_v16  ;;  %v1796_v24 = vpop.permute.xlu2 %1795 }
  0xff   : > { %v1611_v39 = vpack.c.bf16 %v1575_v31, %v1575_v31  ;;  %v1900_v40 = vmul.f32 %v1771_v27, %v1575_v31  ;;  %v521_v27 = vrot.slane %v519_v12, 1 }
 0x100   : > { %v789_v33 = vpop.f32.mrf.mxu1  ;;  %v1124_v37 = vpop.f32.mrf.mxu2 }
 0x101   : > { %1648 = vst.msk [vmem:[%s2781_s9 + $0x30] sm:$0xf] %vm1635_vm4, %v1611_v39  ;;  %v1948_v34 = vsel %vm1924_vm5, %v1900_v40, 0.0  ;;  %v2016_v43 = vmul.f32 %v1900_v40, %v1575_v31  ;;  %v3090_v31 = vor.u32 %v1386_v18, %v1383_v17  ;;  %v1786_v39 = vpop.permute.xlu0 %1785  ;;  %v522_v13 = vsel %vm382_vm2, %v517_v25, %v521_v27 }
 0x102   : > { %v1949_v45 = vadd.f32 %v1948_v34, %v1947_v23 }
 0x103   : > { %2355 = vmatmul.msk.bf16.gmra.mxu1 %vm543_vm0, %v2996_v38  ;;  %v2063_v50 = vsel %vm1924_vm5, %v2016_v43, 0.0  ;;  %v1195_v38 = vadd.f32 %v1124_v37, %v787_v41 }
 0x104   : > { %v2064_v53 = vadd.f32 %v2063_v50, %v2062_v51  ;;  %v1505_v20 = vpop.f32.mrf.mxu3  ;;  %v642_v46 = vpop.f32.mrf.mxu0 }
 0x105   : > { %2457 = vmatmul.msk.bf16.gmra.mxu2 %vm543_vm0, %v1012_v44  ;;  %v1576_v32 = vadd.f32 %v1505_v20, %v1195_v38  ;;  %v790_v26 = vadd.f32 %v789_v33, %v642_v46  ;;  %v880_v33 = vld [vmem:[%s2630_s16 + $0x98] sm:$0x1]  ;;  %v1388_v44 = vsel %vm1227_vm3, %v3053_v47, %v3090_v31 }
 0x106   : > { %v959_v43 = vunpack.c.l.b16 %v880_v33 }
 0x107   : > { %v1612_v59 = vpack.c.bf16 %v1576_v32, %v1576_v32  ;;  %v1901_v60 = vmul.f32 %v1776_v52, %v1576_v32  ;;  %2329 = vmatmul.msk.bf16.gmra.mxu0 %vm543_vm0, %v514_v56 }
 0x108   : > { %v791_v57 = vpop.f32.mrf.mxu1  ;;  %v1127_v61 = vpop.f32.mrf.mxu2 }
 0x109   : > { %1649 = vst.msk [vmem:[%s2781_s9 + $0x34] sm:$0xf] %vm1635_vm4, %v1612_v59  ;;  %v1950_v1 = vsel %vm1924_vm5, %v1901_v60, 0.0  ;;  %v2017_v2 = vmul.f32 %v1901_v60, %v1576_v32  ;;  %v1196_v49 = vadd.f32 %v1127_v61, %v790_v26  ;;  %2487 = vmatmul.msk.bf16.gmra.mxu3 %vm543_vm0, %v1379_v55  ;;  %v978_v32 = vpack.c.b16 %v959_v43, %v959_v43  ;;  %v1791_v59 = vpop.permute.xlu1 %1790 }
 0x10a   : > { %v1951_v54 = vadd.f32 %v1950_v1, %v1949_v45  ;;  %v1226_v45 = vpack.c.b16 %v1225_v36, %v1225_v36 }
 0x10b   : > { %v2065_v5 = vsel %vm1924_vm5, %v2017_v2, 0.0  ;;  %v523_v2 = vshrl.u32 %v3066_v0, 16  ;;  %v1015_v63 = vrot.slane %v978_v32, 1 }
 0x10c   : > { %v2066_v7 = vadd.f32 %v2065_v5, %v2064_v53  ;;  %v1508_v8 = vpop.f32.mrf.mxu3  ;;  %v644_v48 = vpop.f32.mrf.mxu0  ;;  %v381_v53 = vpack.c.b16 %v362_v42, %v362_v42  ;;  %v1393_v55 = vshll.u32 %v1226_v45, 16 }
 0x10d   : > { %v1577_v62 = vadd.f32 %v1508_v8, %v1196_v49  ;;  %v792_v23 = vadd.f32 %v791_v57, %v644_v48  ;;  %v1390_v57 = vshrl.u32 %v1226_v45, 16  ;;  %v525_v12 = vor.u32 %v523_v2, %v521_v27 }
 0x10e   : > { %v527_v49 = vshll.u32 %v381_v53, 16  ;;  %v1016_v18 = vsel %vm979_vm1, %v1013_v16, %v1015_v63 }
 0x10f   : > { %v1613_v21 = vpack.c.bf16 %v1577_v62, %v1577_v62  ;;  %v1902_v4 = vmul.f32 %v1781_v6, %v1577_v62  ;;  %v1392_v5 = vrot.slane %v1390_v57, 1  ;;  %v1395_v6 = vrot.slane %v1393_v55, 2 }
 0x110   : > { %v794_v14 = vpop.f32.mrf.mxu1  ;;  %v1129_v19 = vpop.f32.mrf.mxu2 }
 0x111   : > { %1650 = vst.msk [vmem:[%s2781_s9 + $0x38] sm:$0xf] %vm1635_vm4, %v1613_v21  ;;  %v1952_v51 = vsel %vm1924_vm5, %v1902_v4, 0.0  ;;  %v2018_v22 = vmul.f32 %v1902_v4, %v1577_v62  ;;  %v1197_v15 = vadd.f32 %v1129_v19, %v792_v23  ;;  %v529_v62 = vrot.slane %v527_v49, 1  ;;  %v1806_v55 = vpop.permute.xlu1 %1805 }
 0x112   : > { %v1953_v30 = vadd.f32 %v1952_v51, %v1951_v54  ;;  %v1396_v4 = vor.u32 %v1395_v6, %v1392_v5 }
 0x113   : > { %2356 = vmatmul.msk.bf16.gmra.mxu1 %vm543_vm0, %v3031_v9  ;;  %v2067_v9 = vsel %vm1924_vm5, %v2018_v22, 0.0  ;;  %v530_v51 = vsel %vm382_vm2, %v525_v12, %v529_v62 }
 0x114   : > { %v2068_v40 = vadd.f32 %v2067_v9, %v2066_v7  ;;  %v1510_v41 = vpop.f32.mrf.mxu3  ;;  %v647_v37 = vpop.f32.mrf.mxu0  ;;  %v1397_v58 = vsel %vm1227_vm3, %v3090_v31, %v1396_v4 }
 0x115   : > { %2458 = vmatmul.msk.bf16.gmra.mxu2 %vm543_vm0, %v1014_v28  ;;  %v1578_v35 = vadd.f32 %v1510_v41, %v1197_v15  ;;  %v795_v10 = vadd.f32 %v794_v14, %v647_v37  ;;  %v1801_v41 = vpop.permute.xlu0 %1800 }
 0x117   : > { %v1614_v50 = vpack.c.bf16 %v1578_v35, %v1578_v35  ;;  %v1903_v38 = vmul.f32 %v1786_v39, %v1578_v35  ;;  %2330 = vmatmul.msk.bf16.gmra.mxu0 %vm543_vm0, %v522_v13 }
 0x118   : > { %v796_v34 = vpop.f32.mrf.mxu1  ;;  %v1132_v52 = vpop.f32.mrf.mxu2 }
 0x119   : > { %1651 = vst.msk [vmem:[%s2781_s9 + $0x3c] sm:$0xf] %vm1635_vm4, %v1614_v50  ;;  %v1954_v20 = vsel %vm1924_vm5, %v1903_v38, 0.0  ;;  %v2019_v46 = vmul.f32 %v1903_v38, %v1578_v35  ;;  %v1198_v56 = vadd.f32 %v1132_v52, %v795_v10  ;;  %2488 = vmatmul.msk.bf16.gmra.mxu3 %vm543_vm0, %v1388_v44 }
 0x11a   : > { %v1955_v26 = vadd.f32 %v1954_v20, %v1953_v30 }
 0x11b   : > { %v2069_v47 = vsel %vm1924_vm5, %v2019_v46, 0.0 }
 0x11c   : > { %v2070_v60 = vadd.f32 %v2069_v47, %v2068_v40  ;;  %v1513_v61 = vpop.f32.mrf.mxu3  ;;  %v649_v1 = vpop.f32.mrf.mxu0 }
 0x11d   : > { %v1579_v54 = vadd.f32 %v1513_v61, %v1198_v56  ;;  %v797_v48 = vadd.f32 %v796_v34, %v649_v1 }
 0x11f   : > { %v1615_v7 = vpack.c.bf16 %v1579_v54, %v1579_v54  ;;  %v1904_v8 = vmul.f32 %v1791_v59, %v1579_v54 }
 0x120   : > { %v799_v3 = vpop.f32.mrf.mxu1  ;;  %v1134_v11 = vpop.f32.mrf.mxu2 }
 0x121   : > { %1652 = vst.msk [vmem:[%s2781_s9 + $0x40] sm:$0xf] %vm1635_vm4, %v1615_v7  ;;  %v1956_v14 = vsel %vm1924_vm5, %v1904_v8, 0.0  ;;  %v2020_v17 = vmul.f32 %v1904_v8, %v1579_v54  ;;  %v1199_v19 = vadd.f32 %v1134_v11, %v797_v48  ;;  %v1811_v8 = vpop.permute.xlu2 %1810 }
 0x122   : > { %v1957_v21 = vadd.f32 %v1956_v14, %v1955_v26 }
 0x123   : > { %2357 = vmatmul.msk.bf16.gmra.mxu1 %vm543_vm0, %v3066_v0  ;;  %v2071_v23 = vsel %vm1924_vm5, %v2020_v17, 0.0 }
 0x124   : > { %v2072_v25 = vadd.f32 %v2071_v23, %v2070_v60  ;;  %v1515_v0 = vpop.f32.mrf.mxu3  ;;  %v652_v27 = vpop.f32.mrf.mxu0 }
 0x125   : > { %2459 = vmatmul.msk.bf16.gmra.mxu2 %vm543_vm0, %v1016_v18  ;;  %v1580_v22 = vadd.f32 %v1515_v0, %v1199_v19  ;;  %v800_v28 = vadd.f32 %v799_v3, %v652_v27 }
 0x127   : > { %v1616_v16 = vpack.c.bf16 %v1580_v22, %v1580_v22  ;;  %v1905_v30 = vmul.f32 %v1796_v24, %v1580_v22  ;;  %2331 = vmatmul.msk.bf16.gmra.mxu0 %vm543_vm0, %v530_v51  ;;  %v1816_v51 = vpop.permute.xlu0 %1815 }
 0x128   : > { %v801_v29 = vpop.f32.mrf.mxu1  ;;  %v1137_v33 = vpop.f32.mrf.mxu2 }
 0x129   : > { %1653 = vst.msk [vmem:[%s2781_s9 + $0x44] sm:$0xf] %vm1635_vm4, %v1616_v16  ;;  %v1958_v36 = vsel %vm1924_vm5, %v1905_v30, 0.0  ;;  %v2021_v9 = vmul.f32 %v1905_v30, %v1580_v22  ;;  %v1200_v15 = vadd.f32 %v1137_v33, %v800_v28  ;;  %2489 = vmatmul.msk.bf16.gmra.mxu3 %vm543_vm0, %v1397_v58 }
 0x12a   : > { %v1959_v39 = vadd.f32 %v1958_v36, %v1957_v21 }
 0x12b   : > { %v2073_v40 = vsel %vm1924_vm5, %v2021_v9, 0.0 }
 0x12c   : > { %v2074_v37 = vadd.f32 %v2073_v40, %v2072_v25  ;;  %v1518_v31 = vpop.f32.mrf.mxu3  ;;  %v654_v13 = vpop.f32.mrf.mxu0 }
 0x12d   : > { %v1581_v42 = vadd.f32 %v1518_v31, %v1200_v15  ;;  %v802_v43 = vadd.f32 %v801_v29, %v654_v13 }
 0x12f   : > { %v1617_v10 = vpack.c.bf16 %v1581_v42, %v1581_v42  ;;  %v1906_v34 = vmul.f32 %v1801_v41, %v1581_v42 }
 0x130   : > { %v804_v35 = vpop.f32.mrf.mxu1  ;;  %v1139_v44 = vpop.f32.mrf.mxu2 }
 0x131   : > { %1654 = vst.msk [vmem:[%s2781_s9 + $0x48] sm:$0xf] %vm1635_vm4, %v1617_v10  ;;  %v1960_v45 = vsel %vm1924_vm5, %v1906_v34, 0.0  ;;  %v2022_v50 = vmul.f32 %v1906_v34, %v1581_v42  ;;  %v1201_v53 = vadd.f32 %v1139_v44, %v802_v43 }
 0x132   : > { %v1961_v38 = vadd.f32 %v1960_v45, %v1959_v39 }
 0x133   : > { %v2075_v52 = vsel %vm1924_vm5, %v2022_v50, 0.0 }
 0x134   : > { %v2076_v20 = vadd.f32 %v2075_v52, %v2074_v37  ;;  %v1520_v46 = vpop.f32.mrf.mxu3  ;;  %v657_v56 = vpop.f32.mrf.mxu0 }
 0x135   : > { %v1582_v32 = vadd.f32 %v1520_v46, %v1201_v53  ;;  %v805_v26 = vadd.f32 %v804_v35, %v657_v56  ;;  %v1821_v37 = vpop.permute.xlu1 %1820  ;;  %v1826_v56 = vpop.permute.xlu2 %1825 }
 0x137   : > { %v1618_v47 = vpack.c.bf16 %v1582_v32, %v1582_v32  ;;  %v1907_v59 = vmul.f32 %v1806_v55, %v1582_v32 }
 0x138   : > { %v806_v57 = vpop.f32.mrf.mxu1  ;;  %v1142_v60 = vpop.f32.mrf.mxu2 }
 0x139   : > { %1655 = vst.msk [vmem:[%s2781_s9 + $0x4c] sm:$0xf] %vm1635_vm4, %v1618_v47  ;;  %v1962_v61 = vsel %vm1924_vm5, %v1907_v59, 0.0  ;;  %v2023_v1 = vmul.f32 %v1907_v59, %v1582_v32  ;;  %v1202_v2 = vadd.f32 %v1142_v60, %v805_v26 }
 0x13a   : > { %v1963_v49 = vadd.f32 %v1962_v61, %v1961_v38 }
 0x13b   : > { %v2077_v54 = vsel %vm1924_vm5, %v2023_v1, 0.0 }
 0x13c   : > { %v2078_v3 = vadd.f32 %v2077_v54, %v2076_v20  ;;  %v1523_v63 = vpop.f32.mrf.mxu3  ;;  %v659_v5 = vpop.f32.mrf.mxu0 }
 0x13d   : > { %v1583_v6 = vadd.f32 %v1523_v63, %v1202_v2  ;;  %v807_v12 = vadd.f32 %v806_v57, %v659_v5  ;;  %v1831_v63 = vpop.permute.xlu0 %1830 }
 0x13f   : > { %v1619_v48 = vpack.c.bf16 %v1583_v6, %v1583_v6  ;;  %v1908_v11 = vmul.f32 %v1811_v8, %v1583_v6 }
 0x140   : > { %v809_v7 = vpop.f32.mrf.mxu1  ;;  %v1144_v62 = vpop.f32.mrf.mxu2 }
 0x141   : > { %1656 = vst.msk [vmem:[%s2781_s9 + $0x50] sm:$0xf] %vm1635_vm4, %v1619_v48  ;;  %v1964_v14 = vsel %vm1924_vm5, %v1908_v11, 0.0  ;;  %v2024_v17 = vmul.f32 %v1908_v11, %v1583_v6  ;;  %v1203_v4 = vadd.f32 %v1144_v62, %v807_v12 }
 0x142   : > { %v1965_v18 = vadd.f32 %v1964_v14, %v1963_v49 }
 0x143   : > { %v2079_v21 = vsel %vm1924_vm5, %v2024_v17, 0.0 }
 0x144   : > { %v2080_v23 = vadd.f32 %v2079_v21, %v2078_v3  ;;  %v1525_v19 = vpop.f32.mrf.mxu3  ;;  %v662_v24 = vpop.f32.mrf.mxu0 }
 0x145   : > { %v1584_v25 = vadd.f32 %v1525_v19, %v1203_v4  ;;  %v810_v0 = vadd.f32 %v809_v7, %v662_v24 }
 0x147   : > { %v1620_v22 = vpack.c.bf16 %v1584_v25, %v1584_v25  ;;  %v1909_v28 = vmul.f32 %v1816_v51, %v1584_v25 }
 0x148   : > { %v811_v27 = vpop.f32.mrf.mxu1  ;;  %v1147_v29 = vpop.f32.mrf.mxu2 }
 0x149   : > { %1657 = vst.msk [vmem:[%s2781_s9 + $0x54] sm:$0xf] %vm1635_vm4, %v1620_v22  ;;  %v1966_v58 = vsel %vm1924_vm5, %v1909_v28, 0.0  ;;  %v2025_v16 = vmul.f32 %v1909_v28, %v1584_v25  ;;  %v1204_v30 = vadd.f32 %v1147_v29, %v810_v0 }
 0x14a   : > { %v1967_v33 = vadd.f32 %v1966_v58, %v1965_v18 }
 0x14b   : > { %v2081_v36 = vsel %vm1924_vm5, %v2025_v16, 0.0 }
 0x14c   : > { %v2082_v9 = vadd.f32 %v2081_v36, %v2080_v23  ;;  %v1528_v15 = vpop.f32.mrf.mxu3  ;;  %v664_v39 = vpop.f32.mrf.mxu0 }
 0x14d   : > { %v1585_v40 = vadd.f32 %v1528_v15, %v1204_v30  ;;  %v812_v42 = vadd.f32 %v811_v27, %v664_v39 }
 0x14f   : > { %v1621_v31 = vpack.c.bf16 %v1585_v40, %v1585_v40  ;;  %v1910_v13 = vmul.f32 %v1821_v37, %v1585_v40 }
 0x150   : > { %v814_v41 = vpop.f32.mrf.mxu1  ;;  %v1149_v35 = vpop.f32.mrf.mxu2 }
 0x151   : > { %1658 = vst.msk [vmem:[%s2781_s9 + $0x58] sm:$0xf] %vm1635_vm4, %v1621_v31  ;;  %v1968_v10 = vsel %vm1924_vm5, %v1910_v13, 0.0  ;;  %v2026_v34 = vmul.f32 %v1910_v13, %v1585_v40  ;;  %v1205_v45 = vadd.f32 %v1149_v35, %v812_v42 }
 0x152   : > { %v1969_v43 = vadd.f32 %v1968_v10, %v1967_v33 }
 0x153   : > { %v2083_v44 = vsel %vm1924_vm5, %v2026_v34, 0.0 }
 0x154   : > { %v2084_v50 = vadd.f32 %v2083_v44, %v2082_v9  ;;  %v1530_v38 = vpop.f32.mrf.mxu3  ;;  %v667_v52 = vpop.f32.mrf.mxu0 }
 0x155   : > { %v1586_v53 = vadd.f32 %v1530_v38, %v1205_v45  ;;  %v815_v20 = vadd.f32 %v814_v41, %v667_v52 }
 0x157   : > { %v1622_v32 = vpack.c.bf16 %v1586_v53, %v1586_v53  ;;  %v1911_v26 = vmul.f32 %v1826_v56, %v1586_v53 }
 0x158   : > { %v816_v46 = vpop.f32.mrf.mxu1  ;;  %v1152_v57 = vpop.f32.mrf.mxu2 }
 0x159   : > { %1659 = vst.msk [vmem:[%s2781_s9 + $0x5c] sm:$0xf] %vm1635_vm4, %v1622_v32  ;;  %v1970_v55 = vsel %vm1924_vm5, %v1911_v26, 0.0  ;;  %v2027_v47 = vmul.f32 %v1911_v26, %v1586_v53  ;;  %v1206_v59 = vadd.f32 %v1152_v57, %v815_v20 }
 0x15a   : > { %v1971_v60 = vadd.f32 %v1970_v55, %v1969_v43  ;;  %v1836_v55 = vpop.permute.xlu1 %1835 }
 0x15b   : > { %v2085_v61 = vsel %vm1924_vm5, %v2027_v47, 0.0 }
 0x15c   : > { %v2086_v1 = vadd.f32 %v2085_v61, %v2084_v50  ;;  %v1533_v2 = vpop.f32.mrf.mxu3  ;;  %v669_v49 = vpop.f32.mrf.mxu0 }
 0x15d   : > { %v1587_v54 = vadd.f32 %v1533_v2, %v1206_v59  ;;  %v817_v7 = vadd.f32 %v816_v46, %v669_v49 }
 0x15f   : > { %v1623_v5 = vpack.c.bf16 %v1587_v54, %v1587_v54  ;;  %v1912_v6 = vmul.f32 %v1831_v63, %v1587_v54  ;;  %v1841_v63 = vpop.permute.xlu2 %1840 }
 0x160   : > { %v819_v3 = vpop.f32.mrf.mxu1  ;;  %v1154_v8 = vpop.f32.mrf.mxu2 }
 0x161   : > { %1660 = vst.msk [vmem:[%s2781_s9 + $0x60] sm:$0xf] %vm1635_vm4, %v1623_v5  ;;  %v1972_v48 = vsel %vm1924_vm5, %v1912_v6, 0.0  ;;  %v2028_v11 = vmul.f32 %v1912_v6, %v1587_v54  ;;  %v1207_v14 = vadd.f32 %v1154_v8, %v817_v7  ;;  %v1846_v5 = vpop.permute.xlu0 %1845 }
 0x162   : > { %v3152_v12 = vadd.f32 %v1972_v48, %v1971_v60  ;;  %v1851_v8 = vpop.permute.xlu1 %1850 }
 0x163   : > { %v2087_v62 = vsel %vm1924_vm5, %v2028_v11, 0.0 }
 0x164   : > { %v3155_v17 = vadd.f32 %v2087_v62, %v2086_v1  ;;  %v1535_v18 = vpop.f32.mrf.mxu3  ;;  %v672_v21 = vpop.f32.mrf.mxu0 }
 0x165   : > { %v3157_v4 = vadd.f32 %v1535_v18, %v1207_v14  ;;  %v820_v23 = vadd.f32 %v819_v3, %v672_v21 }
 0x167   : > { %v1624_v24 = vpack.c.bf16 %v3157_v4, %v3157_v4  ;;  %v1913_v62 = vmul.f32 %v1836_v55, %v3157_v4 }
 0x168   : > { %v821_v19 = vpop.f32.mrf.mxu1  ;;  %v1157_v25 = vpop.f32.mrf.mxu2 }
 0x169   : > { %1661 = vst.msk [vmem:[%s2781_s9 + $0x64] sm:$0xf] %vm1635_vm4, %v1624_v24  ;;  %v1208_v0 = vadd.f32 %v1157_v25, %v820_v23 }
 0x16c   : > { %v1538_v27 = vpop.f32.mrf.mxu3  ;;  %v674_v51 = vpop.f32.mrf.mxu0 }
 0x16d   : > { %v3163_v22 = vadd.f32 %v1538_v27, %v1208_v0  ;;  %v822_v58 = vadd.f32 %v821_v19, %v674_v51  ;;  %v1856_v0 = vpop.permute.xlu2 %1855  ;;  %v2029_v27 = vmul.f32 %v1913_v62, %v3157_v4  ;;  %v1861_v51 = vpop.permute.xlu0 %1860 }
 0x16f   : > { %v1625_v29 = vpack.c.bf16 %v3163_v22, %v3163_v22  ;;  %v1914_v23 = vmul.f32 %v1841_v63, %v3163_v22 }
 0x170   : > { %v824_v28 = vpop.f32.mrf.mxu1  ;;  %v1159_v16 = vpop.f32.mrf.mxu2 }
 0x171   : > { %1662 = vst.msk [vmem:[%s2781_s9 + $0x68] sm:$0xf] %vm1635_vm4, %v1625_v29  ;;  %v1209_v30 = vadd.f32 %v1159_v16, %v822_v58  ;;  %v1866_v29 = vpop.permute.xlu1 %1865  ;;  %v1974_v58 = vsel %vm1924_vm5, %v1913_v62, 0.0  ;;  %v2030_v16 = vmul.f32 %v1914_v23, %v3163_v22 }
 0x174   : > { %v1540_v33 = vpop.f32.mrf.mxu3  ;;  %v677_v36 = vpop.f32.mrf.mxu0 }
 0x175   : > { %v3169_v9 = vadd.f32 %v1540_v33, %v1209_v30  ;;  %v825_v15 = vadd.f32 %v824_v28, %v677_v36  ;;  %v1876_v55 = vpop.permute.xlu0 %1875 }
 0x177   : > { %v1626_v40 = vpack.c.bf16 %v3169_v9, %v3169_v9  ;;  %v1915_v28 = vmul.f32 %v1846_v5, %v3169_v9 }
 0x178   : > { %v826_v39 = vpop.f32.mrf.mxu1  ;;  %v1162_v41 = vpop.f32.mrf.mxu2 }
 0x179   : > { %1663 = vst.msk [vmem:[%s2781_s9 + $0x6c] sm:$0xf] %vm1635_vm4, %v1626_v40  ;;  %v1210_v37 = vadd.f32 %v1162_v41, %v825_v15  ;;  %v2089_v15 = vsel %vm1924_vm5, %v2029_v27, 0.0  ;;  %v1976_v41 = vsel %vm1924_vm5, %v1914_v23, 0.0 }
 0x17c   : > { %v1543_v31 = vpop.f32.mrf.mxu3  ;;  %v679_v13 = vpop.f32.mrf.mxu0 }
 0x17d   : > { %v3175_v42 = vadd.f32 %v1543_v31, %v1210_v37  ;;  %v827_v34 = vadd.f32 %v826_v39, %v679_v13  ;;  %v2031_v37 = vmul.f32 %v1915_v28, %v3169_v9 }
 0x17f   : > { %v1627_v10 = vpack.c.bf16 %v3175_v42, %v3175_v42  ;;  %v1916_v30 = vmul.f32 %v1851_v8, %v3175_v42 }
 0x180   : > { %v829_v35 = vpop.f32.mrf.mxu1  ;;  %v1164_v43 = vpop.f32.mrf.mxu2 }
 0x181   : > { %1664 = vst.msk [vmem:[%s2781_s9 + $0x70] sm:$0xf] %vm1635_vm4, %v1627_v10  ;;  %v1211_v44 = vadd.f32 %v1164_v43, %v827_v34  ;;  %v2091_v10 = vsel %vm1924_vm5, %v2030_v16, 0.0  ;;  %v1978_v34 = vsel %vm1924_vm5, %v1915_v28, 0.0  ;;  %v2032_v43 = vmul.f32 %v1916_v30, %v3175_v42 }
 0x184   : > { %v1545_v45 = vpop.f32.mrf.mxu3  ;;  %v682_v50 = vpop.f32.mrf.mxu0 }
 0x185   : > { %v3181_v38 = vadd.f32 %v1545_v45, %v1211_v44  ;;  %v830_v52 = vadd.f32 %v829_v35, %v682_v50  ;;  %v1975_v35 = vadd.f32 %v1974_v58, %v3152_v12  ;;  %v2090_v50 = vadd.f32 %v2089_v15, %v3155_v17 }
 0x186   : > { %v2095_v17 = vsel %vm1924_vm5, %v2032_v43, 0.0 }
 0x187   : > { %v1628_v20 = vpack.c.bf16 %v3181_v38, %v3181_v38  ;;  %v1917_v39 = vmul.f32 %v1856_v0, %v3181_v38 }
 0x188   : > { %v831_v53 = vpop.f32.mrf.mxu1  ;;  %v1167_v46 = vpop.f32.mrf.mxu2 }
 0x189   : > { %1665 = vst.msk [vmem:[%s2781_s9 + $0x74] sm:$0xf] %vm1635_vm4, %v1628_v20  ;;  %v1212_v56 = vadd.f32 %v1167_v46, %v830_v52  ;;  %v1977_v52 = vadd.f32 %v1976_v41, %v1975_v35  ;;  %v2033_v9 = vmul.f32 %v1917_v39, %v3181_v38  ;;  %v1980_v20 = vsel %vm1924_vm5, %v1916_v30, 0.0 }
 0x18c   : > { %v1548_v32 = vpop.f32.mrf.mxu3  ;;  %v684_v26 = vpop.f32.mrf.mxu0 }
 0x18d   : > { %v3187_v57 = vadd.f32 %v1548_v32, %v1212_v56  ;;  %v832_v59 = vadd.f32 %v831_v53, %v684_v26  ;;  %v2093_v53 = vsel %vm1924_vm5, %v2031_v37, 0.0  ;;  %v1871_v56 = vpop.permute.xlu2 %1870  ;;  %v2092_v32 = vadd.f32 %v2091_v10, %v2090_v50 }
 0x18e   : > { %v1979_v26 = vadd.f32 %v1978_v34, %v1977_v52 }
 0x18f   : > { %v1629_v47 = vpack.c.bf16 %v3187_v57, %v3187_v57  ;;  %v1918_v22 = vmul.f32 %v1861_v51, %v3187_v57 }
 0x190   : > { %v834_v60 = vpop.f32.mrf.mxu1  ;;  %v1169_v61 = vpop.f32.mrf.mxu2 }
 0x191   : > { %1666 = vst.msk [vmem:[%s2781_s9 + $0x78] sm:$0xf] %vm1635_vm4, %v1629_v47  ;;  %v1213_v1 = vadd.f32 %v1169_v61, %v832_v59  ;;  %v2034_v42 = vmul.f32 %v1918_v22, %v3187_v57  ;;  %v1982_v47 = vsel %vm1924_vm5, %v1917_v39, 0.0  ;;  %v2094_v59 = vadd.f32 %v2093_v53, %v2092_v32 }
 0x192   : > { %v2097_v61 = vsel %vm1924_vm5, %v2033_v9, 0.0 }
 0x193   : > { %v2096_v57 = vadd.f32 %v2095_v17, %v2094_v59  ;;  %v2099_v8 = vsel %vm1924_vm5, %v2034_v42, 0.0 }
 0x194   : > { %v1550_v2 = vpop.f32.mrf.mxu3  ;;  %v687_v49 = vpop.f32.mrf.mxu0 }
 0x195   : > { %v3193_v54 = vadd.f32 %v1550_v2, %v1213_v1  ;;  %v835_v3 = vadd.f32 %v834_v60, %v687_v49  ;;  %v1981_v60 = vadd.f32 %v1980_v20, %v1979_v26  ;;  %v1984_v49 = vsel %vm1924_vm5, %v1918_v22, 0.0 }
 0x197   : > { %v1630_v6 = vpack.c.bf16 %v3193_v54, %v3193_v54  ;;  %v1919_v12 = vmul.f32 %v1866_v29, %v3193_v54 }
 0x198   : > { %v1172_v7 = vpop.f32.mrf.mxu2  ;;  %v836_v48 = vpop.f32.mrf.mxu1 }
 0x199   : > { %1667 = vst.msk [vmem:[%s2781_s9 + $0x7c] sm:$0xf] %vm1635_vm4, %v1630_v6  ;;  %v1214_v11 = vadd.f32 %v1172_v7, %v835_v3  ;;  %v2035_v3 = vmul.f32 %v1919_v12, %v3193_v54  ;;  %v1881_v6 = vpop.permute.xlu1 %1880  ;;  %v1983_v7 = vadd.f32 %v1982_v47, %v1981_v60 }
 0x19b   : > { %v2101_v54 = vsel %vm1924_vm5, %v2035_v3, 0.0 }
 0x19c   : > { %v1553_v14 = vpop.f32.mrf.mxu3  ;;  %v689_v18 = vpop.f32.mrf.mxu0 }
 0x19d   : > { %v1595_v21 = vadd.f32 %v1553_v14, %v1214_v11  ;;  %v837_v24 = vadd.f32 %v836_v48, %v689_v18  ;;  %v1986_v48 = vsel %vm1924_vm5, %v1919_v12, 0.0 }
 0x19f   : > { %v1631_v19 = vpack.c.bf16 %v1595_v21, %v1595_v21  ;;  %v1920_v38 = vmul.f32 %v1871_v56, %v1595_v21 }
 0x1a0   : > { %v1174_v25 = vpop.f32.mrf.mxu2  ;;  %v839_v33 = vpop.f32.mrf.mxu1 }
 0x1a1   : > { %1668 = vst.msk [vmem:[%s2781_s9 + $0x80] sm:$0xf] %vm1635_vm4, %v1631_v19  ;;  %v1215_v36 = vadd.f32 %v1174_v25, %v837_v24  ;;  %v2036_v62 = vmul.f32 %v1920_v38, %v1595_v21  ;;  %v2098_v19 = vadd.f32 %v2097_v61, %v2096_v57  ;;  %v1985_v24 = vadd.f32 %v1984_v49, %v1983_v7 }
 0x1a2   : > { %v1988_v0 = vsel %vm1924_vm5, %v1920_v38, 0.0 }
 0x1a3   : > { %v2100_v51 = vadd.f32 %v2099_v8, %v2098_v19  ;;  %v1987_v28 = vadd.f32 %v1986_v48, %v1985_v24  ;;  %v2103_v29 = vsel %vm1924_vm5, %v2036_v62, 0.0 }
 0x1a4   : > { %v1555_v40 = vpop.f32.mrf.mxu3  ;;  %v692_v4 = vpop.f32.mrf.mxu0 }
 0x1a5   : > { %v1596_v31 = vadd.f32 %v1555_v40, %v1215_v36  ;;  %v840_v13 = vadd.f32 %v839_v33, %v692_v4  ;;  %v2102_v30 = vadd.f32 %v2101_v54, %v2100_v51  ;;  %v1989_v33 = vadd.f32 %v1988_v0, %v1987_v28  ;;  %v1886_v4 = vpop.permute.xlu2 %1885 }
 0x1a7   : > { %v1632_v44 = vpack.c.bf16 %v1596_v31, %v1596_v31  ;;  %v1921_v63 = vmul.f32 %v1876_v55, %v1596_v31  ;;  %v2104_v41 = vadd.f32 %v2103_v29, %v2102_v30 }
 0x1a8   : > { %v1177_v45 = vpop.f32.mrf.mxu2  ;;  %v841_v11 = vpop.f32.mrf.mxu1 }
 0x1a9   : > { %1669 = vst.msk [vmem:[%s2781_s9 + $0x84] sm:$0xf] %vm1635_vm4, %v1632_v44  ;;  %v1216_v46 = vadd.f32 %v1177_v45, %v840_v13  ;;  %v2037_v27 = vmul.f32 %v1921_v63, %v1596_v31  ;;  %v1990_v58 = vsel %vm1924_vm5, %v1921_v63, 0.0 }
 0x1aa   : > { %v1991_v37 = vadd.f32 %v1990_v58, %v1989_v33 }
 0x1ab   : > { %v2105_v15 = vsel %vm1924_vm5, %v2037_v27, 0.0 }
 0x1ac   : > { %v1558_v1 = vpop.f32.mrf.mxu3  ;;  %v694_v2 = vpop.f32.mrf.mxu0  ;;  %v2106_v22 = vadd.f32 %v2105_v15, %v2104_v41 }
 0x1ad   : > { %v1597_v5 = vadd.f32 %v1558_v1, %v1216_v46  ;;  %v842_v23 = vadd.f32 %v841_v11, %v694_v2 }
 0x1af   : > { %v1633_v14 = vpack.c.bf16 %v1597_v5, %v1597_v5  ;;  %v1922_v18 = vmul.f32 %v1881_v6, %v1597_v5 }
 0x1b0   : > { %v1179_v25 = vpop.f32.mrf.mxu2 }
 0x1b1   : > { %1670 = vst.msk [vmem:[%s2781_s9 + $0x88] sm:$0xf] %vm1635_vm4, %v1633_v14  ;;  %v2038_v21 = vmul.f32 %v1922_v18, %v1597_v5  ;;  %v1217_v16 = vadd.f32 %v1179_v25, %v842_v23  ;;  %v1992_v39 = vsel %vm1924_vm5, %v1922_v18, 0.0 }
 0x1b2   : > { %v1993_v10 = vadd.f32 %v1992_v39, %v1991_v37 }
 0x1b3   : > { %v2107_v31 = vsel %vm1924_vm5, %v2038_v21, 0.0 }
 0x1b4   : > { %v1560_v36 = vpop.f32.mrf.mxu3  ;;  %v2108_v44 = vadd.f32 %v2107_v31, %v2106_v22 }
 0x1b5   : > { %v1598_v40 = vadd.f32 %v1560_v36, %v1217_v16 }
 0x1b7   : > { %v1634_v13 = vpack.c.bf16 %v1598_v40, %v1598_v40  ;;  %v1923_v35 = vmul.f32 %v1886_v4, %v1598_v40 }
 0x1b9   : > { %1671 = vst.msk [vmem:[%s2781_s9 + $0x8c] sm:$0xf] %vm1635_vm4, %v1634_v13  ;;  %v1994_v34 = vsel %vm1924_vm5, %v1923_v35, 0.0  ;;  %v2039_v43 = vmul.f32 %v1923_v35, %v1598_v40 }
 0x1ba   : > { %v1995_v45 = vadd.f32 %v1994_v34, %v1993_v10 }
 0x1bb   : > { %v2109_v50 = vsel %vm1924_vm5, %v2039_v43, 0.0 }
 0x1bc   : > { %v1996_v52 = vrot.slane %v1995_v45, 4  ;;  %v2110_v9 = vadd.f32 %v2109_v50, %v2108_v44 }
 0x1be   : > { %v1997_v53 = vadd.f32 %v1996_v52, %v1995_v45  ;;  %v2111_v20 = vrot.slane %v2110_v9, 4 }
 0x1c0   : > { %v1998_v12 = vrot.slane %v1997_v53, 2  ;;  %v2112_v46 = vadd.f32 %v2111_v20, %v2110_v9 }
 0x1c2   : > { %v1999_v56 = vadd.f32 %v1998_v12, %v1997_v53  ;;  %v2113_v32 = vrot.slane %v2112_v46, 2 }
 0x1c4   : > { %v2000_v26 = vrot.slane %v1999_v56, 1  ;;  %v2114_v42 = vadd.f32 %v2113_v32, %v2112_v46 }
 0x1c6   : > { %v2001_v55 = vadd.f32 %v2000_v26, %v1999_v56  ;;  %v2115_v17 = vrot.slane %v2114_v42, 1 }
 0x1c8   : > { %2003 = vst.msk [vmem:[%s238_s28] sm:$0x1] %vm2002_vm6, %v2001_v55  ;;  %v2116_v47 = vadd.f32 %v2115_v17, %v2114_v42 }
 0x1ca   : > { %2117 = vst.msk [vmem:[%s241_s6] sm:$0x1] %vm2002_vm6, %v2116_v47 }
 0x1cb PF: > { %s16_s18 = sadd.s32 1, %s2556_s18  }
 0x1cc   : > { %p13_p4 = scmp.ge.s32.totalorder %s16_s18, 4  }
 0x1ce   :  { %15 = sbr.rel (!%p13_p4) target bundleno = 1 (0x1), region = 89 }

// kernel: tile.23
= control target key start
LH: loop header
LB: loop body
LE: loop exit
PB: predicated region body
PF: predicated region fallthrough
CT: control target
= control target key end

     0   :  { %s22_s0 = inlined_call_operand.vmem [shape: f32[10], index: 0, kind: input, shape index: {}]   ;;  %s23_s1 = inlined_call_operand.vmem [shape: f32[8,10], index: 1, kind: output, shape index: {}]  }
   0x1   :  { %v4_v0 = vld [vmem:[%s22_s0] ss:$0 sm:$0xff] }
   0x2   :  { %5 = vst [vmem:[%s23_s1] sm:$0xff] %v4_v0 }

// kernel: tile.1
= control target key start
LH: loop header
LB: loop body
LE: loop exit
PB: predicated region body
PF: predicated region fallthrough
CT: control target
= control target key end

     0   :  { %s140_s10 = smov 125   ;;  %vm3_vm0 = vcmask 7168   ;;  %s141_s11 = smov 127   ;;  %s295_s0 = inlined_call_operand.vmem [shape: f32[8,10], index: 0, kind: input, shape index: {}]   ;;  %s296_s1 = inlined_call_operand.vmem [shape: f32[80,1], index: 1, kind: output, shape index: {}]  }
   0x1   :  { %v29_v0 = vld.sshfl [vmem:[%s295_s0] sm:$0xff pattern:$0x62514703]   ;;  %s143_s18 = smov 124   ;;  %s144_s19 = smov 126  }
   0x2   :  { %v5_v1 = vld.sshfl [vmem:[%s295_s0] sm:$0xff pattern:$0x36251470]   ;;  %30 = vrot.lane.b32.xlu1 %v29_v0, %s140_s10  ;;  %s145_s20 = smov 122   ;;  %s146_s21 = smov 120  }
   0x3   :  { %6 = vrot.lane.b32.xlu0 %v5_v1, %s141_s11  ;;  %v2_v2 = vld [vmem:[%s295_s0] sm:$0xff]   ;;  %s147_s22 = smov 121   ;;  %s148_s23 = smov 119  }
   0x4   :  { %4 = vst.msk [vmem:[%s296_s1] ss:$10 sm:$0xff] %vm3_vm0, %v2_v2   ;;  %v41_v3 = vld.sshfl [vmem:[%s295_s0] sm:$0xff pattern:$0x25147036]   ;;  %s142_s0 = smov 123  }
   0x5   :  { %52 = vrot.lane.b32.xlu2 %v41_v3, %s142_s0 }
   0xa   :  { %42 = vrot.lane.b32.xlu1 %v41_v3, %s143_s18 }
   0xb   :  { %18 = vrot.lane.b32.xlu0 %v29_v0, %s144_s19 }
   0xd   :  { %62 = vrot.lane.b32.xlu2 %v41_v3, %s145_s20 }
  0x12   :  { %82 = vrot.lane.b32.xlu1 %v41_v3, %s146_s21 }
  0x13   :  { %72 = vrot.lane.b32.xlu0 %v41_v3, %s147_s22 }
  0x15   :  { %92 = vrot.lane.b32.xlu2 %v41_v3, %s148_s23 }
  0x5f   :  { %v53_v4 = vpop.permute.xlu2 %52  }
  0x60   :  { %116 = vst.msk [vmem:[%s296_s1 + $0x41] ss:$-30 sm:$0x7] %vm3_vm0, %v53_v4  }
  0x61   :  { %117 = vst.msk [vmem:[%s296_s1 + $0xa5] ss:$-30 sm:$0x38] %vm3_vm0, %v53_v4  }
  0x62   :  { %118 = vst.msk [vmem:[%s296_s1 + $0xeb] ss:$-30 sm:$0xc0] %vm3_vm0, %v53_v4  }
  0x67   :  { %v63_v5 = vpop.permute.xlu2 %62  }
  0x68   :  { %119 = vst.msk [vmem:[%s296_s1 + $0x42] ss:$-30 sm:$0x7] %vm3_vm0, %v63_v5  }
  0x69   :  { %120 = vst.msk [vmem:[%s296_s1 + $0xa6] ss:$-30 sm:$0x38] %vm3_vm0, %v63_v5  }
  0x6a   :  { %121 = vst.msk [vmem:[%s296_s1 + $0xec] ss:$-30 sm:$0xc0] %vm3_vm0, %v63_v5  }
  0x6f   :  { %v93_v6 = vpop.permute.xlu2 %92  }
  0x70   :  { %128 = vst.msk [vmem:[%s296_s1 + $0x45] ss:$-30 sm:$0x7] %vm3_vm0, %v93_v6  }
  0x71   :  { %129 = vst.msk [vmem:[%s296_s1 + $0xa9] ss:$-30 sm:$0x38] %vm3_vm0, %v93_v6  }
  0x72   :  { %130 = vst.msk [vmem:[%s296_s1 + $0xef] ss:$-30 sm:$0xc0] %vm3_vm0, %v93_v6  }
  0x74   :  { %v31_v7 = vpop.permute.xlu1 %30  }
  0x75   :  { %v7_v8 = vpop.permute.xlu0 %6   ;;  %109 = vst.msk [vmem:[%s296_s1 + $0x21] ss:$-30 sm:$0x3] %vm3_vm0, %v31_v7  }
  0x76   :  { %110 = vst.msk [vmem:[%s296_s1 + $0x85] ss:$-30 sm:$0x1c] %vm3_vm0, %v31_v7  }
  0x77   :  { %111 = vst.msk [vmem:[%s296_s1 + $0xcb] ss:$-30 sm:$0x60] %vm3_vm0, %v31_v7  }
  0x78   :  { %112 = vst.msk [vmem:[%s296_s1 + $0x38] sm:$0x80] %vm3_vm0, %v31_v7  }
  0x79   :  { %101 = vst.msk [vmem:[%s296_s1 + $0x1] ss:$70 sm:$0x3] %vm3_vm0, %v7_v8  }
  0x7a   :  { %102 = vst.msk [vmem:[%s296_s1 + $0x65] ss:$-30 sm:$0xc] %vm3_vm0, %v7_v8  }
  0x7b   :  { %103 = vst.msk [vmem:[%s296_s1 + $0xab] ss:$-30 sm:$0x30] %vm3_vm0, %v7_v8  }
  0x7c   :  { %104 = vst.msk [vmem:[%s296_s1 + $0xf1] ss:$-30 sm:$0xc0] %vm3_vm0, %v7_v8   ;;  %v43_v9 = vpop.permute.xlu1 %42  }
  0x7d   :  { %v19_v10 = vpop.permute.xlu0 %18   ;;  %113 = vst.msk [vmem:[%s296_s1 + $0x40] ss:$-30 sm:$0x7] %vm3_vm0, %v43_v9  }
  0x7e   :  { %114 = vst.msk [vmem:[%s296_s1 + $0xa4] ss:$-30 sm:$0x38] %vm3_vm0, %v43_v9  }
  0x7f   :  { %115 = vst.msk [vmem:[%s296_s1 + $0xea] ss:$-30 sm:$0xc0] %vm3_vm0, %v43_v9  }
  0x80   :  { %105 = vst.msk [vmem:[%s296_s1 + $0x20] ss:$-30 sm:$0x3] %vm3_vm0, %v19_v10  }
  0x81   :  { %106 = vst.msk [vmem:[%s296_s1 + $0x84] ss:$-30 sm:$0x1c] %vm3_vm0, %v19_v10  }
  0x82   :  { %107 = vst.msk [vmem:[%s296_s1 + $0xca] ss:$-30 sm:$0x60] %vm3_vm0, %v19_v10  }
  0x83   :  { %108 = vst.msk [vmem:[%s296_s1 + $0x37] sm:$0x80] %vm3_vm0, %v19_v10  }
  0x84   :  { %v83_v11 = vpop.permute.xlu1 %82  }
  0x85   :  { %v73_v12 = vpop.permute.xlu0 %72   ;;  %125 = vst.msk [vmem:[%s296_s1 + $0x44] ss:$-30 sm:$0x7] %vm3_vm0, %v83_v11  }
  0x86   :  { %126 = vst.msk [vmem:[%s296_s1 + $0xa8] ss:$-30 sm:$0x38] %vm3_vm0, %v83_v11  }
  0x87   :  { %127 = vst.msk [vmem:[%s296_s1 + $0xee] ss:$-30 sm:$0xc0] %vm3_vm0, %v83_v11  }
  0x88   :  { %122 = vst.msk [vmem:[%s296_s1 + $0x43] ss:$-30 sm:$0x7] %vm3_vm0, %v73_v12  }
  0x89   :  { %123 = vst.msk [vmem:[%s296_s1 + $0xa7] ss:$-30 sm:$0x38] %vm3_vm0, %v73_v12  }
  0x8a   :  { %124 = vst.msk [vmem:[%s296_s1 + $0xed] ss:$-30 sm:$0xc0] %vm3_vm0, %v73_v12  }

// kernel: netD_forward.11
= control target key start
LH: loop header
LB: loop body
LE: loop exit
PB: predicated region body
PF: predicated region fallthrough
CT: control target
= control target key end

     0   :  { %s397_s12 = smov 0   ;;  %s480_s0 = inlined_call_operand.vmem [shape: bf16[2,80,32], index: 0, kind: input, shape index: {}]   ;;  %s481_s1 = inlined_call_operand.vmem [shape: f32[1,32], index: 1, kind: input, shape index: {}]   ;;  %s482_s2 = inlined_call_operand.vmem [shape: f32[1,32], index: 2, kind: input, shape index: {}]   ;;  %s483_s3 = inlined_call_operand.vmem [shape: bf16[2,80,32], index: 3, kind: output, shape index: {}]  }
   0x1 LB: > { %s325_s13 = sadd.s32 4294967295, %s375_s12   ;;  %p329_p0 = scmp.ge.s32.totalorder %s375_s12, 1  ;;  %s375_s12 = sphi %s397_s12, %s13_s12  }
   0x2   : > { %p137_p1 = scmp.lt.s32.totalorder %s375_s12, 3 }
   0x4   : > { %p138_p2 = pnand %p329_p0, %p137_p1 }
   0x5   : > { %p161_p3 = scmp.lt.s32.totalorder (!%p138_p2), %s325_s13, 1 }
   0x6   : > { %141 = sbr.rel (%p138_p2) target bundleno = 41 (0x29), region = 32 }
   0xb   : > { %s485_s13 = smov (!%p161_p3, %s325_s13), 1  ;;  %v418_v0 = vld [vmem:[%s481_s1] ss:$0 sm:$0xff]  ;;  %vm259_vm0 = vcmask 257024  }
   0xc   : > { %s358_s14 = smul.u32 40, %s485_s13  ;;  %v426_v5 = vld [vmem:[%s482_s2] ss:$0 sm:$0xff] }
   0xe   : > { %s413_s17 = scalar_lea.vmem %s480_s0, %s358_s14  ;;  %s450_s24 = scalar_lea.vmem %s483_s3, %s358_s14 }
   0xf   : > { %v335_v1 = vld [vmem:[%s413_s17] sm:$0xff]   ;;  %v354_v2 = vld [vmem:[%s413_s17 + $0x8] sm:$0xff]   ;;  %v355_v3 = vld [vmem:[%s413_s17 + $0x10] sm:$0xff]  }
  0x10   : > { %v336_v4 = vunpack.c.l.bf16 %v335_v1  ;;  %v337_v6 = vunpack.c.h.bf16 %v335_v1  ;;  %v340_v7 = vunpack.c.l.bf16 %v354_v2  ;;  %v341_v8 = vunpack.c.h.bf16 %v354_v2  ;;  %v356_v9 = vld [vmem:[%s413_s17 + $0x18] sm:$0xff]   ;;  %v357_v41 = vld [vmem:[%s413_s17 + $0x20] sm:$0xff]  }
  0x11   : > { %v344_v10 = vunpack.c.l.bf16 %v355_v3  ;;  %v345_v11 = vunpack.c.h.bf16 %v355_v3  ;;  %v348_v12 = vunpack.c.l.bf16 %v356_v9  ;;  %v349_v13 = vunpack.c.h.bf16 %v356_v9 }
  0x12   : > { %v195_v14 = vmul.f32 %v418_v0, %v336_v4  ;;  %v196_v15 = vmul.f32 %v418_v0, %v337_v6  ;;  %v197_v16 = vmul.f32 %v418_v0, %v340_v7  ;;  %v198_v17 = vmul.f32 %v418_v0, %v341_v8 }
  0x13   : > { %v199_v18 = vmul.f32 %v418_v0, %v344_v10  ;;  %v200_v19 = vmul.f32 %v418_v0, %v345_v11  ;;  %v201_v20 = vmul.f32 %v418_v0, %v348_v12  ;;  %v202_v21 = vmul.f32 %v418_v0, %v349_v13 }
  0x14   : > { %v209_v22 = vadd.f32 %v426_v5, %v195_v14  ;;  %v210_v23 = vadd.f32 %v426_v5, %v196_v15  ;;  %v211_v24 = vadd.f32 %v426_v5, %v197_v16  ;;  %v212_v25 = vadd.f32 %v426_v5, %v198_v17 }
  0x15   : > { %v213_v26 = vadd.f32 %v426_v5, %v199_v18  ;;  %v214_v27 = vadd.f32 %v426_v5, %v200_v19  ;;  %v215_v28 = vadd.f32 %v426_v5, %v201_v20  ;;  %v216_v29 = vadd.f32 %v426_v5, %v202_v21 }
  0x16   : > { %vm219_vm1 = vcmp.gt.f32.partialorder %v209_v22, 0.0  ;;  %v229_v30 = vmul.f32 0.2, %v209_v22  ;;  %vm220_vm2 = vcmp.gt.f32.partialorder %v210_v23, 0.0  ;;  %v230_v31 = vmul.f32 0.2, %v210_v23 }
  0x17   : > { %vm221_vm3 = vcmp.gt.f32.partialorder %v211_v24, 0.0  ;;  %v231_v32 = vmul.f32 0.2, %v211_v24  ;;  %vm222_vm4 = vcmp.gt.f32.partialorder %v212_v25, 0.0  ;;  %v232_v33 = vmul.f32 0.2, %v212_v25 }
  0x18   : > { %v239_v34 = vsel %vm219_vm1, %v209_v22, %v229_v30  ;;  %v240_v35 = vsel %vm220_vm2, %v210_v23, %v230_v31  ;;  %vm223_vm5 = vcmp.gt.f32.partialorder %v213_v26, 0.0  ;;  %v233_v36 = vmul.f32 0.2, %v213_v26 }
  0x19   : > { %v249_v37 = vpack.c.bf16 %v239_v34, %v239_v34  ;;  %v250_v38 = vpack.c.bf16 %v240_v35, %v240_v35  ;;  %v241_v39 = vsel %vm221_vm3, %v211_v24, %v231_v32  ;;  %v242_v40 = vsel %vm222_vm4, %v212_v25, %v232_v33 }
  0x1a   : > { %v251_v42 = vpack.c.bf16 %v241_v39, %v241_v39  ;;  %v252_v43 = vpack.c.bf16 %v242_v40, %v242_v40  ;;  %v243_v44 = vsel %vm223_vm5, %v213_v26, %v233_v36  ;;  %vm224_vm6 = vcmp.gt.f32.partialorder %v214_v27, 0.0 }
  0x1b   : > { %260 = vst.msk [vmem:[%s450_s24] sm:$0xf] %vm259_vm0, %v249_v37  ;;  %v253_v45 = vpack.c.bf16 %v243_v44, %v243_v44  ;;  %v234_v46 = vmul.f32 0.2, %v214_v27  ;;  %vm225_vm7 = vcmp.gt.f32.partialorder %v215_v28, 0.0  ;;  %vm226_vm8 = vcmp.gt.f32.partialorder %v216_v29, 0.0 }
  0x1c   : > { %261 = vst.msk [vmem:[%s450_s24 + $0x4] sm:$0xf] %vm259_vm0, %v250_v38  ;;  %v235_v47 = vmul.f32 0.2, %v215_v28  ;;  %v236_v48 = vmul.f32 0.2, %v216_v29  ;;  %v352_v49 = vunpack.c.l.bf16 %v357_v41  ;;  %v353_v50 = vunpack.c.h.bf16 %v357_v41 }
  0x1d   : > { %262 = vst.msk [vmem:[%s450_s24 + $0x8] sm:$0xf] %vm259_vm0, %v251_v42  ;;  %v244_v51 = vsel %vm224_vm6, %v214_v27, %v234_v46 }
  0x1e   : > { %263 = vst.msk [vmem:[%s450_s24 + $0xc] sm:$0xf] %vm259_vm0, %v252_v43  ;;  %v254_v52 = vpack.c.bf16 %v244_v51, %v244_v51  ;;  %v245_v53 = vsel %vm225_vm7, %v215_v28, %v235_v47  ;;  %v246_v54 = vsel %vm226_vm8, %v216_v29, %v236_v48  ;;  %v203_v55 = vmul.f32 %v418_v0, %v352_v49 }
  0x1f   : > { %264 = vst.msk [vmem:[%s450_s24 + $0x10] sm:$0xf] %vm259_vm0, %v253_v45  ;;  %v255_v56 = vpack.c.bf16 %v245_v53, %v245_v53  ;;  %v256_v57 = vpack.c.bf16 %v246_v54, %v246_v54  ;;  %v204_v58 = vmul.f32 %v418_v0, %v353_v50 }
  0x20   : > { %265 = vst.msk [vmem:[%s450_s24 + $0x14] sm:$0xf] %vm259_vm0, %v254_v52  ;;  %v217_v59 = vadd.f32 %v426_v5, %v203_v55 }
  0x21   : > { %266 = vst.msk [vmem:[%s450_s24 + $0x18] sm:$0xf] %vm259_vm0, %v255_v56  ;;  %v218_v60 = vadd.f32 %v426_v5, %v204_v58 }
  0x22   : > { %267 = vst.msk [vmem:[%s450_s24 + $0x1c] sm:$0xf] %vm259_vm0, %v256_v57  ;;  %vm227_vm9 = vcmp.gt.f32.partialorder %v217_v59, 0.0  ;;  %v237_v61 = vmul.f32 0.2, %v217_v59 }
  0x23   : > { %vm228_vm10 = vcmp.gt.f32.partialorder %v218_v60, 0.0  ;;  %v238_v62 = vmul.f32 0.2, %v218_v60 }
  0x24   : > { %v247_v63 = vsel %vm227_vm9, %v217_v59, %v237_v61 }
  0x25   : > { %v257_v1 = vpack.c.bf16 %v247_v63, %v247_v63  ;;  %v248_v2 = vsel %vm228_vm10, %v218_v60, %v238_v62 }
  0x26   : > { %v258_v3 = vpack.c.bf16 %v248_v2, %v248_v2 }
  0x27   : > { %268 = vst.msk [vmem:[%s450_s24 + $0x20] sm:$0xf] %vm259_vm0, %v257_v1 }
  0x28   : > { %269 = vst.msk [vmem:[%s450_s24 + $0x24] sm:$0xf] %vm259_vm0, %v258_v3 }
  0x29 PF: > { %s13_s12 = sadd.s32 1, %s375_s12  }
  0x2a   : > { %p10_p4 = scmp.ge.s32.totalorder %s13_s12, 4  }
  0x2c   :  { %12 = sbr.rel (!%p10_p4) target bundleno = 1 (0x1), region = 62 }

// kernel: netD_forward.10
= control target key start
LH: loop header
LB: loop body
LE: loop exit
PB: predicated region body
PF: predicated region fallthrough
CT: control target
= control target key end

     0   :  { %s1275_s18 = smov 0   ;;  %s1497_s0 = inlined_call_operand.vmem [shape: bf16[2,100,64], index: 0, kind: input, shape index: {}]   ;;  %s1498_s1 = inlined_call_operand.vmem [shape: bf16[4,64,32], index: 1, kind: input, shape index: {}]   ;;  %s1499_s2 = inlined_call_operand.vmem [shape: f32[80,1], index: 2, kind: input, shape index: {}]   ;;  %s1500_s3 = inlined_call_operand.vmem [shape: bf16[2,80,32], index: 3, kind: output, shape index: {0}]   ;;  %s1501_s4 = inlined_call_operand.vmem [shape: f32[2,1,32], index: 4, kind: output, shape index: {1}]   ;;  %s1502_s5 = inlined_call_operand.vmem [shape: f32[2,1,32], index: 5, kind: output, shape index: {2}]  }
   0x1 LB: > { %s1039_s19 = sadd.s32 4294967295, %s1242_s18   ;;  %p1043_p0 = scmp.ge.s32.totalorder %s1242_s18, 1  ;;  %s1242_s18 = sphi %s1275_s18, %s16_s18  }
   0x2   : > { %p192_p1 = scmp.lt.s32.totalorder %s1242_s18, 3 }
   0x4   : > { %p193_p2 = pnand %p1043_p0, %p192_p1 }
   0x5   : > { %p226_p3 = scmp.lt.s32.totalorder (!%p193_p2), %s1039_s19, 1 }
   0x6   : > { %196 = sbr.rel (%p193_p2) target bundleno = 257 (0x101), region = 32 }
   0xb   : > { %v1208_v0 = vld [vmem:[%s1498_s1 + $0x38] sm:$0xff]  ;;  %v1207_v4 = vld [vmem:[%s1498_s1 + $0x30] sm:$0xff]  ;;  %s1504_s19 = smov (!%p226_p3, %s1039_s19), 1  ;;  %v1244_v8 = vmov 0   ;;  %v1206_v9 = vld [vmem:[%s1498_s1 + $0x28] sm:$0xff]  ;;  %vm534_vm1 = vcmask 1046528  }
   0xc   : > { %v1204_v1 = vld [vmem:[%s1498_s1 + $0x18] sm:$0xff]  ;;  %388 = vmatpush.bf16.msra.mxu0 %v1208_v0  ;;  %v1203_v5 = vld [vmem:[%s1498_s1 + $0x10] sm:$0xff]  ;;  %s1222_s11 = smul.u32 52, %s1504_s19  ;;  %1233 = vset.pattern.permute.xlu0 %v1244_v8  ;;  %v800_v10 = vld [vmem:[%s1499_s2] sm:$0xff]  ;;  %vm299_vm0 = vsmask.f32 7424  ;;  %s241_s14 = scalar_lea.vmem %s1502_s5, %s1504_s19 }
   0xd   : > { %v1217_v2 = vld [vmem:[%s1498_s1 + $0x58] sm:$0xff]  ;;  %456 = vmatpush.bf16.msra.mxu1 %v1204_v1  ;;  %v1216_v6 = vld [vmem:[%s1498_s1 + $0x50] sm:$0xff]  ;;  %1234 = vset.pattern.permute.xlu1 %v1244_v8  ;;  %v1202_v11 = vld [vmem:[%s1498_s1 + $0x8] sm:$0xff]  ;;  %vm368_vm2 = vcmask 523264   ;;  %vm642_vm3 = vsmask.f32 6400 }
   0xe   : > { %v1221_v3 = vld [vmem:[%s1498_s1 + $0x78] sm:$0xff]  ;;  %589 = vmatpush.bf16.msra.mxu2 %v1217_v2  ;;  %v1220_v7 = vld [vmem:[%s1498_s1 + $0x70] sm:$0xff]  ;;  %1235 = vset.pattern.permute.xlu2 %v1244_v8  ;;  %v1215_v12 = vld [vmem:[%s1498_s1 + $0x48] sm:$0xff]  ;;  %s1328_s26 = scalar_lea.vmem %s1497_s0, %s1222_s11  ;;  %s1223_s30 = smul.u32 40, %s1504_s19  ;;  %vm789_vm4 = vcmask 257024   ;;  %vm870_vm5 = vcmask 261120  }
   0xf   : > { %739 = vmatpush.bf16.msra.mxu3 %v1221_v3  ;;  %v1219_v13 = vld [vmem:[%s1498_s1 + $0x68] sm:$0xff]  ;;  %v1196_v14 = vld [vmem:[%s1328_s26] sm:$0xff]  ;;  %812 = vperm.xlu0 %1233, %v800_v10   ;;  %v1211_v45 = vld [vmem:[%s1328_s26 + $0x14] sm:$0xff]  ;;  %s238_s11 = scalar_lea.vmem %s1501_s4, %s1504_s19  ;;  %vm896_vm6 = vcmask 253952  }
  0x10   : > { %389 = vmatpush.bf16.msra.mxu0 %v1207_v4  ;;  %v1332_v15 = vld [vmem:[%s1328_s26 + $0x8] sm:$0xff]  ;;  %v1126_v16 = vld [vmem:[%s1328_s26 + $0x4] sm:$0xe]  ;;  %v301_v19 = vshrl.u32 %v1196_v14, 16  ;;  %v303_v20 = vshll.u32 %v1196_v14, 16  ;;  %v1198_v47 = vld [vmem:[%s1328_s26 + $0x10] sm:$0xff]  ;;  %s1434_s8 = scalar_lea.vmem %s1500_s3, %s1223_s30 }
  0x11   : > { %457 = vmatpush.bf16.msra.mxu1 %v1203_v5  ;;  %v1209_v17 = vld [vmem:[%s1328_s26 + $0x4] sm:$0xf0]  ;;  %v1337_v18 = vld [vmem:[%s1328_s26 + $0xc] sm:$0xff]  ;;  %v308_v21 = vshll.u32 %v1332_v15, 16  ;;  %v1205_v23 = vld [vmem:[%s1498_s1 + $0x20] sm:$0xff]  ;;  %v661_v49 = vshrl.u32 %v1211_v45, 16 }
  0x12   : > { %590 = vmatpush.bf16.msra.mxu2 %v1216_v6  ;;  %v1127_v22 = vor.u32 %v1209_v17, %v1126_v16  ;;  %v1201_v24 = vld [vmem:[%s1498_s1] sm:$0xff]  ;;  %v536_v25 = vrot.slane %v1337_v18, 1  ;;  %v652_v26 = vshrl.u32 %v1337_v18, 16  ;;  %v655_v27 = vshll.u32 %v1337_v18, 16  ;;  %v801_v39 = vld [vmem:[%s1499_s2 + $0x8] sm:$0xff]  ;;  %v802_v48 = vld [vmem:[%s1499_s2 + $0x10] sm:$0xff] }
  0x13   : > { %740 = vmatpush.bf16.msra.mxu3 %v1220_v7  ;;  %v1214_v28 = vld [vmem:[%s1498_s1 + $0x40] sm:$0xff]  ;;  %v305_v30 = vrot.slane %v303_v20, 1  ;;  %v310_v31 = vrot.slane %v308_v21, 1  ;;  %v664_v50 = vshll.u32 %v1211_v45, 16  ;;  %822 = vperm.xlu1 %1234, %v802_v48   ;;  %v312_v51 = vshrl.u32 %v1332_v15, 16  ;;  %v803_v55 = vld [vmem:[%s1499_s2 + $0x18] sm:$0xff] }
  0x14   : > { %390 = vmatpush.bf16.msra.mxu0 %v1206_v9  ;;  %v1218_v29 = vld [vmem:[%s1498_s1 + $0x60] sm:$0xff]  ;;  %v535_v32 = vrot.slane %v1127_v22, 1  ;;  %v644_v33 = vshrl.u32 %v1127_v22, 16  ;;  %v647_v34 = vshll.u32 %v1127_v22, 16  ;;  %v654_v35 = vrot.slane %v652_v26, 1  ;;  %v1199_v0 = vld [vmem:[%s1328_s26 + $0x18] sm:$0xff] }
  0x15   : > { %458 = vmatpush.bf16.msra.mxu1 %v1202_v11  ;;  %v657_v36 = vrot.slane %v655_v27, 2  ;;  %v306_v37 = vor.u32 %v305_v30, %v301_v19  ;;  %v316_v52 = vshll.u32 %v1198_v47, 16  ;;  %v663_v53 = vrot.slane %v661_v49, 1  ;;  %v1212_v63 = vld [vmem:[%s1328_s26 + $0x1c] sm:$0xff]  ;;  %v806_v1 = vld [vmem:[%s1499_s2 + $0x30] sm:$0xff] }
  0x16   : > { %591 = vmatpush.bf16.msra.mxu2 %v1215_v12  ;;  %v646_v38 = vrot.slane %v644_v33, 1  ;;  %v649_v40 = vrot.slane %v647_v34, 2  ;;  %v537_v43 = vsel %vm534_vm1, %v535_v32, %v536_v25  ;;  %v666_v54 = vrot.slane %v664_v50, 2  ;;  %v496_v11 = vld [vmem:[%s1328_s26 + $0x2c] sm:$0x1]  ;;  %v1200_v21 = vld [vmem:[%s1328_s26 + $0x20] sm:$0xff] }
  0x17   : > { %741 = vmatpush.bf16.msra.mxu3 %v1219_v13  ;;  %v658_v41 = vor.u32 %v657_v36, %v654_v35  ;;  %v311_v42 = vsel %vm299_vm0, %v306_v37, %v310_v31  ;;  %817 = vperm.xlu0 %1233, %v801_v39   ;;  %v314_v56 = vor.u32 %v312_v51, %v310_v31  ;;  %v318_v57 = vrot.slane %v316_v52, 1  ;;  %v629_v32 = vld [vmem:[%s1328_s26 + $0x2c] sm:$0x3]  ;;  %v261_v36 = vld [vmem:[%s1328_s26 + $0x28] sm:$0x1] }
  0x18   : > { %391 = vmatpush.bf16.msra.mxu0 %v1205_v23  ;;  %v650_v44 = vor.u32 %v649_v40, %v646_v38  ;;  %v538_v58 = vrot.slane %v1211_v45, 1  ;;  %v667_v59 = vor.u32 %v666_v54, %v663_v53  ;;  %v670_v2 = vshrl.u32 %v1212_v63, 16  ;;  %v809_v23 = vld [vmem:[%s1499_s2 + $0x48] sm:$0xff]  ;;  %v808_v45 = vld [vmem:[%s1499_s2 + $0x40] sm:$0xff] }
  0x19   : > { %459 = vmatpush.bf16.msra.mxu1 %v1201_v24  ;;  %v319_v60 = vsel %vm299_vm0, %v314_v56, %v318_v57  ;;  %v673_v3 = vshll.u32 %v1212_v63, 16  ;;  %v320_v4 = vshrl.u32 %v1198_v47, 16  ;;  %v324_v5 = vshll.u32 %v1199_v0, 16  ;;  %v807_v24 = vld [vmem:[%s1499_s2 + $0x38] sm:$0xff]  ;;  %v805_v35 = vld [vmem:[%s1499_s2 + $0x28] sm:$0xff] }
  0x1a   : > { %592 = vmatpush.bf16.msra.mxu2 %v1214_v28  ;;  %v659_v46 = vsel %vm642_vm3, %v650_v44, %v658_v41  ;;  %v539_v61 = vsel %vm534_vm1, %v536_v25, %v538_v58  ;;  %v668_v62 = vsel %vm642_vm3, %v658_v41, %v667_v59  ;;  %v672_v6 = vrot.slane %v670_v2, 1  ;;  %v804_v25 = vld [vmem:[%s1499_s2 + $0x20] sm:$0xff] }
  0x1b   : > { %742 = vmatpush.bf16.msra.mxu3 %v1218_v29  ;;  %1090 = vmatmul.msk.bf16.vlgmr.msra.gmra.mxu0 %vm368_vm2, %v311_v42  ;;  %v675_v7 = vrot.slane %v673_v3, 2  ;;  %v322_v8 = vor.u32 %v320_v4, %v318_v57  ;;  %v326_v9 = vrot.slane %v324_v5, 1  ;;  %v540_v10 = vrot.slane %v1212_v63, 1 }
  0x1c   : > { %1111 = vmatmul.msk.bf16.vlgmr.msra.gmra.mxu1 %vm368_vm2, %v1196_v14  ;;  %827 = vperm.xlu1 %1234, %v803_v55   ;;  %v527_v13 = vunpack.c.l.b16 %v496_v11  ;;  %v328_v28 = vshrl.u32 %v1199_v0, 16  ;;  %v332_v29 = vshll.u32 %v1200_v21, 16  ;;  %v640_v38 = vunpack.c.l.b16 %v629_v32 }
  0x1d   : > { %1160 = vmatmul.msk.bf16.vlgmr.msra.gmra.mxu2 %vm368_vm2, %v537_v43  ;;  %v676_v12 = vor.u32 %v675_v7, %v672_v6  ;;  %v327_v14 = vsel %vm299_vm0, %v322_v8, %v326_v9  ;;  %v541_v17 = vsel %vm534_vm1, %v538_v58, %v540_v10  ;;  %832 = vperm.xlu2 %1235, %v804_v25   ;;  %v292_v40 = vunpack.c.l.b16 %v261_v36 }
  0x1e   : > { %1189 = vmatmul.msk.bf16.vlgmr.msra.gmra.mxu3 %vm368_vm2, %v659_v46  ;;  %v533_v16 = vpack.c.b16 %v527_v13, %v527_v13  ;;  %v330_v33 = vor.u32 %v328_v28, %v326_v9  ;;  %v334_v34 = vrot.slane %v332_v29, 1  ;;  %v641_v43 = vpack.c.b16 %v640_v38, %v640_v38 }
  0x1f   : > { %842 = vperm.xlu0 %1233, %v806_v1   ;;  %v677_v18 = vsel %vm642_vm3, %v667_v59, %v676_v12  ;;  %v298_v44 = vpack.c.b16 %v292_v40, %v292_v40  ;;  %v336_v48 = vshrl.u32 %v1200_v21, 16 }
  0x20   : > { %v544_v20 = vrot.slane %v533_v16, 1  ;;  %v335_v39 = vsel %vm299_vm0, %v330_v33, %v334_v34  ;;  %v688_v46 = vshrl.u32 %v641_v43, 16 }
  0x21   : > { %v340_v49 = vshll.u32 %v298_v44, 16  ;;  %v338_v52 = vor.u32 %v336_v48, %v334_v34 }
  0x22   : > { %v690_v50 = vrot.slane %v688_v46, 1 }
  0x23   : > { %v342_v53 = vrot.slane %v340_v49, 1 }
  0x24   : > { %847 = vperm.xlu1 %1234, %v807_v24  }
  0x25   : > { %837 = vperm.xlu2 %1235, %v805_v35   ;;  %v343_v55 = vsel %vm299_vm0, %v338_v52, %v342_v53 }
  0x27   : > { %857 = vperm.xlu0 %1233, %v809_v23  }
  0x2b   : > { %1091 = vmatmul.msk.bf16.gmra.mxu0 %vm368_vm2, %v319_v60 }
  0x2c   : > { %1112 = vmatmul.msk.bf16.gmra.mxu1 %vm368_vm2, %v1332_v15  ;;  %v1213_v15 = vld [vmem:[%s1328_s26 + $0x24] sm:$0xff] }
  0x2d   : > { %1161 = vmatmul.msk.bf16.gmra.mxu2 %vm368_vm2, %v539_v61  ;;  %v542_v19 = vrot.slane %v1213_v15, 1  ;;  %v679_v26 = vshrl.u32 %v1213_v15, 16  ;;  %v682_v27 = vshll.u32 %v1213_v15, 16  ;;  %852 = vperm.xlu2 %1235, %v808_v45  }
  0x2e   : > { %1190 = vmatmul.msk.bf16.gmra.mxu3 %vm368_vm2, %v668_v62 }
  0x2f   : > { %v545_v22 = vsel %vm534_vm1, %v542_v19, %v544_v20  ;;  %v681_v30 = vrot.slane %v679_v26, 1  ;;  %v684_v31 = vrot.slane %v682_v27, 2  ;;  %v543_v41 = vsel %vm534_vm1, %v540_v10, %v542_v19 }
  0x31   : > { %v685_v37 = vor.u32 %v684_v31, %v681_v30 }
  0x33   : > { %v686_v42 = vsel %vm642_vm3, %v676_v12, %v685_v37 }
  0x3b   : > { %1092 = vmatmul.msk.bf16.gmra.mxu0 %vm368_vm2, %v327_v14 }
  0x3c   : > { %1113 = vmatmul.msk.bf16.gmra.mxu1 %vm368_vm2, %v1198_v47  ;;  %v691_v47 = vshll.u32 %v641_v43, 16 }
  0x3d   : > { %1162 = vmatmul.msk.bf16.gmra.mxu2 %vm368_vm2, %v541_v17 }
  0x3e   : > { %1191 = vmatmul.msk.bf16.gmra.mxu3 %vm368_vm2, %v677_v18  ;;  %v693_v51 = vrot.slane %v691_v47, 2 }
  0x40   : > { %v694_v54 = vor.u32 %v693_v51, %v690_v50 }
  0x42   : > { %v695_v56 = vsel %vm642_vm3, %v685_v37, %v694_v54 }
  0x4b   : > { %1093 = vmatmul.msk.bf16.gmra.mxu0 %vm368_vm2, %v335_v39 }
  0x4c   : > { %1114 = vmatmul.msk.bf16.gmra.mxu1 %vm368_vm2, %v1199_v0 }
  0x4d   : > { %1163 = vmatmul.msk.bf16.gmra.mxu2 %vm368_vm2, %v543_v41 }
  0x4e   : > { %1192 = vmatmul.msk.bf16.gmra.mxu3 %vm368_vm2, %v686_v42 }
  0x5b   : > { %1094 = vmatmul.msk.bf16.gmra.mxu0 %vm368_vm2, %v343_v55 }
  0x5c   : > { %1115 = vmatmul.msk.bf16.gmra.mxu1 %vm368_vm2, %v1200_v21 }
  0x5d   : > { %1164 = vmatmul.msk.bf16.gmra.mxu2 %vm368_vm2, %v545_v22 }
  0x5e   : > { %1193 = vmatmul.msk.bf16.gmra.mxu3 %vm368_vm2, %v695_v56 }
  0x77   : > { %v833_v46 = vpop.permute.xlu2 %832 }
  0x81   : > { %v813_v40 = vpop.permute.xlu0 %812 }
  0x85   : > { %v823_v43 = vpop.permute.xlu1 %822 }
  0x89   : > { %v818_v53 = vpop.permute.xlu0 %817 }
  0x8e   : > { %v828_v56 = vpop.permute.xlu1 %827 }
  0x98   : > { %v393_v57 = vpop.f32.mrf.mxu0 }
  0x99   : > { %v461_v58 = vpop.f32.mrf.mxu1 }
  0x9a   : > { %v462_v59 = vadd.f32 %v461_v58, %v393_v57 }
  0xa0   : > { %v594_v60 = vpop.f32.mrf.mxu2  ;;  %v395_v63 = vpop.f32.mrf.mxu0 }
  0xa1   : > { %v619_v61 = vadd.f32 %v594_v60, %v462_v59  ;;  %v744_v62 = vpop.f32.mrf.mxu3  ;;  %v463_v0 = vpop.f32.mrf.mxu1 }
  0xa2   : > { %v464_v3 = vadd.f32 %v463_v0, %v395_v63 }
  0xa3   : > { %v1429_v1 = vadd.f32 %v744_v62, %v619_v61 }
  0xa5   : > { %v779_v2 = vpack.c.bf16 %v1429_v1, %v1429_v1  ;;  %v860_v58 = vmul.f32 %v813_v40, %v1429_v1 }
  0xa7   : > { %790 = vst.msk [vmem:[%s1434_s8] sm:$0xf] %vm789_vm4, %v779_v2 }
  0xa8   : > { %v596_v4 = vpop.f32.mrf.mxu2  ;;  %v398_v7 = vpop.f32.mrf.mxu0 }
  0xa9   : > { %v620_v5 = vadd.f32 %v596_v4, %v464_v3  ;;  %v746_v6 = vpop.f32.mrf.mxu3  ;;  %v466_v8 = vpop.f32.mrf.mxu1 }
  0xaa   : > { %v467_v11 = vadd.f32 %v466_v8, %v398_v7  ;;  %v838_v4 = vpop.permute.xlu2 %837 }
  0xab   : > { %v1440_v9 = vadd.f32 %v746_v6, %v620_v5  ;;  %v898_v6 = vmul.f32 %v860_v58, %v1429_v1 }
  0xad   : > { %v780_v10 = vpack.c.bf16 %v1440_v9, %v1440_v9  ;;  %v861_v55 = vmul.f32 %v818_v53, %v1440_v9 }
  0xaf   : > { %791 = vst.msk [vmem:[%s1434_s8 + $0x4] sm:$0xf] %vm789_vm4, %v780_v10  ;;  %v899_v3 = vmul.f32 %v861_v55, %v1440_v9  ;;  %v872_v8 = vsel %vm870_vm5, %v861_v55, 0.0  ;;  %v908_v9 = vsel %vm870_vm5, %v898_v6, 0.0 }
  0xb0   : > { %v599_v12 = vpop.f32.mrf.mxu2  ;;  %v400_v15 = vpop.f32.mrf.mxu0 }
  0xb1   : > { %v621_v13 = vadd.f32 %v599_v12, %v467_v11  ;;  %v749_v14 = vpop.f32.mrf.mxu3  ;;  %v468_v16 = vpop.f32.mrf.mxu1 }
  0xb2   : > { %v469_v19 = vadd.f32 %v468_v16, %v400_v15  ;;  %v909_v15 = vsel %vm870_vm5, %v899_v3, 0.0 }
  0xb3   : > { %v771_v17 = vadd.f32 %v749_v14, %v621_v13  ;;  %v871_v14 = vsel %vm870_vm5, %v860_v58, 0.0 }
  0xb5   : > { %v781_v18 = vpack.c.bf16 %v771_v17, %v771_v17  ;;  %v862_v60 = vmul.f32 %v823_v43, %v771_v17 }
  0xb7   : > { %792 = vst.msk [vmem:[%s1434_s8 + $0x8] sm:$0xf] %vm789_vm4, %v781_v18  ;;  %v900_v10 = vmul.f32 %v862_v60, %v771_v17  ;;  %v874_v16 = vsel %vm870_vm5, %v862_v60, 0.0 }
  0xb8   : > { %v601_v20 = vpop.f32.mrf.mxu2  ;;  %v403_v23 = vpop.f32.mrf.mxu0 }
  0xb9   : > { %v622_v21 = vadd.f32 %v601_v20, %v469_v19  ;;  %v751_v22 = vpop.f32.mrf.mxu3  ;;  %v471_v24 = vpop.f32.mrf.mxu1  ;;  %v873_v19 = vadd.f32 %v872_v8, %v871_v14  ;;  %v911_v17 = vsel %vm870_vm5, %v900_v10, 0.0 }
  0xba   : > { %v472_v27 = vadd.f32 %v471_v24, %v403_v23  ;;  %v843_v20 = vpop.permute.xlu0 %842 }
  0xbb   : > { %v772_v25 = vadd.f32 %v751_v22, %v622_v21 }
  0xbd   : > { %v782_v26 = vpack.c.bf16 %v772_v25, %v772_v25  ;;  %v863_v63 = vmul.f32 %v828_v56, %v772_v25 }
  0xbf   : > { %793 = vst.msk [vmem:[%s1434_s8 + $0xc] sm:$0xf] %vm789_vm4, %v782_v26  ;;  %v901_v13 = vmul.f32 %v863_v63, %v772_v25  ;;  %v876_v22 = vsel %vm870_vm5, %v863_v63, 0.0  ;;  %v910_v26 = vadd.f32 %v909_v15, %v908_v9 }
  0xc0   : > { %v604_v28 = vpop.f32.mrf.mxu2  ;;  %v405_v31 = vpop.f32.mrf.mxu0 }
  0xc1   : > { %v623_v29 = vadd.f32 %v604_v28, %v472_v27  ;;  %v754_v30 = vpop.f32.mrf.mxu3  ;;  %v473_v32 = vpop.f32.mrf.mxu1  ;;  %v875_v27 = vadd.f32 %v874_v16, %v873_v19  ;;  %v913_v28 = vsel %vm870_vm5, %v901_v13, 0.0 }
  0xc2   : > { %v474_v35 = vadd.f32 %v473_v32, %v405_v31 }
  0xc3   : > { %v773_v33 = vadd.f32 %v754_v30, %v623_v29  ;;  %v848_v29 = vpop.permute.xlu1 %847 }
  0xc5   : > { %v783_v34 = vpack.c.bf16 %v773_v33, %v773_v33  ;;  %v864_v7 = vmul.f32 %v833_v46, %v773_v33 }
  0xc7   : > { %794 = vst.msk [vmem:[%s1434_s8 + $0x10] sm:$0xf] %vm789_vm4, %v783_v34  ;;  %v902_v1 = vmul.f32 %v864_v7, %v773_v33  ;;  %v878_v30 = vsel %vm870_vm5, %v864_v7, 0.0  ;;  %v853_v34 = vpop.permute.xlu2 %852 }
  0xc8   : > { %v606_v36 = vpop.f32.mrf.mxu2  ;;  %v408_v39 = vpop.f32.mrf.mxu0 }
  0xc9   : > { %v624_v37 = vadd.f32 %v606_v36, %v474_v35  ;;  %v756_v38 = vpop.f32.mrf.mxu3  ;;  %v476_v41 = vpop.f32.mrf.mxu1  ;;  %v912_v35 = vadd.f32 %v911_v17, %v910_v26  ;;  %v877_v36 = vadd.f32 %v876_v22, %v875_v27 }
  0xca   : > { %v477_v45 = vadd.f32 %v476_v41, %v408_v39 }
  0xcb   : > { %v774_v42 = vadd.f32 %v756_v38, %v624_v37  ;;  %v915_v37 = vsel %vm870_vm5, %v902_v1, 0.0  ;;  %v879_v46 = vadd.f32 %v878_v30, %v877_v36 }
  0xcd   : > { %v784_v44 = vpack.c.bf16 %v774_v42, %v774_v42  ;;  %v865_v18 = vmul.f32 %v838_v4, %v774_v42 }
  0xcf   : > { %795 = vst.msk [vmem:[%s1434_s8 + $0x14] sm:$0xf] %vm789_vm4, %v784_v44  ;;  %v903_v31 = vmul.f32 %v865_v18, %v774_v42  ;;  %v880_v40 = vsel %vm870_vm5, %v865_v18, 0.0 }
  0xd0   : > { %v609_v47 = vpop.f32.mrf.mxu2  ;;  %v410_v50 = vpop.f32.mrf.mxu0 }
  0xd1   : > { %v625_v48 = vadd.f32 %v609_v47, %v477_v45  ;;  %v759_v49 = vpop.f32.mrf.mxu3  ;;  %v478_v51 = vpop.f32.mrf.mxu1  ;;  %v914_v45 = vadd.f32 %v913_v28, %v912_v35  ;;  %v917_v47 = vsel %vm870_vm5, %v903_v31, 0.0 }
  0xd2   : > { %v479_v57 = vadd.f32 %v478_v51, %v410_v50  ;;  %v881_v51 = vadd.f32 %v880_v40, %v879_v46 }
  0xd3   : > { %v775_v52 = vadd.f32 %v759_v49, %v625_v48  ;;  %v916_v50 = vadd.f32 %v915_v37, %v914_v45 }
  0xd5   : > { %v785_v54 = vpack.c.bf16 %v775_v52, %v775_v52  ;;  %v866_v23 = vmul.f32 %v843_v20, %v775_v52 }
  0xd7   : > { %796 = vst.msk [vmem:[%s1434_s8 + $0x18] sm:$0xf] %vm789_vm4, %v785_v54  ;;  %v904_v41 = vmul.f32 %v866_v23, %v775_v52  ;;  %v882_v42 = vsel %vm870_vm5, %v866_v23, 0.0 }
  0xd8   : > { %v611_v59 = vpop.f32.mrf.mxu2  ;;  %v413_v0 = vpop.f32.mrf.mxu0  ;;  %v883_v58 = vadd.f32 %v882_v42, %v881_v51 }
  0xd9   : > { %v626_v61 = vadd.f32 %v611_v59, %v479_v57  ;;  %v761_v62 = vpop.f32.mrf.mxu3  ;;  %v481_v2 = vpop.f32.mrf.mxu1  ;;  %v919_v54 = vsel %vm870_vm5, %v904_v41, 0.0  ;;  %v918_v57 = vadd.f32 %v917_v47, %v916_v50 }
  0xda   : > { %v482_v12 = vadd.f32 %v481_v2, %v413_v0  ;;  %v858_v0 = vpop.permute.xlu0 %857 }
  0xdb   : > { %v776_v5 = vadd.f32 %v761_v62, %v626_v61  ;;  %v920_v63 = vadd.f32 %v919_v54, %v918_v57 }
  0xdd   : > { %v786_v11 = vpack.c.bf16 %v776_v5, %v776_v5  ;;  %v867_v32 = vmul.f32 %v848_v29, %v776_v5 }
  0xdf   : > { %797 = vst.msk [vmem:[%s1434_s8 + $0x1c] sm:$0xf] %vm789_vm4, %v786_v11  ;;  %v905_v48 = vmul.f32 %v867_v32, %v776_v5  ;;  %v884_v55 = vsel %vm870_vm5, %v867_v32, 0.0 }
  0xe0   : > { %v614_v21 = vpop.f32.mrf.mxu2  ;;  %v415_v38 = vpop.f32.mrf.mxu0  ;;  %v885_v2 = vadd.f32 %v884_v55, %v883_v58 }
  0xe1   : > { %v627_v24 = vadd.f32 %v614_v21, %v482_v12  ;;  %v764_v25 = vpop.f32.mrf.mxu3  ;;  %v483_v39 = vpop.f32.mrf.mxu1  ;;  %v921_v60 = vsel %vm870_vm5, %v905_v48, 0.0 }
  0xe2   : > { %v484_v49 = vadd.f32 %v483_v39, %v415_v38  ;;  %v922_v6 = vadd.f32 %v921_v60, %v920_v63 }
  0xe3   : > { %v777_v33 = vadd.f32 %v764_v25, %v627_v24 }
  0xe5   : > { %v787_v43 = vpack.c.bf16 %v777_v33, %v777_v33  ;;  %v868_v44 = vmul.f32 %v853_v34, %v777_v33 }
  0xe7   : > { %798 = vst.msk [vmem:[%s1434_s8 + $0x20] sm:$0xf] %vm789_vm4, %v787_v43  ;;  %v906_v52 = vmul.f32 %v868_v44, %v777_v33  ;;  %v886_v61 = vsel %vm870_vm5, %v868_v44, 0.0 }
  0xe8   : > { %v616_v53 = vpop.f32.mrf.mxu2  ;;  %v887_v7 = vadd.f32 %v886_v61, %v885_v2 }
  0xe9   : > { %v628_v56 = vadd.f32 %v616_v53, %v484_v49  ;;  %v766_v59 = vpop.f32.mrf.mxu3  ;;  %v923_v3 = vsel %vm870_vm5, %v906_v52, 0.0 }
  0xea   : > { %v924_v11 = vadd.f32 %v923_v3, %v922_v6 }
  0xeb   : > { %v778_v62 = vadd.f32 %v766_v59, %v628_v56 }
  0xed   : > { %v788_v4 = vpack.c.bf16 %v778_v62, %v778_v62  ;;  %v869_v5 = vmul.f32 %v858_v0, %v778_v62 }
  0xef   : > { %799 = vst.msk [vmem:[%s1434_s8 + $0x24] sm:$0xf] %vm789_vm4, %v788_v4  ;;  %v888_v8 = vsel %vm870_vm5, %v869_v5, 0.0  ;;  %v907_v10 = vmul.f32 %v869_v5, %v778_v62 }
  0xf0   : > { %v889_v12 = vadd.f32 %v888_v8, %v887_v7 }
  0xf1   : > { %v925_v13 = vsel %vm870_vm5, %v907_v10, 0.0 }
  0xf2   : > { %v890_v14 = vrot.slane %v889_v12, 4  ;;  %v926_v15 = vadd.f32 %v925_v13, %v924_v11 }
  0xf4   : > { %v891_v16 = vadd.f32 %v890_v14, %v889_v12  ;;  %v927_v18 = vrot.slane %v926_v15, 4 }
  0xf6   : > { %v892_v9 = vrot.slane %v891_v16, 2  ;;  %v928_v19 = vadd.f32 %v927_v18, %v926_v15 }
  0xf8   : > { %v893_v1 = vadd.f32 %v892_v9, %v891_v16  ;;  %v929_v20 = vrot.slane %v928_v19, 2 }
  0xfa   : > { %v894_v21 = vrot.slane %v893_v1, 1  ;;  %v930_v17 = vadd.f32 %v929_v20, %v928_v19 }
  0xfc   : > { %v895_v22 = vadd.f32 %v894_v21, %v893_v1  ;;  %v931_v23 = vrot.slane %v930_v17, 1 }
  0xfe   : > { %897 = vst.msk [vmem:[%s238_s11] sm:$0x1] %vm896_vm6, %v895_v22  ;;  %v932_v24 = vadd.f32 %v931_v23, %v930_v17 }
 0x100   : > { %933 = vst.msk [vmem:[%s241_s14] sm:$0x1] %vm896_vm6, %v932_v24 }
 0x101 PF: > { %s16_s18 = sadd.s32 1, %s1242_s18  }
 0x102   : > { %p13_p4 = scmp.ge.s32.totalorder %s16_s18, 4  }
 0x104   :  { %15 = sbr.rel (!%p13_p4) target bundleno = 1 (0x1), region = 89 }

// kernel: tile.28
= control target key start
LH: loop header
LB: loop body
LE: loop exit
PB: predicated region body
PF: predicated region fallthrough
CT: control target
= control target key end

     0   :  { %s22_s0 = inlined_call_operand.vmem [shape: f32[6], index: 0, kind: input, shape index: {}]   ;;  %s23_s1 = inlined_call_operand.vmem [shape: f32[4,6], index: 1, kind: output, shape index: {}]  }
   0x1   :  { %v4_v0 = vld [vmem:[%s22_s0] ss:$0 sm:$0xff] }
   0x2   :  { %5 = vst [vmem:[%s23_s1] sm:$0xf] %v4_v0 }

// kernel: tile.2
= control target key start
LH: loop header
LB: loop body
LE: loop exit
PB: predicated region body
PF: predicated region fallthrough
CT: control target
= control target key end

     0   :  { %s50_s8 = smov 127   ;;  %s51_s9 = smov 123   ;;  %vm7_vm0 = vcmask 7168   ;;  %s85_s0 = inlined_call_operand.vmem [shape: f32[4,6], index: 0, kind: input, shape index: {}]   ;;  %s86_s1 = inlined_call_operand.vmem [shape: f32[24,1], index: 1, kind: output, shape index: {}]  }
   0x1   :  { %v4_v0 = vld [vmem:[%s85_s0] sm:$0xf]  ;;  %s49_s0 = smov 125   ;;  %s52_s10 = smov 124  }
   0x2   :  { %5 = vst [vmem:[#allocation0] sm:$0xf] %v4_v0  ;;  %s53_s11 = smov 126  }
   0x9   :  { %v21_v1 = vld [vmem:[#allocation0] sm:$0xf]  }
   0xa   :  { %v9_v2 = vld [vmem:[#allocation0] sm:$0xf]   ;;  %22 = vrot.lane.b32.xlu1 %v21_v1, %s49_s0 }
   0xb   :  { %10 = vrot.lane.b32.xlu0 %v9_v2, %s50_s8  ;;  %v33_v3 = vld [vmem:[#allocation0] sm:$0xf]  }
   0xc   :  { %34 = vrot.lane.b32.xlu2 %v33_v3, %s51_s9  ;;  %v27_v4 = vld [vmem:[#allocation0] sm:$0xf]  }
   0xd   :  { %v15_v5 = vld [vmem:[#allocation0] sm:$0xf]  }
   0xe   :  { %v6_v6 = vld [vmem:[#allocation0] sm:$0xf]  }
   0xf   :  { %8 = vst.msk [vmem:[%s86_s1] ss:$6 sm:$0xf] %vm7_vm0, %v6_v6  }
  0x12   :  { %28 = vrot.lane.b32.xlu1 %v27_v4, %s52_s10 }
  0x13   :  { %16 = vrot.lane.b32.xlu0 %v15_v5, %s53_s11 }
  0x66   :  { %v35_v7 = vpop.permute.xlu2 %34  }
  0x67   :  { %43 = vst.msk [vmem:[%s86_s1 + $0x5] ss:$6 sm:$0xf] %vm7_vm0, %v35_v7  }
  0x7c   :  { %v23_v8 = vpop.permute.xlu1 %22  }
  0x7d   :  { %v11_v9 = vpop.permute.xlu0 %10   ;;  %41 = vst.msk [vmem:[%s86_s1 + $0x3] ss:$6 sm:$0xf] %vm7_vm0, %v23_v8  }
  0x7e   :  { %39 = vst.msk [vmem:[%s86_s1 + $0x1] ss:$6 sm:$0xf] %vm7_vm0, %v11_v9  }
  0x84   :  { %v29_v10 = vpop.permute.xlu1 %28  }
  0x85   :  { %v17_v11 = vpop.permute.xlu0 %16   ;;  %42 = vst.msk [vmem:[%s86_s1 + $0x4] ss:$6 sm:$0xf] %vm7_vm0, %v29_v10  }
  0x86   :  { %40 = vst.msk [vmem:[%s86_s1 + $0x2] ss:$6 sm:$0xf] %vm7_vm0, %v17_v11  }

// kernel: netD_forward.13
= control target key start
LH: loop header
LB: loop body
LE: loop exit
PB: predicated region body
PF: predicated region fallthrough
CT: control target
= control target key end

     0   :  { %s375_s15 = smov 0   ;;  %s411_s0 = inlined_call_operand.vmem [shape: bf16[2,24,64], index: 0, kind: input, shape index: {}]   ;;  %s412_s1 = inlined_call_operand.vmem [shape: f32[1,64], index: 1, kind: input, shape index: {}]   ;;  %s413_s2 = inlined_call_operand.vmem [shape: f32[1,64], index: 2, kind: input, shape index: {}]   ;;  %s414_s3 = inlined_call_operand.vmem [shape: f32[24,64], index: 3, kind: input, shape index: {}]   ;;  %s415_s4 = inlined_call_operand.vmem [shape: f32[2,1,1], index: 4, kind: output, shape index: {}]  }
   0x1 LB: > { %s313_s16 = sadd.s32 4294967295, %s348_s15   ;;  %p317_p0 = scmp.ge.s32.totalorder %s348_s15, 1  ;;  %s348_s15 = sphi %s375_s15, %s14_s15  }
   0x2   : > { %p162_p1 = scmp.lt.s32.totalorder %s348_s15, 3 }
   0x4   : > { %p163_p2 = pnand %p317_p0, %p162_p1 }
   0x5   : > { %p186_p3 = scmp.lt.s32.totalorder (!%p163_p2), %s313_s16, 1 }
   0x6   : > { %166 = sbr.rel (%p163_p2) target bundleno = 243 (0xf3), region = 36 }
   0xb   : > { %s417_s16 = smov (!%p186_p3, %s313_s16), 1  ;;  %v336_v0 = vld [vmem:[%s412_s1] ss:$0 sm:$0xff]  ;;  %v224_v17 = vld [vmem:[%s414_s3 + $0x8] sm:$0xff]  ;;  %v225_v18 = vld [vmem:[%s414_s3 + $0x10] sm:$0xff]  ;;  %vm229_vm3 = vcmask 523264  }
   0xc   : > { %s325_s17 = smul.u32 12, %s417_s16  ;;  %v337_v6 = vld [vmem:[%s413_s2] ss:$0 sm:$0xff]  ;;  %s193_s8 = scalar_lea.vmem %s415_s4, %s417_s16  ;;  %vm264_vm7 = vcmask 0  }
   0xd   : > { %v223_v14 = vld [vmem:[%s414_s3] sm:$0xff] }
   0xe   : > { %s190_s20 = scalar_lea.vmem %s411_s0, %s325_s17 }
   0xf   : > { %v322_v1 = vld [vmem:[%s190_s20] sm:$0xff]   ;;  %v196_v2 = vld [vmem:[%s190_s20 + $0x8] sm:$0xf] }
  0x10   : > { %v323_v3 = vunpack.c.l.bf16 %v322_v1  ;;  %v324_v4 = vunpack.c.h.bf16 %v322_v1  ;;  %v199_v5 = vunpack.c.l.bf16 %v196_v2 }
  0x12   : > { %v204_v7 = vmul.f32 %v336_v0, %v323_v3  ;;  %v205_v8 = vmul.f32 %v336_v0, %v324_v4  ;;  %v206_v9 = vmul.f32 %v336_v0, %v199_v5 }
  0x14   : > { %v211_v10 = vadd.f32 %v337_v6, %v204_v7  ;;  %v212_v11 = vadd.f32 %v337_v6, %v205_v8  ;;  %v213_v12 = vadd.f32 %v337_v6, %v206_v9 }
  0x16   : > { %vm214_vm0 = vcmp.gt.f32.partialorder %v211_v10, 0.0  ;;  %vm215_vm1 = vcmp.gt.f32.partialorder %v212_v11, 0.0  ;;  %vm216_vm2 = vcmp.gt.f32.partialorder %v213_v12, 0.0  ;;  %v217_v13 = vmul.f32 0.2, %v211_v10 }
  0x17   : > { %v218_v15 = vmul.f32 0.2, %v212_v11  ;;  %v219_v16 = vmul.f32 0.2, %v213_v12 }
  0x18   : > { %v220_v19 = vsel %vm214_vm0, %v211_v10, %v217_v13 }
  0x19   : > { %v221_v20 = vsel %vm215_vm1, %v212_v11, %v218_v15  ;;  %v222_v21 = vsel %vm216_vm2, %v213_v12, %v219_v16  ;;  %v226_v22 = vmul.f32 %v223_v14, %v220_v19 }
  0x1a   : > { %v227_v23 = vmul.f32 %v224_v17, %v221_v20  ;;  %v228_v24 = vmul.f32 %v225_v18, %v222_v21 }
  0x1b   : > { %v230_v25 = vsel %vm229_vm3, %v226_v22, 0.0 }
  0x1c   : > { %v231_v26 = vsel %vm229_vm3, %v227_v23, 0.0  ;;  %v233_v27 = vsel %vm229_vm3, %v228_v24, 0.0 }
  0x1d   : > { %v232_v28 = vadd.f32 %v231_v26, %v230_v25 }
  0x1f   : > { %v234_v29 = vadd.f32 %v233_v27, %v232_v28 }
  0x21   : > { %235 = vadd.xlane.f32.xlu0 %v234_v29 }
  0x94   : > { %v236_v30 = vpop.xlane.xlu0 %235 }
  0x95   : > { %v237_v31 = vrot.slane %v236_v30, 4 }
  0x97   : > { %v238_v32 = vadd.f32 %v237_v31, %v236_v30 }
  0x99   : > { %v239_v33 = vrot.slane %v238_v32, 2 }
  0x9b   : > { %v240_v34 = vadd.f32 %v239_v33, %v238_v32 }
  0x9d   : > { %v241_v35 = vrot.slane %v240_v34, 1 }
  0x9f   : > { %v242_v36 = vadd.f32 %v241_v35, %v240_v34 }
  0xa1   : > { %326 = vpush %v242_v36 }
  0xd2   : > { %s327_s5 = spop %326 }
  0xd3   : > { %v244_v37 = vstv %s327_s5 }
  0xd4   : > { %v245_v38 = vsub.f32 0.0, %v244_v37 }
  0xd6   : > { %v246_v39 = vmul.f32 1.442695, %v245_v38 }
  0xd8   : > { %338 = vpow2.f32 %v246_v39 }
  0xde   : > { %v339_v40 = vpop.eup %338 }
  0xdf   : > { %v248_v41 = vadd.f32 1.0, %v339_v40 }
  0xe1   : > { %340 = vrcp.f32 %v248_v41  ;;  %v260_v45 = vand.u32 2147483648, %v248_v41  ;;  %v258_v47 = vand.u32 2147483647, %v248_v41  ;;  %vm254_vm5 = vweird.f32 %v248_v41 }
  0xe3   : > { %v261_v49 = vor.u32 1.1754944e-38, %v260_v45  ;;  %vm259_vm8 = vcmp.eq.f32.partialorder %v258_v47, 8.507059e+37 }
  0xe7   : > { %v341_v42 = vpop.eup %340 }
  0xe8   : > { %v250_v43 = vmul.f32 %v341_v42, %v248_v41  ;;  %vm255_vm4 = vweird.f32 %v341_v42 }
  0xe9   : > { %vm256_vm6 = vmor %vm254_vm5, %vm255_vm4 }
  0xea   : > { %v251_v44 = vsub.f32 1.0, %v250_v43 }
  0xec   : > { %v252_v46 = vmul.f32 %v341_v42, %v251_v44 }
  0xee   : > { %v253_v48 = vadd.f32 %v341_v42, %v252_v46 }
  0xf0   : > { %v257_v50 = vsel %vm256_vm6, %v341_v42, %v253_v48 }
  0xf1   : > { %v262_v51 = vsel %vm259_vm8, %v261_v49, %v257_v50 }
  0xf2   : > { %265 = vst.msk [vmem:[%s193_s8] sm:$0x1] %vm264_vm7, %v262_v51 }
  0xf3 PF: > { %s14_s15 = sadd.s32 1, %s348_s15  }
  0xf4   : > { %p11_p4 = scmp.ge.s32.totalorder %s14_s15, 4  }
  0xf6   :  { %13 = sbr.rel (!%p11_p4) target bundleno = 1 (0x1), region = 66 }

// kernel: netD_forward.12
= control target key start
LH: loop header
LB: loop body
LE: loop exit
PB: predicated region body
PF: predicated region fallthrough
CT: control target
= control target key end

     0   :  { %s1090_s18 = smov 0   ;;  %s1259_s0 = inlined_call_operand.vmem [shape: bf16[2,36,128], index: 0, kind: input, shape index: {}]   ;;  %s1260_s1 = inlined_call_operand.vmem [shape: bf16[4,128,64], index: 1, kind: input, shape index: {}]   ;;  %s1261_s2 = inlined_call_operand.vmem [shape: f32[24,1], index: 2, kind: input, shape index: {}]   ;;  %s1262_s3 = inlined_call_operand.vmem [shape: bf16[2,24,64], index: 3, kind: output, shape index: {0}]   ;;  %s1263_s4 = inlined_call_operand.vmem [shape: f32[2,1,64], index: 4, kind: output, shape index: {1}]   ;;  %s1264_s5 = inlined_call_operand.vmem [shape: f32[2,1,64], index: 5, kind: output, shape index: {2}]  }
   0x1 LB: > { %s814_s19 = sadd.s32 4294967295, %s1057_s18   ;;  %p818_p0 = scmp.ge.s32.totalorder %s1057_s18, 1  ;;  %s1057_s18 = sphi %s1090_s18, %s16_s18  }
   0x2   : > { %p192_p1 = scmp.lt.s32.totalorder %s1057_s18, 3 }
   0x4   : > { %p193_p2 = pnand %p818_p0, %p192_p1 }
   0x5   : > { %p226_p3 = scmp.lt.s32.totalorder (!%p193_p2), %s814_s19, 1 }
   0x6   : > { %196 = sbr.rel (%p193_p2) target bundleno = 217 (0xd9), region = 32 }
   0xb   : > { %v1014_v0 = vld [vmem:[%s1260_s1 + $0x78] sm:$0xff]  ;;  %v1013_v4 = vld [vmem:[%s1260_s1 + $0x70] sm:$0xff]  ;;  %s1266_s19 = smov (!%p226_p3, %s814_s19), 1  ;;  %v1012_v8 = vld [vmem:[%s1260_s1 + $0x68] sm:$0xff]  ;;  %v1059_v41 = vmov 0   ;;  %vm467_vm1 = vcmask 1044480  }
   0xc   : > { %v1006_v1 = vld [vmem:[%s1260_s1 + $0x38] sm:$0xff]  ;;  %355 = vmatpush.bf16.msra.mxu0 %v1014_v0  ;;  %v1005_v5 = vld [vmem:[%s1260_s1 + $0x30] sm:$0xff]  ;;  %s1038_s11 = smul.u32 20, %s1266_s19  ;;  %v1004_v9 = vld [vmem:[%s1260_s1 + $0x28] sm:$0xff]  ;;  %1049 = vset.pattern.permute.xlu0 %v1059_v41  ;;  %vm289_vm0 = vsmask.f32 7424  ;;  %s238_s6 = scalar_lea.vmem %s1263_s4, %s1266_s19 }
   0xd   : > { %v1022_v2 = vld [vmem:[%s1260_s1 + $0xb8] sm:$0xff]  ;;  %424 = vmatpush.bf16.msra.mxu1 %v1006_v1  ;;  %v1021_v6 = vld [vmem:[%s1260_s1 + $0xb0] sm:$0xff]  ;;  %v1020_v10 = vld [vmem:[%s1260_s1 + $0xa8] sm:$0xff]  ;;  %1050 = vset.pattern.permute.xlu1 %v1059_v41  ;;  %vm563_vm2 = vsmask.f32 4352  ;;  %s1039_s25 = smul.u32 12, %s1266_s19  ;;  %s241_s9 = scalar_lea.vmem %s1264_s5, %s1266_s19 }
   0xe   : > { %v1030_v3 = vld [vmem:[%s1260_s1 + $0xf8] sm:$0xff]  ;;  %521 = vmatpush.bf16.msra.mxu2 %v1022_v2  ;;  %v1029_v7 = vld [vmem:[%s1260_s1 + $0xf0] sm:$0xff]  ;;  %v1028_v11 = vld [vmem:[%s1260_s1 + $0xe8] sm:$0xff]  ;;  %s230_s24 = scalar_lea.vmem %s1259_s0, %s1038_s11  ;;  %vm655_vm3 = vcmask 519168   ;;  %vm680_vm4 = vcmask 523264   ;;  %vm692_vm5 = vcmask 516096  }
   0xf   : > { %631 = vmatpush.bf16.msra.mxu3 %v1030_v3  ;;  %v1011_v12 = vld [vmem:[%s1260_s1 + $0x60] sm:$0xff]  ;;  %v244_v16 = vld [vmem:[%s230_s24 + $0x8] sm:$0xff]   ;;  %v1010_v21 = vld [vmem:[%s1260_s1 + $0x58] sm:$0xff]  ;;  %s1234_s28 = scalar_lea.vmem %s1262_s3, %s1039_s25 }
  0x10   : > { %356 = vmatpush.bf16.msra.mxu0 %v1013_v4  ;;  %v1003_v13 = vld [vmem:[%s1260_s1 + $0x20] sm:$0xff]  ;;  %v261_v17 = vld [vmem:[%s230_s24 + $0xc] sm:$0x1]  ;;  %v1152_v18 = vunpack.c.l.b16 %v244_v16  ;;  %v1002_v22 = vld [vmem:[%s1260_s1 + $0x18] sm:$0xff]  ;;  %v573_v39 = vshrl.u32 %v244_v16, 16  ;;  %v576_v40 = vshll.u32 %v244_v16, 16 }
  0x11   : > { %425 = vmatpush.bf16.msra.mxu1 %v1005_v5  ;;  %v1019_v14 = vld [vmem:[%s1260_s1 + $0xa0] sm:$0xff]  ;;  %v1018_v23 = vld [vmem:[%s1260_s1 + $0x98] sm:$0xff]  ;;  %v286_v24 = vunpack.c.l.b16 %v261_v17  ;;  %v443_v28 = vld [vmem:[%s230_s24 + $0xc] sm:$0x7] }
  0x12   : > { %522 = vmatpush.bf16.msra.mxu2 %v1021_v6  ;;  %v1027_v15 = vld [vmem:[%s1260_s1 + $0xe0] sm:$0xff]  ;;  %v1026_v26 = vld [vmem:[%s1260_s1 + $0xd8] sm:$0xff]  ;;  %v1009_v29 = vld [vmem:[%s1260_s1 + $0x50] sm:$0xff]  ;;  %v464_v33 = vunpack.c.l.b16 %v443_v28  ;;  %v575_v53 = vrot.slane %v573_v39, 3  ;;  %v578_v54 = vrot.slane %v576_v40, 4 }
  0x13   : > { %632 = vmatpush.bf16.msra.mxu3 %v1029_v7  ;;  %v1035_v19 = vld [vmem:[%s230_s24] sm:$0xf0]  ;;  %v1036_v20 = vld [vmem:[%s230_s24] sm:$0x8]  ;;  %v1001_v30 = vld [vmem:[%s1260_s1 + $0x10] sm:$0xff]  ;;  %v1177_v31 = vpack.c.b16 %v286_v24, %v1152_v18  ;;  %v373_v7 = vpack.c.b16 %v1152_v18, %v1152_v18 }
  0x14   : > { %357 = vmatpush.bf16.msra.mxu0 %v1012_v8  ;;  %v1163_v25 = vor.u32 %v1036_v20, %v1035_v19  ;;  %v1168_v27 = vld [vmem:[%s230_s24] sm:$0xff]   ;;  %v1017_v36 = vld [vmem:[%s1260_s1 + $0x90] sm:$0xff]  ;;  %v1008_v43 = vld [vmem:[%s1260_s1 + $0x48] sm:$0xff]  ;;  %v466_v48 = vpack.c.b16 %v464_v33, %v1152_v18  ;;  %v579_v1 = vor.u32 %v578_v54, %v575_v53 }
  0x15   : > { %426 = vmatpush.bf16.msra.mxu1 %v1004_v9  ;;  %v293_v32 = vshll.u32 %v1168_v27, 16  ;;  %v659_v35 = vld [vmem:[%s1261_s2] sm:$0xff]  ;;  %v1025_v37 = vld [vmem:[%s1260_s1 + $0xd0] sm:$0xff]  ;;  %v1000_v44 = vld [vmem:[%s1260_s1 + $0x8] sm:$0xff]  ;;  %v291_v45 = vshrl.u32 %v1168_v27, 16  ;;  %v298_v47 = vshll.u32 %v1177_v31, 16 }
  0x16   : > { %523 = vmatpush.bf16.msra.mxu2 %v1020_v10  ;;  %v565_v34 = vshrl.u32 %v1163_v25, 16  ;;  %v568_v38 = vshll.u32 %v1163_v25, 16  ;;  %664 = vperm.xlu0 %1049, %v659_v35   ;;  %v661_v42 = vld [vmem:[%s1261_s2 + $0x10] sm:$0xff]  ;;  %v1016_v49 = vld [vmem:[%s1260_s1 + $0x88] sm:$0xff]  ;;  %v1007_v55 = vld [vmem:[%s1260_s1 + $0x40] sm:$0xff]  ;;  %v468_v62 = vrot.slane %v1163_v25, 3 }
  0x17   : > { %633 = vmatpush.bf16.msra.mxu3 %v1028_v11  ;;  %v295_v46 = vrot.slane %v293_v32, 1  ;;  %v1024_v50 = vld [vmem:[%s1260_s1 + $0xc8] sm:$0xff]  ;;  %674 = vperm.xlu1 %1050, %v661_v42   ;;  %v999_v56 = vld [vmem:[%s1260_s1] sm:$0xff]  ;;  %v300_v58 = vrot.slane %v298_v47, 1  ;;  %v469_v63 = vrot.slane %v466_v48, 3  ;;  %v302_v5 = vshrl.u32 %v1177_v31, 16 }
  0x18   : > { %358 = vmatpush.bf16.msra.mxu0 %v1011_v12  ;;  %v567_v51 = vrot.slane %v565_v34, 3  ;;  %v570_v52 = vrot.slane %v568_v38, 4  ;;  %v660_v59 = vld [vmem:[%s1261_s2 + $0x8] sm:$0xff]  ;;  %v1015_v60 = vld [vmem:[%s1260_s1 + $0x80] sm:$0xff] }
  0x19   : > { %427 = vmatpush.bf16.msra.mxu1 %v1003_v13  ;;  %v296_v57 = vor.u32 %v295_v46, %v291_v45  ;;  %v1023_v61 = vld [vmem:[%s1260_s1 + $0xc0] sm:$0xff]  ;;  %v470_v3 = vsel %vm467_vm1, %v468_v62, %v469_v63  ;;  %v304_v6 = vor.u32 %v302_v5, %v300_v58 }
  0x1a   : > { %524 = vmatpush.bf16.msra.mxu2 %v1019_v14  ;;  %v571_v0 = vor.u32 %v570_v52, %v567_v51 }
  0x1b   : > { %634 = vmatpush.bf16.msra.mxu3 %v1027_v15  ;;  %v301_v2 = vsel %vm289_vm0, %v296_v57, %v300_v58 }
  0x1c   : > { %359 = vmatpush.bf16.msra.mxu0 %v1010_v21  ;;  %v580_v4 = vsel %vm563_vm2, %v571_v0, %v579_v1 }
  0x1d   : > { %428 = vmatpush.bf16.msra.mxu1 %v1002_v22 }
  0x1e   : > { %525 = vmatpush.bf16.msra.mxu2 %v1018_v23  ;;  %669 = vperm.xlu0 %1049, %v660_v59  }
  0x1f   : > { %635 = vmatpush.bf16.msra.mxu3 %v1026_v26 }
  0x20   : > { %360 = vmatpush.bf16.msra.mxu0 %v1009_v29 }
  0x21   : > { %429 = vmatpush.bf16.msra.mxu1 %v1001_v30 }
  0x22   : > { %526 = vmatpush.bf16.msra.mxu2 %v1017_v36 }
  0x23   : > { %636 = vmatpush.bf16.msra.mxu3 %v1025_v37 }
  0x24   : > { %361 = vmatpush.bf16.msra.mxu0 %v1008_v43 }
  0x25   : > { %430 = vmatpush.bf16.msra.mxu1 %v1000_v44 }
  0x26   : > { %527 = vmatpush.bf16.msra.mxu2 %v1016_v49 }
  0x27   : > { %637 = vmatpush.bf16.msra.mxu3 %v1024_v50 }
  0x28   : > { %362 = vmatpush.bf16.msra.mxu0 %v1007_v55 }
  0x29   : > { %431 = vmatpush.bf16.msra.mxu1 %v999_v56 }
  0x2a   : > { %528 = vmatpush.bf16.msra.mxu2 %v1015_v60 }
  0x2b   : > { %638 = vmatpush.bf16.msra.mxu3 %v1023_v61  ;;  %363 = vmatmul.bf16.vlgmr.msra.gmra.mxu0 %v301_v2 }
  0x2c   : > { %432 = vmatmul.bf16.vlgmr.msra.gmra.mxu1 %v1168_v27 }
  0x2d   : > { %529 = vmatmul.bf16.vlgmr.msra.gmra.mxu2 %v470_v3 }
  0x2e   : > { %639 = vmatmul.bf16.vlgmr.msra.gmra.mxu3 %v580_v4 }
  0x3b   : > { %368 = vmatmul.bf16.gmra.mxu0 %v304_v6 }
  0x3c   : > { %437 = vmatmul.bf16.gmra.mxu1 %v373_v7 }
  0x3d   : > { %534 = vmatmul.bf16.gmra.mxu2 %v469_v63 }
  0x3e   : > { %644 = vmatmul.bf16.gmra.mxu3 %v579_v1 }
  0x88   : > { %v665_v16 = vpop.permute.xlu0 %664 }
  0x89   : > { %v675_v37 = vpop.permute.xlu1 %674 }
  0x90   : > { %v670_v26 = vpop.permute.xlu0 %669 }
  0xa8   : > { %v364_v8 = vpop.f32.mrf.mxu0 }
  0xa9   : > { %v433_v9 = vpop.f32.mrf.mxu1 }
  0xaa   : > { %v434_v10 = vadd.f32 %v433_v9, %v364_v8 }
  0xb0   : > { %v530_v11 = vpop.f32.mrf.mxu2  ;;  %v366_v14 = vpop.f32.mrf.mxu0 }
  0xb1   : > { %v640_v12 = vpop.f32.mrf.mxu3  ;;  %v539_v13 = vadd.f32 %v530_v11, %v434_v10  ;;  %v435_v15 = vpop.f32.mrf.mxu1 }
  0xb2   : > { %v436_v19 = vadd.f32 %v435_v15, %v366_v14 }
  0xb3   : > { %v649_v17 = vadd.f32 %v640_v12, %v539_v13 }
  0xb5   : > { %v652_v18 = vpack.c.bf16 %v649_v17, %v649_v17  ;;  %v677_v30 = vmul.f32 %v665_v16, %v649_v17 }
  0xb7   : > { %656 = vst.msk [vmem:[%s1234_s28] sm:$0xf] %vm655_vm3, %v652_v18  ;;  %v694_v38 = vmul.f32 %v677_v30, %v649_v17  ;;  %v681_v41 = vsel %vm680_vm4, %v677_v30, 0.0 }
  0xb8   : > { %v532_v20 = vpop.f32.mrf.mxu2  ;;  %v369_v23 = vpop.f32.mrf.mxu0 }
  0xb9   : > { %v642_v21 = vpop.f32.mrf.mxu3  ;;  %v540_v22 = vadd.f32 %v532_v20, %v436_v19  ;;  %v438_v24 = vpop.f32.mrf.mxu1  ;;  %v697_v46 = vsel %vm680_vm4, %v694_v38, 0.0 }
  0xba   : > { %v439_v29 = vadd.f32 %v438_v24, %v369_v23 }
  0xbb   : > { %v650_v25 = vadd.f32 %v642_v21, %v540_v22 }
  0xbd   : > { %v653_v27 = vpack.c.bf16 %v650_v25, %v650_v25  ;;  %v678_v28 = vmul.f32 %v670_v26, %v650_v25 }
  0xbf   : > { %657 = vst.msk [vmem:[%s1234_s28 + $0x4] sm:$0xf] %vm655_vm3, %v653_v27  ;;  %v695_v33 = vmul.f32 %v678_v28, %v650_v25  ;;  %v682_v39 = vsel %vm680_vm4, %v678_v28, 0.0 }
  0xc0   : > { %v535_v31 = vpop.f32.mrf.mxu2  ;;  %v371_v35 = vpop.f32.mrf.mxu0  ;;  %v683_v45 = vadd.f32 %v682_v39, %v681_v41 }
  0xc1   : > { %v645_v32 = vpop.f32.mrf.mxu3  ;;  %v541_v34 = vadd.f32 %v535_v31, %v439_v29  ;;  %v440_v36 = vpop.f32.mrf.mxu1  ;;  %v698_v42 = vsel %vm680_vm4, %v695_v33, 0.0 }
  0xc2   : > { %v699_v49 = vadd.f32 %v698_v42, %v697_v46 }
  0xc3   : > { %v651_v40 = vadd.f32 %v645_v32, %v541_v34 }
  0xc5   : > { %v654_v43 = vpack.c.bf16 %v651_v40, %v651_v40  ;;  %v679_v44 = vmul.f32 %v675_v37, %v651_v40 }
  0xc7   : > { %658 = vst.msk [vmem:[%s1234_s28 + $0x8] sm:$0xf] %vm655_vm3, %v654_v43  ;;  %v684_v47 = vsel %vm680_vm4, %v679_v44, 0.0  ;;  %v696_v48 = vmul.f32 %v679_v44, %v651_v40 }
  0xc8   : > { %v685_v50 = vadd.f32 %v684_v47, %v683_v45  ;;  %v537_v51 = vpop.f32.mrf.mxu2 }
  0xc9   : > { %v647_v52 = vpop.f32.mrf.mxu3  ;;  %v700_v53 = vsel %vm680_vm4, %v696_v48, 0.0 }
  0xca   : > { %v686_v54 = vrot.slane %v685_v50, 4  ;;  %v701_v55 = vadd.f32 %v700_v53, %v699_v49 }
  0xcc   : > { %v687_v56 = vadd.f32 %v686_v54, %v685_v50  ;;  %v702_v57 = vrot.slane %v701_v55, 4 }
  0xce   : > { %v688_v58 = vrot.slane %v687_v56, 2  ;;  %v703_v59 = vadd.f32 %v702_v57, %v701_v55 }
  0xd0   : > { %v689_v60 = vadd.f32 %v688_v58, %v687_v56  ;;  %v704_v61 = vrot.slane %v703_v59, 2 }
  0xd2   : > { %v690_v62 = vrot.slane %v689_v60, 1  ;;  %v705_v63 = vadd.f32 %v704_v61, %v703_v59 }
  0xd4   : > { %v691_v0 = vadd.f32 %v690_v62, %v689_v60  ;;  %v706_v1 = vrot.slane %v705_v63, 1 }
  0xd6   : > { %693 = vst.msk [vmem:[%s238_s6] sm:$0x1] %vm692_vm5, %v691_v0  ;;  %v707_v2 = vadd.f32 %v706_v1, %v705_v63 }
  0xd8   : > { %708 = vst.msk [vmem:[%s241_s9] sm:$0x1] %vm692_vm5, %v707_v2 }
  0xd9 PF: > { %s16_s18 = sadd.s32 1, %s1057_s18  }
  0xda   : > { %p13_p4 = scmp.ge.s32.totalorder %s16_s18, 4  }
  0xdc   :  { %15 = sbr.rel (!%p13_p4) target bundleno = 1 (0x1), region = 89 }

</bundles_post_ra>
